<compile_context>
chip_gen: v7x
topology: tpu7x:2x2x1
jax: 0.10.0
libtpu: 0.0.40
codegen_flags: <defaults>
</compile_context>

<pallas_src>
import numpy as np
import jax
import jax.numpy as jnp
from jax import lax
from jax.experimental import pallas as pl
from jax.experimental.pallas import tpu as pltpu


# ----------------------------- fused kernel ---------------------------------
def hybrid_kernel(tok_ref, ec_ref, convb_ref,
                  wih1_ref, whh1_ref, b1_ref,
                  w2a_ref, w2b_ref, b2_ref, whh2_ref,
                  fcw_ref, fcb_ref, out_ref,
                  h1_ref, pa_ref, pb_ref):
    Bp = out_ref.shape[0]                      # padded batch (multiple of 8)
    SB, H2 = h1_ref.shape                      # H2 = 2*H (both directions)
    S = SB // Bp
    H = H2 // 2
    V1, WF = ec_ref.shape                      # (vocab+1, W*Fm) folded table
    Fm = convb_ref.shape[1]
    W = WF // Fm
    L = S - W + 1                              # valid-conv output length

    # ---- embedding+conv folded into one one-hot matmul ---------------------
    tok = tok_ref[...]                                       # (Bp*S, 1) int32
    iota = lax.broadcasted_iota(jnp.int32, (Bp * S, V1), 1)
    onehot = (iota == tok).astype(jnp.float32)               # (Bp*S, V1)
    proj = jnp.dot(onehot, ec_ref[...],
                   preferred_element_type=jnp.float32)       # (Bp*S, W*Fm)
    proj = proj.reshape(Bp, S, WF)

    # valid conv = W shifted adds over the time axis, lane-chunk w per tap
    acc = proj[:, 0:L, 0:Fm]
    for w in range(1, W):
        acc = acc + proj[:, w:w + L, w * Fm:(w + 1) * Fm]
    conv = jnp.maximum(acc + convb_ref[...].reshape(1, 1, Fm), 0.0)
    pooled = jnp.max(conv, axis=1)                           # (Bp, Fm)

    # ---- fused bidirectional LSTM cell (both directions per step) ----------
    # gate layout over 8H lanes: [i_f,i_b, f_f,f_b, g_f,g_b, o_f,o_b];
    # state layout over 2H lanes: [fw | bw].
    def cell(xin, h_cat, c_cat, whh):
        gates = xin + jnp.dot(h_cat, whh, preferred_element_type=jnp.float32)
        i_g = jax.nn.sigmoid(gates[:, 0 * H2:1 * H2])
        f_g = jax.nn.sigmoid(gates[:, 1 * H2:2 * H2])
        g_g = jnp.tanh(gates[:, 2 * H2:3 * H2])          # tanh only on g lanes
        o_g = jax.nn.sigmoid(gates[:, 3 * H2:4 * H2])
        c_new = f_g * c_cat + i_g * g_g
        h_new = o_g * jnp.tanh(c_new)
        return h_new, c_new

    zeros = jnp.zeros((Bp, H2), jnp.float32)

    # Layer 1: the pooled vector repeats over time, so its input projection is
    # time-invariant and hoisted out of the recurrence.
    xin1 = jnp.dot(pooled, wih1_ref[...],
                   preferred_element_type=jnp.float32) + b1_ref[...]
    whh1 = whh1_ref[...]                                     # held in vregs
    h_cat, c_cat = zeros, zeros
    for k in range(S):                          # fully unrolled, h/c in vregs
        h_cat, c_cat = cell(xin1, h_cat, c_cat, whh1)
        # single lane-dense, 8-row-aligned store:
        # row-block k holds [h1_fw[k] | h1_bw[S-1-k]]
        h1_ref[k * Bp:(k + 1) * Bp, :] = h_cat

    # Layer 2: input projections hoisted as two bulk matmuls; the merged
    # weights w2a/w2b already account for the time-reversed bw storage, so
    # xin at fused step k is simply PA[row k] + PB[row S-1-k].
    h1_all = h1_ref[...]                                     # (S*Bp, 2H)
    pa_ref[...] = jnp.dot(h1_all, w2a_ref[...],
                          preferred_element_type=jnp.float32) + b2_ref[...]
    pb_ref[...] = jnp.dot(h1_all, w2b_ref[...],
                          preferred_element_type=jnp.float32)
    whh2 = whh2_ref[...]
    h_cat, c_cat = zeros, zeros
    for k in range(S):                          # fully unrolled
        r = S - 1 - k
        xin = pa_ref[k * Bp:(k + 1) * Bp, :] + pb_ref[r * Bp:(r + 1) * Bp, :]
        h_cat, c_cat = cell(xin, h_cat, c_cat, whh2)

    # h_cat == [ht[-2] | ht[-1]]; fc has out_features=1 -> masked row-sum.
    out_ref[...] = (jnp.sum(h_cat * fcw_ref[...], axis=1, keepdims=True)
                    + fcb_ref[...])


# ------------------------------- wrapper -------------------------------------
def _full_spec(shape):
    r = len(shape)
    return pl.BlockSpec(shape, lambda i, _r=r: (0,) * _r)


@jax.jit
def hybrid_forward(tokens, kp):
    B, S = tokens.shape
    Bp = max(8, ((B + 7) // 8) * 8)             # pad batch to 8-sublane blocks
    V1, WF = kp['emb_conv'].shape
    Fm = kp['conv_b'].shape[1]
    H8 = kp['whh1'].shape[1]                    # 8*H
    H2 = H8 // 4                                # 2*H

    tok = jnp.zeros((Bp, S), jnp.int32).at[:B].set(tokens.astype(jnp.int32))
    tok2d = tok.reshape(Bp * S, 1)

    out = pl.pallas_call(
        hybrid_kernel,
        out_shape=jax.ShapeDtypeStruct((Bp, 1), jnp.float32),
        grid=(1,),
        in_specs=[_full_spec((Bp * S, 1)),
                  _full_spec((V1, WF)),
                  _full_spec((1, Fm)),
                  _full_spec((Fm, H8)),
                  _full_spec((H2, H8)),
                  _full_spec((1, H8)),
                  _full_spec((H2, H8)),
                  _full_spec((H2, H8)),
                  _full_spec((1, H8)),
                  _full_spec((H2, H8)),
                  _full_spec((1, H2)),
                  _full_spec((1, 1))],
        out_specs=_full_spec((Bp, 1)),
        scratch_shapes=[pltpu.VMEM((S * Bp, H2), jnp.float32),   # layer-1 h
                        pltpu.VMEM((S * Bp, H8), jnp.float32),   # l2 proj A
                        pltpu.VMEM((S * Bp, H8), jnp.float32)],  # l2 proj B
        compiler_params=pltpu.CompilerParams(
            dimension_semantics=("arbitrary",)),
    )(tok2d, kp['emb_conv'], kp['conv_b'],
      kp['wih1'], kp['whh1'], kp['b1'],
      kp['w2a'], kp['w2b'], kp['b2'], kp['whh2'],
      kp['fcw'], kp['fcb'])
    return out[:B, 0]                           # drop batch padding, .view(-1)


# ------------------------------ params ---------------------------------------
def init_params(key, *, vocab, E, H, W, Fm):
    ks = jax.random.split(key, 17)

    def nrm(k, shape, scale=0.1):
        return scale * jax.random.normal(k, shape, dtype=jnp.float32)

    emb = nrm(ks[0], (vocab + 1, E))
    emb = emb.at[0].set(0.0)                    # padding_idx=0
    return dict(
        emb=emb,
        conv_w=nrm(ks[1], (W, E, Fm)),          # torch (Fm, E, W) permuted
        conv_b=nrm(ks[2], (1, Fm)),
        # per (layer, direction): W_ih^T, W_hh^T, combined bias (b_ih + b_hh)
        wih1f=nrm(ks[3], (Fm, 4 * H)), whh1f=nrm(ks[4], (H, 4 * H)), b1f=nrm(ks[5], (1, 4 * H)),
        wih1b=nrm(ks[6], (Fm, 4 * H)), whh1b=nrm(ks[7], (H, 4 * H)), b1b=nrm(ks[8], (1, 4 * H)),
        wih2f=nrm(ks[9], (2 * H, 4 * H)), whh2f=nrm(ks[10], (H, 4 * H)), b2f=nrm(ks[11], (1, 4 * H)),
        wih2b=nrm(ks[12], (2 * H, 4 * H)), whh2b=nrm(ks[13], (H, 4 * H)), b2b=nrm(ks[14], (1, 4 * H)),
        fcw=nrm(ks[15], (1, 2 * H)), fcb=nrm(ks[16], (1, 1)),
    )


def pack_params(p):
    """Pack native params into the fused-kernel layout (done once, host side)."""
    H = p['whh1f'].shape[0]
    W, E, Fm = p['conv_w'].shape
    V1 = p['emb'].shape[0]

    def gm(wf, wb):
        # gate-major interleave of the two directions along the last axis:
        # [i_f, i_b, f_f, f_b, g_f, g_b, o_f, o_b]
        return jnp.concatenate(
            [m[..., g * H:(g + 1) * H] for g in range(4) for m in (wf, wb)],
            axis=-1)

    def whh_cat(whf, whb):
        # block-diagonal recurrent weight for the concatenated state (2H, 8H)
        return jnp.concatenate([gm(whf, jnp.zeros_like(whf)),
                                gm(jnp.zeros_like(whb), whb)], axis=0)

    # Fold the embedding table into the conv weights:
    #   emb_conv[v, w*Fm + f] = sum_e emb[v,e] * conv_w[w,e,f]
    emb_conv = jnp.einsum('ve,wef->vwf', p['emb'],
                          p['conv_w']).reshape(V1, W * Fm)

    # Layer-2 merged input-projection weights for the time-reversed storage
    # h1s[r] = [h1_fw[r] | h1_bw[S-1-r]]:
    #   PA = h1s @ w2a + b2 ; PB = h1s @ w2b ; xin[k] = PA[k] + PB[S-1-k]
    f_top, f_bot = p['wih2f'][:H], p['wih2f'][H:]
    b_top, b_bot = p['wih2b'][:H], p['wih2b'][H:]
    zH = jnp.zeros((H, 4 * H), jnp.float32)
    w2a = jnp.concatenate([gm(f_top, zH), gm(zH, b_bot)], axis=0)   # (2H, 8H)
    w2b = jnp.concatenate([gm(zH, b_top), gm(f_bot, zH)], axis=0)   # (2H, 8H)

    return dict(
        emb_conv=emb_conv,
        conv_b=p['conv_b'],
        wih1=gm(p['wih1f'], p['wih1b']),
        whh1=whh_cat(p['whh1f'], p['whh1b']),
        b1=gm(p['b1f'], p['b1b']),
        w2a=w2a, w2b=w2b, b2=gm(p['b2f'], p['b2b']),
        whh2=whh_cat(p['whh2f'], p['whh2b']),
        fcw=p['fcw'], fcb=p['fcb'],
    )


# ------------------------- pure-JAX reference --------------------------------
def reference_forward(inputs, p):
    x = p['emb'][inputs]                        # (B, S, E)
    B, S, _ = x.shape
    W, _, Fm = p['conv_w'].shape
    L = S - W + 1
    acc = jnp.zeros((B, L, Fm), jnp.float32)
    for w in range(W):
        acc = acc + jnp.einsum('ble,ef->blf', x[:, w:w + L, :], p['conv_w'][w])
    acc = jnp.maximum(acc + p['conv_b'], 0.0)
    pooled = jnp.max(acc, axis=1)               # (B, F)

    H = p['whh1f'].shape[0]

    def cell(xp, h, c, whh):
        g = xp + h @ whh
        i = jax.nn.sigmoid(g[:, :H]); f = jax.nn.sigmoid(g[:, H:2 * H])
        gg = jnp.tanh(g[:, 2 * H:3 * H]); o = jax.nn.sigmoid(g[:, 3 * H:])
        c = f * c + i * gg
        return o * jnp.tanh(c), c

    zeros = jnp.zeros((inputs.shape[0], H), jnp.float32)
    xpf = pooled @ p['wih1f'] + p['b1f']
    xpb = pooled @ p['wih1b'] + p['b1b']
    h, c = zeros, zeros
    h1f = []
    for _ in range(S):
        h, c = cell(xpf, h, c, p['whh1f']); h1f.append(h)
    h, c = zeros, zeros
    h1b = [None] * S
    for k in range(S):
        h, c = cell(xpb, h, c, p['whh1b']); h1b[S - 1 - k] = h

    h, c = zeros, zeros
    for t in range(S):
        xp = h1f[t] @ p['wih2f'][:H] + h1b[t] @ p['wih2f'][H:] + p['b2f']
        h, c = cell(xp, h, c, p['whh2f'])
    h2f = h
    h, c = zeros, zeros
    for k in range(S):
        t = S - 1 - k
        xp = h1f[t] @ p['wih2b'][:H] + h1b[t] @ p['wih2b'][H:] + p['b2b']
        h, c = cell(xp, h, c, p['whh2b'])
    h2b = h
    hcat = jnp.concatenate([h2f, h2b], axis=1)
    return (hcat @ p['fcw'].T + p['fcb'])[:, 0]


if __name__ == "__main__":
    B, S = 2, 24                                # batch, sequence length
    E, H, W, Fm, vocab = 32, 32, 16, 64, 50     # emb, hidden, window, filters

    key = jax.random.PRNGKey(0)
    k_param, k_tok = jax.random.split(key)
    params = init_params(k_param, vocab=vocab, E=E, H=H, W=W, Fm=Fm)
    kparams = pack_params(params)

    tokens = jax.random.randint(k_tok, (B, S), 1, vocab + 1, dtype=jnp.int32)
    tokens = tokens.at[:, -2:].set(0)           # exercise padding_idx=0

    out = jax.block_until_ready(hybrid_forward(tokens, kparams))
    ref = jax.block_until_ready(reference_forward(tokens, params))
    np.testing.assert_allclose(np.asarray(out), np.asarray(ref),
                               rtol=5e-3, atol=5e-3)
    print("KERNEL_OK")
</pallas_src>

<mosaic_0001>
module attributes {stable_mosaic.version = 11 : i64} {
  func.func @hybrid_kernel(%arg0: i32, %arg1: memref<192x1xi32, #tpu.memory_space<vmem>>, %arg2: memref<51x1024xf32, #tpu.memory_space<vmem>>, %arg3: memref<1x64xf32, #tpu.memory_space<vmem>>, %arg4: memref<64x256xf32, #tpu.memory_space<vmem>>, %arg5: memref<64x256xf32, #tpu.memory_space<vmem>>, %arg6: memref<1x256xf32, #tpu.memory_space<vmem>>, %arg7: memref<64x256xf32, #tpu.memory_space<vmem>>, %arg8: memref<64x256xf32, #tpu.memory_space<vmem>>, %arg9: memref<1x256xf32, #tpu.memory_space<vmem>>, %arg10: memref<64x256xf32, #tpu.memory_space<vmem>>, %arg11: memref<1x64xf32, #tpu.memory_space<vmem>>, %arg12: memref<1x1xf32, #tpu.memory_space<vmem>>, %arg13: memref<8x1xf32, #tpu.memory_space<vmem>>, %arg14: memref<192x64xf32, #tpu.memory_space<vmem>>, %arg15: memref<192x256xf32, #tpu.memory_space<vmem>>, %arg16: memref<192x256xf32, #tpu.memory_space<vmem>>) attributes {dimension_semantics = [#tpu.dimension_semantics<arbitrary>], iteration_bounds = array<i64: 1>, scalar_prefetch = 0 : i64, scratch_operands = 3 : i64, tpu.core_type = #tpu.core_type<tc>, window_params = [{pipeline_mode = #tpu.pipeline_mode<synchronous>, transform_indices = @transform_0, window_bounds = array<i64: 192, 1>}, {pipeline_mode = #tpu.pipeline_mode<synchronous>, transform_indices = @transform_1, window_bounds = array<i64: 51, 1024>}, {pipeline_mode = #tpu.pipeline_mode<synchronous>, transform_indices = @transform_2, window_bounds = array<i64: 1, 64>}, {pipeline_mode = #tpu.pipeline_mode<synchronous>, transform_indices = @transform_3, window_bounds = array<i64: 64, 256>}, {pipeline_mode = #tpu.pipeline_mode<synchronous>, transform_indices = @transform_4, window_bounds = array<i64: 64, 256>}, {pipeline_mode = #tpu.pipeline_mode<synchronous>, transform_indices = @transform_5, window_bounds = array<i64: 1, 256>}, {pipeline_mode = #tpu.pipeline_mode<synchronous>, transform_indices = @transform_6, window_bounds = array<i64: 64, 256>}, {pipeline_mode = #tpu.pipeline_mode<synchronous>, transform_indices = @transform_7, window_bounds = array<i64: 64, 256>}, {pipeline_mode = #tpu.pipeline_mode<synchronous>, transform_indices = @transform_8, window_bounds = array<i64: 1, 256>}, {pipeline_mode = #tpu.pipeline_mode<synchronous>, transform_indices = @transform_9, window_bounds = array<i64: 64, 256>}, {pipeline_mode = #tpu.pipeline_mode<synchronous>, transform_indices = @transform_10, window_bounds = array<i64: 1, 64>}, {pipeline_mode = #tpu.pipeline_mode<synchronous>, transform_indices = @transform_11, window_bounds = array<i64: 1, 1>}, {pipeline_mode = #tpu.pipeline_mode<synchronous>, transform_indices = @transform_12, window_bounds = array<i64: 8, 1>}]} {
    %c0 = arith.constant 0 : index
    %c0_0 = arith.constant 0 : index
    %0 = vector.load %arg1[%c0, %c0_0] : memref<192x1xi32, #tpu.memory_space<vmem>>, vector<192x1xi32>
    %1 = tpu.iota {dimensions = array<i32: 1>} : vector<192x51xi32>
    %2 = vector.broadcast %0 : vector<192x1xi32> to vector<192x51xi32>
    %3 = arith.cmpi eq, %1, %2 : vector<192x51xi32>
    %4 = arith.extui %3 : vector<192x51xi1> to vector<192x51xi32>
    %5 = arith.sitofp %4 : vector<192x51xi32> to vector<192x51xf32>
    %c0_1 = arith.constant 0 : index
    %c0_2 = arith.constant 0 : index
    %6 = vector.load %arg2[%c0_1, %c0_2] : memref<51x1024xf32, #tpu.memory_space<vmem>>, vector<51x1024xf32>
    %cst = arith.constant dense<0.000000e+00> : vector<192x1024xf32>
    %7 = tpu.matmul %5, %6, %cst {dimension_numbers = #tpu.dot_dimension_numbers<[1], [0], [0], [1], [0, 0, 1, 1], [], []>} : vector<192x51xf32>, vector<51x1024xf32>, vector<192x1024xf32> -> vector<192x1024xf32>
    %8 = vector.shape_cast %7 : vector<192x1024xf32> to vector<8x24x1024xf32>
    %9 = vector.extract_strided_slice %8 {offsets = [0, 0, 0], sizes = [8, 9, 64], strides = [1, 1, 1]} : vector<8x24x1024xf32> to vector<8x9x64xf32>
    %10 = vector.extract_strided_slice %8 {offsets = [0, 1, 64], sizes = [8, 9, 64], strides = [1, 1, 1]} : vector<8x24x1024xf32> to vector<8x9x64xf32>
    %11 = arith.addf %9, %10 : vector<8x9x64xf32>
    %12 = vector.extract_strided_slice %8 {offsets = [0, 2, 128], sizes = [8, 9, 64], strides = [1, 1, 1]} : vector<8x24x1024xf32> to vector<8x9x64xf32>
    %13 = arith.addf %11, %12 : vector<8x9x64xf32>
    %14 = vector.extract_strided_slice %8 {offsets = [0, 3, 192], sizes = [8, 9, 64], strides = [1, 1, 1]} : vector<8x24x1024xf32> to vector<8x9x64xf32>
    %15 = arith.addf %13, %14 : vector<8x9x64xf32>
    %16 = vector.extract_strided_slice %8 {offsets = [0, 4, 256], sizes = [8, 9, 64], strides = [1, 1, 1]} : vector<8x24x1024xf32> to vector<8x9x64xf32>
    %17 = arith.addf %15, %16 : vector<8x9x64xf32>
    %18 = vector.extract_strided_slice %8 {offsets = [0, 5, 320], sizes = [8, 9, 64], strides = [1, 1, 1]} : vector<8x24x1024xf32> to vector<8x9x64xf32>
    %19 = arith.addf %17, %18 : vector<8x9x64xf32>
    %20 = vector.extract_strided_slice %8 {offsets = [0, 6, 384], sizes = [8, 9, 64], strides = [1, 1, 1]} : vector<8x24x1024xf32> to vector<8x9x64xf32>
    %21 = arith.addf %19, %20 : vector<8x9x64xf32>
    %22 = vector.extract_strided_slice %8 {offsets = [0, 7, 448], sizes = [8, 9, 64], strides = [1, 1, 1]} : vector<8x24x1024xf32> to vector<8x9x64xf32>
    %23 = arith.addf %21, %22 : vector<8x9x64xf32>
    %24 = vector.extract_strided_slice %8 {offsets = [0, 8, 512], sizes = [8, 9, 64], strides = [1, 1, 1]} : vector<8x24x1024xf32> to vector<8x9x64xf32>
    %25 = arith.addf %23, %24 : vector<8x9x64xf32>
    %26 = vector.extract_strided_slice %8 {offsets = [0, 9, 576], sizes = [8, 9, 64], strides = [1, 1, 1]} : vector<8x24x1024xf32> to vector<8x9x64xf32>
    %27 = arith.addf %25, %26 : vector<8x9x64xf32>
    %28 = vector.extract_strided_slice %8 {offsets = [0, 10, 640], sizes = [8, 9, 64], strides = [1, 1, 1]} : vector<8x24x1024xf32> to vector<8x9x64xf32>
    %29 = arith.addf %27, %28 : vector<8x9x64xf32>
    %30 = vector.extract_strided_slice %8 {offsets = [0, 11, 704], sizes = [8, 9, 64], strides = [1, 1, 1]} : vector<8x24x1024xf32> to vector<8x9x64xf32>
    %31 = arith.addf %29, %30 : vector<8x9x64xf32>
    %32 = vector.extract_strided_slice %8 {offsets = [0, 12, 768], sizes = [8, 9, 64], strides = [1, 1, 1]} : vector<8x24x1024xf32> to vector<8x9x64xf32>
    %33 = arith.addf %31, %32 : vector<8x9x64xf32>
    %34 = vector.extract_strided_slice %8 {offsets = [0, 13, 832], sizes = [8, 9, 64], strides = [1, 1, 1]} : vector<8x24x1024xf32> to vector<8x9x64xf32>
    %35 = arith.addf %33, %34 : vector<8x9x64xf32>
    %36 = vector.extract_strided_slice %8 {offsets = [0, 14, 896], sizes = [8, 9, 64], strides = [1, 1, 1]} : vector<8x24x1024xf32> to vector<8x9x64xf32>
    %37 = arith.addf %35, %36 : vector<8x9x64xf32>
    %38 = vector.extract_strided_slice %8 {offsets = [0, 15, 960], sizes = [8, 9, 64], strides = [1, 1, 1]} : vector<8x24x1024xf32> to vector<8x9x64xf32>
    %39 = arith.addf %37, %38 : vector<8x9x64xf32>
    %c0_3 = arith.constant 0 : index
    %c0_4 = arith.constant 0 : index
    %40 = vector.load %arg3[%c0_3, %c0_4] : memref<1x64xf32, #tpu.memory_space<vmem>>, vector<1x64xf32>
    %41 = vector.shape_cast %40 : vector<1x64xf32> to vector<1x1x64xf32>
    %42 = vector.broadcast %41 : vector<1x1x64xf32> to vector<8x9x64xf32>
    %43 = arith.addf %39, %42 : vector<8x9x64xf32>
    %cst_5 = arith.constant 0.000000e+00 : f32
    %44 = vector.broadcast %cst_5 : f32 to vector<8x9x64xf32>
    %45 = arith.maximumf %43, %44 : vector<8x9x64xf32>
    %cst_6 = arith.constant dense<0xFF800000> : vector<8x64xf32>
    %46 = vector.multi_reduction <maximumf>, %45, %cst_6 [1] : vector<8x9x64xf32> to vector<8x64xf32>
    %cst_7 = arith.constant 0.000000e+00 : f32
    %47 = vector.broadcast %cst_7 : f32 to vector<8x64xf32>
    %c0_8 = arith.constant 0 : index
    %c0_9 = arith.constant 0 : index
    %48 = vector.load %arg4[%c0_8, %c0_9] : memref<64x256xf32, #tpu.memory_space<vmem>>, vector<64x256xf32>
    %cst_10 = arith.constant dense<0.000000e+00> : vector<8x256xf32>
    %49 = tpu.matmul %46, %48, %cst_10 {dimension_numbers = #tpu.dot_dimension_numbers<[1], [0], [0], [1], [0, 0, 1, 1], [], []>} : vector<8x64xf32>, vector<64x256xf32>, vector<8x256xf32> -> vector<8x256xf32>
    %c0_11 = arith.constant 0 : index
    %c0_12 = arith.constant 0 : index
    %50 = vector.load %arg6[%c0_11, %c0_12] : memref<1x256xf32, #tpu.memory_space<vmem>>, vector<1x256xf32>
    %51 = vector.broadcast %50 : vector<1x256xf32> to vector<8x256xf32>
    %52 = arith.addf %49, %51 : vector<8x256xf32>
    %c0_13 = arith.constant 0 : index
    %c0_14 = arith.constant 0 : index
    %53 = vector.load %arg5[%c0_13, %c0_14] : memref<64x256xf32, #tpu.memory_space<vmem>>, vector<64x256xf32>
    %cst_15 = arith.constant dense<0.000000e+00> : vector<8x256xf32>
    %54 = tpu.matmul %47, %53, %cst_15 {dimension_numbers = #tpu.dot_dimension_numbers<[1], [0], [0], [1], [0, 0, 1, 1], [], []>} : vector<8x64xf32>, vector<64x256xf32>, vector<8x256xf32> -> vector<8x256xf32>
    %55 = arith.addf %52, %54 : vector<8x256xf32>
    %56 = vector.extract_strided_slice %55 {offsets = [0, 0], sizes = [8, 64], strides = [1, 1]} : vector<8x256xf32> to vector<8x64xf32>
    %57 = arith.negf %56 : vector<8x64xf32>
    %58 = math.exp %57 : vector<8x64xf32>
    %cst_16 = arith.constant 1.000000e+00 : f32
    %59 = vector.broadcast %cst_16 : f32 to vector<8x64xf32>
    %60 = arith.addf %59, %58 : vector<8x64xf32>
    %61 = arith.divf %59, %60 : vector<8x64xf32>
    %62 = vector.extract_strided_slice %55 {offsets = [0, 64], sizes = [8, 64], strides = [1, 1]} : vector<8x256xf32> to vector<8x64xf32>
    %63 = arith.negf %62 : vector<8x64xf32>
    %64 = math.exp %63 : vector<8x64xf32>
    %cst_17 = arith.constant 1.000000e+00 : f32
    %65 = vector.broadcast %cst_17 : f32 to vector<8x64xf32>
    %66 = arith.addf %65, %64 : vector<8x64xf32>
    %67 = arith.divf %65, %66 : vector<8x64xf32>
    %68 = vector.extract_strided_slice %55 {offsets = [0, 128], sizes = [8, 64], strides = [1, 1]} : vector<8x256xf32> to vector<8x64xf32>
    %69 = math.tanh %68 : vector<8x64xf32>
    %70 = vector.extract_strided_slice %55 {offsets = [0, 192], sizes = [8, 64], strides = [1, 1]} : vector<8x256xf32> to vector<8x64xf32>
    %71 = arith.negf %70 : vector<8x64xf32>
    %72 = math.exp %71 : vector<8x64xf32>
    %cst_18 = arith.constant 1.000000e+00 : f32
    %73 = vector.broadcast %cst_18 : f32 to vector<8x64xf32>
    %74 = arith.addf %73, %72 : vector<8x64xf32>
    %75 = arith.divf %73, %74 : vector<8x64xf32>
    %76 = arith.mulf %67, %47 : vector<8x64xf32>
    %77 = arith.mulf %61, %69 : vector<8x64xf32>
    %78 = arith.addf %76, %77 : vector<8x64xf32>
    %79 = math.tanh %78 : vector<8x64xf32>
    %80 = arith.mulf %75, %79 : vector<8x64xf32>
    %c0_19 = arith.constant 0 : index
    %c0_20 = arith.constant 0 : index
    %81 = vector.load %arg14[%c0_19, %c0_20] : memref<192x64xf32, #tpu.memory_space<vmem>>, vector<8x64xf32>
    tpu.vector_store %arg14[%c0_19, %c0_20], %80 {strides = array<i32>} : memref<192x64xf32, #tpu.memory_space<vmem>>, vector<8x64xf32>,
    %cst_21 = arith.constant dense<0.000000e+00> : vector<8x256xf32>
    %82 = tpu.matmul %80, %53, %cst_21 {dimension_numbers = #tpu.dot_dimension_numbers<[1], [0], [0], [1], [0, 0, 1, 1], [], []>} : vector<8x64xf32>, vector<64x256xf32>, vector<8x256xf32> -> vector<8x256xf32>
    %83 = arith.addf %52, %82 : vector<8x256xf32>
    %84 = vector.extract_strided_slice %83 {offsets = [0, 0], sizes = [8, 64], strides = [1, 1]} : vector<8x256xf32> to vector<8x64xf32>
    %85 = arith.negf %84 : vector<8x64xf32>
    %86 = math.exp %85 : vector<8x64xf32>
    %cst_22 = arith.constant 1.000000e+00 : f32
    %87 = vector.broadcast %cst_22 : f32 to vector<8x64xf32>
    %88 = arith.addf %87, %86 : vector<8x64xf32>
    %89 = arith.divf %87, %88 : vector<8x64xf32>
    %90 = vector.extract_strided_slice %83 {offsets = [0, 64], sizes = [8, 64], strides = [1, 1]} : vector<8x256xf32> to vector<8x64xf32>
    %91 = arith.negf %90 : vector<8x64xf32>
    %92 = math.exp %91 : vector<8x64xf32>
    %cst_23 = arith.constant 1.000000e+00 : f32
    %93 = vector.broadcast %cst_23 : f32 to vector<8x64xf32>
    %94 = arith.addf %93, %92 : vector<8x64xf32>
    %95 = arith.divf %93, %94 : vector<8x64xf32>
    %96 = vector.extract_strided_slice %83 {offsets = [0, 128], sizes = [8, 64], strides = [1, 1]} : vector<8x256xf32> to vector<8x64xf32>
    %97 = math.tanh %96 : vector<8x64xf32>
    %98 = vector.extract_strided_slice %83 {offsets = [0, 192], sizes = [8, 64], strides = [1, 1]} : vector<8x256xf32> to vector<8x64xf32>
    %99 = arith.negf %98 : vector<8x64xf32>
    %100 = math.exp %99 : vector<8x64xf32>
    %cst_24 = arith.constant 1.000000e+00 : f32
    %101 = vector.broadcast %cst_24 : f32 to vector<8x64xf32>
    %102 = arith.addf %101, %100 : vector<8x64xf32>
    %103 = arith.divf %101, %102 : vector<8x64xf32>
    %104 = arith.mulf %95, %78 : vector<8x64xf32>
    %105 = arith.mulf %89, %97 : vector<8x64xf32>
    %106 = arith.addf %104, %105 : vector<8x64xf32>
    %107 = math.tanh %106 : vector<8x64xf32>
    %108 = arith.mulf %103, %107 : vector<8x64xf32>
    %c8 = arith.constant 8 : index
    %c0_25 = arith.constant 0 : index
    %109 = vector.load %arg14[%c8, %c0_25] : memref<192x64xf32, #tpu.memory_space<vmem>>, vector<8x64xf32>
    tpu.vector_store %arg14[%c8, %c0_25], %108 {strides = array<i32>} : memref<192x64xf32, #tpu.memory_space<vmem>>, vector<8x64xf32>,
    %cst_26 = arith.constant dense<0.000000e+00> : vector<8x256xf32>
    %110 = tpu.matmul %108, %53, %cst_26 {dimension_numbers = #tpu.dot_dimension_numbers<[1], [0], [0], [1], [0, 0, 1, 1], [], []>} : vector<8x64xf32>, vector<64x256xf32>, vector<8x256xf32> -> vector<8x256xf32>
    %111 = arith.addf %52, %110 : vector<8x256xf32>
    %112 = vector.extract_strided_slice %111 {offsets = [0, 0], sizes = [8, 64], strides = [1, 1]} : vector<8x256xf32> to vector<8x64xf32>
    %113 = arith.negf %112 : vector<8x64xf32>
    %114 = math.exp %113 : vector<8x64xf32>
    %cst_27 = arith.constant 1.000000e+00 : f32
    %115 = vector.broadcast %cst_27 : f32 to vector<8x64xf32>
    %116 = arith.addf %115, %114 : vector<8x64xf32>
    %117 = arith.divf %115, %116 : vector<8x64xf32>
    %118 = vector.extract_strided_slice %111 {offsets = [0, 64], sizes = [8, 64], strides = [1, 1]} : vector<8x256xf32> to vector<8x64xf32>
    %119 = arith.negf %118 : vector<8x64xf32>
    %120 = math.exp %119 : vector<8x64xf32>
    %cst_28 = arith.constant 1.000000e+00 : f32
    %121 = vector.broadcast %cst_28 : f32 to vector<8x64xf32>
    %122 = arith.addf %121, %120 : vector<8x64xf32>
    %123 = arith.divf %121, %122 : vector<8x64xf32>
    %124 = vector.extract_strided_slice %111 {offsets = [0, 128], sizes = [8, 64], strides = [1, 1]} : vector<8x256xf32> to vector<8x64xf32>
    %125 = math.tanh %124 : vector<8x64xf32>
    %126 = vector.extract_strided_slice %111 {offsets = [0, 192], sizes = [8, 64], strides = [1, 1]} : vector<8x256xf32> to vector<8x64xf32>
    %127 = arith.negf %126 : vector<8x64xf32>
    %128 = math.exp %127 : vector<8x64xf32>
    %cst_29 = arith.constant 1.000000e+00 : f32
    %129 = vector.broadcast %cst_29 : f32 to vector<8x64xf32>
    %130 = arith.addf %129, %128 : vector<8x64xf32>
    %131 = arith.divf %129, %130 : vector<8x64xf32>
    %132 = arith.mulf %123, %106 : vector<8x64xf32>
    %133 = arith.mulf %117, %125 : vector<8x64xf32>
    %134 = arith.addf %132, %133 : vector<8x64xf32>
    %135 = math.tanh %134 : vector<8x64xf32>
    %136 = arith.mulf %131, %135 : vector<8x64xf32>
    %c16 = arith.constant 16 : index
    %c0_30 = arith.constant 0 : index
    %137 = vector.load %arg14[%c16, %c0_30] : memref<192x64xf32, #tpu.memory_space<vmem>>, vector<8x64xf32>
    tpu.vector_store %arg14[%c16, %c0_30], %136 {strides = array<i32>} : memref<192x64xf32, #tpu.memory_space<vmem>>, vector<8x64xf32>,
    %cst_31 = arith.constant dense<0.000000e+00> : vector<8x256xf32>
    %138 = tpu.matmul %136, %53, %cst_31 {dimension_numbers = #tpu.dot_dimension_numbers<[1], [0], [0], [1], [0, 0, 1, 1], [], []>} : vector<8x64xf32>, vector<64x256xf32>, vector<8x256xf32> -> vector<8x256xf32>
    %139 = arith.addf %52, %138 : vector<8x256xf32>
    %140 = vector.extract_strided_slice %139 {offsets = [0, 0], sizes = [8, 64], strides = [1, 1]} : vector<8x256xf32> to vector<8x64xf32>
    %141 = arith.negf %140 : vector<8x64xf32>
    %142 = math.exp %141 : vector<8x64xf32>
    %cst_32 = arith.constant 1.000000e+00 : f32
    %143 = vector.broadcast %cst_32 : f32 to vector<8x64xf32>
    %144 = arith.addf %143, %142 : vector<8x64xf32>
    %145 = arith.divf %143, %144 : vector<8x64xf32>
    %146 = vector.extract_strided_slice %139 {offsets = [0, 64], sizes = [8, 64], strides = [1, 1]} : vector<8x256xf32> to vector<8x64xf32>
    %147 = arith.negf %146 : vector<8x64xf32>
    %148 = math.exp %147 : vector<8x64xf32>
    %cst_33 = arith.constant 1.000000e+00 : f32
    %149 = vector.broadcast %cst_33 : f32 to vector<8x64xf32>
    %150 = arith.addf %149, %148 : vector<8x64xf32>
    %151 = arith.divf %149, %150 : vector<8x64xf32>
    %152 = vector.extract_strided_slice %139 {offsets = [0, 128], sizes = [8, 64], strides = [1, 1]} : vector<8x256xf32> to vector<8x64xf32>
    %153 = math.tanh %152 : vector<8x64xf32>
    %154 = vector.extract_strided_slice %139 {offsets = [0, 192], sizes = [8, 64], strides = [1, 1]} : vector<8x256xf32> to vector<8x64xf32>
    %155 = arith.negf %154 : vector<8x64xf32>
    %156 = math.exp %155 : vector<8x64xf32>
    %cst_34 = arith.constant 1.000000e+00 : f32
    %157 = vector.broadcast %cst_34 : f32 to vector<8x64xf32>
    %158 = arith.addf %157, %156 : vector<8x64xf32>
    %159 = arith.divf %157, %158 : vector<8x64xf32>
    %160 = arith.mulf %151, %134 : vector<8x64xf32>
    %161 = arith.mulf %145, %153 : vector<8x64xf32>
    %162 = arith.addf %160, %161 : vector<8x64xf32>
    %163 = math.tanh %162 : vector<8x64xf32>
    %164 = arith.mulf %159, %163 : vector<8x64xf32>
    %c24 = arith.constant 24 : index
    %c0_35 = arith.constant 0 : index
    %165 = vector.load %arg14[%c24, %c0_35] : memref<192x64xf32, #tpu.memory_space<vmem>>, vector<8x64xf32>
    tpu.vector_store %arg14[%c24, %c0_35], %164 {strides = array<i32>} : memref<192x64xf32, #tpu.memory_space<vmem>>, vector<8x64xf32>,
    %cst_36 = arith.constant dense<0.000000e+00> : vector<8x256xf32>
    %166 = tpu.matmul %164, %53, %cst_36 {dimension_numbers = #tpu.dot_dimension_numbers<[1], [0], [0], [1], [0, 0, 1, 1], [], []>} : vector<8x64xf32>, vector<64x256xf32>, vector<8x256xf32> -> vector<8x256xf32>
    %167 = arith.addf %52, %166 : vector<8x256xf32>
    %168 = vector.extract_strided_slice %167 {offsets = [0, 0], sizes = [8, 64], strides = [1, 1]} : vector<8x256xf32> to vector<8x64xf32>
    %169 = arith.negf %168 : vector<8x64xf32>
    %170 = math.exp %169 : vector<8x64xf32>
    %cst_37 = arith.constant 1.000000e+00 : f32
    %171 = vector.broadcast %cst_37 : f32 to vector<8x64xf32>
    %172 = arith.addf %171, %170 : vector<8x64xf32>
    %173 = arith.divf %171, %172 : vector<8x64xf32>
    %174 = vector.extract_strided_slice %167 {offsets = [0, 64], sizes = [8, 64], strides = [1, 1]} : vector<8x256xf32> to vector<8x64xf32>
    %175 = arith.negf %174 : vector<8x64xf32>
    %176 = math.exp %175 : vector<8x64xf32>
    %cst_38 = arith.constant 1.000000e+00 : f32
    %177 = vector.broadcast %cst_38 : f32 to vector<8x64xf32>
    %178 = arith.addf %177, %176 : vector<8x64xf32>
    %179 = arith.divf %177, %178 : vector<8x64xf32>
    %180 = vector.extract_strided_slice %167 {offsets = [0, 128], sizes = [8, 64], strides = [1, 1]} : vector<8x256xf32> to vector<8x64xf32>
    %181 = math.tanh %180 : vector<8x64xf32>
    %182 = vector.extract_strided_slice %167 {offsets = [0, 192], sizes = [8, 64], strides = [1, 1]} : vector<8x256xf32> to vector<8x64xf32>
    %183 = arith.negf %182 : vector<8x64xf32>
    %184 = math.exp %183 : vector<8x64xf32>
    %cst_39 = arith.constant 1.000000e+00 : f32
    %185 = vector.broadcast %cst_39 : f32 to vector<8x64xf32>
    %186 = arith.addf %185, %184 : vector<8x64xf32>
    %187 = arith.divf %185, %186 : vector<8x64xf32>
    %188 = arith.mulf %179, %162 : vector<8x64xf32>
    %189 = arith.mulf %173, %181 : vector<8x64xf32>
    %190 = arith.addf %188, %189 : vector<8x64xf32>
    %191 = math.tanh %190 : vector<8x64xf32>
    %192 = arith.mulf %187, %191 : vector<8x64xf32>
    %c32 = arith.constant 32 : index
    %c0_40 = arith.constant 0 : index
    %193 = vector.load %arg14[%c32, %c0_40] : memref<192x64xf32, #tpu.memory_space<vmem>>, vector<8x64xf32>
    tpu.vector_store %arg14[%c32, %c0_40], %192 {strides = array<i32>} : memref<192x64xf32, #tpu.memory_space<vmem>>, vector<8x64xf32>,
    %cst_41 = arith.constant dense<0.000000e+00> : vector<8x256xf32>
    %194 = tpu.matmul %192, %53, %cst_41 {dimension_numbers = #tpu.dot_dimension_numbers<[1], [0], [0], [1], [0, 0, 1, 1], [], []>} : vector<8x64xf32>, vector<64x256xf32>, vector<8x256xf32> -> vector<8x256xf32>
    %195 = arith.addf %52, %194 : vector<8x256xf32>
    %196 = vector.extract_strided_slice %195 {offsets = [0, 0], sizes = [8, 64], strides = [1, 1]} : vector<8x256xf32> to vector<8x64xf32>
    %197 = arith.negf %196 : vector<8x64xf32>
    %198 = math.exp %197 : vector<8x64xf32>
    %cst_42 = arith.constant 1.000000e+00 : f32
    %199 = vector.broadcast %cst_42 : f32 to vector<8x64xf32>
    %200 = arith.addf %199, %198 : vector<8x64xf32>
    %201 = arith.divf %199, %200 : vector<8x64xf32>
    %202 = vector.extract_strided_slice %195 {offsets = [0, 64], sizes = [8, 64], strides = [1, 1]} : vector<8x256xf32> to vector<8x64xf32>
    %203 = arith.negf %202 : vector<8x64xf32>
    %204 = math.exp %203 : vector<8x64xf32>
    %cst_43 = arith.constant 1.000000e+00 : f32
    %205 = vector.broadcast %cst_43 : f32 to vector<8x64xf32>
    %206 = arith.addf %205, %204 : vector<8x64xf32>
    %207 = arith.divf %205, %206 : vector<8x64xf32>
    %208 = vector.extract_strided_slice %195 {offsets = [0, 128], sizes = [8, 64], strides = [1, 1]} : vector<8x256xf32> to vector<8x64xf32>
    %209 = math.tanh %208 : vector<8x64xf32>
    %210 = vector.extract_strided_slice %195 {offsets = [0, 192], sizes = [8, 64], strides = [1, 1]} : vector<8x256xf32> to vector<8x64xf32>
    %211 = arith.negf %210 : vector<8x64xf32>
    %212 = math.exp %211 : vector<8x64xf32>
    %cst_44 = arith.constant 1.000000e+00 : f32
    %213 = vector.broadcast %cst_44 : f32 to vector<8x64xf32>
    %214 = arith.addf %213, %212 : vector<8x64xf32>
    %215 = arith.divf %213, %214 : vector<8x64xf32>
    %216 = arith.mulf %207, %190 : vector<8x64xf32>
    %217 = arith.mulf %201, %209 : vector<8x64xf32>
    %218 = arith.addf %216, %217 : vector<8x64xf32>
    %219 = math.tanh %218 : vector<8x64xf32>
    %220 = arith.mulf %215, %219 : vector<8x64xf32>
    %c40 = arith.constant 40 : index
    %c0_45 = arith.constant 0 : index
    %221 = vector.load %arg14[%c40, %c0_45] : memref<192x64xf32, #tpu.memory_space<vmem>>, vector<8x64xf32>
    tpu.vector_store %arg14[%c40, %c0_45], %220 {strides = array<i32>} : memref<192x64xf32, #tpu.memory_space<vmem>>, vector<8x64xf32>,
    %cst_46 = arith.constant dense<0.000000e+00> : vector<8x256xf32>
    %222 = tpu.matmul %220, %53, %cst_46 {dimension_numbers = #tpu.dot_dimension_numbers<[1], [0], [0], [1], [0, 0, 1, 1], [], []>} : vector<8x64xf32>, vector<64x256xf32>, vector<8x256xf32> -> vector<8x256xf32>
    %223 = arith.addf %52, %222 : vector<8x256xf32>
    %224 = vector.extract_strided_slice %223 {offsets = [0, 0], sizes = [8, 64], strides = [1, 1]} : vector<8x256xf32> to vector<8x64xf32>
    %225 = arith.negf %224 : vector<8x64xf32>
    %226 = math.exp %225 : vector<8x64xf32>
    %cst_47 = arith.constant 1.000000e+00 : f32
    %227 = vector.broadcast %cst_47 : f32 to vector<8x64xf32>
    %228 = arith.addf %227, %226 : vector<8x64xf32>
    %229 = arith.divf %227, %228 : vector<8x64xf32>
    %230 = vector.extract_strided_slice %223 {offsets = [0, 64], sizes = [8, 64], strides = [1, 1]} : vector<8x256xf32> to vector<8x64xf32>
    %231 = arith.negf %230 : vector<8x64xf32>
    %232 = math.exp %231 : vector<8x64xf32>
    %cst_48 = arith.constant 1.000000e+00 : f32
    %233 = vector.broadcast %cst_48 : f32 to vector<8x64xf32>
    %234 = arith.addf %233, %232 : vector<8x64xf32>
    %235 = arith.divf %233, %234 : vector<8x64xf32>
    %236 = vector.extract_strided_slice %223 {offsets = [0, 128], sizes = [8, 64], strides = [1, 1]} : vector<8x256xf32> to vector<8x64xf32>
    %237 = math.tanh %236 : vector<8x64xf32>
    %238 = vector.extract_strided_slice %223 {offsets = [0, 192], sizes = [8, 64], strides = [1, 1]} : vector<8x256xf32> to vector<8x64xf32>
    %239 = arith.negf %238 : vector<8x64xf32>
    %240 = math.exp %239 : vector<8x64xf32>
    %cst_49 = arith.constant 1.000000e+00 : f32
    %241 = vector.broadcast %cst_49 : f32 to vector<8x64xf32>
    %242 = arith.addf %241, %240 : vector<8x64xf32>
    %243 = arith.divf %241, %242 : vector<8x64xf32>
    %244 = arith.mulf %235, %218 : vector<8x64xf32>
    %245 = arith.mulf %229, %237 : vector<8x64xf32>
    %246 = arith.addf %244, %245 : vector<8x64xf32>
    %247 = math.tanh %246 : vector<8x64xf32>
    %248 = arith.mulf %243, %247 : vector<8x64xf32>
    %c48 = arith.constant 48 : index
    %c0_50 = arith.constant 0 : index
    %249 = vector.load %arg14[%c48, %c0_50] : memref<192x64xf32, #tpu.memory_space<vmem>>, vector<8x64xf32>
    tpu.vector_store %arg14[%c48, %c0_50], %248 {strides = array<i32>} : memref<192x64xf32, #tpu.memory_space<vmem>>, vector<8x64xf32>,
    %cst_51 = arith.constant dense<0.000000e+00> : vector<8x256xf32>
    %250 = tpu.matmul %248, %53, %cst_51 {dimension_numbers = #tpu.dot_dimension_numbers<[1], [0], [0], [1], [0, 0, 1, 1], [], []>} : vector<8x64xf32>, vector<64x256xf32>, vector<8x256xf32> -> vector<8x256xf32>
    %251 = arith.addf %52, %250 : vector<8x256xf32>
    %252 = vector.extract_strided_slice %251 {offsets = [0, 0], sizes = [8, 64], strides = [1, 1]} : vector<8x256xf32> to vector<8x64xf32>
    %253 = arith.negf %252 : vector<8x64xf32>
    %254 = math.exp %253 : vector<8x64xf32>
    %cst_52 = arith.constant 1.000000e+00 : f32
    %255 = vector.broadcast %cst_52 : f32 to vector<8x64xf32>
    %256 = arith.addf %255, %254 : vector<8x64xf32>
    %257 = arith.divf %255, %256 : vector<8x64xf32>
    %258 = vector.extract_strided_slice %251 {offsets = [0, 64], sizes = [8, 64], strides = [1, 1]} : vector<8x256xf32> to vector<8x64xf32>
    %259 = arith.negf %258 : vector<8x64xf32>
    %260 = math.exp %259 : vector<8x64xf32>
    %cst_53 = arith.constant 1.000000e+00 : f32
    %261 = vector.broadcast %cst_53 : f32 to vector<8x64xf32>
    %262 = arith.addf %261, %260 : vector<8x64xf32>
    %263 = arith.divf %261, %262 : vector<8x64xf32>
    %264 = vector.extract_strided_slice %251 {offsets = [0, 128], sizes = [8, 64], strides = [1, 1]} : vector<8x256xf32> to vector<8x64xf32>
    %265 = math.tanh %264 : vector<8x64xf32>
    %266 = vector.extract_strided_slice %251 {offsets = [0, 192], sizes = [8, 64], strides = [1, 1]} : vector<8x256xf32> to vector<8x64xf32>
    %267 = arith.negf %266 : vector<8x64xf32>
    %268 = math.exp %267 : vector<8x64xf32>
    %cst_54 = arith.constant 1.000000e+00 : f32
    %269 = vector.broadcast %cst_54 : f32 to vector<8x64xf32>
    %270 = arith.addf %269, %268 : vector<8x64xf32>
    %271 = arith.divf %269, %270 : vector<8x64xf32>
    %272 = arith.mulf %263, %246 : vector<8x64xf32>
    %273 = arith.mulf %257, %265 : vector<8x64xf32>
    %274 = arith.addf %272, %273 : vector<8x64xf32>
    %275 = math.tanh %274 : vector<8x64xf32>
    %276 = arith.mulf %271, %275 : vector<8x64xf32>
    %c56 = arith.constant 56 : index
    %c0_55 = arith.constant 0 : index
    %277 = vector.load %arg14[%c56, %c0_55] : memref<192x64xf32, #tpu.memory_space<vmem>>, vector<8x64xf32>
    tpu.vector_store %arg14[%c56, %c0_55], %276 {strides = array<i32>} : memref<192x64xf32, #tpu.memory_space<vmem>>, vector<8x64xf32>,
    %cst_56 = arith.constant dense<0.000000e+00> : vector<8x256xf32>
    %278 = tpu.matmul %276, %53, %cst_56 {dimension_numbers = #tpu.dot_dimension_numbers<[1], [0], [0], [1], [0, 0, 1, 1], [], []>} : vector<8x64xf32>, vector<64x256xf32>, vector<8x256xf32> -> vector<8x256xf32>
    %279 = arith.addf %52, %278 : vector<8x256xf32>
    %280 = vector.extract_strided_slice %279 {offsets = [0, 0], sizes = [8, 64], strides = [1, 1]} : vector<8x256xf32> to vector<8x64xf32>
    %281 = arith.negf %280 : vector<8x64xf32>
    %282 = math.exp %281 : vector<8x64xf32>
    %cst_57 = arith.constant 1.000000e+00 : f32
    %283 = vector.broadcast %cst_57 : f32 to vector<8x64xf32>
    %284 = arith.addf %283, %282 : vector<8x64xf32>
    %285 = arith.divf %283, %284 : vector<8x64xf32>
    %286 = vector.extract_strided_slice %279 {offsets = [0, 64], sizes = [8, 64], strides = [1, 1]} : vector<8x256xf32> to vector<8x64xf32>
    %287 = arith.negf %286 : vector<8x64xf32>
    %288 = math.exp %287 : vector<8x64xf32>
    %cst_58 = arith.constant 1.000000e+00 : f32
    %289 = vector.broadcast %cst_58 : f32 to vector<8x64xf32>
    %290 = arith.addf %289, %288 : vector<8x64xf32>
    %291 = arith.divf %289, %290 : vector<8x64xf32>
    %292 = vector.extract_strided_slice %279 {offsets = [0, 128], sizes = [8, 64], strides = [1, 1]} : vector<8x256xf32> to vector<8x64xf32>
    %293 = math.tanh %292 : vector<8x64xf32>
    %294 = vector.extract_strided_slice %279 {offsets = [0, 192], sizes = [8, 64], strides = [1, 1]} : vector<8x256xf32> to vector<8x64xf32>
    %295 = arith.negf %294 : vector<8x64xf32>
    %296 = math.exp %295 : vector<8x64xf32>
    %cst_59 = arith.constant 1.000000e+00 : f32
    %297 = vector.broadcast %cst_59 : f32 to vector<8x64xf32>
    %298 = arith.addf %297, %296 : vector<8x64xf32>
    %299 = arith.divf %297, %298 : vector<8x64xf32>
    %300 = arith.mulf %291, %274 : vector<8x64xf32>
    %301 = arith.mulf %285, %293 : vector<8x64xf32>
    %302 = arith.addf %300, %301 : vector<8x64xf32>
    %303 = math.tanh %302 : vector<8x64xf32>
    %304 = arith.mulf %299, %303 : vector<8x64xf32>
    %c64 = arith.constant 64 : index
    %c0_60 = arith.constant 0 : index
    %305 = vector.load %arg14[%c64, %c0_60] : memref<192x64xf32, #tpu.memory_space<vmem>>, vector<8x64xf32>
    tpu.vector_store %arg14[%c64, %c0_60], %304 {strides = array<i32>} : memref<192x64xf32, #tpu.memory_space<vmem>>, vector<8x64xf32>,
    %cst_61 = arith.constant dense<0.000000e+00> : vector<8x256xf32>
    %306 = tpu.matmul %304, %53, %cst_61 {dimension_numbers = #tpu.dot_dimension_numbers<[1], [0], [0], [1], [0, 0, 1, 1], [], []>} : vector<8x64xf32>, vector<64x256xf32>, vector<8x256xf32> -> vector<8x256xf32>
    %307 = arith.addf %52, %306 : vector<8x256xf32>
    %308 = vector.extract_strided_slice %307 {offsets = [0, 0], sizes = [8, 64], strides = [1, 1]} : vector<8x256xf32> to vector<8x64xf32>
    %309 = arith.negf %308 : vector<8x64xf32>
    %310 = math.exp %309 : vector<8x64xf32>
    %cst_62 = arith.constant 1.000000e+00 : f32
    %311 = vector.broadcast %cst_62 : f32 to vector<8x64xf32>
    %312 = arith.addf %311, %310 : vector<8x64xf32>
    %313 = arith.divf %311, %312 : vector<8x64xf32>
    %314 = vector.extract_strided_slice %307 {offsets = [0, 64], sizes = [8, 64], strides = [1, 1]} : vector<8x256xf32> to vector<8x64xf32>
    %315 = arith.negf %314 : vector<8x64xf32>
    %316 = math.exp %315 : vector<8x64xf32>
    %cst_63 = arith.constant 1.000000e+00 : f32
    %317 = vector.broadcast %cst_63 : f32 to vector<8x64xf32>
    %318 = arith.addf %317, %316 : vector<8x64xf32>
    %319 = arith.divf %317, %318 : vector<8x64xf32>
    %320 = vector.extract_strided_slice %307 {offsets = [0, 128], sizes = [8, 64], strides = [1, 1]} : vector<8x256xf32> to vector<8x64xf32>
    %321 = math.tanh %320 : vector<8x64xf32>
    %322 = vector.extract_strided_slice %307 {offsets = [0, 192], sizes = [8, 64], strides = [1, 1]} : vector<8x256xf32> to vector<8x64xf32>
    %323 = arith.negf %322 : vector<8x64xf32>
    %324 = math.exp %323 : vector<8x64xf32>
    %cst_64 = arith.constant 1.000000e+00 : f32
    %325 = vector.broadcast %cst_64 : f32 to vector<8x64xf32>
    %326 = arith.addf %325, %324 : vector<8x64xf32>
    %327 = arith.divf %325, %326 : vector<8x64xf32>
    %328 = arith.mulf %319, %302 : vector<8x64xf32>
    %329 = arith.mulf %313, %321 : vector<8x64xf32>
    %330 = arith.addf %328, %329 : vector<8x64xf32>
    %331 = math.tanh %330 : vector<8x64xf32>
    %332 = arith.mulf %327, %331 : vector<8x64xf32>
    %c72 = arith.constant 72 : index
    %c0_65 = arith.constant 0 : index
    %333 = vector.load %arg14[%c72, %c0_65] : memref<192x64xf32, #tpu.memory_space<vmem>>, vector<8x64xf32>
    tpu.vector_store %arg14[%c72, %c0_65], %332 {strides = array<i32>} : memref<192x64xf32, #tpu.memory_space<vmem>>, vector<8x64xf32>,
    %cst_66 = arith.constant dense<0.000000e+00> : vector<8x256xf32>
    %334 = tpu.matmul %332, %53, %cst_66 {dimension_numbers = #tpu.dot_dimension_numbers<[1], [0], [0], [1], [0, 0, 1, 1], [], []>} : vector<8x64xf32>, vector<64x256xf32>, vector<8x256xf32> -> vector<8x256xf32>
    %335 = arith.addf %52, %334 : vector<8x256xf32>
    %336 = vector.extract_strided_slice %335 {offsets = [0, 0], sizes = [8, 64], strides = [1, 1]} : vector<8x256xf32> to vector<8x64xf32>
    %337 = arith.negf %336 : vector<8x64xf32>
    %338 = math.exp %337 : vector<8x64xf32>
    %cst_67 = arith.constant 1.000000e+00 : f32
    %339 = vector.broadcast %cst_67 : f32 to vector<8x64xf32>
    %340 = arith.addf %339, %338 : vector<8x64xf32>
    %341 = arith.divf %339, %340 : vector<8x64xf32>
    %342 = vector.extract_strided_slice %335 {offsets = [0, 64], sizes = [8, 64], strides = [1, 1]} : vector<8x256xf32> to vector<8x64xf32>
    %343 = arith.negf %342 : vector<8x64xf32>
    %344 = math.exp %343 : vector<8x64xf32>
    %cst_68 = arith.constant 1.000000e+00 : f32
    %345 = vector.broadcast %cst_68 : f32 to vector<8x64xf32>
    %346 = arith.addf %345, %344 : vector<8x64xf32>
    %347 = arith.divf %345, %346 : vector<8x64xf32>
    %348 = vector.extract_strided_slice %335 {offsets = [0, 128], sizes = [8, 64], strides = [1, 1]} : vector<8x256xf32> to vector<8x64xf32>
    %349 = math.tanh %348 : vector<8x64xf32>
    %350 = vector.extract_strided_slice %335 {offsets = [0, 192], sizes = [8, 64], strides = [1, 1]} : vector<8x256xf32> to vector<8x64xf32>
    %351 = arith.negf %350 : vector<8x64xf32>
    %352 = math.exp %351 : vector<8x64xf32>
    %cst_69 = arith.constant 1.000000e+00 : f32
    %353 = vector.broadcast %cst_69 : f32 to vector<8x64xf32>
    %354 = arith.addf %353, %352 : vector<8x64xf32>
    %355 = arith.divf %353, %354 : vector<8x64xf32>
    %356 = arith.mulf %347, %330 : vector<8x64xf32>
    %357 = arith.mulf %341, %349 : vector<8x64xf32>
    %358 = arith.addf %356, %357 : vector<8x64xf32>
    %359 = math.tanh %358 : vector<8x64xf32>
    %360 = arith.mulf %355, %359 : vector<8x64xf32>
    %c80 = arith.constant 80 : index
    %c0_70 = arith.constant 0 : index
    %361 = vector.load %arg14[%c80, %c0_70] : memref<192x64xf32, #tpu.memory_space<vmem>>, vector<8x64xf32>
    tpu.vector_store %arg14[%c80, %c0_70], %360 {strides = array<i32>} : memref<192x64xf32, #tpu.memory_space<vmem>>, vector<8x64xf32>,
    %cst_71 = arith.constant dense<0.000000e+00> : vector<8x256xf32>
    %362 = tpu.matmul %360, %53, %cst_71 {dimension_numbers = #tpu.dot_dimension_numbers<[1], [0], [0], [1], [0, 0, 1, 1], [], []>} : vector<8x64xf32>, vector<64x256xf32>, vector<8x256xf32> -> vector<8x256xf32>
    %363 = arith.addf %52, %362 : vector<8x256xf32>
    %364 = vector.extract_strided_slice %363 {offsets = [0, 0], sizes = [8, 64], strides = [1, 1]} : vector<8x256xf32> to vector<8x64xf32>
    %365 = arith.negf %364 : vector<8x64xf32>
    %366 = math.exp %365 : vector<8x64xf32>
    %cst_72 = arith.constant 1.000000e+00 : f32
    %367 = vector.broadcast %cst_72 : f32 to vector<8x64xf32>
    %368 = arith.addf %367, %366 : vector<8x64xf32>
    %369 = arith.divf %367, %368 : vector<8x64xf32>
    %370 = vector.extract_strided_slice %363 {offsets = [0, 64], sizes = [8, 64], strides = [1, 1]} : vector<8x256xf32> to vector<8x64xf32>
    %371 = arith.negf %370 : vector<8x64xf32>
    %372 = math.exp %371 : vector<8x64xf32>
    %cst_73 = arith.constant 1.000000e+00 : f32
    %373 = vector.broadcast %cst_73 : f32 to vector<8x64xf32>
    %374 = arith.addf %373, %372 : vector<8x64xf32>
    %375 = arith.divf %373, %374 : vector<8x64xf32>
    %376 = vector.extract_strided_slice %363 {offsets = [0, 128], sizes = [8, 64], strides = [1, 1]} : vector<8x256xf32> to vector<8x64xf32>
    %377 = math.tanh %376 : vector<8x64xf32>
    %378 = vector.extract_strided_slice %363 {offsets = [0, 192], sizes = [8, 64], strides = [1, 1]} : vector<8x256xf32> to vector<8x64xf32>
    %379 = arith.negf %378 : vector<8x64xf32>
    %380 = math.exp %379 : vector<8x64xf32>
    %cst_74 = arith.constant 1.000000e+00 : f32
    %381 = vector.broadcast %cst_74 : f32 to vector<8x64xf32>
    %382 = arith.addf %381, %380 : vector<8x64xf32>
    %383 = arith.divf %381, %382 : vector<8x64xf32>
    %384 = arith.mulf %375, %358 : vector<8x64xf32>
    %385 = arith.mulf %369, %377 : vector<8x64xf32>
    %386 = arith.addf %384, %385 : vector<8x64xf32>
    %387 = math.tanh %386 : vector<8x64xf32>
    %388 = arith.mulf %383, %387 : vector<8x64xf32>
    %c88 = arith.constant 88 : index
    %c0_75 = arith.constant 0 : index
    %389 = vector.load %arg14[%c88, %c0_75] : memref<192x64xf32, #tpu.memory_space<vmem>>, vector<8x64xf32>
    tpu.vector_store %arg14[%c88, %c0_75], %388 {strides = array<i32>} : memref<192x64xf32, #tpu.memory_space<vmem>>, vector<8x64xf32>,
    %cst_76 = arith.constant dense<0.000000e+00> : vector<8x256xf32>
    %390 = tpu.matmul %388, %53, %cst_76 {dimension_numbers = #tpu.dot_dimension_numbers<[1], [0], [0], [1], [0, 0, 1, 1], [], []>} : vector<8x64xf32>, vector<64x256xf32>, vector<8x256xf32> -> vector<8x256xf32>
    %391 = arith.addf %52, %390 : vector<8x256xf32>
    %392 = vector.extract_strided_slice %391 {offsets = [0, 0], sizes = [8, 64], strides = [1, 1]} : vector<8x256xf32> to vector<8x64xf32>
    %393 = arith.negf %392 : vector<8x64xf32>
    %394 = math.exp %393 : vector<8x64xf32>
    %cst_77 = arith.constant 1.000000e+00 : f32
    %395 = vector.broadcast %cst_77 : f32 to vector<8x64xf32>
    %396 = arith.addf %395, %394 : vector<8x64xf32>
    %397 = arith.divf %395, %396 : vector<8x64xf32>
    %398 = vector.extract_strided_slice %391 {offsets = [0, 64], sizes = [8, 64], strides = [1, 1]} : vector<8x256xf32> to vector<8x64xf32>
    %399 = arith.negf %398 : vector<8x64xf32>
    %400 = math.exp %399 : vector<8x64xf32>
    %cst_78 = arith.constant 1.000000e+00 : f32
    %401 = vector.broadcast %cst_78 : f32 to vector<8x64xf32>
    %402 = arith.addf %401, %400 : vector<8x64xf32>
    %403 = arith.divf %401, %402 : vector<8x64xf32>
    %404 = vector.extract_strided_slice %391 {offsets = [0, 128], sizes = [8, 64], strides = [1, 1]} : vector<8x256xf32> to vector<8x64xf32>
    %405 = math.tanh %404 : vector<8x64xf32>
    %406 = vector.extract_strided_slice %391 {offsets = [0, 192], sizes = [8, 64], strides = [1, 1]} : vector<8x256xf32> to vector<8x64xf32>
    %407 = arith.negf %406 : vector<8x64xf32>
    %408 = math.exp %407 : vector<8x64xf32>
    %cst_79 = arith.constant 1.000000e+00 : f32
    %409 = vector.broadcast %cst_79 : f32 to vector<8x64xf32>
    %410 = arith.addf %409, %408 : vector<8x64xf32>
    %411 = arith.divf %409, %410 : vector<8x64xf32>
    %412 = arith.mulf %403, %386 : vector<8x64xf32>
    %413 = arith.mulf %397, %405 : vector<8x64xf32>
    %414 = arith.addf %412, %413 : vector<8x64xf32>
    %415 = math.tanh %414 : vector<8x64xf32>
    %416 = arith.mulf %411, %415 : vector<8x64xf32>
    %c96 = arith.constant 96 : index
    %c0_80 = arith.constant 0 : index
    %417 = vector.load %arg14[%c96, %c0_80] : memref<192x64xf32, #tpu.memory_space<vmem>>, vector<8x64xf32>
    tpu.vector_store %arg14[%c96, %c0_80], %416 {strides = array<i32>} : memref<192x64xf32, #tpu.memory_space<vmem>>, vector<8x64xf32>,
    %cst_81 = arith.constant dense<0.000000e+00> : vector<8x256xf32>
    %418 = tpu.matmul %416, %53, %cst_81 {dimension_numbers = #tpu.dot_dimension_numbers<[1], [0], [0], [1], [0, 0, 1, 1], [], []>} : vector<8x64xf32>, vector<64x256xf32>, vector<8x256xf32> -> vector<8x256xf32>
    %419 = arith.addf %52, %418 : vector<8x256xf32>
    %420 = vector.extract_strided_slice %419 {offsets = [0, 0], sizes = [8, 64], strides = [1, 1]} : vector<8x256xf32> to vector<8x64xf32>
    %421 = arith.negf %420 : vector<8x64xf32>
    %422 = math.exp %421 : vector<8x64xf32>
    %cst_82 = arith.constant 1.000000e+00 : f32
    %423 = vector.broadcast %cst_82 : f32 to vector<8x64xf32>
    %424 = arith.addf %423, %422 : vector<8x64xf32>
    %425 = arith.divf %423, %424 : vector<8x64xf32>
    %426 = vector.extract_strided_slice %419 {offsets = [0, 64], sizes = [8, 64], strides = [1, 1]} : vector<8x256xf32> to vector<8x64xf32>
    %427 = arith.negf %426 : vector<8x64xf32>
    %428 = math.exp %427 : vector<8x64xf32>
    %cst_83 = arith.constant 1.000000e+00 : f32
    %429 = vector.broadcast %cst_83 : f32 to vector<8x64xf32>
    %430 = arith.addf %429, %428 : vector<8x64xf32>
    %431 = arith.divf %429, %430 : vector<8x64xf32>
    %432 = vector.extract_strided_slice %419 {offsets = [0, 128], sizes = [8, 64], strides = [1, 1]} : vector<8x256xf32> to vector<8x64xf32>
    %433 = math.tanh %432 : vector<8x64xf32>
    %434 = vector.extract_strided_slice %419 {offsets = [0, 192], sizes = [8, 64], strides = [1, 1]} : vector<8x256xf32> to vector<8x64xf32>
    %435 = arith.negf %434 : vector<8x64xf32>
    %436 = math.exp %435 : vector<8x64xf32>
    %cst_84 = arith.constant 1.000000e+00 : f32
    %437 = vector.broadcast %cst_84 : f32 to vector<8x64xf32>
    %438 = arith.addf %437, %436 : vector<8x64xf32>
    %439 = arith.divf %437, %438 : vector<8x64xf32>
    %440 = arith.mulf %431, %414 : vector<8x64xf32>
    %441 = arith.mulf %425, %433 : vector<8x64xf32>
    %442 = arith.addf %440, %441 : vector<8x64xf32>
    %443 = math.tanh %442 : vector<8x64xf32>
    %444 = arith.mulf %439, %443 : vector<8x64xf32>
    %c104 = arith.constant 104 : index
    %c0_85 = arith.constant 0 : index
    %445 = vector.load %arg14[%c104, %c0_85] : memref<192x64xf32, #tpu.memory_space<vmem>>, vector<8x64xf32>
    tpu.vector_store %arg14[%c104, %c0_85], %444 {strides = array<i32>} : memref<192x64xf32, #tpu.memory_space<vmem>>, vector<8x64xf32>,
    %cst_86 = arith.constant dense<0.000000e+00> : vector<8x256xf32>
    %446 = tpu.matmul %444, %53, %cst_86 {dimension_numbers = #tpu.dot_dimension_numbers<[1], [0], [0], [1], [0, 0, 1, 1], [], []>} : vector<8x64xf32>, vector<64x256xf32>, vector<8x256xf32> -> vector<8x256xf32>
    %447 = arith.addf %52, %446 : vector<8x256xf32>
    %448 = vector.extract_strided_slice %447 {offsets = [0, 0], sizes = [8, 64], strides = [1, 1]} : vector<8x256xf32> to vector<8x64xf32>
    %449 = arith.negf %448 : vector<8x64xf32>
    %450 = math.exp %449 : vector<8x64xf32>
    %cst_87 = arith.constant 1.000000e+00 : f32
    %451 = vector.broadcast %cst_87 : f32 to vector<8x64xf32>
    %452 = arith.addf %451, %450 : vector<8x64xf32>
    %453 = arith.divf %451, %452 : vector<8x64xf32>
    %454 = vector.extract_strided_slice %447 {offsets = [0, 64], sizes = [8, 64], strides = [1, 1]} : vector<8x256xf32> to vector<8x64xf32>
    %455 = arith.negf %454 : vector<8x64xf32>
    %456 = math.exp %455 : vector<8x64xf32>
    %cst_88 = arith.constant 1.000000e+00 : f32
    %457 = vector.broadcast %cst_88 : f32 to vector<8x64xf32>
    %458 = arith.addf %457, %456 : vector<8x64xf32>
    %459 = arith.divf %457, %458 : vector<8x64xf32>
    %460 = vector.extract_strided_slice %447 {offsets = [0, 128], sizes = [8, 64], strides = [1, 1]} : vector<8x256xf32> to vector<8x64xf32>
    %461 = math.tanh %460 : vector<8x64xf32>
    %462 = vector.extract_strided_slice %447 {offsets = [0, 192], sizes = [8, 64], strides = [1, 1]} : vector<8x256xf32> to vector<8x64xf32>
    %463 = arith.negf %462 : vector<8x64xf32>
    %464 = math.exp %463 : vector<8x64xf32>
    %cst_89 = arith.constant 1.000000e+00 : f32
    %465 = vector.broadcast %cst_89 : f32 to vector<8x64xf32>
    %466 = arith.addf %465, %464 : vector<8x64xf32>
    %467 = arith.divf %465, %466 : vector<8x64xf32>
    %468 = arith.mulf %459, %442 : vector<8x64xf32>
    %469 = arith.mulf %453, %461 : vector<8x64xf32>
    %470 = arith.addf %468, %469 : vector<8x64xf32>
    %471 = math.tanh %470 : vector<8x64xf32>
    %472 = arith.mulf %467, %471 : vector<8x64xf32>
    %c112 = arith.constant 112 : index
    %c0_90 = arith.constant 0 : index
    %473 = vector.load %arg14[%c112, %c0_90] : memref<192x64xf32, #tpu.memory_space<vmem>>, vector<8x64xf32>
    tpu.vector_store %arg14[%c112, %c0_90], %472 {strides = array<i32>} : memref<192x64xf32, #tpu.memory_space<vmem>>, vector<8x64xf32>,
    %cst_91 = arith.constant dense<0.000000e+00> : vector<8x256xf32>
    %474 = tpu.matmul %472, %53, %cst_91 {dimension_numbers = #tpu.dot_dimension_numbers<[1], [0], [0], [1], [0, 0, 1, 1], [], []>} : vector<8x64xf32>, vector<64x256xf32>, vector<8x256xf32> -> vector<8x256xf32>
    %475 = arith.addf %52, %474 : vector<8x256xf32>
    %476 = vector.extract_strided_slice %475 {offsets = [0, 0], sizes = [8, 64], strides = [1, 1]} : vector<8x256xf32> to vector<8x64xf32>
    %477 = arith.negf %476 : vector<8x64xf32>
    %478 = math.exp %477 : vector<8x64xf32>
    %cst_92 = arith.constant 1.000000e+00 : f32
    %479 = vector.broadcast %cst_92 : f32 to vector<8x64xf32>
    %480 = arith.addf %479, %478 : vector<8x64xf32>
    %481 = arith.divf %479, %480 : vector<8x64xf32>
    %482 = vector.extract_strided_slice %475 {offsets = [0, 64], sizes = [8, 64], strides = [1, 1]} : vector<8x256xf32> to vector<8x64xf32>
    %483 = arith.negf %482 : vector<8x64xf32>
    %484 = math.exp %483 : vector<8x64xf32>
    %cst_93 = arith.constant 1.000000e+00 : f32
    %485 = vector.broadcast %cst_93 : f32 to vector<8x64xf32>
    %486 = arith.addf %485, %484 : vector<8x64xf32>
    %487 = arith.divf %485, %486 : vector<8x64xf32>
    %488 = vector.extract_strided_slice %475 {offsets = [0, 128], sizes = [8, 64], strides = [1, 1]} : vector<8x256xf32> to vector<8x64xf32>
    %489 = math.tanh %488 : vector<8x64xf32>
    %490 = vector.extract_strided_slice %475 {offsets = [0, 192], sizes = [8, 64], strides = [1, 1]} : vector<8x256xf32> to vector<8x64xf32>
    %491 = arith.negf %490 : vector<8x64xf32>
    %492 = math.exp %491 : vector<8x64xf32>
    %cst_94 = arith.constant 1.000000e+00 : f32
    %493 = vector.broadcast %cst_94 : f32 to vector<8x64xf32>
    %494 = arith.addf %493, %492 : vector<8x64xf32>
    %495 = arith.divf %493, %494 : vector<8x64xf32>
    %496 = arith.mulf %487, %470 : vector<8x64xf32>
    %497 = arith.mulf %481, %489 : vector<8x64xf32>
    %498 = arith.addf %496, %497 : vector<8x64xf32>
    %499 = math.tanh %498 : vector<8x64xf32>
    %500 = arith.mulf %495, %499 : vector<8x64xf32>
    %c120 = arith.constant 120 : index
    %c0_95 = arith.constant 0 : index
    %501 = vector.load %arg14[%c120, %c0_95] : memref<192x64xf32, #tpu.memory_space<vmem>>, vector<8x64xf32>
    tpu.vector_store %arg14[%c120, %c0_95], %500 {strides = array<i32>} : memref<192x64xf32, #tpu.memory_space<vmem>>, vector<8x64xf32>,
    %cst_96 = arith.constant dense<0.000000e+00> : vector<8x256xf32>
    %502 = tpu.matmul %500, %53, %cst_96 {dimension_numbers = #tpu.dot_dimension_numbers<[1], [0], [0], [1], [0, 0, 1, 1], [], []>} : vector<8x64xf32>, vector<64x256xf32>, vector<8x256xf32> -> vector<8x256xf32>
    %503 = arith.addf %52, %502 : vector<8x256xf32>
    %504 = vector.extract_strided_slice %503 {offsets = [0, 0], sizes = [8, 64], strides = [1, 1]} : vector<8x256xf32> to vector<8x64xf32>
    %505 = arith.negf %504 : vector<8x64xf32>
    %506 = math.exp %505 : vector<8x64xf32>
    %cst_97 = arith.constant 1.000000e+00 : f32
    %507 = vector.broadcast %cst_97 : f32 to vector<8x64xf32>
    %508 = arith.addf %507, %506 : vector<8x64xf32>
    %509 = arith.divf %507, %508 : vector<8x64xf32>
    %510 = vector.extract_strided_slice %503 {offsets = [0, 64], sizes = [8, 64], strides = [1, 1]} : vector<8x256xf32> to vector<8x64xf32>
    %511 = arith.negf %510 : vector<8x64xf32>
    %512 = math.exp %511 : vector<8x64xf32>
    %cst_98 = arith.constant 1.000000e+00 : f32
    %513 = vector.broadcast %cst_98 : f32 to vector<8x64xf32>
    %514 = arith.addf %513, %512 : vector<8x64xf32>
    %515 = arith.divf %513, %514 : vector<8x64xf32>
    %516 = vector.extract_strided_slice %503 {offsets = [0, 128], sizes = [8, 64], strides = [1, 1]} : vector<8x256xf32> to vector<8x64xf32>
    %517 = math.tanh %516 : vector<8x64xf32>
    %518 = vector.extract_strided_slice %503 {offsets = [0, 192], sizes = [8, 64], strides = [1, 1]} : vector<8x256xf32> to vector<8x64xf32>
    %519 = arith.negf %518 : vector<8x64xf32>
    %520 = math.exp %519 : vector<8x64xf32>
    %cst_99 = arith.constant 1.000000e+00 : f32
    %521 = vector.broadcast %cst_99 : f32 to vector<8x64xf32>
    %522 = arith.addf %521, %520 : vector<8x64xf32>
    %523 = arith.divf %521, %522 : vector<8x64xf32>
    %524 = arith.mulf %515, %498 : vector<8x64xf32>
    %525 = arith.mulf %509, %517 : vector<8x64xf32>
    %526 = arith.addf %524, %525 : vector<8x64xf32>
    %527 = math.tanh %526 : vector<8x64xf32>
    %528 = arith.mulf %523, %527 : vector<8x64xf32>
    %c128 = arith.constant 128 : index
    %c0_100 = arith.constant 0 : index
    %529 = vector.load %arg14[%c128, %c0_100] : memref<192x64xf32, #tpu.memory_space<vmem>>, vector<8x64xf32>
    tpu.vector_store %arg14[%c128, %c0_100], %528 {strides = array<i32>} : memref<192x64xf32, #tpu.memory_space<vmem>>, vector<8x64xf32>,
    %cst_101 = arith.constant dense<0.000000e+00> : vector<8x256xf32>
    %530 = tpu.matmul %528, %53, %cst_101 {dimension_numbers = #tpu.dot_dimension_numbers<[1], [0], [0], [1], [0, 0, 1, 1], [], []>} : vector<8x64xf32>, vector<64x256xf32>, vector<8x256xf32> -> vector<8x256xf32>
    %531 = arith.addf %52, %530 : vector<8x256xf32>
    %532 = vector.extract_strided_slice %531 {offsets = [0, 0], sizes = [8, 64], strides = [1, 1]} : vector<8x256xf32> to vector<8x64xf32>
    %533 = arith.negf %532 : vector<8x64xf32>
    %534 = math.exp %533 : vector<8x64xf32>
    %cst_102 = arith.constant 1.000000e+00 : f32
    %535 = vector.broadcast %cst_102 : f32 to vector<8x64xf32>
    %536 = arith.addf %535, %534 : vector<8x64xf32>
    %537 = arith.divf %535, %536 : vector<8x64xf32>
    %538 = vector.extract_strided_slice %531 {offsets = [0, 64], sizes = [8, 64], strides = [1, 1]} : vector<8x256xf32> to vector<8x64xf32>
    %539 = arith.negf %538 : vector<8x64xf32>
    %540 = math.exp %539 : vector<8x64xf32>
    %cst_103 = arith.constant 1.000000e+00 : f32
    %541 = vector.broadcast %cst_103 : f32 to vector<8x64xf32>
    %542 = arith.addf %541, %540 : vector<8x64xf32>
    %543 = arith.divf %541, %542 : vector<8x64xf32>
    %544 = vector.extract_strided_slice %531 {offsets = [0, 128], sizes = [8, 64], strides = [1, 1]} : vector<8x256xf32> to vector<8x64xf32>
    %545 = math.tanh %544 : vector<8x64xf32>
    %546 = vector.extract_strided_slice %531 {offsets = [0, 192], sizes = [8, 64], strides = [1, 1]} : vector<8x256xf32> to vector<8x64xf32>
    %547 = arith.negf %546 : vector<8x64xf32>
    %548 = math.exp %547 : vector<8x64xf32>
    %cst_104 = arith.constant 1.000000e+00 : f32
    %549 = vector.broadcast %cst_104 : f32 to vector<8x64xf32>
    %550 = arith.addf %549, %548 : vector<8x64xf32>
    %551 = arith.divf %549, %550 : vector<8x64xf32>
    %552 = arith.mulf %543, %526 : vector<8x64xf32>
    %553 = arith.mulf %537, %545 : vector<8x64xf32>
    %554 = arith.addf %552, %553 : vector<8x64xf32>
    %555 = math.tanh %554 : vector<8x64xf32>
    %556 = arith.mulf %551, %555 : vector<8x64xf32>
    %c136 = arith.constant 136 : index
    %c0_105 = arith.constant 0 : index
    %557 = vector.load %arg14[%c136, %c0_105] : memref<192x64xf32, #tpu.memory_space<vmem>>, vector<8x64xf32>
    tpu.vector_store %arg14[%c136, %c0_105], %556 {strides = array<i32>} : memref<192x64xf32, #tpu.memory_space<vmem>>, vector<8x64xf32>,
    %cst_106 = arith.constant dense<0.000000e+00> : vector<8x256xf32>
    %558 = tpu.matmul %556, %53, %cst_106 {dimension_numbers = #tpu.dot_dimension_numbers<[1], [0], [0], [1], [0, 0, 1, 1], [], []>} : vector<8x64xf32>, vector<64x256xf32>, vector<8x256xf32> -> vector<8x256xf32>
    %559 = arith.addf %52, %558 : vector<8x256xf32>
    %560 = vector.extract_strided_slice %559 {offsets = [0, 0], sizes = [8, 64], strides = [1, 1]} : vector<8x256xf32> to vector<8x64xf32>
    %561 = arith.negf %560 : vector<8x64xf32>
    %562 = math.exp %561 : vector<8x64xf32>
    %cst_107 = arith.constant 1.000000e+00 : f32
    %563 = vector.broadcast %cst_107 : f32 to vector<8x64xf32>
    %564 = arith.addf %563, %562 : vector<8x64xf32>
    %565 = arith.divf %563, %564 : vector<8x64xf32>
    %566 = vector.extract_strided_slice %559 {offsets = [0, 64], sizes = [8, 64], strides = [1, 1]} : vector<8x256xf32> to vector<8x64xf32>
    %567 = arith.negf %566 : vector<8x64xf32>
    %568 = math.exp %567 : vector<8x64xf32>
    %cst_108 = arith.constant 1.000000e+00 : f32
    %569 = vector.broadcast %cst_108 : f32 to vector<8x64xf32>
    %570 = arith.addf %569, %568 : vector<8x64xf32>
    %571 = arith.divf %569, %570 : vector<8x64xf32>
    %572 = vector.extract_strided_slice %559 {offsets = [0, 128], sizes = [8, 64], strides = [1, 1]} : vector<8x256xf32> to vector<8x64xf32>
    %573 = math.tanh %572 : vector<8x64xf32>
    %574 = vector.extract_strided_slice %559 {offsets = [0, 192], sizes = [8, 64], strides = [1, 1]} : vector<8x256xf32> to vector<8x64xf32>
    %575 = arith.negf %574 : vector<8x64xf32>
    %576 = math.exp %575 : vector<8x64xf32>
    %cst_109 = arith.constant 1.000000e+00 : f32
    %577 = vector.broadcast %cst_109 : f32 to vector<8x64xf32>
    %578 = arith.addf %577, %576 : vector<8x64xf32>
    %579 = arith.divf %577, %578 : vector<8x64xf32>
    %580 = arith.mulf %571, %554 : vector<8x64xf32>
    %581 = arith.mulf %565, %573 : vector<8x64xf32>
    %582 = arith.addf %580, %581 : vector<8x64xf32>
    %583 = math.tanh %582 : vector<8x64xf32>
    %584 = arith.mulf %579, %583 : vector<8x64xf32>
    %c144 = arith.constant 144 : index
    %c0_110 = arith.constant 0 : index
    %585 = vector.load %arg14[%c144, %c0_110] : memref<192x64xf32, #tpu.memory_space<vmem>>, vector<8x64xf32>
    tpu.vector_store %arg14[%c144, %c0_110], %584 {strides = array<i32>} : memref<192x64xf32, #tpu.memory_space<vmem>>, vector<8x64xf32>,
    %cst_111 = arith.constant dense<0.000000e+00> : vector<8x256xf32>
    %586 = tpu.matmul %584, %53, %cst_111 {dimension_numbers = #tpu.dot_dimension_numbers<[1], [0], [0], [1], [0, 0, 1, 1], [], []>} : vector<8x64xf32>, vector<64x256xf32>, vector<8x256xf32> -> vector<8x256xf32>
    %587 = arith.addf %52, %586 : vector<8x256xf32>
    %588 = vector.extract_strided_slice %587 {offsets = [0, 0], sizes = [8, 64], strides = [1, 1]} : vector<8x256xf32> to vector<8x64xf32>
    %589 = arith.negf %588 : vector<8x64xf32>
    %590 = math.exp %589 : vector<8x64xf32>
    %cst_112 = arith.constant 1.000000e+00 : f32
    %591 = vector.broadcast %cst_112 : f32 to vector<8x64xf32>
    %592 = arith.addf %591, %590 : vector<8x64xf32>
    %593 = arith.divf %591, %592 : vector<8x64xf32>
    %594 = vector.extract_strided_slice %587 {offsets = [0, 64], sizes = [8, 64], strides = [1, 1]} : vector<8x256xf32> to vector<8x64xf32>
    %595 = arith.negf %594 : vector<8x64xf32>
    %596 = math.exp %595 : vector<8x64xf32>
    %cst_113 = arith.constant 1.000000e+00 : f32
    %597 = vector.broadcast %cst_113 : f32 to vector<8x64xf32>
    %598 = arith.addf %597, %596 : vector<8x64xf32>
    %599 = arith.divf %597, %598 : vector<8x64xf32>
    %600 = vector.extract_strided_slice %587 {offsets = [0, 128], sizes = [8, 64], strides = [1, 1]} : vector<8x256xf32> to vector<8x64xf32>
    %601 = math.tanh %600 : vector<8x64xf32>
    %602 = vector.extract_strided_slice %587 {offsets = [0, 192], sizes = [8, 64], strides = [1, 1]} : vector<8x256xf32> to vector<8x64xf32>
    %603 = arith.negf %602 : vector<8x64xf32>
    %604 = math.exp %603 : vector<8x64xf32>
    %cst_114 = arith.constant 1.000000e+00 : f32
    %605 = vector.broadcast %cst_114 : f32 to vector<8x64xf32>
    %606 = arith.addf %605, %604 : vector<8x64xf32>
    %607 = arith.divf %605, %606 : vector<8x64xf32>
    %608 = arith.mulf %599, %582 : vector<8x64xf32>
    %609 = arith.mulf %593, %601 : vector<8x64xf32>
    %610 = arith.addf %608, %609 : vector<8x64xf32>
    %611 = math.tanh %610 : vector<8x64xf32>
    %612 = arith.mulf %607, %611 : vector<8x64xf32>
    %c152 = arith.constant 152 : index
    %c0_115 = arith.constant 0 : index
    %613 = vector.load %arg14[%c152, %c0_115] : memref<192x64xf32, #tpu.memory_space<vmem>>, vector<8x64xf32>
    tpu.vector_store %arg14[%c152, %c0_115], %612 {strides = array<i32>} : memref<192x64xf32, #tpu.memory_space<vmem>>, vector<8x64xf32>,
    %cst_116 = arith.constant dense<0.000000e+00> : vector<8x256xf32>
    %614 = tpu.matmul %612, %53, %cst_116 {dimension_numbers = #tpu.dot_dimension_numbers<[1], [0], [0], [1], [0, 0, 1, 1], [], []>} : vector<8x64xf32>, vector<64x256xf32>, vector<8x256xf32> -> vector<8x256xf32>
    %615 = arith.addf %52, %614 : vector<8x256xf32>
    %616 = vector.extract_strided_slice %615 {offsets = [0, 0], sizes = [8, 64], strides = [1, 1]} : vector<8x256xf32> to vector<8x64xf32>
    %617 = arith.negf %616 : vector<8x64xf32>
    %618 = math.exp %617 : vector<8x64xf32>
    %cst_117 = arith.constant 1.000000e+00 : f32
    %619 = vector.broadcast %cst_117 : f32 to vector<8x64xf32>
    %620 = arith.addf %619, %618 : vector<8x64xf32>
    %621 = arith.divf %619, %620 : vector<8x64xf32>
    %622 = vector.extract_strided_slice %615 {offsets = [0, 64], sizes = [8, 64], strides = [1, 1]} : vector<8x256xf32> to vector<8x64xf32>
    %623 = arith.negf %622 : vector<8x64xf32>
    %624 = math.exp %623 : vector<8x64xf32>
    %cst_118 = arith.constant 1.000000e+00 : f32
    %625 = vector.broadcast %cst_118 : f32 to vector<8x64xf32>
    %626 = arith.addf %625, %624 : vector<8x64xf32>
    %627 = arith.divf %625, %626 : vector<8x64xf32>
    %628 = vector.extract_strided_slice %615 {offsets = [0, 128], sizes = [8, 64], strides = [1, 1]} : vector<8x256xf32> to vector<8x64xf32>
    %629 = math.tanh %628 : vector<8x64xf32>
    %630 = vector.extract_strided_slice %615 {offsets = [0, 192], sizes = [8, 64], strides = [1, 1]} : vector<8x256xf32> to vector<8x64xf32>
    %631 = arith.negf %630 : vector<8x64xf32>
    %632 = math.exp %631 : vector<8x64xf32>
    %cst_119 = arith.constant 1.000000e+00 : f32
    %633 = vector.broadcast %cst_119 : f32 to vector<8x64xf32>
    %634 = arith.addf %633, %632 : vector<8x64xf32>
    %635 = arith.divf %633, %634 : vector<8x64xf32>
    %636 = arith.mulf %627, %610 : vector<8x64xf32>
    %637 = arith.mulf %621, %629 : vector<8x64xf32>
    %638 = arith.addf %636, %637 : vector<8x64xf32>
    %639 = math.tanh %638 : vector<8x64xf32>
    %640 = arith.mulf %635, %639 : vector<8x64xf32>
    %c160 = arith.constant 160 : index
    %c0_120 = arith.constant 0 : index
    %641 = vector.load %arg14[%c160, %c0_120] : memref<192x64xf32, #tpu.memory_space<vmem>>, vector<8x64xf32>
    tpu.vector_store %arg14[%c160, %c0_120], %640 {strides = array<i32>} : memref<192x64xf32, #tpu.memory_space<vmem>>, vector<8x64xf32>,
    %cst_121 = arith.constant dense<0.000000e+00> : vector<8x256xf32>
    %642 = tpu.matmul %640, %53, %cst_121 {dimension_numbers = #tpu.dot_dimension_numbers<[1], [0], [0], [1], [0, 0, 1, 1], [], []>} : vector<8x64xf32>, vector<64x256xf32>, vector<8x256xf32> -> vector<8x256xf32>
    %643 = arith.addf %52, %642 : vector<8x256xf32>
    %644 = vector.extract_strided_slice %643 {offsets = [0, 0], sizes = [8, 64], strides = [1, 1]} : vector<8x256xf32> to vector<8x64xf32>
    %645 = arith.negf %644 : vector<8x64xf32>
    %646 = math.exp %645 : vector<8x64xf32>
    %cst_122 = arith.constant 1.000000e+00 : f32
    %647 = vector.broadcast %cst_122 : f32 to vector<8x64xf32>
    %648 = arith.addf %647, %646 : vector<8x64xf32>
    %649 = arith.divf %647, %648 : vector<8x64xf32>
    %650 = vector.extract_strided_slice %643 {offsets = [0, 64], sizes = [8, 64], strides = [1, 1]} : vector<8x256xf32> to vector<8x64xf32>
    %651 = arith.negf %650 : vector<8x64xf32>
    %652 = math.exp %651 : vector<8x64xf32>
    %cst_123 = arith.constant 1.000000e+00 : f32
    %653 = vector.broadcast %cst_123 : f32 to vector<8x64xf32>
    %654 = arith.addf %653, %652 : vector<8x64xf32>
    %655 = arith.divf %653, %654 : vector<8x64xf32>
    %656 = vector.extract_strided_slice %643 {offsets = [0, 128], sizes = [8, 64], strides = [1, 1]} : vector<8x256xf32> to vector<8x64xf32>
    %657 = math.tanh %656 : vector<8x64xf32>
    %658 = vector.extract_strided_slice %643 {offsets = [0, 192], sizes = [8, 64], strides = [1, 1]} : vector<8x256xf32> to vector<8x64xf32>
    %659 = arith.negf %658 : vector<8x64xf32>
    %660 = math.exp %659 : vector<8x64xf32>
    %cst_124 = arith.constant 1.000000e+00 : f32
    %661 = vector.broadcast %cst_124 : f32 to vector<8x64xf32>
    %662 = arith.addf %661, %660 : vector<8x64xf32>
    %663 = arith.divf %661, %662 : vector<8x64xf32>
    %664 = arith.mulf %655, %638 : vector<8x64xf32>
    %665 = arith.mulf %649, %657 : vector<8x64xf32>
    %666 = arith.addf %664, %665 : vector<8x64xf32>
    %667 = math.tanh %666 : vector<8x64xf32>
    %668 = arith.mulf %663, %667 : vector<8x64xf32>
    %c168 = arith.constant 168 : index
    %c0_125 = arith.constant 0 : index
    %669 = vector.load %arg14[%c168, %c0_125] : memref<192x64xf32, #tpu.memory_space<vmem>>, vector<8x64xf32>
    tpu.vector_store %arg14[%c168, %c0_125], %668 {strides = array<i32>} : memref<192x64xf32, #tpu.memory_space<vmem>>, vector<8x64xf32>,
    %cst_126 = arith.constant dense<0.000000e+00> : vector<8x256xf32>
    %670 = tpu.matmul %668, %53, %cst_126 {dimension_numbers = #tpu.dot_dimension_numbers<[1], [0], [0], [1], [0, 0, 1, 1], [], []>} : vector<8x64xf32>, vector<64x256xf32>, vector<8x256xf32> -> vector<8x256xf32>
    %671 = arith.addf %52, %670 : vector<8x256xf32>
    %672 = vector.extract_strided_slice %671 {offsets = [0, 0], sizes = [8, 64], strides = [1, 1]} : vector<8x256xf32> to vector<8x64xf32>
    %673 = arith.negf %672 : vector<8x64xf32>
    %674 = math.exp %673 : vector<8x64xf32>
    %cst_127 = arith.constant 1.000000e+00 : f32
    %675 = vector.broadcast %cst_127 : f32 to vector<8x64xf32>
    %676 = arith.addf %675, %674 : vector<8x64xf32>
    %677 = arith.divf %675, %676 : vector<8x64xf32>
    %678 = vector.extract_strided_slice %671 {offsets = [0, 64], sizes = [8, 64], strides = [1, 1]} : vector<8x256xf32> to vector<8x64xf32>
    %679 = arith.negf %678 : vector<8x64xf32>
    %680 = math.exp %679 : vector<8x64xf32>
    %cst_128 = arith.constant 1.000000e+00 : f32
    %681 = vector.broadcast %cst_128 : f32 to vector<8x64xf32>
    %682 = arith.addf %681, %680 : vector<8x64xf32>
    %683 = arith.divf %681, %682 : vector<8x64xf32>
    %684 = vector.extract_strided_slice %671 {offsets = [0, 128], sizes = [8, 64], strides = [1, 1]} : vector<8x256xf32> to vector<8x64xf32>
    %685 = math.tanh %684 : vector<8x64xf32>
    %686 = vector.extract_strided_slice %671 {offsets = [0, 192], sizes = [8, 64], strides = [1, 1]} : vector<8x256xf32> to vector<8x64xf32>
    %687 = arith.negf %686 : vector<8x64xf32>
    %688 = math.exp %687 : vector<8x64xf32>
    %cst_129 = arith.constant 1.000000e+00 : f32
    %689 = vector.broadcast %cst_129 : f32 to vector<8x64xf32>
    %690 = arith.addf %689, %688 : vector<8x64xf32>
    %691 = arith.divf %689, %690 : vector<8x64xf32>
    %692 = arith.mulf %683, %666 : vector<8x64xf32>
    %693 = arith.mulf %677, %685 : vector<8x64xf32>
    %694 = arith.addf %692, %693 : vector<8x64xf32>
    %695 = math.tanh %694 : vector<8x64xf32>
    %696 = arith.mulf %691, %695 : vector<8x64xf32>
    %c176 = arith.constant 176 : index
    %c0_130 = arith.constant 0 : index
    %697 = vector.load %arg14[%c176, %c0_130] : memref<192x64xf32, #tpu.memory_space<vmem>>, vector<8x64xf32>
    tpu.vector_store %arg14[%c176, %c0_130], %696 {strides = array<i32>} : memref<192x64xf32, #tpu.memory_space<vmem>>, vector<8x64xf32>,
    %cst_131 = arith.constant dense<0.000000e+00> : vector<8x256xf32>
    %698 = tpu.matmul %696, %53, %cst_131 {dimension_numbers = #tpu.dot_dimension_numbers<[1], [0], [0], [1], [0, 0, 1, 1], [], []>} : vector<8x64xf32>, vector<64x256xf32>, vector<8x256xf32> -> vector<8x256xf32>
    %699 = arith.addf %52, %698 : vector<8x256xf32>
    %700 = vector.extract_strided_slice %699 {offsets = [0, 0], sizes = [8, 64], strides = [1, 1]} : vector<8x256xf32> to vector<8x64xf32>
    %701 = arith.negf %700 : vector<8x64xf32>
    %702 = math.exp %701 : vector<8x64xf32>
    %cst_132 = arith.constant 1.000000e+00 : f32
    %703 = vector.broadcast %cst_132 : f32 to vector<8x64xf32>
    %704 = arith.addf %703, %702 : vector<8x64xf32>
    %705 = arith.divf %703, %704 : vector<8x64xf32>
    %706 = vector.extract_strided_slice %699 {offsets = [0, 64], sizes = [8, 64], strides = [1, 1]} : vector<8x256xf32> to vector<8x64xf32>
    %707 = arith.negf %706 : vector<8x64xf32>
    %708 = math.exp %707 : vector<8x64xf32>
    %cst_133 = arith.constant 1.000000e+00 : f32
    %709 = vector.broadcast %cst_133 : f32 to vector<8x64xf32>
    %710 = arith.addf %709, %708 : vector<8x64xf32>
    %711 = arith.divf %709, %710 : vector<8x64xf32>
    %712 = vector.extract_strided_slice %699 {offsets = [0, 128], sizes = [8, 64], strides = [1, 1]} : vector<8x256xf32> to vector<8x64xf32>
    %713 = math.tanh %712 : vector<8x64xf32>
    %714 = vector.extract_strided_slice %699 {offsets = [0, 192], sizes = [8, 64], strides = [1, 1]} : vector<8x256xf32> to vector<8x64xf32>
    %715 = arith.negf %714 : vector<8x64xf32>
    %716 = math.exp %715 : vector<8x64xf32>
    %cst_134 = arith.constant 1.000000e+00 : f32
    %717 = vector.broadcast %cst_134 : f32 to vector<8x64xf32>
    %718 = arith.addf %717, %716 : vector<8x64xf32>
    %719 = arith.divf %717, %718 : vector<8x64xf32>
    %720 = arith.mulf %711, %694 : vector<8x64xf32>
    %721 = arith.mulf %705, %713 : vector<8x64xf32>
    %722 = arith.addf %720, %721 : vector<8x64xf32>
    %723 = math.tanh %722 : vector<8x64xf32>
    %724 = arith.mulf %719, %723 : vector<8x64xf32>
    %c184 = arith.constant 184 : index
    %c0_135 = arith.constant 0 : index
    %725 = vector.load %arg14[%c184, %c0_135] : memref<192x64xf32, #tpu.memory_space<vmem>>, vector<8x64xf32>
    tpu.vector_store %arg14[%c184, %c0_135], %724 {strides = array<i32>} : memref<192x64xf32, #tpu.memory_space<vmem>>, vector<8x64xf32>,
    %c0_136 = arith.constant 0 : index
    %c0_137 = arith.constant 0 : index
    %726 = vector.load %arg14[%c0_136, %c0_137] : memref<192x64xf32, #tpu.memory_space<vmem>>, vector<192x64xf32>
    %c0_138 = arith.constant 0 : index
    %c0_139 = arith.constant 0 : index
    %727 = vector.load %arg7[%c0_138, %c0_139] : memref<64x256xf32, #tpu.memory_space<vmem>>, vector<64x256xf32>
    %cst_140 = arith.constant dense<0.000000e+00> : vector<192x256xf32>
    %728 = tpu.matmul %726, %727, %cst_140 {dimension_numbers = #tpu.dot_dimension_numbers<[1], [0], [0], [1], [0, 0, 1, 1], [], []>} : vector<192x64xf32>, vector<64x256xf32>, vector<192x256xf32> -> vector<192x256xf32>
    %c0_141 = arith.constant 0 : index
    %c0_142 = arith.constant 0 : index
    %729 = vector.load %arg9[%c0_141, %c0_142] : memref<1x256xf32, #tpu.memory_space<vmem>>, vector<1x256xf32>
    %730 = vector.broadcast %729 : vector<1x256xf32> to vector<192x256xf32>
    %731 = arith.addf %728, %730 : vector<192x256xf32>
    %c0_143 = arith.constant 0 : index
    %c0_144 = arith.constant 0 : index
    %732 = vector.load %arg15[%c0_143, %c0_144] : memref<192x256xf32, #tpu.memory_space<vmem>>, vector<192x256xf32>
    tpu.vector_store %arg15[%c0_143, %c0_144], %731 {strides = array<i32>} : memref<192x256xf32, #tpu.memory_space<vmem>>, vector<192x256xf32>,
    %c0_145 = arith.constant 0 : index
    %c0_146 = arith.constant 0 : index
    %733 = vector.load %arg8[%c0_145, %c0_146] : memref<64x256xf32, #tpu.memory_space<vmem>>, vector<64x256xf32>
    %cst_147 = arith.constant dense<0.000000e+00> : vector<192x256xf32>
    %734 = tpu.matmul %726, %733, %cst_147 {dimension_numbers = #tpu.dot_dimension_numbers<[1], [0], [0], [1], [0, 0, 1, 1], [], []>} : vector<192x64xf32>, vector<64x256xf32>, vector<192x256xf32> -> vector<192x256xf32>
    %c0_148 = arith.constant 0 : index
    %c0_149 = arith.constant 0 : index
    %735 = vector.load %arg16[%c0_148, %c0_149] : memref<192x256xf32, #tpu.memory_space<vmem>>, vector<192x256xf32>
    tpu.vector_store %arg16[%c0_148, %c0_149], %734 {strides = array<i32>} : memref<192x256xf32, #tpu.memory_space<vmem>>, vector<192x256xf32>,
    %c0_150 = arith.constant 0 : index
    %c0_151 = arith.constant 0 : index
    %736 = vector.load %arg10[%c0_150, %c0_151] : memref<64x256xf32, #tpu.memory_space<vmem>>, vector<64x256xf32>
    %c0_152 = arith.constant 0 : index
    %c0_153 = arith.constant 0 : index
    %737 = vector.load %arg15[%c0_152, %c0_153] : memref<192x256xf32, #tpu.memory_space<vmem>>, vector<8x256xf32>
    %c184_154 = arith.constant 184 : index
    %c0_155 = arith.constant 0 : index
    %738 = vector.load %arg16[%c184_154, %c0_155] : memref<192x256xf32, #tpu.memory_space<vmem>>, vector<8x256xf32>
    %739 = arith.addf %737, %738 : vector<8x256xf32>
    %cst_156 = arith.constant dense<0.000000e+00> : vector<8x256xf32>
    %740 = tpu.matmul %47, %736, %cst_156 {dimension_numbers = #tpu.dot_dimension_numbers<[1], [0], [0], [1], [0, 0, 1, 1], [], []>} : vector<8x64xf32>, vector<64x256xf32>, vector<8x256xf32> -> vector<8x256xf32>
    %741 = arith.addf %739, %740 : vector<8x256xf32>
    %742 = vector.extract_strided_slice %741 {offsets = [0, 0], sizes = [8, 64], strides = [1, 1]} : vector<8x256xf32> to vector<8x64xf32>
    %743 = arith.negf %742 : vector<8x64xf32>
    %744 = math.exp %743 : vector<8x64xf32>
    %cst_157 = arith.constant 1.000000e+00 : f32
    %745 = vector.broadcast %cst_157 : f32 to vector<8x64xf32>
    %746 = arith.addf %745, %744 : vector<8x64xf32>
    %747 = arith.divf %745, %746 : vector<8x64xf32>
    %748 = vector.extract_strided_slice %741 {offsets = [0, 64], sizes = [8, 64], strides = [1, 1]} : vector<8x256xf32> to vector<8x64xf32>
    %749 = arith.negf %748 : vector<8x64xf32>
    %750 = math.exp %749 : vector<8x64xf32>
    %cst_158 = arith.constant 1.000000e+00 : f32
    %751 = vector.broadcast %cst_158 : f32 to vector<8x64xf32>
    %752 = arith.addf %751, %750 : vector<8x64xf32>
    %753 = arith.divf %751, %752 : vector<8x64xf32>
    %754 = vector.extract_strided_slice %741 {offsets = [0, 128], sizes = [8, 64], strides = [1, 1]} : vector<8x256xf32> to vector<8x64xf32>
    %755 = math.tanh %754 : vector<8x64xf32>
    %756 = vector.extract_strided_slice %741 {offsets = [0, 192], sizes = [8, 64], strides = [1, 1]} : vector<8x256xf32> to vector<8x64xf32>
    %757 = arith.negf %756 : vector<8x64xf32>
    %758 = math.exp %757 : vector<8x64xf32>
    %cst_159 = arith.constant 1.000000e+00 : f32
    %759 = vector.broadcast %cst_159 : f32 to vector<8x64xf32>
    %760 = arith.addf %759, %758 : vector<8x64xf32>
    %761 = arith.divf %759, %760 : vector<8x64xf32>
    %762 = arith.mulf %753, %47 : vector<8x64xf32>
    %763 = arith.mulf %747, %755 : vector<8x64xf32>
    %764 = arith.addf %762, %763 : vector<8x64xf32>
    %765 = math.tanh %764 : vector<8x64xf32>
    %766 = arith.mulf %761, %765 : vector<8x64xf32>
    %c8_160 = arith.constant 8 : index
    %c0_161 = arith.constant 0 : index
    %767 = vector.load %arg15[%c8_160, %c0_161] : memref<192x256xf32, #tpu.memory_space<vmem>>, vector<8x256xf32>
    %c176_162 = arith.constant 176 : index
    %c0_163 = arith.constant 0 : index
    %768 = vector.load %arg16[%c176_162, %c0_163] : memref<192x256xf32, #tpu.memory_space<vmem>>, vector<8x256xf32>
    %769 = arith.addf %767, %768 : vector<8x256xf32>
    %cst_164 = arith.constant dense<0.000000e+00> : vector<8x256xf32>
    %770 = tpu.matmul %766, %736, %cst_164 {dimension_numbers = #tpu.dot_dimension_numbers<[1], [0], [0], [1], [0, 0, 1, 1], [], []>} : vector<8x64xf32>, vector<64x256xf32>, vector<8x256xf32> -> vector<8x256xf32>
    %771 = arith.addf %769, %770 : vector<8x256xf32>
    %772 = vector.extract_strided_slice %771 {offsets = [0, 0], sizes = [8, 64], strides = [1, 1]} : vector<8x256xf32> to vector<8x64xf32>
    %773 = arith.negf %772 : vector<8x64xf32>
    %774 = math.exp %773 : vector<8x64xf32>
    %cst_165 = arith.constant 1.000000e+00 : f32
    %775 = vector.broadcast %cst_165 : f32 to vector<8x64xf32>
    %776 = arith.addf %775, %774 : vector<8x64xf32>
    %777 = arith.divf %775, %776 : vector<8x64xf32>
    %778 = vector.extract_strided_slice %771 {offsets = [0, 64], sizes = [8, 64], strides = [1, 1]} : vector<8x256xf32> to vector<8x64xf32>
    %779 = arith.negf %778 : vector<8x64xf32>
    %780 = math.exp %779 : vector<8x64xf32>
    %cst_166 = arith.constant 1.000000e+00 : f32
    %781 = vector.broadcast %cst_166 : f32 to vector<8x64xf32>
    %782 = arith.addf %781, %780 : vector<8x64xf32>
    %783 = arith.divf %781, %782 : vector<8x64xf32>
    %784 = vector.extract_strided_slice %771 {offsets = [0, 128], sizes = [8, 64], strides = [1, 1]} : vector<8x256xf32> to vector<8x64xf32>
    %785 = math.tanh %784 : vector<8x64xf32>
    %786 = vector.extract_strided_slice %771 {offsets = [0, 192], sizes = [8, 64], strides = [1, 1]} : vector<8x256xf32> to vector<8x64xf32>
    %787 = arith.negf %786 : vector<8x64xf32>
    %788 = math.exp %787 : vector<8x64xf32>
    %cst_167 = arith.constant 1.000000e+00 : f32
    %789 = vector.broadcast %cst_167 : f32 to vector<8x64xf32>
    %790 = arith.addf %789, %788 : vector<8x64xf32>
    %791 = arith.divf %789, %790 : vector<8x64xf32>
    %792 = arith.mulf %783, %764 : vector<8x64xf32>
    %793 = arith.mulf %777, %785 : vector<8x64xf32>
    %794 = arith.addf %792, %793 : vector<8x64xf32>
    %795 = math.tanh %794 : vector<8x64xf32>
    %796 = arith.mulf %791, %795 : vector<8x64xf32>
    %c16_168 = arith.constant 16 : index
    %c0_169 = arith.constant 0 : index
    %797 = vector.load %arg15[%c16_168, %c0_169] : memref<192x256xf32, #tpu.memory_space<vmem>>, vector<8x256xf32>
    %c168_170 = arith.constant 168 : index
    %c0_171 = arith.constant 0 : index
    %798 = vector.load %arg16[%c168_170, %c0_171] : memref<192x256xf32, #tpu.memory_space<vmem>>, vector<8x256xf32>
    %799 = arith.addf %797, %798 : vector<8x256xf32>
    %cst_172 = arith.constant dense<0.000000e+00> : vector<8x256xf32>
    %800 = tpu.matmul %796, %736, %cst_172 {dimension_numbers = #tpu.dot_dimension_numbers<[1], [0], [0], [1], [0, 0, 1, 1], [], []>} : vector<8x64xf32>, vector<64x256xf32>, vector<8x256xf32> -> vector<8x256xf32>
    %801 = arith.addf %799, %800 : vector<8x256xf32>
    %802 = vector.extract_strided_slice %801 {offsets = [0, 0], sizes = [8, 64], strides = [1, 1]} : vector<8x256xf32> to vector<8x64xf32>
    %803 = arith.negf %802 : vector<8x64xf32>
    %804 = math.exp %803 : vector<8x64xf32>
    %cst_173 = arith.constant 1.000000e+00 : f32
    %805 = vector.broadcast %cst_173 : f32 to vector<8x64xf32>
    %806 = arith.addf %805, %804 : vector<8x64xf32>
    %807 = arith.divf %805, %806 : vector<8x64xf32>
    %808 = vector.extract_strided_slice %801 {offsets = [0, 64], sizes = [8, 64], strides = [1, 1]} : vector<8x256xf32> to vector<8x64xf32>
    %809 = arith.negf %808 : vector<8x64xf32>
    %810 = math.exp %809 : vector<8x64xf32>
    %cst_174 = arith.constant 1.000000e+00 : f32
    %811 = vector.broadcast %cst_174 : f32 to vector<8x64xf32>
    %812 = arith.addf %811, %810 : vector<8x64xf32>
    %813 = arith.divf %811, %812 : vector<8x64xf32>
    %814 = vector.extract_strided_slice %801 {offsets = [0, 128], sizes = [8, 64], strides = [1, 1]} : vector<8x256xf32> to vector<8x64xf32>
    %815 = math.tanh %814 : vector<8x64xf32>
    %816 = vector.extract_strided_slice %801 {offsets = [0, 192], sizes = [8, 64], strides = [1, 1]} : vector<8x256xf32> to vector<8x64xf32>
    %817 = arith.negf %816 : vector<8x64xf32>
    %818 = math.exp %817 : vector<8x64xf32>
    %cst_175 = arith.constant 1.000000e+00 : f32
    %819 = vector.broadcast %cst_175 : f32 to vector<8x64xf32>
    %820 = arith.addf %819, %818 : vector<8x64xf32>
    %821 = arith.divf %819, %820 : vector<8x64xf32>
    %822 = arith.mulf %813, %794 : vector<8x64xf32>
    %823 = arith.mulf %807, %815 : vector<8x64xf32>
    %824 = arith.addf %822, %823 : vector<8x64xf32>
    %825 = math.tanh %824 : vector<8x64xf32>
    %826 = arith.mulf %821, %825 : vector<8x64xf32>
    %c24_176 = arith.constant 24 : index
    %c0_177 = arith.constant 0 : index
    %827 = vector.load %arg15[%c24_176, %c0_177] : memref<192x256xf32, #tpu.memory_space<vmem>>, vector<8x256xf32>
    %c160_178 = arith.constant 160 : index
    %c0_179 = arith.constant 0 : index
    %828 = vector.load %arg16[%c160_178, %c0_179] : memref<192x256xf32, #tpu.memory_space<vmem>>, vector<8x256xf32>
    %829 = arith.addf %827, %828 : vector<8x256xf32>
    %cst_180 = arith.constant dense<0.000000e+00> : vector<8x256xf32>
    %830 = tpu.matmul %826, %736, %cst_180 {dimension_numbers = #tpu.dot_dimension_numbers<[1], [0], [0], [1], [0, 0, 1, 1], [], []>} : vector<8x64xf32>, vector<64x256xf32>, vector<8x256xf32> -> vector<8x256xf32>
    %831 = arith.addf %829, %830 : vector<8x256xf32>
    %832 = vector.extract_strided_slice %831 {offsets = [0, 0], sizes = [8, 64], strides = [1, 1]} : vector<8x256xf32> to vector<8x64xf32>
    %833 = arith.negf %832 : vector<8x64xf32>
    %834 = math.exp %833 : vector<8x64xf32>
    %cst_181 = arith.constant 1.000000e+00 : f32
    %835 = vector.broadcast %cst_181 : f32 to vector<8x64xf32>
    %836 = arith.addf %835, %834 : vector<8x64xf32>
    %837 = arith.divf %835, %836 : vector<8x64xf32>
    %838 = vector.extract_strided_slice %831 {offsets = [0, 64], sizes = [8, 64], strides = [1, 1]} : vector<8x256xf32> to vector<8x64xf32>
    %839 = arith.negf %838 : vector<8x64xf32>
    %840 = math.exp %839 : vector<8x64xf32>
    %cst_182 = arith.constant 1.000000e+00 : f32
    %841 = vector.broadcast %cst_182 : f32 to vector<8x64xf32>
    %842 = arith.addf %841, %840 : vector<8x64xf32>
    %843 = arith.divf %841, %842 : vector<8x64xf32>
    %844 = vector.extract_strided_slice %831 {offsets = [0, 128], sizes = [8, 64], strides = [1, 1]} : vector<8x256xf32> to vector<8x64xf32>
    %845 = math.tanh %844 : vector<8x64xf32>
    %846 = vector.extract_strided_slice %831 {offsets = [0, 192], sizes = [8, 64], strides = [1, 1]} : vector<8x256xf32> to vector<8x64xf32>
    %847 = arith.negf %846 : vector<8x64xf32>
    %848 = math.exp %847 : vector<8x64xf32>
    %cst_183 = arith.constant 1.000000e+00 : f32
    %849 = vector.broadcast %cst_183 : f32 to vector<8x64xf32>
    %850 = arith.addf %849, %848 : vector<8x64xf32>
    %851 = arith.divf %849, %850 : vector<8x64xf32>
    %852 = arith.mulf %843, %824 : vector<8x64xf32>
    %853 = arith.mulf %837, %845 : vector<8x64xf32>
    %854 = arith.addf %852, %853 : vector<8x64xf32>
    %855 = math.tanh %854 : vector<8x64xf32>
    %856 = arith.mulf %851, %855 : vector<8x64xf32>
    %c32_184 = arith.constant 32 : index
    %c0_185 = arith.constant 0 : index
    %857 = vector.load %arg15[%c32_184, %c0_185] : memref<192x256xf32, #tpu.memory_space<vmem>>, vector<8x256xf32>
    %c152_186 = arith.constant 152 : index
    %c0_187 = arith.constant 0 : index
    %858 = vector.load %arg16[%c152_186, %c0_187] : memref<192x256xf32, #tpu.memory_space<vmem>>, vector<8x256xf32>
    %859 = arith.addf %857, %858 : vector<8x256xf32>
    %cst_188 = arith.constant dense<0.000000e+00> : vector<8x256xf32>
    %860 = tpu.matmul %856, %736, %cst_188 {dimension_numbers = #tpu.dot_dimension_numbers<[1], [0], [0], [1], [0, 0, 1, 1], [], []>} : vector<8x64xf32>, vector<64x256xf32>, vector<8x256xf32> -> vector<8x256xf32>
    %861 = arith.addf %859, %860 : vector<8x256xf32>
    %862 = vector.extract_strided_slice %861 {offsets = [0, 0], sizes = [8, 64], strides = [1, 1]} : vector<8x256xf32> to vector<8x64xf32>
    %863 = arith.negf %862 : vector<8x64xf32>
    %864 = math.exp %863 : vector<8x64xf32>
    %cst_189 = arith.constant 1.000000e+00 : f32
    %865 = vector.broadcast %cst_189 : f32 to vector<8x64xf32>
    %866 = arith.addf %865, %864 : vector<8x64xf32>
    %867 = arith.divf %865, %866 : vector<8x64xf32>
    %868 = vector.extract_strided_slice %861 {offsets = [0, 64], sizes = [8, 64], strides = [1, 1]} : vector<8x256xf32> to vector<8x64xf32>
    %869 = arith.negf %868 : vector<8x64xf32>
    %870 = math.exp %869 : vector<8x64xf32>
    %cst_190 = arith.constant 1.000000e+00 : f32
    %871 = vector.broadcast %cst_190 : f32 to vector<8x64xf32>
    %872 = arith.addf %871, %870 : vector<8x64xf32>
    %873 = arith.divf %871, %872 : vector<8x64xf32>
    %874 = vector.extract_strided_slice %861 {offsets = [0, 128], sizes = [8, 64], strides = [1, 1]} : vector<8x256xf32> to vector<8x64xf32>
    %875 = math.tanh %874 : vector<8x64xf32>
    %876 = vector.extract_strided_slice %861 {offsets = [0, 192], sizes = [8, 64], strides = [1, 1]} : vector<8x256xf32> to vector<8x64xf32>
    %877 = arith.negf %876 : vector<8x64xf32>
    %878 = math.exp %877 : vector<8x64xf32>
    %cst_191 = arith.constant 1.000000e+00 : f32
    %879 = vector.broadcast %cst_191 : f32 to vector<8x64xf32>
    %880 = arith.addf %879, %878 : vector<8x64xf32>
    %881 = arith.divf %879, %880 : vector<8x64xf32>
    %882 = arith.mulf %873, %854 : vector<8x64xf32>
    %883 = arith.mulf %867, %875 : vector<8x64xf32>
    %884 = arith.addf %882, %883 : vector<8x64xf32>
    %885 = math.tanh %884 : vector<8x64xf32>
    %886 = arith.mulf %881, %885 : vector<8x64xf32>
    %c40_192 = arith.constant 40 : index
    %c0_193 = arith.constant 0 : index
    %887 = vector.load %arg15[%c40_192, %c0_193] : memref<192x256xf32, #tpu.memory_space<vmem>>, vector<8x256xf32>
    %c144_194 = arith.constant 144 : index
    %c0_195 = arith.constant 0 : index
    %888 = vector.load %arg16[%c144_194, %c0_195] : memref<192x256xf32, #tpu.memory_space<vmem>>, vector<8x256xf32>
    %889 = arith.addf %887, %888 : vector<8x256xf32>
    %cst_196 = arith.constant dense<0.000000e+00> : vector<8x256xf32>
    %890 = tpu.matmul %886, %736, %cst_196 {dimension_numbers = #tpu.dot_dimension_numbers<[1], [0], [0], [1], [0, 0, 1, 1], [], []>} : vector<8x64xf32>, vector<64x256xf32>, vector<8x256xf32> -> vector<8x256xf32>
    %891 = arith.addf %889, %890 : vector<8x256xf32>
    %892 = vector.extract_strided_slice %891 {offsets = [0, 0], sizes = [8, 64], strides = [1, 1]} : vector<8x256xf32> to vector<8x64xf32>
    %893 = arith.negf %892 : vector<8x64xf32>
    %894 = math.exp %893 : vector<8x64xf32>
    %cst_197 = arith.constant 1.000000e+00 : f32
    %895 = vector.broadcast %cst_197 : f32 to vector<8x64xf32>
    %896 = arith.addf %895, %894 : vector<8x64xf32>
    %897 = arith.divf %895, %896 : vector<8x64xf32>
    %898 = vector.extract_strided_slice %891 {offsets = [0, 64], sizes = [8, 64], strides = [1, 1]} : vector<8x256xf32> to vector<8x64xf32>
    %899 = arith.negf %898 : vector<8x64xf32>
    %900 = math.exp %899 : vector<8x64xf32>
    %cst_198 = arith.constant 1.000000e+00 : f32
    %901 = vector.broadcast %cst_198 : f32 to vector<8x64xf32>
    %902 = arith.addf %901, %900 : vector<8x64xf32>
    %903 = arith.divf %901, %902 : vector<8x64xf32>
    %904 = vector.extract_strided_slice %891 {offsets = [0, 128], sizes = [8, 64], strides = [1, 1]} : vector<8x256xf32> to vector<8x64xf32>
    %905 = math.tanh %904 : vector<8x64xf32>
    %906 = vector.extract_strided_slice %891 {offsets = [0, 192], sizes = [8, 64], strides = [1, 1]} : vector<8x256xf32> to vector<8x64xf32>
    %907 = arith.negf %906 : vector<8x64xf32>
    %908 = math.exp %907 : vector<8x64xf32>
    %cst_199 = arith.constant 1.000000e+00 : f32
    %909 = vector.broadcast %cst_199 : f32 to vector<8x64xf32>
    %910 = arith.addf %909, %908 : vector<8x64xf32>
    %911 = arith.divf %909, %910 : vector<8x64xf32>
    %912 = arith.mulf %903, %884 : vector<8x64xf32>
    %913 = arith.mulf %897, %905 : vector<8x64xf32>
    %914 = arith.addf %912, %913 : vector<8x64xf32>
    %915 = math.tanh %914 : vector<8x64xf32>
    %916 = arith.mulf %911, %915 : vector<8x64xf32>
    %c48_200 = arith.constant 48 : index
    %c0_201 = arith.constant 0 : index
    %917 = vector.load %arg15[%c48_200, %c0_201] : memref<192x256xf32, #tpu.memory_space<vmem>>, vector<8x256xf32>
    %c136_202 = arith.constant 136 : index
    %c0_203 = arith.constant 0 : index
    %918 = vector.load %arg16[%c136_202, %c0_203] : memref<192x256xf32, #tpu.memory_space<vmem>>, vector<8x256xf32>
    %919 = arith.addf %917, %918 : vector<8x256xf32>
    %cst_204 = arith.constant dense<0.000000e+00> : vector<8x256xf32>
    %920 = tpu.matmul %916, %736, %cst_204 {dimension_numbers = #tpu.dot_dimension_numbers<[1], [0], [0], [1], [0, 0, 1, 1], [], []>} : vector<8x64xf32>, vector<64x256xf32>, vector<8x256xf32> -> vector<8x256xf32>
    %921 = arith.addf %919, %920 : vector<8x256xf32>
    %922 = vector.extract_strided_slice %921 {offsets = [0, 0], sizes = [8, 64], strides = [1, 1]} : vector<8x256xf32> to vector<8x64xf32>
    %923 = arith.negf %922 : vector<8x64xf32>
    %924 = math.exp %923 : vector<8x64xf32>
    %cst_205 = arith.constant 1.000000e+00 : f32
    %925 = vector.broadcast %cst_205 : f32 to vector<8x64xf32>
    %926 = arith.addf %925, %924 : vector<8x64xf32>
    %927 = arith.divf %925, %926 : vector<8x64xf32>
    %928 = vector.extract_strided_slice %921 {offsets = [0, 64], sizes = [8, 64], strides = [1, 1]} : vector<8x256xf32> to vector<8x64xf32>
    %929 = arith.negf %928 : vector<8x64xf32>
    %930 = math.exp %929 : vector<8x64xf32>
    %cst_206 = arith.constant 1.000000e+00 : f32
    %931 = vector.broadcast %cst_206 : f32 to vector<8x64xf32>
    %932 = arith.addf %931, %930 : vector<8x64xf32>
    %933 = arith.divf %931, %932 : vector<8x64xf32>
    %934 = vector.extract_strided_slice %921 {offsets = [0, 128], sizes = [8, 64], strides = [1, 1]} : vector<8x256xf32> to vector<8x64xf32>
    %935 = math.tanh %934 : vector<8x64xf32>
    %936 = vector.extract_strided_slice %921 {offsets = [0, 192], sizes = [8, 64], strides = [1, 1]} : vector<8x256xf32> to vector<8x64xf32>
    %937 = arith.negf %936 : vector<8x64xf32>
    %938 = math.exp %937 : vector<8x64xf32>
    %cst_207 = arith.constant 1.000000e+00 : f32
    %939 = vector.broadcast %cst_207 : f32 to vector<8x64xf32>
    %940 = arith.addf %939, %938 : vector<8x64xf32>
    %941 = arith.divf %939, %940 : vector<8x64xf32>
    %942 = arith.mulf %933, %914 : vector<8x64xf32>
    %943 = arith.mulf %927, %935 : vector<8x64xf32>
    %944 = arith.addf %942, %943 : vector<8x64xf32>
    %945 = math.tanh %944 : vector<8x64xf32>
    %946 = arith.mulf %941, %945 : vector<8x64xf32>
    %c56_208 = arith.constant 56 : index
    %c0_209 = arith.constant 0 : index
    %947 = vector.load %arg15[%c56_208, %c0_209] : memref<192x256xf32, #tpu.memory_space<vmem>>, vector<8x256xf32>
    %c128_210 = arith.constant 128 : index
    %c0_211 = arith.constant 0 : index
    %948 = vector.load %arg16[%c128_210, %c0_211] : memref<192x256xf32, #tpu.memory_space<vmem>>, vector<8x256xf32>
    %949 = arith.addf %947, %948 : vector<8x256xf32>
    %cst_212 = arith.constant dense<0.000000e+00> : vector<8x256xf32>
    %950 = tpu.matmul %946, %736, %cst_212 {dimension_numbers = #tpu.dot_dimension_numbers<[1], [0], [0], [1], [0, 0, 1, 1], [], []>} : vector<8x64xf32>, vector<64x256xf32>, vector<8x256xf32> -> vector<8x256xf32>
    %951 = arith.addf %949, %950 : vector<8x256xf32>
    %952 = vector.extract_strided_slice %951 {offsets = [0, 0], sizes = [8, 64], strides = [1, 1]} : vector<8x256xf32> to vector<8x64xf32>
    %953 = arith.negf %952 : vector<8x64xf32>
    %954 = math.exp %953 : vector<8x64xf32>
    %cst_213 = arith.constant 1.000000e+00 : f32
    %955 = vector.broadcast %cst_213 : f32 to vector<8x64xf32>
    %956 = arith.addf %955, %954 : vector<8x64xf32>
    %957 = arith.divf %955, %956 : vector<8x64xf32>
    %958 = vector.extract_strided_slice %951 {offsets = [0, 64], sizes = [8, 64], strides = [1, 1]} : vector<8x256xf32> to vector<8x64xf32>
    %959 = arith.negf %958 : vector<8x64xf32>
    %960 = math.exp %959 : vector<8x64xf32>
    %cst_214 = arith.constant 1.000000e+00 : f32
    %961 = vector.broadcast %cst_214 : f32 to vector<8x64xf32>
    %962 = arith.addf %961, %960 : vector<8x64xf32>
    %963 = arith.divf %961, %962 : vector<8x64xf32>
    %964 = vector.extract_strided_slice %951 {offsets = [0, 128], sizes = [8, 64], strides = [1, 1]} : vector<8x256xf32> to vector<8x64xf32>
    %965 = math.tanh %964 : vector<8x64xf32>
    %966 = vector.extract_strided_slice %951 {offsets = [0, 192], sizes = [8, 64], strides = [1, 1]} : vector<8x256xf32> to vector<8x64xf32>
    %967 = arith.negf %966 : vector<8x64xf32>
    %968 = math.exp %967 : vector<8x64xf32>
    %cst_215 = arith.constant 1.000000e+00 : f32
    %969 = vector.broadcast %cst_215 : f32 to vector<8x64xf32>
    %970 = arith.addf %969, %968 : vector<8x64xf32>
    %971 = arith.divf %969, %970 : vector<8x64xf32>
    %972 = arith.mulf %963, %944 : vector<8x64xf32>
    %973 = arith.mulf %957, %965 : vector<8x64xf32>
    %974 = arith.addf %972, %973 : vector<8x64xf32>
    %975 = math.tanh %974 : vector<8x64xf32>
    %976 = arith.mulf %971, %975 : vector<8x64xf32>
    %c64_216 = arith.constant 64 : index
    %c0_217 = arith.constant 0 : index
    %977 = vector.load %arg15[%c64_216, %c0_217] : memref<192x256xf32, #tpu.memory_space<vmem>>, vector<8x256xf32>
    %c120_218 = arith.constant 120 : index
    %c0_219 = arith.constant 0 : index
    %978 = vector.load %arg16[%c120_218, %c0_219] : memref<192x256xf32, #tpu.memory_space<vmem>>, vector<8x256xf32>
    %979 = arith.addf %977, %978 : vector<8x256xf32>
    %cst_220 = arith.constant dense<0.000000e+00> : vector<8x256xf32>
    %980 = tpu.matmul %976, %736, %cst_220 {dimension_numbers = #tpu.dot_dimension_numbers<[1], [0], [0], [1], [0, 0, 1, 1], [], []>} : vector<8x64xf32>, vector<64x256xf32>, vector<8x256xf32> -> vector<8x256xf32>
    %981 = arith.addf %979, %980 : vector<8x256xf32>
    %982 = vector.extract_strided_slice %981 {offsets = [0, 0], sizes = [8, 64], strides = [1, 1]} : vector<8x256xf32> to vector<8x64xf32>
    %983 = arith.negf %982 : vector<8x64xf32>
    %984 = math.exp %983 : vector<8x64xf32>
    %cst_221 = arith.constant 1.000000e+00 : f32
    %985 = vector.broadcast %cst_221 : f32 to vector<8x64xf32>
    %986 = arith.addf %985, %984 : vector<8x64xf32>
    %987 = arith.divf %985, %986 : vector<8x64xf32>
    %988 = vector.extract_strided_slice %981 {offsets = [0, 64], sizes = [8, 64], strides = [1, 1]} : vector<8x256xf32> to vector<8x64xf32>
    %989 = arith.negf %988 : vector<8x64xf32>
    %990 = math.exp %989 : vector<8x64xf32>
    %cst_222 = arith.constant 1.000000e+00 : f32
    %991 = vector.broadcast %cst_222 : f32 to vector<8x64xf32>
    %992 = arith.addf %991, %990 : vector<8x64xf32>
    %993 = arith.divf %991, %992 : vector<8x64xf32>
    %994 = vector.extract_strided_slice %981 {offsets = [0, 128], sizes = [8, 64], strides = [1, 1]} : vector<8x256xf32> to vector<8x64xf32>
    %995 = math.tanh %994 : vector<8x64xf32>
    %996 = vector.extract_strided_slice %981 {offsets = [0, 192], sizes = [8, 64], strides = [1, 1]} : vector<8x256xf32> to vector<8x64xf32>
    %997 = arith.negf %996 : vector<8x64xf32>
    %998 = math.exp %997 : vector<8x64xf32>
    %cst_223 = arith.constant 1.000000e+00 : f32
    %999 = vector.broadcast %cst_223 : f32 to vector<8x64xf32>
    %1000 = arith.addf %999, %998 : vector<8x64xf32>
    %1001 = arith.divf %999, %1000 : vector<8x64xf32>
    %1002 = arith.mulf %993, %974 : vector<8x64xf32>
    %1003 = arith.mulf %987, %995 : vector<8x64xf32>
    %1004 = arith.addf %1002, %1003 : vector<8x64xf32>
    %1005 = math.tanh %1004 : vector<8x64xf32>
    %1006 = arith.mulf %1001, %1005 : vector<8x64xf32>
    %c72_224 = arith.constant 72 : index
    %c0_225 = arith.constant 0 : index
    %1007 = vector.load %arg15[%c72_224, %c0_225] : memref<192x256xf32, #tpu.memory_space<vmem>>, vector<8x256xf32>
    %c112_226 = arith.constant 112 : index
    %c0_227 = arith.constant 0 : index
    %1008 = vector.load %arg16[%c112_226, %c0_227] : memref<192x256xf32, #tpu.memory_space<vmem>>, vector<8x256xf32>
    %1009 = arith.addf %1007, %1008 : vector<8x256xf32>
    %cst_228 = arith.constant dense<0.000000e+00> : vector<8x256xf32>
    %1010 = tpu.matmul %1006, %736, %cst_228 {dimension_numbers = #tpu.dot_dimension_numbers<[1], [0], [0], [1], [0, 0, 1, 1], [], []>} : vector<8x64xf32>, vector<64x256xf32>, vector<8x256xf32> -> vector<8x256xf32>
    %1011 = arith.addf %1009, %1010 : vector<8x256xf32>
    %1012 = vector.extract_strided_slice %1011 {offsets = [0, 0], sizes = [8, 64], strides = [1, 1]} : vector<8x256xf32> to vector<8x64xf32>
    %1013 = arith.negf %1012 : vector<8x64xf32>
    %1014 = math.exp %1013 : vector<8x64xf32>
    %cst_229 = arith.constant 1.000000e+00 : f32
    %1015 = vector.broadcast %cst_229 : f32 to vector<8x64xf32>
    %1016 = arith.addf %1015, %1014 : vector<8x64xf32>
    %1017 = arith.divf %1015, %1016 : vector<8x64xf32>
    %1018 = vector.extract_strided_slice %1011 {offsets = [0, 64], sizes = [8, 64], strides = [1, 1]} : vector<8x256xf32> to vector<8x64xf32>
    %1019 = arith.negf %1018 : vector<8x64xf32>
    %1020 = math.exp %1019 : vector<8x64xf32>
    %cst_230 = arith.constant 1.000000e+00 : f32
    %1021 = vector.broadcast %cst_230 : f32 to vector<8x64xf32>
    %1022 = arith.addf %1021, %1020 : vector<8x64xf32>
    %1023 = arith.divf %1021, %1022 : vector<8x64xf32>
    %1024 = vector.extract_strided_slice %1011 {offsets = [0, 128], sizes = [8, 64], strides = [1, 1]} : vector<8x256xf32> to vector<8x64xf32>
    %1025 = math.tanh %1024 : vector<8x64xf32>
    %1026 = vector.extract_strided_slice %1011 {offsets = [0, 192], sizes = [8, 64], strides = [1, 1]} : vector<8x256xf32> to vector<8x64xf32>
    %1027 = arith.negf %1026 : vector<8x64xf32>
    %1028 = math.exp %1027 : vector<8x64xf32>
    %cst_231 = arith.constant 1.000000e+00 : f32
    %1029 = vector.broadcast %cst_231 : f32 to vector<8x64xf32>
    %1030 = arith.addf %1029, %1028 : vector<8x64xf32>
    %1031 = arith.divf %1029, %1030 : vector<8x64xf32>
    %1032 = arith.mulf %1023, %1004 : vector<8x64xf32>
    %1033 = arith.mulf %1017, %1025 : vector<8x64xf32>
    %1034 = arith.addf %1032, %1033 : vector<8x64xf32>
    %1035 = math.tanh %1034 : vector<8x64xf32>
    %1036 = arith.mulf %1031, %1035 : vector<8x64xf32>
    %c80_232 = arith.constant 80 : index
    %c0_233 = arith.constant 0 : index
    %1037 = vector.load %arg15[%c80_232, %c0_233] : memref<192x256xf32, #tpu.memory_space<vmem>>, vector<8x256xf32>
    %c104_234 = arith.constant 104 : index
    %c0_235 = arith.constant 0 : index
    %1038 = vector.load %arg16[%c104_234, %c0_235] : memref<192x256xf32, #tpu.memory_space<vmem>>, vector<8x256xf32>
    %1039 = arith.addf %1037, %1038 : vector<8x256xf32>
    %cst_236 = arith.constant dense<0.000000e+00> : vector<8x256xf32>
    %1040 = tpu.matmul %1036, %736, %cst_236 {dimension_numbers = #tpu.dot_dimension_numbers<[1], [0], [0], [1], [0, 0, 1, 1], [], []>} : vector<8x64xf32>, vector<64x256xf32>, vector<8x256xf32> -> vector<8x256xf32>
    %1041 = arith.addf %1039, %1040 : vector<8x256xf32>
    %1042 = vector.extract_strided_slice %1041 {offsets = [0, 0], sizes = [8, 64], strides = [1, 1]} : vector<8x256xf32> to vector<8x64xf32>
    %1043 = arith.negf %1042 : vector<8x64xf32>
    %1044 = math.exp %1043 : vector<8x64xf32>
    %cst_237 = arith.constant 1.000000e+00 : f32
    %1045 = vector.broadcast %cst_237 : f32 to vector<8x64xf32>
    %1046 = arith.addf %1045, %1044 : vector<8x64xf32>
    %1047 = arith.divf %1045, %1046 : vector<8x64xf32>
    %1048 = vector.extract_strided_slice %1041 {offsets = [0, 64], sizes = [8, 64], strides = [1, 1]} : vector<8x256xf32> to vector<8x64xf32>
    %1049 = arith.negf %1048 : vector<8x64xf32>
    %1050 = math.exp %1049 : vector<8x64xf32>
    %cst_238 = arith.constant 1.000000e+00 : f32
    %1051 = vector.broadcast %cst_238 : f32 to vector<8x64xf32>
    %1052 = arith.addf %1051, %1050 : vector<8x64xf32>
    %1053 = arith.divf %1051, %1052 : vector<8x64xf32>
    %1054 = vector.extract_strided_slice %1041 {offsets = [0, 128], sizes = [8, 64], strides = [1, 1]} : vector<8x256xf32> to vector<8x64xf32>
    %1055 = math.tanh %1054 : vector<8x64xf32>
    %1056 = vector.extract_strided_slice %1041 {offsets = [0, 192], sizes = [8, 64], strides = [1, 1]} : vector<8x256xf32> to vector<8x64xf32>
    %1057 = arith.negf %1056 : vector<8x64xf32>
    %1058 = math.exp %1057 : vector<8x64xf32>
    %cst_239 = arith.constant 1.000000e+00 : f32
    %1059 = vector.broadcast %cst_239 : f32 to vector<8x64xf32>
    %1060 = arith.addf %1059, %1058 : vector<8x64xf32>
    %1061 = arith.divf %1059, %1060 : vector<8x64xf32>
    %1062 = arith.mulf %1053, %1034 : vector<8x64xf32>
    %1063 = arith.mulf %1047, %1055 : vector<8x64xf32>
    %1064 = arith.addf %1062, %1063 : vector<8x64xf32>
    %1065 = math.tanh %1064 : vector<8x64xf32>
    %1066 = arith.mulf %1061, %1065 : vector<8x64xf32>
    %c88_240 = arith.constant 88 : index
    %c0_241 = arith.constant 0 : index
    %1067 = vector.load %arg15[%c88_240, %c0_241] : memref<192x256xf32, #tpu.memory_space<vmem>>, vector<8x256xf32>
    %c96_242 = arith.constant 96 : index
    %c0_243 = arith.constant 0 : index
    %1068 = vector.load %arg16[%c96_242, %c0_243] : memref<192x256xf32, #tpu.memory_space<vmem>>, vector<8x256xf32>
    %1069 = arith.addf %1067, %1068 : vector<8x256xf32>
    %cst_244 = arith.constant dense<0.000000e+00> : vector<8x256xf32>
    %1070 = tpu.matmul %1066, %736, %cst_244 {dimension_numbers = #tpu.dot_dimension_numbers<[1], [0], [0], [1], [0, 0, 1, 1], [], []>} : vector<8x64xf32>, vector<64x256xf32>, vector<8x256xf32> -> vector<8x256xf32>
    %1071 = arith.addf %1069, %1070 : vector<8x256xf32>
    %1072 = vector.extract_strided_slice %1071 {offsets = [0, 0], sizes = [8, 64], strides = [1, 1]} : vector<8x256xf32> to vector<8x64xf32>
    %1073 = arith.negf %1072 : vector<8x64xf32>
    %1074 = math.exp %1073 : vector<8x64xf32>
    %cst_245 = arith.constant 1.000000e+00 : f32
    %1075 = vector.broadcast %cst_245 : f32 to vector<8x64xf32>
    %1076 = arith.addf %1075, %1074 : vector<8x64xf32>
    %1077 = arith.divf %1075, %1076 : vector<8x64xf32>
    %1078 = vector.extract_strided_slice %1071 {offsets = [0, 64], sizes = [8, 64], strides = [1, 1]} : vector<8x256xf32> to vector<8x64xf32>
    %1079 = arith.negf %1078 : vector<8x64xf32>
    %1080 = math.exp %1079 : vector<8x64xf32>
    %cst_246 = arith.constant 1.000000e+00 : f32
    %1081 = vector.broadcast %cst_246 : f32 to vector<8x64xf32>
    %1082 = arith.addf %1081, %1080 : vector<8x64xf32>
    %1083 = arith.divf %1081, %1082 : vector<8x64xf32>
    %1084 = vector.extract_strided_slice %1071 {offsets = [0, 128], sizes = [8, 64], strides = [1, 1]} : vector<8x256xf32> to vector<8x64xf32>
    %1085 = math.tanh %1084 : vector<8x64xf32>
    %1086 = vector.extract_strided_slice %1071 {offsets = [0, 192], sizes = [8, 64], strides = [1, 1]} : vector<8x256xf32> to vector<8x64xf32>
    %1087 = arith.negf %1086 : vector<8x64xf32>
    %1088 = math.exp %1087 : vector<8x64xf32>
    %cst_247 = arith.constant 1.000000e+00 : f32
    %1089 = vector.broadcast %cst_247 : f32 to vector<8x64xf32>
    %1090 = arith.addf %1089, %1088 : vector<8x64xf32>
    %1091 = arith.divf %1089, %1090 : vector<8x64xf32>
    %1092 = arith.mulf %1083, %1064 : vector<8x64xf32>
    %1093 = arith.mulf %1077, %1085 : vector<8x64xf32>
    %1094 = arith.addf %1092, %1093 : vector<8x64xf32>
    %1095 = math.tanh %1094 : vector<8x64xf32>
    %1096 = arith.mulf %1091, %1095 : vector<8x64xf32>
    %c96_248 = arith.constant 96 : index
    %c0_249 = arith.constant 0 : index
    %1097 = vector.load %arg15[%c96_248, %c0_249] : memref<192x256xf32, #tpu.memory_space<vmem>>, vector<8x256xf32>
    %c88_250 = arith.constant 88 : index
    %c0_251 = arith.constant 0 : index
    %1098 = vector.load %arg16[%c88_250, %c0_251] : memref<192x256xf32, #tpu.memory_space<vmem>>, vector<8x256xf32>
    %1099 = arith.addf %1097, %1098 : vector<8x256xf32>
    %cst_252 = arith.constant dense<0.000000e+00> : vector<8x256xf32>
    %1100 = tpu.matmul %1096, %736, %cst_252 {dimension_numbers = #tpu.dot_dimension_numbers<[1], [0], [0], [1], [0, 0, 1, 1], [], []>} : vector<8x64xf32>, vector<64x256xf32>, vector<8x256xf32> -> vector<8x256xf32>
    %1101 = arith.addf %1099, %1100 : vector<8x256xf32>
    %1102 = vector.extract_strided_slice %1101 {offsets = [0, 0], sizes = [8, 64], strides = [1, 1]} : vector<8x256xf32> to vector<8x64xf32>
    %1103 = arith.negf %1102 : vector<8x64xf32>
    %1104 = math.exp %1103 : vector<8x64xf32>
    %cst_253 = arith.constant 1.000000e+00 : f32
    %1105 = vector.broadcast %cst_253 : f32 to vector<8x64xf32>
    %1106 = arith.addf %1105, %1104 : vector<8x64xf32>
    %1107 = arith.divf %1105, %1106 : vector<8x64xf32>
    %1108 = vector.extract_strided_slice %1101 {offsets = [0, 64], sizes = [8, 64], strides = [1, 1]} : vector<8x256xf32> to vector<8x64xf32>
    %1109 = arith.negf %1108 : vector<8x64xf32>
    %1110 = math.exp %1109 : vector<8x64xf32>
    %cst_254 = arith.constant 1.000000e+00 : f32
    %1111 = vector.broadcast %cst_254 : f32 to vector<8x64xf32>
    %1112 = arith.addf %1111, %1110 : vector<8x64xf32>
    %1113 = arith.divf %1111, %1112 : vector<8x64xf32>
    %1114 = vector.extract_strided_slice %1101 {offsets = [0, 128], sizes = [8, 64], strides = [1, 1]} : vector<8x256xf32> to vector<8x64xf32>
    %1115 = math.tanh %1114 : vector<8x64xf32>
    %1116 = vector.extract_strided_slice %1101 {offsets = [0, 192], sizes = [8, 64], strides = [1, 1]} : vector<8x256xf32> to vector<8x64xf32>
    %1117 = arith.negf %1116 : vector<8x64xf32>
    %1118 = math.exp %1117 : vector<8x64xf32>
    %cst_255 = arith.constant 1.000000e+00 : f32
    %1119 = vector.broadcast %cst_255 : f32 to vector<8x64xf32>
    %1120 = arith.addf %1119, %1118 : vector<8x64xf32>
    %1121 = arith.divf %1119, %1120 : vector<8x64xf32>
    %1122 = arith.mulf %1113, %1094 : vector<8x64xf32>
    %1123 = arith.mulf %1107, %1115 : vector<8x64xf32>
    %1124 = arith.addf %1122, %1123 : vector<8x64xf32>
    %1125 = math.tanh %1124 : vector<8x64xf32>
    %1126 = arith.mulf %1121, %1125 : vector<8x64xf32>
    %c104_256 = arith.constant 104 : index
    %c0_257 = arith.constant 0 : index
    %1127 = vector.load %arg15[%c104_256, %c0_257] : memref<192x256xf32, #tpu.memory_space<vmem>>, vector<8x256xf32>
    %c80_258 = arith.constant 80 : index
    %c0_259 = arith.constant 0 : index
    %1128 = vector.load %arg16[%c80_258, %c0_259] : memref<192x256xf32, #tpu.memory_space<vmem>>, vector<8x256xf32>
    %1129 = arith.addf %1127, %1128 : vector<8x256xf32>
    %cst_260 = arith.constant dense<0.000000e+00> : vector<8x256xf32>
    %1130 = tpu.matmul %1126, %736, %cst_260 {dimension_numbers = #tpu.dot_dimension_numbers<[1], [0], [0], [1], [0, 0, 1, 1], [], []>} : vector<8x64xf32>, vector<64x256xf32>, vector<8x256xf32> -> vector<8x256xf32>
    %1131 = arith.addf %1129, %1130 : vector<8x256xf32>
    %1132 = vector.extract_strided_slice %1131 {offsets = [0, 0], sizes = [8, 64], strides = [1, 1]} : vector<8x256xf32> to vector<8x64xf32>
    %1133 = arith.negf %1132 : vector<8x64xf32>
    %1134 = math.exp %1133 : vector<8x64xf32>
    %cst_261 = arith.constant 1.000000e+00 : f32
    %1135 = vector.broadcast %cst_261 : f32 to vector<8x64xf32>
    %1136 = arith.addf %1135, %1134 : vector<8x64xf32>
    %1137 = arith.divf %1135, %1136 : vector<8x64xf32>
    %1138 = vector.extract_strided_slice %1131 {offsets = [0, 64], sizes = [8, 64], strides = [1, 1]} : vector<8x256xf32> to vector<8x64xf32>
    %1139 = arith.negf %1138 : vector<8x64xf32>
    %1140 = math.exp %1139 : vector<8x64xf32>
    %cst_262 = arith.constant 1.000000e+00 : f32
    %1141 = vector.broadcast %cst_262 : f32 to vector<8x64xf32>
    %1142 = arith.addf %1141, %1140 : vector<8x64xf32>
    %1143 = arith.divf %1141, %1142 : vector<8x64xf32>
    %1144 = vector.extract_strided_slice %1131 {offsets = [0, 128], sizes = [8, 64], strides = [1, 1]} : vector<8x256xf32> to vector<8x64xf32>
    %1145 = math.tanh %1144 : vector<8x64xf32>
    %1146 = vector.extract_strided_slice %1131 {offsets = [0, 192], sizes = [8, 64], strides = [1, 1]} : vector<8x256xf32> to vector<8x64xf32>
    %1147 = arith.negf %1146 : vector<8x64xf32>
    %1148 = math.exp %1147 : vector<8x64xf32>
    %cst_263 = arith.constant 1.000000e+00 : f32
    %1149 = vector.broadcast %cst_263 : f32 to vector<8x64xf32>
    %1150 = arith.addf %1149, %1148 : vector<8x64xf32>
    %1151 = arith.divf %1149, %1150 : vector<8x64xf32>
    %1152 = arith.mulf %1143, %1124 : vector<8x64xf32>
    %1153 = arith.mulf %1137, %1145 : vector<8x64xf32>
    %1154 = arith.addf %1152, %1153 : vector<8x64xf32>
    %1155 = math.tanh %1154 : vector<8x64xf32>
    %1156 = arith.mulf %1151, %1155 : vector<8x64xf32>
    %c112_264 = arith.constant 112 : index
    %c0_265 = arith.constant 0 : index
    %1157 = vector.load %arg15[%c112_264, %c0_265] : memref<192x256xf32, #tpu.memory_space<vmem>>, vector<8x256xf32>
    %c72_266 = arith.constant 72 : index
    %c0_267 = arith.constant 0 : index
    %1158 = vector.load %arg16[%c72_266, %c0_267] : memref<192x256xf32, #tpu.memory_space<vmem>>, vector<8x256xf32>
    %1159 = arith.addf %1157, %1158 : vector<8x256xf32>
    %cst_268 = arith.constant dense<0.000000e+00> : vector<8x256xf32>
    %1160 = tpu.matmul %1156, %736, %cst_268 {dimension_numbers = #tpu.dot_dimension_numbers<[1], [0], [0], [1], [0, 0, 1, 1], [], []>} : vector<8x64xf32>, vector<64x256xf32>, vector<8x256xf32> -> vector<8x256xf32>
    %1161 = arith.addf %1159, %1160 : vector<8x256xf32>
    %1162 = vector.extract_strided_slice %1161 {offsets = [0, 0], sizes = [8, 64], strides = [1, 1]} : vector<8x256xf32> to vector<8x64xf32>
    %1163 = arith.negf %1162 : vector<8x64xf32>
    %1164 = math.exp %1163 : vector<8x64xf32>
    %cst_269 = arith.constant 1.000000e+00 : f32
    %1165 = vector.broadcast %cst_269 : f32 to vector<8x64xf32>
    %1166 = arith.addf %1165, %1164 : vector<8x64xf32>
    %1167 = arith.divf %1165, %1166 : vector<8x64xf32>
    %1168 = vector.extract_strided_slice %1161 {offsets = [0, 64], sizes = [8, 64], strides = [1, 1]} : vector<8x256xf32> to vector<8x64xf32>
    %1169 = arith.negf %1168 : vector<8x64xf32>
    %1170 = math.exp %1169 : vector<8x64xf32>
    %cst_270 = arith.constant 1.000000e+00 : f32
    %1171 = vector.broadcast %cst_270 : f32 to vector<8x64xf32>
    %1172 = arith.addf %1171, %1170 : vector<8x64xf32>
    %1173 = arith.divf %1171, %1172 : vector<8x64xf32>
    %1174 = vector.extract_strided_slice %1161 {offsets = [0, 128], sizes = [8, 64], strides = [1, 1]} : vector<8x256xf32> to vector<8x64xf32>
    %1175 = math.tanh %1174 : vector<8x64xf32>
    %1176 = vector.extract_strided_slice %1161 {offsets = [0, 192], sizes = [8, 64], strides = [1, 1]} : vector<8x256xf32> to vector<8x64xf32>
    %1177 = arith.negf %1176 : vector<8x64xf32>
    %1178 = math.exp %1177 : vector<8x64xf32>
    %cst_271 = arith.constant 1.000000e+00 : f32
    %1179 = vector.broadcast %cst_271 : f32 to vector<8x64xf32>
    %1180 = arith.addf %1179, %1178 : vector<8x64xf32>
    %1181 = arith.divf %1179, %1180 : vector<8x64xf32>
    %1182 = arith.mulf %1173, %1154 : vector<8x64xf32>
    %1183 = arith.mulf %1167, %1175 : vector<8x64xf32>
    %1184 = arith.addf %1182, %1183 : vector<8x64xf32>
    %1185 = math.tanh %1184 : vector<8x64xf32>
    %1186 = arith.mulf %1181, %1185 : vector<8x64xf32>
    %c120_272 = arith.constant 120 : index
    %c0_273 = arith.constant 0 : index
    %1187 = vector.load %arg15[%c120_272, %c0_273] : memref<192x256xf32, #tpu.memory_space<vmem>>, vector<8x256xf32>
    %c64_274 = arith.constant 64 : index
    %c0_275 = arith.constant 0 : index
    %1188 = vector.load %arg16[%c64_274, %c0_275] : memref<192x256xf32, #tpu.memory_space<vmem>>, vector<8x256xf32>
    %1189 = arith.addf %1187, %1188 : vector<8x256xf32>
    %cst_276 = arith.constant dense<0.000000e+00> : vector<8x256xf32>
    %1190 = tpu.matmul %1186, %736, %cst_276 {dimension_numbers = #tpu.dot_dimension_numbers<[1], [0], [0], [1], [0, 0, 1, 1], [], []>} : vector<8x64xf32>, vector<64x256xf32>, vector<8x256xf32> -> vector<8x256xf32>
    %1191 = arith.addf %1189, %1190 : vector<8x256xf32>
    %1192 = vector.extract_strided_slice %1191 {offsets = [0, 0], sizes = [8, 64], strides = [1, 1]} : vector<8x256xf32> to vector<8x64xf32>
    %1193 = arith.negf %1192 : vector<8x64xf32>
    %1194 = math.exp %1193 : vector<8x64xf32>
    %cst_277 = arith.constant 1.000000e+00 : f32
    %1195 = vector.broadcast %cst_277 : f32 to vector<8x64xf32>
    %1196 = arith.addf %1195, %1194 : vector<8x64xf32>
    %1197 = arith.divf %1195, %1196 : vector<8x64xf32>
    %1198 = vector.extract_strided_slice %1191 {offsets = [0, 64], sizes = [8, 64], strides = [1, 1]} : vector<8x256xf32> to vector<8x64xf32>
    %1199 = arith.negf %1198 : vector<8x64xf32>
    %1200 = math.exp %1199 : vector<8x64xf32>
    %cst_278 = arith.constant 1.000000e+00 : f32
    %1201 = vector.broadcast %cst_278 : f32 to vector<8x64xf32>
    %1202 = arith.addf %1201, %1200 : vector<8x64xf32>
    %1203 = arith.divf %1201, %1202 : vector<8x64xf32>
    %1204 = vector.extract_strided_slice %1191 {offsets = [0, 128], sizes = [8, 64], strides = [1, 1]} : vector<8x256xf32> to vector<8x64xf32>
    %1205 = math.tanh %1204 : vector<8x64xf32>
    %1206 = vector.extract_strided_slice %1191 {offsets = [0, 192], sizes = [8, 64], strides = [1, 1]} : vector<8x256xf32> to vector<8x64xf32>
    %1207 = arith.negf %1206 : vector<8x64xf32>
    %1208 = math.exp %1207 : vector<8x64xf32>
    %cst_279 = arith.constant 1.000000e+00 : f32
    %1209 = vector.broadcast %cst_279 : f32 to vector<8x64xf32>
    %1210 = arith.addf %1209, %1208 : vector<8x64xf32>
    %1211 = arith.divf %1209, %1210 : vector<8x64xf32>
    %1212 = arith.mulf %1203, %1184 : vector<8x64xf32>
    %1213 = arith.mulf %1197, %1205 : vector<8x64xf32>
    %1214 = arith.addf %1212, %1213 : vector<8x64xf32>
    %1215 = math.tanh %1214 : vector<8x64xf32>
    %1216 = arith.mulf %1211, %1215 : vector<8x64xf32>
    %c128_280 = arith.constant 128 : index
    %c0_281 = arith.constant 0 : index
    %1217 = vector.load %arg15[%c128_280, %c0_281] : memref<192x256xf32, #tpu.memory_space<vmem>>, vector<8x256xf32>
    %c56_282 = arith.constant 56 : index
    %c0_283 = arith.constant 0 : index
    %1218 = vector.load %arg16[%c56_282, %c0_283] : memref<192x256xf32, #tpu.memory_space<vmem>>, vector<8x256xf32>
    %1219 = arith.addf %1217, %1218 : vector<8x256xf32>
    %cst_284 = arith.constant dense<0.000000e+00> : vector<8x256xf32>
    %1220 = tpu.matmul %1216, %736, %cst_284 {dimension_numbers = #tpu.dot_dimension_numbers<[1], [0], [0], [1], [0, 0, 1, 1], [], []>} : vector<8x64xf32>, vector<64x256xf32>, vector<8x256xf32> -> vector<8x256xf32>
    %1221 = arith.addf %1219, %1220 : vector<8x256xf32>
    %1222 = vector.extract_strided_slice %1221 {offsets = [0, 0], sizes = [8, 64], strides = [1, 1]} : vector<8x256xf32> to vector<8x64xf32>
    %1223 = arith.negf %1222 : vector<8x64xf32>
    %1224 = math.exp %1223 : vector<8x64xf32>
    %cst_285 = arith.constant 1.000000e+00 : f32
    %1225 = vector.broadcast %cst_285 : f32 to vector<8x64xf32>
    %1226 = arith.addf %1225, %1224 : vector<8x64xf32>
    %1227 = arith.divf %1225, %1226 : vector<8x64xf32>
    %1228 = vector.extract_strided_slice %1221 {offsets = [0, 64], sizes = [8, 64], strides = [1, 1]} : vector<8x256xf32> to vector<8x64xf32>
    %1229 = arith.negf %1228 : vector<8x64xf32>
    %1230 = math.exp %1229 : vector<8x64xf32>
    %cst_286 = arith.constant 1.000000e+00 : f32
    %1231 = vector.broadcast %cst_286 : f32 to vector<8x64xf32>
    %1232 = arith.addf %1231, %1230 : vector<8x64xf32>
    %1233 = arith.divf %1231, %1232 : vector<8x64xf32>
    %1234 = vector.extract_strided_slice %1221 {offsets = [0, 128], sizes = [8, 64], strides = [1, 1]} : vector<8x256xf32> to vector<8x64xf32>
    %1235 = math.tanh %1234 : vector<8x64xf32>
    %1236 = vector.extract_strided_slice %1221 {offsets = [0, 192], sizes = [8, 64], strides = [1, 1]} : vector<8x256xf32> to vector<8x64xf32>
    %1237 = arith.negf %1236 : vector<8x64xf32>
    %1238 = math.exp %1237 : vector<8x64xf32>
    %cst_287 = arith.constant 1.000000e+00 : f32
    %1239 = vector.broadcast %cst_287 : f32 to vector<8x64xf32>
    %1240 = arith.addf %1239, %1238 : vector<8x64xf32>
    %1241 = arith.divf %1239, %1240 : vector<8x64xf32>
    %1242 = arith.mulf %1233, %1214 : vector<8x64xf32>
    %1243 = arith.mulf %1227, %1235 : vector<8x64xf32>
    %1244 = arith.addf %1242, %1243 : vector<8x64xf32>
    %1245 = math.tanh %1244 : vector<8x64xf32>
    %1246 = arith.mulf %1241, %1245 : vector<8x64xf32>
    %c136_288 = arith.constant 136 : index
    %c0_289 = arith.constant 0 : index
    %1247 = vector.load %arg15[%c136_288, %c0_289] : memref<192x256xf32, #tpu.memory_space<vmem>>, vector<8x256xf32>
    %c48_290 = arith.constant 48 : index
    %c0_291 = arith.constant 0 : index
    %1248 = vector.load %arg16[%c48_290, %c0_291] : memref<192x256xf32, #tpu.memory_space<vmem>>, vector<8x256xf32>
    %1249 = arith.addf %1247, %1248 : vector<8x256xf32>
    %cst_292 = arith.constant dense<0.000000e+00> : vector<8x256xf32>
    %1250 = tpu.matmul %1246, %736, %cst_292 {dimension_numbers = #tpu.dot_dimension_numbers<[1], [0], [0], [1], [0, 0, 1, 1], [], []>} : vector<8x64xf32>, vector<64x256xf32>, vector<8x256xf32> -> vector<8x256xf32>
    %1251 = arith.addf %1249, %1250 : vector<8x256xf32>
    %1252 = vector.extract_strided_slice %1251 {offsets = [0, 0], sizes = [8, 64], strides = [1, 1]} : vector<8x256xf32> to vector<8x64xf32>
    %1253 = arith.negf %1252 : vector<8x64xf32>
    %1254 = math.exp %1253 : vector<8x64xf32>
    %cst_293 = arith.constant 1.000000e+00 : f32
    %1255 = vector.broadcast %cst_293 : f32 to vector<8x64xf32>
    %1256 = arith.addf %1255, %1254 : vector<8x64xf32>
    %1257 = arith.divf %1255, %1256 : vector<8x64xf32>
    %1258 = vector.extract_strided_slice %1251 {offsets = [0, 64], sizes = [8, 64], strides = [1, 1]} : vector<8x256xf32> to vector<8x64xf32>
    %1259 = arith.negf %1258 : vector<8x64xf32>
    %1260 = math.exp %1259 : vector<8x64xf32>
    %cst_294 = arith.constant 1.000000e+00 : f32
    %1261 = vector.broadcast %cst_294 : f32 to vector<8x64xf32>
    %1262 = arith.addf %1261, %1260 : vector<8x64xf32>
    %1263 = arith.divf %1261, %1262 : vector<8x64xf32>
    %1264 = vector.extract_strided_slice %1251 {offsets = [0, 128], sizes = [8, 64], strides = [1, 1]} : vector<8x256xf32> to vector<8x64xf32>
    %1265 = math.tanh %1264 : vector<8x64xf32>
    %1266 = vector.extract_strided_slice %1251 {offsets = [0, 192], sizes = [8, 64], strides = [1, 1]} : vector<8x256xf32> to vector<8x64xf32>
    %1267 = arith.negf %1266 : vector<8x64xf32>
    %1268 = math.exp %1267 : vector<8x64xf32>
    %cst_295 = arith.constant 1.000000e+00 : f32
    %1269 = vector.broadcast %cst_295 : f32 to vector<8x64xf32>
    %1270 = arith.addf %1269, %1268 : vector<8x64xf32>
    %1271 = arith.divf %1269, %1270 : vector<8x64xf32>
    %1272 = arith.mulf %1263, %1244 : vector<8x64xf32>
    %1273 = arith.mulf %1257, %1265 : vector<8x64xf32>
    %1274 = arith.addf %1272, %1273 : vector<8x64xf32>
    %1275 = math.tanh %1274 : vector<8x64xf32>
    %1276 = arith.mulf %1271, %1275 : vector<8x64xf32>
    %c144_296 = arith.constant 144 : index
    %c0_297 = arith.constant 0 : index
    %1277 = vector.load %arg15[%c144_296, %c0_297] : memref<192x256xf32, #tpu.memory_space<vmem>>, vector<8x256xf32>
    %c40_298 = arith.constant 40 : index
    %c0_299 = arith.constant 0 : index
    %1278 = vector.load %arg16[%c40_298, %c0_299] : memref<192x256xf32, #tpu.memory_space<vmem>>, vector<8x256xf32>
    %1279 = arith.addf %1277, %1278 : vector<8x256xf32>
    %cst_300 = arith.constant dense<0.000000e+00> : vector<8x256xf32>
    %1280 = tpu.matmul %1276, %736, %cst_300 {dimension_numbers = #tpu.dot_dimension_numbers<[1], [0], [0], [1], [0, 0, 1, 1], [], []>} : vector<8x64xf32>, vector<64x256xf32>, vector<8x256xf32> -> vector<8x256xf32>
    %1281 = arith.addf %1279, %1280 : vector<8x256xf32>
    %1282 = vector.extract_strided_slice %1281 {offsets = [0, 0], sizes = [8, 64], strides = [1, 1]} : vector<8x256xf32> to vector<8x64xf32>
    %1283 = arith.negf %1282 : vector<8x64xf32>
    %1284 = math.exp %1283 : vector<8x64xf32>
    %cst_301 = arith.constant 1.000000e+00 : f32
    %1285 = vector.broadcast %cst_301 : f32 to vector<8x64xf32>
    %1286 = arith.addf %1285, %1284 : vector<8x64xf32>
    %1287 = arith.divf %1285, %1286 : vector<8x64xf32>
    %1288 = vector.extract_strided_slice %1281 {offsets = [0, 64], sizes = [8, 64], strides = [1, 1]} : vector<8x256xf32> to vector<8x64xf32>
    %1289 = arith.negf %1288 : vector<8x64xf32>
    %1290 = math.exp %1289 : vector<8x64xf32>
    %cst_302 = arith.constant 1.000000e+00 : f32
    %1291 = vector.broadcast %cst_302 : f32 to vector<8x64xf32>
    %1292 = arith.addf %1291, %1290 : vector<8x64xf32>
    %1293 = arith.divf %1291, %1292 : vector<8x64xf32>
    %1294 = vector.extract_strided_slice %1281 {offsets = [0, 128], sizes = [8, 64], strides = [1, 1]} : vector<8x256xf32> to vector<8x64xf32>
    %1295 = math.tanh %1294 : vector<8x64xf32>
    %1296 = vector.extract_strided_slice %1281 {offsets = [0, 192], sizes = [8, 64], strides = [1, 1]} : vector<8x256xf32> to vector<8x64xf32>
    %1297 = arith.negf %1296 : vector<8x64xf32>
    %1298 = math.exp %1297 : vector<8x64xf32>
    %cst_303 = arith.constant 1.000000e+00 : f32
    %1299 = vector.broadcast %cst_303 : f32 to vector<8x64xf32>
    %1300 = arith.addf %1299, %1298 : vector<8x64xf32>
    %1301 = arith.divf %1299, %1300 : vector<8x64xf32>
    %1302 = arith.mulf %1293, %1274 : vector<8x64xf32>
    %1303 = arith.mulf %1287, %1295 : vector<8x64xf32>
    %1304 = arith.addf %1302, %1303 : vector<8x64xf32>
    %1305 = math.tanh %1304 : vector<8x64xf32>
    %1306 = arith.mulf %1301, %1305 : vector<8x64xf32>
    %c152_304 = arith.constant 152 : index
    %c0_305 = arith.constant 0 : index
    %1307 = vector.load %arg15[%c152_304, %c0_305] : memref<192x256xf32, #tpu.memory_space<vmem>>, vector<8x256xf32>
    %c32_306 = arith.constant 32 : index
    %c0_307 = arith.constant 0 : index
    %1308 = vector.load %arg16[%c32_306, %c0_307] : memref<192x256xf32, #tpu.memory_space<vmem>>, vector<8x256xf32>
    %1309 = arith.addf %1307, %1308 : vector<8x256xf32>
    %cst_308 = arith.constant dense<0.000000e+00> : vector<8x256xf32>
    %1310 = tpu.matmul %1306, %736, %cst_308 {dimension_numbers = #tpu.dot_dimension_numbers<[1], [0], [0], [1], [0, 0, 1, 1], [], []>} : vector<8x64xf32>, vector<64x256xf32>, vector<8x256xf32> -> vector<8x256xf32>
    %1311 = arith.addf %1309, %1310 : vector<8x256xf32>
    %1312 = vector.extract_strided_slice %1311 {offsets = [0, 0], sizes = [8, 64], strides = [1, 1]} : vector<8x256xf32> to vector<8x64xf32>
    %1313 = arith.negf %1312 : vector<8x64xf32>
    %1314 = math.exp %1313 : vector<8x64xf32>
    %cst_309 = arith.constant 1.000000e+00 : f32
    %1315 = vector.broadcast %cst_309 : f32 to vector<8x64xf32>
    %1316 = arith.addf %1315, %1314 : vector<8x64xf32>
    %1317 = arith.divf %1315, %1316 : vector<8x64xf32>
    %1318 = vector.extract_strided_slice %1311 {offsets = [0, 64], sizes = [8, 64], strides = [1, 1]} : vector<8x256xf32> to vector<8x64xf32>
    %1319 = arith.negf %1318 : vector<8x64xf32>
    %1320 = math.exp %1319 : vector<8x64xf32>
    %cst_310 = arith.constant 1.000000e+00 : f32
    %1321 = vector.broadcast %cst_310 : f32 to vector<8x64xf32>
    %1322 = arith.addf %1321, %1320 : vector<8x64xf32>
    %1323 = arith.divf %1321, %1322 : vector<8x64xf32>
    %1324 = vector.extract_strided_slice %1311 {offsets = [0, 128], sizes = [8, 64], strides = [1, 1]} : vector<8x256xf32> to vector<8x64xf32>
    %1325 = math.tanh %1324 : vector<8x64xf32>
    %1326 = vector.extract_strided_slice %1311 {offsets = [0, 192], sizes = [8, 64], strides = [1, 1]} : vector<8x256xf32> to vector<8x64xf32>
    %1327 = arith.negf %1326 : vector<8x64xf32>
    %1328 = math.exp %1327 : vector<8x64xf32>
    %cst_311 = arith.constant 1.000000e+00 : f32
    %1329 = vector.broadcast %cst_311 : f32 to vector<8x64xf32>
    %1330 = arith.addf %1329, %1328 : vector<8x64xf32>
    %1331 = arith.divf %1329, %1330 : vector<8x64xf32>
    %1332 = arith.mulf %1323, %1304 : vector<8x64xf32>
    %1333 = arith.mulf %1317, %1325 : vector<8x64xf32>
    %1334 = arith.addf %1332, %1333 : vector<8x64xf32>
    %1335 = math.tanh %1334 : vector<8x64xf32>
    %1336 = arith.mulf %1331, %1335 : vector<8x64xf32>
    %c160_312 = arith.constant 160 : index
    %c0_313 = arith.constant 0 : index
    %1337 = vector.load %arg15[%c160_312, %c0_313] : memref<192x256xf32, #tpu.memory_space<vmem>>, vector<8x256xf32>
    %c24_314 = arith.constant 24 : index
    %c0_315 = arith.constant 0 : index
    %1338 = vector.load %arg16[%c24_314, %c0_315] : memref<192x256xf32, #tpu.memory_space<vmem>>, vector<8x256xf32>
    %1339 = arith.addf %1337, %1338 : vector<8x256xf32>
    %cst_316 = arith.constant dense<0.000000e+00> : vector<8x256xf32>
    %1340 = tpu.matmul %1336, %736, %cst_316 {dimension_numbers = #tpu.dot_dimension_numbers<[1], [0], [0], [1], [0, 0, 1, 1], [], []>} : vector<8x64xf32>, vector<64x256xf32>, vector<8x256xf32> -> vector<8x256xf32>
    %1341 = arith.addf %1339, %1340 : vector<8x256xf32>
    %1342 = vector.extract_strided_slice %1341 {offsets = [0, 0], sizes = [8, 64], strides = [1, 1]} : vector<8x256xf32> to vector<8x64xf32>
    %1343 = arith.negf %1342 : vector<8x64xf32>
    %1344 = math.exp %1343 : vector<8x64xf32>
    %cst_317 = arith.constant 1.000000e+00 : f32
    %1345 = vector.broadcast %cst_317 : f32 to vector<8x64xf32>
    %1346 = arith.addf %1345, %1344 : vector<8x64xf32>
    %1347 = arith.divf %1345, %1346 : vector<8x64xf32>
    %1348 = vector.extract_strided_slice %1341 {offsets = [0, 64], sizes = [8, 64], strides = [1, 1]} : vector<8x256xf32> to vector<8x64xf32>
    %1349 = arith.negf %1348 : vector<8x64xf32>
    %1350 = math.exp %1349 : vector<8x64xf32>
    %cst_318 = arith.constant 1.000000e+00 : f32
    %1351 = vector.broadcast %cst_318 : f32 to vector<8x64xf32>
    %1352 = arith.addf %1351, %1350 : vector<8x64xf32>
    %1353 = arith.divf %1351, %1352 : vector<8x64xf32>
    %1354 = vector.extract_strided_slice %1341 {offsets = [0, 128], sizes = [8, 64], strides = [1, 1]} : vector<8x256xf32> to vector<8x64xf32>
    %1355 = math.tanh %1354 : vector<8x64xf32>
    %1356 = vector.extract_strided_slice %1341 {offsets = [0, 192], sizes = [8, 64], strides = [1, 1]} : vector<8x256xf32> to vector<8x64xf32>
    %1357 = arith.negf %1356 : vector<8x64xf32>
    %1358 = math.exp %1357 : vector<8x64xf32>
    %cst_319 = arith.constant 1.000000e+00 : f32
    %1359 = vector.broadcast %cst_319 : f32 to vector<8x64xf32>
    %1360 = arith.addf %1359, %1358 : vector<8x64xf32>
    %1361 = arith.divf %1359, %1360 : vector<8x64xf32>
    %1362 = arith.mulf %1353, %1334 : vector<8x64xf32>
    %1363 = arith.mulf %1347, %1355 : vector<8x64xf32>
    %1364 = arith.addf %1362, %1363 : vector<8x64xf32>
    %1365 = math.tanh %1364 : vector<8x64xf32>
    %1366 = arith.mulf %1361, %1365 : vector<8x64xf32>
    %c168_320 = arith.constant 168 : index
    %c0_321 = arith.constant 0 : index
    %1367 = vector.load %arg15[%c168_320, %c0_321] : memref<192x256xf32, #tpu.memory_space<vmem>>, vector<8x256xf32>
    %c16_322 = arith.constant 16 : index
    %c0_323 = arith.constant 0 : index
    %1368 = vector.load %arg16[%c16_322, %c0_323] : memref<192x256xf32, #tpu.memory_space<vmem>>, vector<8x256xf32>
    %1369 = arith.addf %1367, %1368 : vector<8x256xf32>
    %cst_324 = arith.constant dense<0.000000e+00> : vector<8x256xf32>
    %1370 = tpu.matmul %1366, %736, %cst_324 {dimension_numbers = #tpu.dot_dimension_numbers<[1], [0], [0], [1], [0, 0, 1, 1], [], []>} : vector<8x64xf32>, vector<64x256xf32>, vector<8x256xf32> -> vector<8x256xf32>
    %1371 = arith.addf %1369, %1370 : vector<8x256xf32>
    %1372 = vector.extract_strided_slice %1371 {offsets = [0, 0], sizes = [8, 64], strides = [1, 1]} : vector<8x256xf32> to vector<8x64xf32>
    %1373 = arith.negf %1372 : vector<8x64xf32>
    %1374 = math.exp %1373 : vector<8x64xf32>
    %cst_325 = arith.constant 1.000000e+00 : f32
    %1375 = vector.broadcast %cst_325 : f32 to vector<8x64xf32>
    %1376 = arith.addf %1375, %1374 : vector<8x64xf32>
    %1377 = arith.divf %1375, %1376 : vector<8x64xf32>
    %1378 = vector.extract_strided_slice %1371 {offsets = [0, 64], sizes = [8, 64], strides = [1, 1]} : vector<8x256xf32> to vector<8x64xf32>
    %1379 = arith.negf %1378 : vector<8x64xf32>
    %1380 = math.exp %1379 : vector<8x64xf32>
    %cst_326 = arith.constant 1.000000e+00 : f32
    %1381 = vector.broadcast %cst_326 : f32 to vector<8x64xf32>
    %1382 = arith.addf %1381, %1380 : vector<8x64xf32>
    %1383 = arith.divf %1381, %1382 : vector<8x64xf32>
    %1384 = vector.extract_strided_slice %1371 {offsets = [0, 128], sizes = [8, 64], strides = [1, 1]} : vector<8x256xf32> to vector<8x64xf32>
    %1385 = math.tanh %1384 : vector<8x64xf32>
    %1386 = vector.extract_strided_slice %1371 {offsets = [0, 192], sizes = [8, 64], strides = [1, 1]} : vector<8x256xf32> to vector<8x64xf32>
    %1387 = arith.negf %1386 : vector<8x64xf32>
    %1388 = math.exp %1387 : vector<8x64xf32>
    %cst_327 = arith.constant 1.000000e+00 : f32
    %1389 = vector.broadcast %cst_327 : f32 to vector<8x64xf32>
    %1390 = arith.addf %1389, %1388 : vector<8x64xf32>
    %1391 = arith.divf %1389, %1390 : vector<8x64xf32>
    %1392 = arith.mulf %1383, %1364 : vector<8x64xf32>
    %1393 = arith.mulf %1377, %1385 : vector<8x64xf32>
    %1394 = arith.addf %1392, %1393 : vector<8x64xf32>
    %1395 = math.tanh %1394 : vector<8x64xf32>
    %1396 = arith.mulf %1391, %1395 : vector<8x64xf32>
    %c176_328 = arith.constant 176 : index
    %c0_329 = arith.constant 0 : index
    %1397 = vector.load %arg15[%c176_328, %c0_329] : memref<192x256xf32, #tpu.memory_space<vmem>>, vector<8x256xf32>
    %c8_330 = arith.constant 8 : index
    %c0_331 = arith.constant 0 : index
    %1398 = vector.load %arg16[%c8_330, %c0_331] : memref<192x256xf32, #tpu.memory_space<vmem>>, vector<8x256xf32>
    %1399 = arith.addf %1397, %1398 : vector<8x256xf32>
    %cst_332 = arith.constant dense<0.000000e+00> : vector<8x256xf32>
    %1400 = tpu.matmul %1396, %736, %cst_332 {dimension_numbers = #tpu.dot_dimension_numbers<[1], [0], [0], [1], [0, 0, 1, 1], [], []>} : vector<8x64xf32>, vector<64x256xf32>, vector<8x256xf32> -> vector<8x256xf32>
    %1401 = arith.addf %1399, %1400 : vector<8x256xf32>
    %1402 = vector.extract_strided_slice %1401 {offsets = [0, 0], sizes = [8, 64], strides = [1, 1]} : vector<8x256xf32> to vector<8x64xf32>
    %1403 = arith.negf %1402 : vector<8x64xf32>
    %1404 = math.exp %1403 : vector<8x64xf32>
    %cst_333 = arith.constant 1.000000e+00 : f32
    %1405 = vector.broadcast %cst_333 : f32 to vector<8x64xf32>
    %1406 = arith.addf %1405, %1404 : vector<8x64xf32>
    %1407 = arith.divf %1405, %1406 : vector<8x64xf32>
    %1408 = vector.extract_strided_slice %1401 {offsets = [0, 64], sizes = [8, 64], strides = [1, 1]} : vector<8x256xf32> to vector<8x64xf32>
    %1409 = arith.negf %1408 : vector<8x64xf32>
    %1410 = math.exp %1409 : vector<8x64xf32>
    %cst_334 = arith.constant 1.000000e+00 : f32
    %1411 = vector.broadcast %cst_334 : f32 to vector<8x64xf32>
    %1412 = arith.addf %1411, %1410 : vector<8x64xf32>
    %1413 = arith.divf %1411, %1412 : vector<8x64xf32>
    %1414 = vector.extract_strided_slice %1401 {offsets = [0, 128], sizes = [8, 64], strides = [1, 1]} : vector<8x256xf32> to vector<8x64xf32>
    %1415 = math.tanh %1414 : vector<8x64xf32>
    %1416 = vector.extract_strided_slice %1401 {offsets = [0, 192], sizes = [8, 64], strides = [1, 1]} : vector<8x256xf32> to vector<8x64xf32>
    %1417 = arith.negf %1416 : vector<8x64xf32>
    %1418 = math.exp %1417 : vector<8x64xf32>
    %cst_335 = arith.constant 1.000000e+00 : f32
    %1419 = vector.broadcast %cst_335 : f32 to vector<8x64xf32>
    %1420 = arith.addf %1419, %1418 : vector<8x64xf32>
    %1421 = arith.divf %1419, %1420 : vector<8x64xf32>
    %1422 = arith.mulf %1413, %1394 : vector<8x64xf32>
    %1423 = arith.mulf %1407, %1415 : vector<8x64xf32>
    %1424 = arith.addf %1422, %1423 : vector<8x64xf32>
    %1425 = math.tanh %1424 : vector<8x64xf32>
    %1426 = arith.mulf %1421, %1425 : vector<8x64xf32>
    %c184_336 = arith.constant 184 : index
    %c0_337 = arith.constant 0 : index
    %1427 = vector.load %arg15[%c184_336, %c0_337] : memref<192x256xf32, #tpu.memory_space<vmem>>, vector<8x256xf32>
    %c0_338 = arith.constant 0 : index
    %c0_339 = arith.constant 0 : index
    %1428 = vector.load %arg16[%c0_338, %c0_339] : memref<192x256xf32, #tpu.memory_space<vmem>>, vector<8x256xf32>
    %1429 = arith.addf %1427, %1428 : vector<8x256xf32>
    %cst_340 = arith.constant dense<0.000000e+00> : vector<8x256xf32>
    %1430 = tpu.matmul %1426, %736, %cst_340 {dimension_numbers = #tpu.dot_dimension_numbers<[1], [0], [0], [1], [0, 0, 1, 1], [], []>} : vector<8x64xf32>, vector<64x256xf32>, vector<8x256xf32> -> vector<8x256xf32>
    %1431 = arith.addf %1429, %1430 : vector<8x256xf32>
    %1432 = vector.extract_strided_slice %1431 {offsets = [0, 0], sizes = [8, 64], strides = [1, 1]} : vector<8x256xf32> to vector<8x64xf32>
    %1433 = arith.negf %1432 : vector<8x64xf32>
    %1434 = math.exp %1433 : vector<8x64xf32>
    %cst_341 = arith.constant 1.000000e+00 : f32
    %1435 = vector.broadcast %cst_341 : f32 to vector<8x64xf32>
    %1436 = arith.addf %1435, %1434 : vector<8x64xf32>
    %1437 = arith.divf %1435, %1436 : vector<8x64xf32>
    %1438 = vector.extract_strided_slice %1431 {offsets = [0, 64], sizes = [8, 64], strides = [1, 1]} : vector<8x256xf32> to vector<8x64xf32>
    %1439 = arith.negf %1438 : vector<8x64xf32>
    %1440 = math.exp %1439 : vector<8x64xf32>
    %cst_342 = arith.constant 1.000000e+00 : f32
    %1441 = vector.broadcast %cst_342 : f32 to vector<8x64xf32>
    %1442 = arith.addf %1441, %1440 : vector<8x64xf32>
    %1443 = arith.divf %1441, %1442 : vector<8x64xf32>
    %1444 = vector.extract_strided_slice %1431 {offsets = [0, 128], sizes = [8, 64], strides = [1, 1]} : vector<8x256xf32> to vector<8x64xf32>
    %1445 = math.tanh %1444 : vector<8x64xf32>
    %1446 = vector.extract_strided_slice %1431 {offsets = [0, 192], sizes = [8, 64], strides = [1, 1]} : vector<8x256xf32> to vector<8x64xf32>
    %1447 = arith.negf %1446 : vector<8x64xf32>
    %1448 = math.exp %1447 : vector<8x64xf32>
    %cst_343 = arith.constant 1.000000e+00 : f32
    %1449 = vector.broadcast %cst_343 : f32 to vector<8x64xf32>
    %1450 = arith.addf %1449, %1448 : vector<8x64xf32>
    %1451 = arith.divf %1449, %1450 : vector<8x64xf32>
    %1452 = arith.mulf %1443, %1424 : vector<8x64xf32>
    %1453 = arith.mulf %1437, %1445 : vector<8x64xf32>
    %1454 = arith.addf %1452, %1453 : vector<8x64xf32>
    %1455 = math.tanh %1454 : vector<8x64xf32>
    %1456 = arith.mulf %1451, %1455 : vector<8x64xf32>
    %c0_344 = arith.constant 0 : index
    %c0_345 = arith.constant 0 : index
    %1457 = vector.load %arg11[%c0_344, %c0_345] : memref<1x64xf32, #tpu.memory_space<vmem>>, vector<1x64xf32>
    %1458 = vector.broadcast %1457 : vector<1x64xf32> to vector<8x64xf32>
    %1459 = arith.mulf %1456, %1458 : vector<8x64xf32>
    %cst_346 = arith.constant dense<0.000000e+00> : vector<8xf32>
    %1460 = vector.multi_reduction <add>, %1459, %cst_346 [1] : vector<8x64xf32> to vector<8xf32>
    %1461 = vector.shape_cast %1460 : vector<8xf32> to vector<8x1xf32>
    %c0_347 = arith.constant 0 : index
    %c0_348 = arith.constant 0 : index
    %1462 = vector.load %arg12[%c0_347, %c0_348] : memref<1x1xf32, #tpu.memory_space<vmem>>, vector<1x1xf32>
    %1463 = vector.broadcast %1462 : vector<1x1xf32> to vector<8x1xf32>
    %1464 = arith.addf %1461, %1463 : vector<8x1xf32>
    %c0_349 = arith.constant 0 : index
    %c0_350 = arith.constant 0 : index
    %1465 = vector.load %arg13[%c0_349, %c0_350] : memref<8x1xf32, #tpu.memory_space<vmem>>, vector<8x1xf32>
    tpu.vector_store %arg13[%c0_349, %c0_350], %1464 {strides = array<i32>} : memref<8x1xf32, #tpu.memory_space<vmem>>, vector<8x1xf32>,
    return
  }
  func.func @transform_0(%arg0: i32) -> (i32, i32) {
    %c0_i32 = arith.constant 0 : i32
    %c0_i32_0 = arith.constant 0 : i32
    %c0_i32_1 = arith.constant 0 : i32
    return %c0_i32, %c0_i32_0 : i32, i32
  }
  func.func @transform_1(%arg0: i32) -> (i32, i32) {
    %c0_i32 = arith.constant 0 : i32
    %c0_i32_0 = arith.constant 0 : i32
    %c0_i32_1 = arith.constant 0 : i32
    return %c0_i32, %c0_i32_0 : i32, i32
  }
  func.func @transform_2(%arg0: i32) -> (i32, i32) {
    %c0_i32 = arith.constant 0 : i32
    %c0_i32_0 = arith.constant 0 : i32
    %c0_i32_1 = arith.constant 0 : i32
    return %c0_i32, %c0_i32_0 : i32, i32
  }
  func.func @transform_3(%arg0: i32) -> (i32, i32) {
    %c0_i32 = arith.constant 0 : i32
    %c0_i32_0 = arith.constant 0 : i32
    %c0_i32_1 = arith.constant 0 : i32
    return %c0_i32, %c0_i32_0 : i32, i32
  }
  func.func @transform_4(%arg0: i32) -> (i32, i32) {
    %c0_i32 = arith.constant 0 : i32
    %c0_i32_0 = arith.constant 0 : i32
    %c0_i32_1 = arith.constant 0 : i32
    return %c0_i32, %c0_i32_0 : i32, i32
  }
  func.func @transform_5(%arg0: i32) -> (i32, i32) {
    %c0_i32 = arith.constant 0 : i32
    %c0_i32_0 = arith.constant 0 : i32
    %c0_i32_1 = arith.constant 0 : i32
    return %c0_i32, %c0_i32_0 : i32, i32
  }
  func.func @transform_6(%arg0: i32) -> (i32, i32) {
    %c0_i32 = arith.constant 0 : i32
    %c0_i32_0 = arith.constant 0 : i32
    %c0_i32_1 = arith.constant 0 : i32
    return %c0_i32, %c0_i32_0 : i32, i32
  }
  func.func @transform_7(%arg0: i32) -> (i32, i32) {
    %c0_i32 = arith.constant 0 : i32
    %c0_i32_0 = arith.constant 0 : i32
    %c0_i32_1 = arith.constant 0 : i32
    return %c0_i32, %c0_i32_0 : i32, i32
  }
  func.func @transform_8(%arg0: i32) -> (i32, i32) {
    %c0_i32 = arith.constant 0 : i32
    %c0_i32_0 = arith.constant 0 : i32
    %c0_i32_1 = arith.constant 0 : i32
    return %c0_i32, %c0_i32_0 : i32, i32
  }
  func.func @transform_9(%arg0: i32) -> (i32, i32) {
    %c0_i32 = arith.constant 0 : i32
    %c0_i32_0 = arith.constant 0 : i32
    %c0_i32_1 = arith.constant 0 : i32
    return %c0_i32, %c0_i32_0 : i32, i32
  }
  func.func @transform_10(%arg0: i32) -> (i32, i32) {
    %c0_i32 = arith.constant 0 : i32
    %c0_i32_0 = arith.constant 0 : i32
    %c0_i32_1 = arith.constant 0 : i32
    return %c0_i32, %c0_i32_0 : i32, i32
  }
  func.func @transform_11(%arg0: i32) -> (i32, i32) {
    %c0_i32 = arith.constant 0 : i32
    %c0_i32_0 = arith.constant 0 : i32
    %c0_i32_1 = arith.constant 0 : i32
    return %c0_i32, %c0_i32_0 : i32, i32
  }
  func.func @transform_12(%arg0: i32) -> (i32, i32) {
    %c0_i32 = arith.constant 0 : i32
    %c0_i32_0 = arith.constant 0 : i32
    %c0_i32_1 = arith.constant 0 : i32
    return %c0_i32, %c0_i32_0 : i32, i32
  }
}

</mosaic_0001>

<bundles_post_ra>
// kernel: hybrid_forward.1
= control target key start
LH: loop header
LB: loop body
LE: loop exit
PB: predicated region body
PF: predicated region fallthrough
CT: control target
= control target key end

     0   :  { %s13381_s0 = inlined_call_operand.vmem [shape: s32[192,1], index: 0, kind: input, shape index: {}]   ;;  %s13382_s1 = inlined_call_operand.hbm [shape: f32[51,1024], index: 1, kind: input, shape index: {}]   ;;  %s13383_s2 = inlined_call_operand.vmem [shape: f32[1,64], index: 2, kind: input, shape index: {}]   ;;  %s13384_s3 = inlined_call_operand.vmem [shape: f32[64,256], index: 3, kind: input, shape index: {}]   ;;  %s13385_s4 = inlined_call_operand.hbm [shape: f32[64,256], index: 4, kind: input, shape index: {}]   ;;  %s13386_s5 = inlined_call_operand.vmem [shape: f32[1,256], index: 5, kind: input, shape index: {}]   ;;  %s13387_s6 = inlined_call_operand.hbm [shape: f32[64,256], index: 6, kind: input, shape index: {}]   ;;  %s13388_s7 = inlined_call_operand.hbm [shape: f32[64,256], index: 7, kind: input, shape index: {}]   ;;  %s13389_s8 = inlined_call_operand.vmem [shape: f32[1,256], index: 8, kind: input, shape index: {}]   ;;  %s13390_s9 = inlined_call_operand.hbm [shape: f32[64,256], index: 9, kind: input, shape index: {}]   ;;  %s13391_s10 = inlined_call_operand.vmem [shape: f32[1,64], index: 10, kind: input, shape index: {}]   ;;  %s13392_s11 = inlined_call_operand.<no memory space> [shape: f32[1,1], index: 11, kind: input, shape index: {}]   ;;  %s13393_s12 = inlined_call_operand.vmem [shape: f32[8,1], index: 12, kind: output, shape index: {}]  }
   0x1   :  { %v17_v0 = vstv %s13392_s11 }
   0x2   :  { %18 = vst [vmem:[#allocation5] sm:$0x1] %v17_v0 }
   0x3   :  { %19 = vsyncpa [#allocation7], 0 }
   0x4   :  { %20 = vsyncpa [#allocation9], 0 }
   0x5   :  { %21 = vsyncpa [#allocation12], 0  ;;  %s10384_s23 = smov [#allocation8]   ;;  %s10268_s27 = scalar_lea.hbm %s13385_s4, 2048 }
   0x6   :  { %s45_s24 = sshll.u32 %s10384_s23, 4  ;;  %p10269_p0 = scmp.ne.s32.totalorder %s13385_s4, %s10268_s27  ;;  %s46_s24 = int_to_ptr.vmem [resolvable:$true] %s45_s24 }
   0x7   :  { %p10272_p1 = scmp.lt.u32.totalorder %s10268_s27, %s13385_s4 }
   0x9   :  { %p10274_p2 = pnand %p10272_p1, %p10269_p0 }
   0xb   :  { %10277 = shalt.err (!%p10274_p2)
}
   0xc   :  { %s10278_s11 = scalar_lea.vmem %s46_s24, 2048  ;;  %p10283_p4 = scmp.lt.s32.totalorder %s46_s24, %s46_s24 }
   0xd   :  { %p10279_p3 = scmp.ne.s32.totalorder %s46_s24, %s10278_s11  ;;  %p10284_p5 = scmp.lt.s32.totalorder %s10278_s11, %s10278_s11 }
   0xf   :  { %p10285_p6 = por %p10284_p5, %p10283_p4 }
  0x11   :  { %p10286_p7 = pnand %p10285_p6, %p10279_p3 }
  0x13   :  { %10289 = shalt.err (!%p10286_p7)
}
  0x14   :  { %s10385_s14 = smov 256   ;;  %s10386_s15 = smov 16  }
  0x15   :  { %51 = dma.hbm_to_vmem [thread:$0]  %s13385_s4, 2048, %s46_s24, [#allocation9], %s10385_s14, %s10385_s14, %s10386_s15  }
  0x16   :  { %s10387_s18 = smov [#allocation11]   ;;  %s10388_s20 = smov [#allocation6]  }
  0x17   :  { %s71_s19 = sshll.u32 %s10387_s18, 4  ;;  %s29_s21 = sshll.u32 %s10388_s20, 4  ;;  %s72_s19 = int_to_ptr.vmem [resolvable:$true] %s71_s19  ;;  %s30_s21 = int_to_ptr.vmem [resolvable:$true] %s29_s21 }
  0x18   :  { %s10290_s25 = scalar_lea.hbm %s13388_s7, 2048 }
  0x19   :  { %p10291_p8 = scmp.ne.s32.totalorder %s13388_s7, %s10290_s25  ;;  %p10294_p9 = scmp.lt.u32.totalorder %s10290_s25, %s13388_s7 }
  0x1b   :  { %p10296_p10 = pnand %p10294_p9, %p10291_p8 }
  0x1d   :  { %10299 = shalt.err (!%p10296_p10)
}
  0x1e   :  { %s10300_s4 = scalar_lea.vmem %s72_s19, 2048  ;;  %p10305_p12 = scmp.lt.s32.totalorder %s72_s19, %s72_s19 }
  0x1f   :  { %p10301_p11 = scmp.ne.s32.totalorder %s72_s19, %s10300_s4  ;;  %p10306_p13 = scmp.lt.s32.totalorder %s10300_s4, %s10300_s4 }
  0x21   :  { %p10307_p0 = por %p10306_p13, %p10305_p12 }
  0x23   :  { %p10308_p1 = pnand %p10307_p0, %p10301_p11 }
  0x25   :  { %10311 = shalt.err (!%p10308_p1)
}
  0x26   :  { %77 = dma.hbm_to_vmem [thread:$0]  %s13388_s7, 2048, %s72_s19, [#allocation12], %s10385_s14, %s10385_s14, %s10386_s15  }
  0x27   :  { %s10312_s16 = scalar_lea.hbm %s13382_s1, 7168 }
  0x28   :  { %p10313_p2 = scmp.ne.s32.totalorder %s13382_s1, %s10312_s16  ;;  %p10316_p3 = scmp.lt.u32.totalorder %s10312_s16, %s13382_s1 }
  0x2a   :  { %p10318_p4 = pnand %p10316_p3, %p10313_p2 }
  0x2c   :  { %10321 = shalt.err (!%p10318_p4)
}
  0x2d   :  { %s10322_s23 = scalar_lea.vmem %s30_s21, 7168  ;;  %p10327_p6 = scmp.lt.s32.totalorder %s30_s21, %s30_s21 }
  0x2e   :  { %p10323_p5 = scmp.ne.s32.totalorder %s30_s21, %s10322_s23  ;;  %p10328_p7 = scmp.lt.s32.totalorder %s10322_s23, %s10322_s23 }
  0x30   :  { %p10329_p8 = por %p10328_p7, %p10327_p6 }
  0x32   :  { %p10330_p9 = pnand %p10329_p8, %p10323_p5 }
  0x34   :  { %10333 = shalt.err (!%p10330_p9)
}
  0x35   :  { %s10389_s7 = smov 1024   ;;  %s10390_s19 = smov 64  }
  0x36   :  { %35 = dma.hbm_to_vmem [thread:$0]  %s13382_s1, 7168, %s30_s21, [#allocation7], %s10389_s7, %s10389_s7, %s10390_s19  }
  0x37   :  { %s10391_s27 = smov [#allocation10]   ;;  %s10392_s29 = smov [#allocation13]  }
  0x38   :  { %s59_s28 = sshll.u32 %s10391_s27, 4  ;;  %s85_s4 = sshll.u32 %s10392_s29, 4  ;;  %s60_s28 = int_to_ptr.vmem [resolvable:$true] %s59_s28  ;;  %s86_s4 = int_to_ptr.vmem [resolvable:$true] %s85_s4 }
  0x39   :  { %s10334_s13 = scalar_lea.hbm %s13387_s6, 2048 }
  0x3a   :  { %p10335_p10 = scmp.ne.s32.totalorder %s13387_s6, %s10334_s13  ;;  %p10338_p11 = scmp.lt.u32.totalorder %s10334_s13, %s13387_s6 }
  0x3c   :  { %p10340_p12 = pnand %p10338_p11, %p10335_p10 }
  0x3e   :  { %10343 = shalt.err (!%p10340_p12)
}
  0x3f   :  { %s10344_s1 = scalar_lea.vmem %s60_s28, 2048  ;;  %p10349_p0 = scmp.lt.s32.totalorder %s60_s28, %s60_s28 }
  0x40   :  { %p10345_p13 = scmp.ne.s32.totalorder %s60_s28, %s10344_s1  ;;  %p10350_p1 = scmp.lt.s32.totalorder %s10344_s1, %s10344_s1 }
  0x42   :  { %p10351_p2 = por %p10350_p1, %p10349_p0 }
  0x44   :  { %p10352_p3 = pnand %p10351_p2, %p10345_p13 }
  0x46   :  { %10355 = shalt.err (!%p10352_p3)
}
  0x47   :  { %65 = dma.hbm_to_vmem [thread:$0]  %s13387_s6, 2048, %s60_s28, [#allocation9], %s10385_s14, %s10385_s14, %s10386_s15  }
  0x48   :  { %s10356_s7 = scalar_lea.hbm %s13390_s9, 2048 }
  0x49   :  { %p10357_p4 = scmp.ne.s32.totalorder %s13390_s9, %s10356_s7  ;;  %p10360_p5 = scmp.lt.u32.totalorder %s10356_s7, %s13390_s9 }
  0x4b   :  { %p10362_p6 = pnand %p10360_p5, %p10357_p4 }
  0x4d   :  { %10365 = shalt.err (!%p10362_p6)
}
  0x4e   :  { %s10366_s24 = scalar_lea.vmem %s86_s4, 2048  ;;  %p10371_p8 = scmp.lt.s32.totalorder %s86_s4, %s86_s4 }
  0x4f   :  { %p10367_p7 = scmp.ne.s32.totalorder %s86_s4, %s10366_s24  ;;  %p10372_p9 = scmp.lt.s32.totalorder %s10366_s24, %s10366_s24 }
  0x51   :  { %p10373_p10 = por %p10372_p9, %p10371_p8 }
  0x53   :  { %p10374_p11 = pnand %p10373_p10, %p10367_p7 }
  0x55   :  { %10377 = shalt.err (!%p10374_p11)
}
  0x56   :  { %91 = dma.hbm_to_vmem [thread:$0]  %s13390_s9, 2048, %s86_s4, [#allocation12], %s10385_s14, %s10385_s14, %s10386_s15  }
  0x57   :  { %10378 = dma.done.wait [#allocation7], 7168  }
  0x58   :  { %10379 = vsyncadd [#allocation7], 4294960128 }
  0x59   :  { %10380 = dma.done.wait [#allocation9], 4096  }
  0x5a   :  { %10381 = vsyncadd [#allocation9], 4294963200 }
  0x5b   :  { %10382 = dma.done.wait [#allocation12], 4096  }
  0x5c   :  { %10383 = vsyncadd [#allocation12], 4294963200  ;;  %v10393_v1 = vmov 0   ;;  %v13408_v2 = vmov 0.0   ;;  %v113_v3 = vld [vmem:[%s13381_s0 + $0x10] sm:$0xff]  ;;  %v111_v4 = vld [vmem:[%s13381_s0] sm:$0xff] }
  0x5d   :  { %9691 = vset.pattern.permute.xlu1 %v10393_v1  ;;  %9690 = vset.pattern.permute.xlu0 %v10393_v1  ;;  %v114_v5 = vld [vmem:[%s13381_s0 + $0x18] sm:$0xff]  ;;  %v112_v6 = vld [vmem:[%s13381_s0 + $0x8] sm:$0xff]  ;;  %v115_v8 = vld [vmem:[%s13381_s0 + $0x20] sm:$0xff]  ;;  %vm410_vm0 = vcmask 1042432   ;;  %vm337_vm1 = vcmask 416768  }
  0x5e   :  { %499 = vmatprep.mubr.f32.mxu0 %v13408_v2  ;;  %1184 = vmatprep.mubr.f32.mxu1 %v13408_v2  ;;  %v116_v7 = vld [vmem:[%s13381_s0 + $0x28] sm:$0xff]  ;;  %v118_v9 = vld [vmem:[%s13381_s0 + $0x38] sm:$0xff]  ;;  %v117_v17 = vld [vmem:[%s13381_s0 + $0x30] sm:$0xff] }
  0x5f   :  { %144 = vperm.xlu1 %9691, %v113_v3   ;;  %138 = vperm.xlu0 %9690, %v111_v4   ;;  %v282_v10 = vld [vmem:[#allocation6 + $0x8] sm:$0xff]  ;;  %v281_v12 = vld [vmem:[#allocation6] sm:$0xff]  ;;  %v122_v31 = vld [vmem:[%s13381_s0 + $0x58] sm:$0xff] }
  0x60   :  { %v290_v11 = vld [vmem:[#allocation6 + $0x48] sm:$0xff]  ;;  %v289_v14 = vld [vmem:[#allocation6 + $0x40] sm:$0xff]  ;;  %v284_v34 = vld [vmem:[#allocation6 + $0x18] sm:$0xff] }
  0x61   :  { %v8663_v13 = vpack.c.bf16 %v290_v11, %v282_v10  ;;  %v298_v15 = vld [vmem:[#allocation6 + $0x88] sm:$0xff]  ;;  %v8665_v18 = vpack.c.bf16 %v289_v14, %v281_v12  ;;  %v297_v20 = vld [vmem:[#allocation6 + $0x80] sm:$0xff]  ;;  %v292_v35 = vld [vmem:[#allocation6 + $0x58] sm:$0xff] }
  0x62   :  { %v306_v16 = vld [vmem:[#allocation6 + $0xc8] sm:$0xff]  ;;  %v305_v21 = vld [vmem:[#allocation6 + $0xc0] sm:$0xff]  ;;  %v8675_v39 = vpack.c.bf16 %v292_v35, %v284_v34  ;;  %v126_v40 = vld [vmem:[%s13381_s0 + $0x78] sm:$0xff] }
  0x63   :  { %147 = vperm.xlu1 %9691, %v114_v5   ;;  %141 = vperm.xlu0 %9690, %v112_v6   ;;  %v8667_v19 = vpack.c.bf16 %v306_v16, %v298_v15  ;;  %v314_v22 = vld [vmem:[#allocation6 + $0x108] sm:$0xff]  ;;  %v8669_v24 = vpack.c.bf16 %v305_v21, %v297_v20  ;;  %v313_v25 = vld [vmem:[#allocation6 + $0x100] sm:$0xff]  ;;  %v288_v42 = vld [vmem:[#allocation6 + $0x38] sm:$0xff] }
  0x64   :  { %8664 = vmatprep.subr.bf16.mxu0 %v8663_v13  ;;  %v322_v23 = vld [vmem:[#allocation6 + $0x148] sm:$0xff]  ;;  %v321_v26 = vld [vmem:[#allocation6 + $0x140] sm:$0xff]  ;;  %v296_v43 = vld [vmem:[#allocation6 + $0x78] sm:$0xff] }
  0x65   :  { %8666 = vmatpush1.bf16.msra.mxu0 %v8665_v18  ;;  %v120_v27 = vld [vmem:[%s13381_s0 + $0x48] sm:$0xff]  ;;  %v119_v28 = vld [vmem:[%s13381_s0 + $0x40] sm:$0xff]  ;;  %v8671_v29 = vpack.c.bf16 %v322_v23, %v314_v22  ;;  %v8673_v30 = vpack.c.bf16 %v321_v26, %v313_v25  ;;  %v121_v32 = vld [vmem:[%s13381_s0 + $0x50] sm:$0xff]  ;;  %v10588_v44 = vpack.c.bf16 %v296_v43, %v288_v42 }
  0x66   :  { %8668 = vmatprep.subr.bf16.mxu0 %v8667_v19  ;;  %v330_v33 = vld [vmem:[#allocation6 + $0x188] sm:$0x7]  ;;  %v329_v36 = vld [vmem:[#allocation6 + $0x180] sm:$0x7]  ;;  %v125_v41 = vld [vmem:[%s13381_s0 + $0x70] sm:$0xff] }
  0x67   :  { %153 = vperm.xlu1 %9691, %v116_v7   ;;  %150 = vperm.xlu0 %9690, %v115_v8   ;;  %v124_v37 = vld [vmem:[%s13381_s0 + $0x68] sm:$0xff]  ;;  %v123_v38 = vld [vmem:[%s13381_s0 + $0x60] sm:$0xff]  ;;  %v287_v45 = vld [vmem:[#allocation6 + $0x30] sm:$0xff]  ;;  %v13394_v7 = vlaneseq }
  0x68   :  { %v295_v46 = vld [vmem:[#allocation6 + $0x70] sm:$0xff]  ;;  %v128_v47 = vld [vmem:[%s13381_s0 + $0x88] sm:$0xff]  ;;  %v127_v49 = vld [vmem:[%s13381_s0 + $0x80] sm:$0xff]  ;;  %9527 = vmatprep.subr.bf16.mxu1 %v10588_v44 }
  0x69   :  { %8670 = vmatpush1.bf16.msra.mxu0 %v8669_v24  ;;  %v10593_v48 = vpack.c.bf16 %v295_v46, %v287_v45  ;;  %v304_v50 = vld [vmem:[#allocation6 + $0xb8] sm:$0xff]  ;;  %v303_v53 = vld [vmem:[#allocation6 + $0xb0] sm:$0xff]  ;;  %v132_v0 = vld [vmem:[%s13381_s0 + $0xa8] sm:$0xff]  ;;  %v10639_v8 = vand.u32 127, %v13394_v7 }
  0x6a   :  { %8672 = vmatprep.subr.bf16.mxu0 %v8671_v29  ;;  %v312_v51 = vld [vmem:[#allocation6 + $0xf8] sm:$0xff]  ;;  %v311_v54 = vld [vmem:[#allocation6 + $0xf0] sm:$0xff]  ;;  %v286_v34 = vld [vmem:[#allocation6 + $0x28] sm:$0xff] }
  0x6b   :  { %159 = vperm.xlu1 %9691, %v118_v9   ;;  %156 = vperm.xlu0 %9690, %v117_v17   ;;  %v10600_v52 = vpack.c.bf16 %v312_v51, %v304_v50  ;;  %v10602_v55 = vpack.c.bf16 %v311_v54, %v303_v53  ;;  %v130_v56 = vld [vmem:[%s13381_s0 + $0x98] sm:$0xff]  ;;  %v129_v57 = vld [vmem:[%s13381_s0 + $0x90] sm:$0xff]  ;;  %v131_v1 = vld [vmem:[%s13381_s0 + $0xa0] sm:$0xff] }
  0x6c   :  { %9531 = vmatpush1.bf16.msra.mxu1 %v10593_v48  ;;  %v320_v58 = vld [vmem:[#allocation6 + $0x138] sm:$0xff]  ;;  %v319_v61 = vld [vmem:[#allocation6 + $0x130] sm:$0xff]  ;;  %v294_v35 = vld [vmem:[#allocation6 + $0x68] sm:$0xff] }
  0x6d   :  { %8674 = vmatpush1.bf16.msra.mxu0 %v8673_v30  ;;  %9528 = vmatprep.subr.bf16.mxu1 %v10600_v52  ;;  %v328_v59 = vld [vmem:[#allocation6 + $0x178] sm:$0xff]  ;;  %v327_v62 = vld [vmem:[#allocation6 + $0x170] sm:$0xff] }
  0x6e   :  { %8365 = vmatprep.subr.msk.mxu0 %vm410_vm0, %v330_v33  ;;  %v10612_v60 = vpack.c.bf16 %v328_v59, %v320_v58  ;;  %v10614_v63 = vpack.c.bf16 %v327_v62, %v319_v61  ;;  %v10624_v3 = vld [vmem:[#allocation6 + $0x1b8] sm:$0x7]  ;;  %v10626_v4 = vld [vmem:[#allocation6 + $0x1b0] sm:$0x7] }
  0x6f   :  { %165 = vperm.xlu1 %9691, %v120_v27   ;;  %162 = vperm.xlu0 %9690, %v119_v28   ;;  %v134_v5 = vld [vmem:[%s13381_s0 + $0xb8] sm:$0xff]  ;;  %v133_v6 = vld [vmem:[%s13381_s0 + $0xb0] sm:$0xff] }
  0x70   :  { %9532 = vmatpush1.bf16.msra.mxu1 %v10602_v55  ;;  %v283_v9 = vld [vmem:[#allocation6 + $0x10] sm:$0xff]  ;;  %v300_v11 = vld [vmem:[#allocation6 + $0x98] sm:$0xff] }
  0x71   :  { %8366 = vmatpush1.msk.msra.mxu0 %vm410_vm0, %v329_v36  ;;  %9529 = vmatprep.subr.bf16.mxu1 %v10612_v60  ;;  %v291_v10 = vld [vmem:[#allocation6 + $0x50] sm:$0xff]  ;;  %v308_v12 = vld [vmem:[#allocation6 + $0xd8] sm:$0xff] }
  0x72   :  { %8676 = vmatprep.subr.bf16.mxu0 %v8675_v39  ;;  %v8677_v15 = vpack.c.bf16 %v291_v10, %v283_v9  ;;  %v8679_v16 = vpack.c.bf16 %v308_v12, %v300_v11  ;;  %v299_v17 = vld [vmem:[#allocation6 + $0x90] sm:$0xff]  ;;  %v316_v20 = vld [vmem:[#allocation6 + $0x118] sm:$0xff]  ;;  %v8687_v39 = vpack.c.bf16 %v294_v35, %v286_v34  ;;  %v318_v34 = vld [vmem:[#allocation6 + $0x128] sm:$0xff] }
  0x73   :  { %171 = vperm.xlu1 %9691, %v122_v31   ;;  %168 = vperm.xlu0 %9690, %v121_v32   ;;  %v307_v18 = vld [vmem:[#allocation6 + $0xd0] sm:$0xff]  ;;  %v324_v21 = vld [vmem:[#allocation6 + $0x158] sm:$0xff]  ;;  %v326_v35 = vld [vmem:[#allocation6 + $0x168] sm:$0xff] }
  0x74   :  { %9533 = vmatpush1.bf16.msra.mxu1 %v10614_v63  ;;  %v8681_v24 = vpack.c.bf16 %v307_v18, %v299_v17  ;;  %v8683_v25 = vpack.c.bf16 %v324_v21, %v316_v20  ;;  %v315_v26 = vld [vmem:[#allocation6 + $0x110] sm:$0xff]  ;;  %v332_v33 = vld [vmem:[#allocation6 + $0x198] sm:$0x7] }
  0x75   :  { %9530 = vmatprep.subr.msk.mxu1 %vm410_vm0, %v10624_v3  ;;  %v323_v27 = vld [vmem:[#allocation6 + $0x150] sm:$0xff] }
  0x76   :  { %v8685_v32 = vpack.c.bf16 %v323_v27, %v315_v26  ;;  %v302_v26 = vld [vmem:[#allocation6 + $0xa8] sm:$0xff] }
  0x77   :  { %177 = vperm.xlu1 %9691, %v124_v37   ;;  %174 = vperm.xlu0 %9690, %v123_v38   ;;  %v331_v38 = vld [vmem:[#allocation6 + $0x190] sm:$0x7]  ;;  %v310_v27 = vld [vmem:[#allocation6 + $0xe8] sm:$0xff] }
  0x78   :  { %9534 = vmatpush1.msk.msra.mxu1 %vm410_vm0, %v10626_v4 }
  0x7b   :  { %183 = vperm.xlu1 %9691, %v126_v40   ;;  %180 = vperm.xlu0 %9690, %v125_v41  }
  0x7f   :  { %189 = vperm.xlu1 %9691, %v128_v47   ;;  %186 = vperm.xlu0 %9690, %v127_v49  }
  0x83   :  { %195 = vperm.xlu1 %9691, %v130_v56   ;;  %192 = vperm.xlu0 %9690, %v129_v57  }
  0x87   :  { %201 = vperm.xlu1 %9691, %v132_v0   ;;  %198 = vperm.xlu0 %9690, %v131_v1  }
  0x8b   :  { %207 = vperm.xlu1 %9691, %v134_v5   ;;  %204 = vperm.xlu0 %9690, %v133_v6  }
  0xde   :  { %v145_v13 = vpop.permute.xlu1 %144  ;;  %v139_v14 = vpop.permute.xlu0 %138 }
  0xdf   :  { %vm209_vm2 = vcmp.eq.s32.totalorder %v10639_v8, %v139_v14  ;;  %vm211_vm3 = vcmp.eq.s32.totalorder %v10639_v8, %v145_v13 }
  0xe0   :  { %v10643_v19 = vsel %vm209_vm2, 1.0, %v13408_v2  ;;  %v10656_v29 = vsel %vm211_vm3, 1.0, %v13408_v2 }
  0xe1   :  { %8367 = vmatmul.mubr.msk.f32.vlgmr.msra.gmra.mrb[0].mxu0 %vm337_vm1, %v10643_v19 }
  0xe2   :  { %8678 = vmatpush1.bf16.msra.mxu0 %v8677_v15  ;;  %v148_v22 = vpop.permute.xlu1 %147  ;;  %v142_v23 = vpop.permute.xlu0 %141  ;;  %505 = vmatprep.mubr.f32.mxu0 %v13408_v2 }
  0xe3   :  { %vm210_vm4 = vcmp.eq.s32.totalorder %v10639_v8, %v142_v23  ;;  %8680 = vmatprep.subr.bf16.mxu0 %v8679_v16  ;;  %vm212_vm5 = vcmp.eq.s32.totalorder %v10639_v8, %v148_v22 }
  0xe4   :  { %v10651_v28 = vsel %vm210_vm4, 1.0, %v13408_v2  ;;  %v10665_v40 = vsel %vm212_vm5, 1.0, %v13408_v2 }
  0xe5   :  { %8368 = vmatmul.mubr.msk.f32.gmra.mrb[2].mxu0 %vm337_vm1, %v10651_v28 }
  0xe6   :  { %v154_v30 = vpop.permute.xlu1 %153  ;;  %v151_v31 = vpop.permute.xlu0 %150  ;;  %511 = vmatprep.mubr.f32.mxu0 %v13408_v2  ;;  %8682 = vmatpush1.bf16.msra.mxu0 %v8681_v24 }
  0xe7   :  { %8684 = vmatprep.subr.bf16.mxu0 %v8683_v25  ;;  %vm213_vm6 = vcmp.eq.s32.totalorder %v10639_v8, %v151_v31  ;;  %vm214_vm7 = vcmp.eq.s32.totalorder %v10639_v8, %v154_v30  ;;  %v293_v25 = vld [vmem:[#allocation6 + $0x60] sm:$0xff]  ;;  %v8691_v31 = vpack.c.bf16 %v310_v27, %v302_v26 }
  0xe8   :  { %v10673_v43 = vsel %vm213_vm6, 1.0, %v13408_v2  ;;  %v10680_v47 = vsel %vm214_vm7, 1.0, %v13408_v2 }
  0xe9   :  { %8369 = vmatmul.mubr.msk.f32.gmra.mrb[4].mxu0 %vm337_vm1, %v10656_v29 }
  0xea   :  { %v160_v36 = vpop.permute.xlu1 %159  ;;  %v157_v37 = vpop.permute.xlu0 %156  ;;  %515 = vmatprep.mubr.f32.mxu0 %v13408_v2  ;;  %8686 = vmatpush1.bf16.msra.mxu0 %v8685_v32  ;;  %v301_v32 = vld [vmem:[#allocation6 + $0xa0] sm:$0xff] }
  0xeb   :  { %8391 = vmatprep.subr.msk.mxu0 %vm410_vm0, %v332_v33  ;;  %vm215_vm8 = vcmp.eq.s32.totalorder %v10639_v8, %v157_v37  ;;  %vm216_vm9 = vcmp.eq.s32.totalorder %v10639_v8, %v160_v36  ;;  %v309_v33 = vld [vmem:[#allocation6 + $0xe0] sm:$0xff]  ;;  %v8695_v37 = vpack.c.bf16 %v326_v35, %v318_v34 }
  0xec   :  { %v10687_v51 = vsel %vm215_vm8, 1.0, %v13408_v2  ;;  %v10694_v56 = vsel %vm216_vm9, 1.0, %v13408_v2  ;;  %v8693_v36 = vpack.c.bf16 %v309_v33, %v301_v32 }
  0xed   :  { %8370 = vmatmul.mubr.msk.f32.gmra.mrb[6].mxu0 %vm337_vm1, %v10665_v40 }
  0xee   :  { %v166_v41 = vpop.permute.xlu1 %165  ;;  %v163_v42 = vpop.permute.xlu0 %162  ;;  %521 = vmatprep.mubr.f32.mxu0 %v13408_v2  ;;  %8392 = vmatpush1.msk.msra.mxu0 %vm410_vm0, %v331_v38  ;;  %v317_v38 = vld [vmem:[#allocation6 + $0x120] sm:$0xff] }
  0xef   :  { %8688 = vmatprep.subr.bf16.mxu0 %v8687_v39  ;;  %vm217_vm10 = vcmp.eq.s32.totalorder %v10639_v8, %v163_v42  ;;  %vm218_vm11 = vcmp.eq.s32.totalorder %v10639_v8, %v166_v41  ;;  %v325_v39 = vld [vmem:[#allocation6 + $0x160] sm:$0xff]  ;;  %v334_v42 = vld [vmem:[#allocation6 + $0x1a8] sm:$0x7] }
  0xf0   :  { %v10701_v59 = vsel %vm217_vm10, 1.0, %v13408_v2  ;;  %v10710_v0 = vsel %vm218_vm11, 1.0, %v13408_v2  ;;  %v8697_v41 = vpack.c.bf16 %v325_v39, %v317_v38 }
  0xf1   :  { %8371 = vmatmul.mubr.msk.f32.gmra.mrb[8].mxu0 %vm337_vm1, %v10673_v43 }
  0xf2   :  { %v172_v45 = vpop.permute.xlu1 %171  ;;  %v169_v46 = vpop.permute.xlu0 %168  ;;  %527 = vmatprep.mubr.f32.mxu0 %v13408_v2 }
  0xf3   :  { %vm219_vm12 = vcmp.eq.s32.totalorder %v10639_v8, %v169_v46  ;;  %vm220_vm14 = vcmp.eq.s32.totalorder %v10639_v8, %v172_v45  ;;  %v333_v45 = vld [vmem:[#allocation6 + $0x1a0] sm:$0x7] }
  0xf4   :  { %v10718_v6 = vsel %vm219_vm12, 1.0, %v13408_v2  ;;  %v10732_v11 = vsel %vm220_vm14, 1.0, %v13408_v2  ;;  %vm1223_vm12 = vcmask 1046528   ;;  %vm1328_vm14 = vcmask 1045504  }
  0xf5   :  { %8372 = vmatmul.mubr.msk.f32.gmra.mrb[10].mxu0 %vm337_vm1, %v10680_v47 }
  0xf6   :  { %v178_v49 = vpop.permute.xlu1 %177  ;;  %v175_v50 = vpop.permute.xlu0 %174  ;;  %531 = vmatprep.mubr.f32.mxu0 %v13408_v2 }
  0xf7   :  { %vm221_vm2 = vcmp.eq.s32.totalorder %v10639_v8, %v175_v50  ;;  %vm222_vm4 = vcmp.eq.s32.totalorder %v10639_v8, %v178_v49 }
  0xf8   :  { %v10746_v14 = vsel %vm221_vm2, 1.0, %v13408_v2  ;;  %v10760_v16 = vsel %vm222_vm4, 1.0, %v13408_v2  ;;  %vm1708_vm2 = vcmask 1040384   ;;  %vm2546_vm4 = vcmask 1041409  }
  0xf9   :  { %8373 = vmatmul.mubr.msk.f32.gmra.mrb[12].mxu0 %vm337_vm1, %v10687_v51 }
  0xfa   :  { %v184_v53 = vpop.permute.xlu1 %183  ;;  %v181_v54 = vpop.permute.xlu0 %180  ;;  %537 = vmatprep.mubr.f32.mxu0 %v13408_v2 }
  0xfb   :  { %vm223_vm6 = vcmp.eq.s32.totalorder %v10639_v8, %v181_v54  ;;  %vm224_vm7 = vcmp.eq.s32.totalorder %v10639_v8, %v184_v53 }
  0xfc   :  { %v10773_v18 = vsel %vm223_vm6, 1.0, %v13408_v2  ;;  %v10780_v20 = vsel %vm224_vm7, 1.0, %v13408_v2  ;;  %vm2550_vm6 = vcmask 1043459   ;;  %vm2552_vm7 = vcmask 1044484  }
  0xfd   :  { %8374 = vmatmul.mubr.msk.f32.gmra.mrb[14].mxu0 %vm337_vm1, %v10694_v56 }
  0xfe   :  { %v190_v57 = vpop.permute.xlu1 %189  ;;  %v187_v58 = vpop.permute.xlu0 %186  ;;  %543 = vmatprep.mubr.f32.mxu0 %v13408_v2 }
  0xff   :  { %vm225_vm8 = vcmp.eq.s32.totalorder %v10639_v8, %v187_v58  ;;  %vm226_vm9 = vcmp.eq.s32.totalorder %v10639_v8, %v190_v57 }
 0x100   :  { %v10787_v21 = vsel %vm225_vm8, 1.0, %v13408_v2  ;;  %v10794_v22 = vsel %vm226_vm9, 1.0, %v13408_v2  ;;  %vm2554_vm8 = vcmask 1045509   ;;  %vm2556_vm9 = vcmask 1046534  }
 0x101   :  { %8375 = vmatmul.mubr.msk.f32.gmra.mrb[16].mxu0 %vm337_vm1, %v10701_v59 }
 0x102   :  { %v10706_v61 = vpop.permute.xlu1 %195  ;;  %v193_v62 = vpop.permute.xlu0 %192  ;;  %547 = vmatprep.mubr.f32.mxu0 %v13408_v2 }
 0x103   :  { %vm227_vm10 = vcmp.eq.s32.totalorder %v10639_v8, %v193_v62  ;;  %vm228_vm11 = vcmp.eq.s32.totalorder %v10639_v8, %v10706_v61 }
 0x104   :  { %v10801_v23 = vsel %vm227_vm10, 1.0, %v13408_v2  ;;  %v10809_v24 = vsel %vm228_vm11, 1.0, %v13408_v2  ;;  %vm2558_vm10 = vcmask 1047559   ;;  %vm8332_vm11 = vcmask 7168  }
 0x105   :  { %8376 = vmatmul.mubr.msk.f32.gmra.mrb[18].mxu0 %vm337_vm1, %v10710_v0 }
 0x106   :  { %v202_v1 = vpop.permute.xlu1 %201  ;;  %v199_v5 = vpop.permute.xlu0 %198  ;;  %553 = vmatprep.mubr.f32.mxu0 %v13408_v2 }
 0x107   :  { %vm229_vm13 = vcmp.eq.s32.totalorder %v10639_v8, %v199_v5  ;;  %vm230_vm15 = vcmp.eq.s32.totalorder %v10639_v8, %v202_v1 }
 0x108   :  { %v10721_v9 = vsel %vm229_vm13, 1.0, %v13408_v2  ;;  %v10735_v12 = vsel %vm230_vm15, 1.0, %v13408_v2  ;;  %vm1385_vm13 = vcmask 1044480   ;;  %vm1490_vm15 = vcmask 1043456  }
 0x109   :  { %8377 = vmatmul.mubr.msk.f32.gmra.mrb[20].mxu0 %vm337_vm1, %v10718_v6  ;;  %8465 = vmatmul.mubr.msk.f32.vlgmr.msra.gmra.mrb[0].mxu1 %vm337_vm1, %v10721_v9 }
 0x10a   :  { %v205_v10 = vpop.permute.xlu0 %204  ;;  %559 = vmatprep.mubr.f32.mxu0 %v13408_v2  ;;  %1190 = vmatprep.mubr.f32.mxu1 %v13408_v2  ;;  %v208_v13 = vpop.permute.xlu1 %207 }
 0x10b   :  { %vm231_vm3 = vcmp.eq.s32.totalorder %v10639_v8, %v205_v10  ;;  %vm232_vm5 = vcmp.eq.s32.totalorder %v10639_v8, %v208_v13  ;;  %v285_v8 = vld [vmem:[#allocation6 + $0x20] sm:$0xff] }
 0x10c   :  { %v10749_v15 = vsel %vm231_vm3, 1.0, %v13408_v2  ;;  %v10763_v17 = vsel %vm232_vm5, 1.0, %v13408_v2  ;;  %v8689_v30 = vpack.c.bf16 %v293_v25, %v285_v8  ;;  %vm1651_vm3 = vcmask 1041408  }
 0x10d   :  { %8378 = vmatmul.mubr.msk.f32.gmra.mrb[22].mxu0 %vm337_vm1, %v10732_v11  ;;  %8466 = vmatmul.mubr.msk.f32.gmra.mrb[2].mxu1 %vm337_vm1, %v10735_v12  ;;  %vm2548_vm5 = vcmask 1042434  }
 0x10e   :  { %563 = vmatprep.mubr.f32.mxu0 %v13408_v2  ;;  %1194 = vmatprep.mubr.f32.mxu1 %v13408_v2 }
 0x111   :  { %8379 = vmatmul.mubr.msk.f32.gmra.mrb[24].mxu0 %vm337_vm1, %v10746_v14  ;;  %8467 = vmatmul.mubr.msk.f32.gmra.mrb[4].mxu1 %vm337_vm1, %v10749_v15 }
 0x112   :  { %569 = vmatprep.mubr.f32.mxu0 %v13408_v2  ;;  %1200 = vmatprep.mubr.f32.mxu1 %v13408_v2 }
 0x115   :  { %8380 = vmatmul.mubr.msk.f32.gmra.mrb[26].mxu0 %vm337_vm1, %v10760_v16  ;;  %8468 = vmatmul.mubr.msk.f32.gmra.mrb[6].mxu1 %vm337_vm1, %v10763_v17 }
 0x116   :  { %575 = vmatprep.mubr.f32.mxu0 %v13408_v2  ;;  %2716 = vmatprep.mubr.f32.mxu1 %v13408_v2 }
 0x119   :  { %8381 = vmatmul.mubr.msk.f32.gmra.mrb[28].mxu0 %vm337_vm1, %v10773_v18 }
 0x11a   :  { %579 = vmatprep.mubr.f32.mxu0 %v13408_v2 }
 0x11d   :  { %8382 = vmatmul.mubr.msk.f32.gmra.mrb[30].mxu0 %vm337_vm1, %v10780_v20 }
 0x11e   :  { %585 = vmatprep.mubr.f32.mxu0 %v13408_v2 }
 0x121   :  { %8383 = vmatmul.mubr.msk.f32.gmra.mrb[32].mxu0 %vm337_vm1, %v10787_v21 }
 0x122   :  { %591 = vmatprep.mubr.f32.mxu0 %v13408_v2 }
 0x125   :  { %8384 = vmatmul.mubr.msk.f32.gmra.mrb[34].mxu0 %vm337_vm1, %v10794_v22 }
 0x126   :  { %595 = vmatprep.mubr.f32.mxu0 %v13408_v2 }
 0x129   :  { %8385 = vmatmul.mubr.msk.f32.gmra.mrb[36].mxu0 %vm337_vm1, %v10801_v23 }
 0x12a   :  { %601 = vmatprep.mubr.f32.mxu0 %v13408_v2 }
 0x12d   :  { %8386 = vmatmul.mubr.msk.f32.gmra.mrb[38].mxu0 %vm337_vm1, %v10809_v24 }
 0x12e   :  { %607 = vmatprep.mubr.f32.mxu0 %v13408_v2 }
 0x131   :  { %8387 = vmatmul.mubr.msk.f32.gmra.mrb[40].mxu0 %vm337_vm1, %v10721_v9 }
 0x132   :  { %611 = vmatprep.mubr.f32.mxu0 %v13408_v2 }
 0x135   :  { %8388 = vmatmul.mubr.msk.f32.gmra.mrb[42].mxu0 %vm337_vm1, %v10735_v12 }
 0x136   :  { %617 = vmatprep.mubr.f32.mxu0 %v13408_v2 }
 0x139   :  { %8389 = vmatmul.mubr.msk.f32.gmra.mrb[44].mxu0 %vm337_vm1, %v10749_v15 }
 0x13a   :  { %623 = vmatprep.mubr.f32.mxu0 %v13408_v2 }
 0x13d   :  { %8390 = vmatmul.mubr.msk.f32.gmra.mrb[46].mxu0 %vm337_vm1, %v10763_v17 }
 0x13e   :  { %692 = vmatprep.mubr.f32.mxu0 %v13408_v2 }
 0x141   :  { %8393 = vmatmul.mubr.msk.f32.vlgmr.msra.gmra.mrb[48].mxu0 %vm337_vm1, %v10643_v19 }
 0x142   :  { %8690 = vmatpush1.bf16.msra.mxu0 %v8689_v30  ;;  %698 = vmatprep.mubr.f32.mxu0 %v13408_v2 }
 0x143   :  { %8692 = vmatprep.subr.bf16.mxu0 %v8691_v31 }
 0x145   :  { %8394 = vmatmul.mubr.msk.f32.gmra.mrb[50].mxu0 %vm337_vm1, %v10651_v28 }
 0x146   :  { %704 = vmatprep.mubr.f32.mxu0 %v13408_v2  ;;  %8694 = vmatpush1.bf16.msra.mxu0 %v8693_v36 }
 0x147   :  { %8696 = vmatprep.subr.bf16.mxu0 %v8695_v37 }
 0x149   :  { %8395 = vmatmul.mubr.msk.f32.gmra.mrb[52].mxu0 %vm337_vm1, %v10656_v29 }
 0x14a   :  { %708 = vmatprep.mubr.f32.mxu0 %v13408_v2  ;;  %8698 = vmatpush1.bf16.msra.mxu0 %v8697_v41 }
 0x14b   :  { %8417 = vmatprep.subr.msk.mxu0 %vm410_vm0, %v334_v42 }
 0x14d   :  { %8396 = vmatmul.mubr.msk.f32.gmra.mrb[54].mxu0 %vm337_vm1, %v10665_v40 }
 0x14e   :  { %714 = vmatprep.mubr.f32.mxu0 %v13408_v2  ;;  %8418 = vmatpush1.msk.msra.mxu0 %vm410_vm0, %v333_v45 }
 0x14f   :  { %8700 = vmatprep.subr.bf16.mxu0 %v10588_v44 }
 0x151   :  { %8397 = vmatmul.mubr.msk.f32.gmra.mrb[56].mxu0 %vm337_vm1, %v10673_v43 }
 0x152   :  { %720 = vmatprep.mubr.f32.mxu0 %v13408_v2 }
 0x155   :  { %8398 = vmatmul.mubr.msk.f32.gmra.mrb[58].mxu0 %vm337_vm1, %v10680_v47 }
 0x156   :  { %724 = vmatprep.mubr.f32.mxu0 %v13408_v2 }
 0x159   :  { %8399 = vmatmul.mubr.msk.f32.gmra.mrb[60].mxu0 %vm337_vm1, %v10687_v51 }
 0x15a   :  { %730 = vmatprep.mubr.f32.mxu0 %v13408_v2 }
 0x15d   :  { %8400 = vmatmul.mubr.msk.f32.gmra.mrb[62].mxu0 %vm337_vm1, %v10694_v56 }
 0x15e   :  { %736 = vmatprep.mubr.f32.mxu0 %v13408_v2 }
 0x161   :  { %8401 = vmatmul.mubr.msk.f32.gmra.mrb[64].mxu0 %vm337_vm1, %v10701_v59 }
 0x162   :  { %740 = vmatprep.mubr.f32.mxu0 %v13408_v2 }
 0x165   :  { %8402 = vmatmul.mubr.msk.f32.gmra.mrb[66].mxu0 %vm337_vm1, %v10710_v0 }
 0x166   :  { %746 = vmatprep.mubr.f32.mxu0 %v13408_v2 }
 0x169   :  { %8403 = vmatmul.mubr.msk.f32.gmra.mrb[68].mxu0 %vm337_vm1, %v10718_v6 }
 0x16a   :  { %752 = vmatprep.mubr.f32.mxu0 %v13408_v2 }
 0x16d   :  { %8404 = vmatmul.mubr.msk.f32.gmra.mrb[70].mxu0 %vm337_vm1, %v10732_v11 }
 0x16e   :  { %756 = vmatprep.mubr.f32.mxu0 %v13408_v2 }
 0x171   :  { %8405 = vmatmul.mubr.msk.f32.gmra.mrb[72].mxu0 %vm337_vm1, %v10746_v14 }
 0x172   :  { %762 = vmatprep.mubr.f32.mxu0 %v13408_v2 }
 0x175   :  { %8406 = vmatmul.mubr.msk.f32.gmra.mrb[74].mxu0 %vm337_vm1, %v10760_v16 }
 0x176   :  { %768 = vmatprep.mubr.f32.mxu0 %v13408_v2 }
 0x179   :  { %8407 = vmatmul.mubr.msk.f32.gmra.mrb[76].mxu0 %vm337_vm1, %v10773_v18 }
 0x17a   :  { %772 = vmatprep.mubr.f32.mxu0 %v13408_v2 }
 0x17d   :  { %8408 = vmatmul.mubr.msk.f32.gmra.mrb[78].mxu0 %vm337_vm1, %v10780_v20 }
 0x17e   :  { %778 = vmatprep.mubr.f32.mxu0 %v13408_v2 }
 0x181   :  { %8409 = vmatmul.mubr.msk.f32.gmra.mrb[80].mxu0 %vm337_vm1, %v10787_v21 }
 0x182   :  { %784 = vmatprep.mubr.f32.mxu0 %v13408_v2 }
 0x185   :  { %8410 = vmatmul.mubr.msk.f32.gmra.mrb[82].mxu0 %vm337_vm1, %v10794_v22 }
 0x186   :  { %788 = vmatprep.mubr.f32.mxu0 %v13408_v2 }
 0x189   :  { %8411 = vmatmul.mubr.msk.f32.gmra.mrb[84].mxu0 %vm337_vm1, %v10801_v23 }
 0x18a   :  { %794 = vmatprep.mubr.f32.mxu0 %v13408_v2 }
 0x18d   :  { %8412 = vmatmul.mubr.msk.f32.gmra.mrb[86].mxu0 %vm337_vm1, %v10809_v24 }
 0x18e   :  { %800 = vmatprep.mubr.f32.mxu0 %v13408_v2 }
 0x191   :  { %8413 = vmatmul.mubr.msk.f32.gmra.mrb[88].mxu0 %vm337_vm1, %v10721_v9 }
 0x192   :  { %804 = vmatprep.mubr.f32.mxu0 %v13408_v2 }
 0x195   :  { %8414 = vmatmul.mubr.msk.f32.gmra.mrb[90].mxu0 %vm337_vm1, %v10735_v12 }
 0x196   :  { %810 = vmatprep.mubr.f32.mxu0 %v13408_v2 }
 0x199   :  { %8415 = vmatmul.mubr.msk.f32.gmra.mrb[92].mxu0 %vm337_vm1, %v10749_v15 }
 0x19a   :  { %816 = vmatprep.mubr.f32.mxu0 %v13408_v2 }
 0x19d   :  { %8416 = vmatmul.mubr.msk.f32.gmra.mrb[94].mxu0 %vm337_vm1, %v10763_v17 }
 0x19e   :  { %885 = vmatprep.mubr.f32.mxu0 %v13408_v2 }
 0x1a1   :  { %8419 = vmatmul.mubr.msk.f32.vlgmr.msra.gmra.mrb[96].mxu0 %vm337_vm1, %v10643_v19 }
 0x1a2   :  { %8702 = vmatpush1.bf16.msra.mxu0 %v10593_v48  ;;  %889 = vmatprep.mubr.f32.mxu0 %v13408_v2 }
 0x1a3   :  { %8704 = vmatprep.subr.bf16.mxu0 %v10600_v52 }
 0x1a5   :  { %8420 = vmatmul.mubr.msk.f32.gmra.mrb[98].mxu0 %vm337_vm1, %v10651_v28 }
 0x1a6   :  { %895 = vmatprep.mubr.f32.mxu0 %v13408_v2  ;;  %8706 = vmatpush1.bf16.msra.mxu0 %v10602_v55 }
 0x1a7   :  { %8708 = vmatprep.subr.bf16.mxu0 %v10612_v60 }
 0x1a9   :  { %8421 = vmatmul.mubr.msk.f32.gmra.mrb[100].mxu0 %vm337_vm1, %v10656_v29 }
 0x1aa   :  { %901 = vmatprep.mubr.f32.mxu0 %v13408_v2  ;;  %8710 = vmatpush1.bf16.msra.mxu0 %v10614_v63 }
 0x1ab   :  { %8443 = vmatprep.subr.msk.mxu0 %vm410_vm0, %v10624_v3 }
 0x1ad   :  { %8422 = vmatmul.mubr.msk.f32.gmra.mrb[102].mxu0 %vm337_vm1, %v10665_v40 }
 0x1ae   :  { %905 = vmatprep.mubr.f32.mxu0 %v13408_v2  ;;  %8444 = vmatpush1.msk.msra.mxu0 %vm410_vm0, %v10626_v4 }
 0x1b1   :  { %8423 = vmatmul.mubr.msk.f32.gmra.mrb[104].mxu0 %vm337_vm1, %v10673_v43 }
 0x1b2   :  { %911 = vmatprep.mubr.f32.mxu0 %v13408_v2 }
 0x1b4   :  { %v10925_v44 = vpop.f32.mrb[0].mxu0 }
 0x1b5   :  { %v503_v48 = vpop.f32.mrb[1].mxu0  ;;  %8424 = vmatmul.mubr.msk.f32.gmra.mrb[106].mxu0 %vm337_vm1, %v10680_v47  ;;  %v1224_v63 = vrot.slane %v10925_v44, 1 }
 0x1b6   :  { %917 = vmatprep.mubr.f32.mxu0 %v13408_v2  ;;  %v1329_v3 = vrot.slane %v503_v48, 2  ;;  %v1386_v49 = vrot.slane %v503_v48, 3 }
 0x1b8   :  { %v10930_v52 = vpop.f32.mrb[2].mxu0 }
 0x1b9   :  { %v1225_v55 = vrot.slane %v10930_v52, 1  ;;  %v10933_v60 = vpop.f32.mrb[3].mxu0  ;;  %8425 = vmatmul.mubr.msk.f32.gmra.mrb[108].mxu0 %vm337_vm1, %v10687_v51 }
 0x1ba   :  { %v13397_v4 = vrot.slane %v10933_v60, 2  ;;  %v13407_v46 = vrot.slane %v10933_v60, 3  ;;  %921 = vmatprep.mubr.f32.mxu0 %v13408_v2 }
 0x1bb   :  { %v1226_v50 = vsel %vm1223_vm12, %v1224_v63, %v1225_v55 }
 0x1bc   :  { %1248 = vrot.lane.b32.xlu0 %v1226_v50, %s10390_s19  ;;  %v513_v53 = vpop.f32.mrb[4].mxu0  ;;  %v1388_v54 = vsel %vm1385_vm13, %v1386_v49, %v13407_v46  ;;  %v10951_v57 = vsel %vm1328_vm14, %v1329_v3, %v13397_v4  ;;  %v13468_v46 = vmov 0.0  }
 0x1bd   :  { %v514_v58 = vpop.f32.mrb[5].mxu0  ;;  %8426 = vmatmul.mubr.msk.f32.gmra.mrb[110].mxu0 %vm337_vm1, %v10694_v56 }
 0x1be   :  { %927 = vmatprep.mubr.f32.mxu0 %v13408_v2 }
 0x1c0   :  { %1410 = vrot.lane.b32.xlu0 %v1388_v54, %s10390_s19  ;;  %v10957_v61 = vpop.f32.mrb[6].mxu0 }
 0x1c1   :  { %v519_v62 = vpop.f32.mrb[7].mxu0  ;;  %8427 = vmatmul.mubr.msk.f32.gmra.mrb[112].mxu0 %vm337_vm1, %v10701_v59  ;;  %v1227_v5 = vrot.slane %v10957_v61, 1 }
 0x1c2   :  { %933 = vmatprep.mubr.f32.mxu0 %v13408_v2  ;;  %v1332_v8 = vrot.slane %v519_v62, 2  ;;  %v1389_v25 = vrot.slane %v519_v62, 3 }
 0x1c4   :  { %v10962_v1 = vpop.f32.mrb[8].mxu0 }
 0x1c5   :  { %v13406_v10 = vrot.slane %v10962_v1, 1  ;;  %v10966_v13 = vpop.f32.mrb[9].mxu0  ;;  %8428 = vmatmul.mubr.msk.f32.gmra.mrb[114].mxu0 %vm337_vm1, %v10710_v0 }
 0x1c6   :  { %v13396_v26 = vrot.slane %v10966_v13, 2  ;;  %v13405_v27 = vrot.slane %v10966_v13, 3  ;;  %937 = vmatprep.mubr.f32.mxu0 %v13408_v2 }
 0x1c7   :  { %v10976_v30 = vsel %vm1223_vm12, %v1227_v5, %v13406_v10 }
 0x1c8   :  { %v529_v31 = vpop.f32.mrb[10].mxu0  ;;  %v10981_v32 = vsel %vm1385_vm13, %v1389_v25, %v13405_v27  ;;  %v10986_v33 = vsel %vm1328_vm14, %v1332_v8, %v13396_v26 }
 0x1c9   :  { %v530_v34 = vpop.f32.mrb[11].mxu0  ;;  %8429 = vmatmul.mubr.msk.f32.gmra.mrb[116].mxu0 %vm337_vm1, %v10718_v6 }
 0x1ca   :  { %943 = vmatprep.mubr.f32.mxu0 %v13408_v2 }
 0x1cc   :  { %v10991_v35 = vpop.f32.mrb[12].mxu0 }
 0x1cd   :  { %13459 = vst [vmem:[#allocation17_spill] sm:$0xff] %v10991_v35  ;;  %v535_v36 = vpop.f32.mrb[13].mxu0  ;;  %8430 = vmatmul.mubr.msk.f32.gmra.mrb[118].mxu0 %vm337_vm1, %v10732_v11  ;;  %v1230_v38 = vrot.slane %v10991_v35, 1 }
 0x1ce   :  { %949 = vmatprep.mubr.f32.mxu0 %v13408_v2  ;;  %v1335_v42 = vrot.slane %v535_v36, 2  ;;  %v1392_v45 = vrot.slane %v535_v36, 3 }
 0x1d0   :  { %v10996_v37 = vpop.f32.mrb[14].mxu0 }
 0x1d1   :  { %v13404_v39 = vrot.slane %v10996_v37, 1  ;;  %v11000_v41 = vpop.f32.mrb[15].mxu0  ;;  %8431 = vmatmul.mubr.msk.f32.gmra.mrb[120].mxu0 %vm337_vm1, %v10746_v14 }
 0x1d2   :  { %v13395_v48 = vrot.slane %v11000_v41, 2  ;;  %v13398_v63 = vrot.slane %v11000_v41, 3  ;;  %953 = vmatprep.mubr.f32.mxu0 %v13408_v2 }
 0x1d3   :  { %v11010_v3 = vsel %vm1223_vm12, %v1230_v38, %v13404_v39 }
 0x1d4   :  { %v545_v49 = vpop.f32.mrb[16].mxu0  ;;  %v11015_v50 = vsel %vm1385_vm13, %v1392_v45, %v13398_v63  ;;  %v11020_v53 = vsel %vm1328_vm14, %v1335_v42, %v13395_v48 }
 0x1d5   :  { %13460 = vst [vmem:[#allocation18_spill] sm:$0xff] %v11020_v53  ;;  %v546_v54 = vpop.f32.mrb[17].mxu0  ;;  %8432 = vmatmul.mubr.msk.f32.gmra.mrb[122].mxu0 %vm337_vm1, %v10760_v16 }
 0x1d6   :  { %959 = vmatprep.mubr.f32.mxu0 %v13408_v2 }
 0x1d8   :  { %v11025_v58 = vpop.f32.mrb[18].mxu0 }
 0x1d9   :  { %13461 = vst [vmem:[#allocation19_spill] sm:$0xff] %v11025_v58  ;;  %v551_v62 = vpop.f32.mrb[19].mxu0  ;;  %8433 = vmatmul.mubr.msk.f32.gmra.mrb[124].mxu0 %vm337_vm1, %v10773_v18  ;;  %v1233_v25 = vrot.slane %v11025_v58, 1 }
 0x1da   :  { %965 = vmatprep.mubr.f32.mxu0 %v13408_v2  ;;  %v1338_v42 = vrot.slane %v551_v62, 2  ;;  %v1395_v45 = vrot.slane %v551_v62, 3 }
 0x1dc   :  { %v11030_v5 = vpop.f32.mrb[20].mxu0  ;;  %v11032_v8 = vpop.f32.mrb[0].mxu1 }
 0x1dd   :  { %13462 = vst [vmem:[#allocation20_spill] sm:$0xff] %v11032_v8  ;;  %v13403_v31 = vrot.slane %v11030_v5, 1  ;;  %v11036_v34 = vpop.f32.mrb[21].mxu0  ;;  %8434 = vmatmul.mubr.msk.f32.gmra.mrb[126].mxu0 %vm337_vm1, %v10780_v20  ;;  %v11040_v36 = vpop.f32.mrb[1].mxu1  ;;  %v13399_v38 = vrot.slane %v11032_v8, 5 }
 0x1de   :  { %13463 = vst [vmem:[#allocation21_spill] sm:$0xff] %v11040_v36  ;;  %v13401_v49 = vrot.slane %v11036_v34, 2  ;;  %v13402_v54 = vrot.slane %v11036_v34, 3  ;;  %969 = vmatprep.mubr.f32.mxu0 %v13408_v2 }
 0x1df   :  { %2199 = vrot.lane.b32.xlu1 %v13399_v38, %s10390_s19  ;;  %v11052_v7 = vsel %vm1223_vm12, %v1233_v25, %v13403_v31  ;;  %v13400_v25 = vrot.slane %v11040_v36, 7 }
 0x1e0   :  { %v561_v48 = vpop.f32.mrb[22].mxu0  ;;  %v1192_v26 = vpop.f32.mrb[2].mxu1  ;;  %v11057_v62 = vsel %vm1385_vm13, %v1395_v45, %v13402_v54  ;;  %v11062_v4 = vsel %vm1328_vm14, %v1338_v42, %v13401_v49 }
 0x1e1   :  { %13464 = vst [vmem:[#allocation22_spill] sm:$0xff] %v11062_v4  ;;  %v562_v63 = vpop.f32.mrb[23].mxu0  ;;  %8435 = vmatmul.mubr.msk.f32.gmra.mrb[128].mxu0 %vm337_vm1, %v10787_v21  ;;  %v1193_v38 = vpop.f32.mrb[3].mxu1 }
 0x1e2   :  { %975 = vmatprep.mubr.f32.mxu0 %v13408_v2 }
 0x1e3   :  { %2359 = vrot.lane.b32.xlu1 %v13400_v25, %s10390_s19 }
 0x1e4   :  { %v11071_v26 = vpop.f32.mrb[24].mxu0  ;;  %v1196_v48 = vpop.f32.mrb[4].mxu1 }
 0x1e5   :  { %13465 = vst [vmem:[#allocation23_spill] sm:$0xff] %v11071_v26  ;;  %v567_v45 = vpop.f32.mrb[25].mxu0  ;;  %8436 = vmatmul.mubr.msk.f32.gmra.mrb[130].mxu0 %vm337_vm1, %v10794_v22  ;;  %v1198_v63 = vpop.f32.mrb[5].mxu1  ;;  %v1236_v38 = vrot.slane %v11071_v26, 1  ;;  %v2114_v42 = vrot.slane %v1196_v48, 4  ;;  %v2170_v25 = vrot.slane %v1196_v48, 5 }
 0x1e6   :  { %981 = vmatprep.mubr.f32.mxu0 %v13408_v2  ;;  %v1341_v49 = vrot.slane %v567_v45, 2  ;;  %v1398_v54 = vrot.slane %v567_v45, 3  ;;  %v2274_v31 = vrot.slane %v1198_v63, 6  ;;  %v2330_v10 = vrot.slane %v1198_v63, 7 }
 0x1e7   :  { %1250 = vrot.lane.b32.xlu1 %v1225_v55, %s10390_s19  ;;  %v13469_v2 = vrot.slane %v10933_v60, 3 }
 0x1e8   :  { %v11080_v39 = vpop.f32.mrb[26].mxu0  ;;  %v11082_v27 = vpop.f32.mrb[6].mxu1 }
 0x1e9   :  { %13466 = vst [vmem:[#allocation24_spill] sm:$0xff] %v11082_v27  ;;  %v2171_v36 = vrot.slane %v11082_v27, 5  ;;  %v11087_v8 = vpop.f32.mrb[27].mxu0  ;;  %8437 = vmatmul.mubr.msk.f32.gmra.mrb[132].mxu0 %vm337_vm1, %v10801_v23  ;;  %v11091_v55 = vpop.f32.mrb[7].mxu1  ;;  %v13470_v58 = vrot.slane %v11080_v39, 1  ;;  %v13471_v48 = vrot.slane %v11082_v27, 4 }
 0x1ea   :  { %13467 = vst [vmem:[#allocation25_spill] sm:$0xff] %v11091_v55  ;;  %985 = vmatprep.mubr.f32.mxu0 %v13468_v46  ;;  %v13473_v63 = vrot.slane %v11087_v8, 3 }
 0x1eb   :  { %1412 = vrot.lane.b32.xlu1 %v13469_v2, %s10390_s19  ;;  %v2172_v4 = vsel %vm410_vm0, %v2170_v25, %v2171_v36  ;;  %v11105_v53 = vsel %vm1223_vm12, %v1236_v38, %v13470_v58  ;;  %v11110_v45 = vsel %vm1490_vm15, %v2114_v42, %v13471_v48  ;;  %v13474_v2 = vrot.slane %v11087_v8, 2 }
 0x1ec   :  { %13472 = vst [vmem:[#allocation26_spill] sm:$0xff] %v11110_v45  ;;  %v577_v26 = vpop.f32.mrb[28].mxu0  ;;  %2201 = vrot.lane.b32.xlu0 %v2172_v4, %s10390_s19  ;;  %v11116_v35 = vsel %vm1385_vm13, %v1398_v54, %v13473_v63  ;;  %v13475_v58 = vrot.slane %v11091_v55, 7  ;;  %v13477_v42 = vrot.slane %v11091_v55, 6 }
 0x1ed   :  { %v11121_v25 = vsel %vm1328_vm14, %v1341_v49, %v13474_v2  ;;  %v578_v4 = vpop.f32.mrb[29].mxu0  ;;  %8438 = vmatmul.mubr.msk.f32.gmra.mrb[134].mxu0 %vm337_vm1, %v10809_v24 }
 0x1ee   :  { %v11126_v38 = vsel %vm1708_vm2, %v2330_v10, %v13475_v58  ;;  %v11131_v26 = vsel %vm1651_vm3, %v2274_v31, %v13477_v42  ;;  %991 = vmatprep.mubr.f32.mxu0 %v13468_v46  ;;  %v13479_v31 = vrot.slane %v10962_v1, 1 }
 0x1ef   :  { %13476 = vst [vmem:[#allocation27_spill] sm:$0xff] %v11126_v38  ;;  %13478 = vst [vmem:[#allocation28_spill] sm:$0xff] %v11131_v26  ;;  %2203 = vrot.lane.b32.xlu1 %v2171_v36, %s10390_s19 }
 0x1f0   :  { %v11137_v49 = vpop.f32.mrb[30].mxu0  ;;  %1252 = vrot.lane.b32.xlu0 %v10976_v30, %s10390_s19 }
 0x1f1   :  { %v583_v10 = vpop.f32.mrb[31].mxu0  ;;  %8439 = vmatmul.mubr.msk.f32.gmra.mrb[136].mxu0 %vm337_vm1, %v10721_v9  ;;  %v1239_v36 = vrot.slane %v11137_v49, 1 }
 0x1f2   :  { %997 = vmatprep.mubr.f32.mxu0 %v13468_v46  ;;  %v1344_v9 = vrot.slane %v583_v10, 2  ;;  %v1401_v63 = vrot.slane %v583_v10, 3 }
 0x1f3   :  { %1254 = vrot.lane.b32.xlu1 %v13479_v31, %s10390_s19 }
 0x1f4   :  { %v11147_v54 = vpop.f32.mrb[32].mxu0  ;;  %1414 = vrot.lane.b32.xlu0 %v10981_v32, %s10390_s19  ;;  %v13480_v32 = vrot.slane %v10966_v13, 3 }
 0x1f5   :  { %v13419_v48 = vrot.slane %v11147_v54, 1  ;;  %v11153_v30 = vpop.f32.mrb[33].mxu0  ;;  %8440 = vmatmul.mubr.msk.f32.gmra.mrb[138].mxu0 %vm337_vm1, %v10735_v12 }
 0x1f6   :  { %v13417_v2 = vrot.slane %v11153_v30, 2  ;;  %v13418_v58 = vrot.slane %v11153_v30, 3  ;;  %1001 = vmatprep.mubr.f32.mxu0 %v13468_v46 }
 0x1f7   :  { %1416 = vrot.lane.b32.xlu1 %v13480_v32, %s10390_s19  ;;  %v1241_v42 = vsel %vm1223_vm12, %v1239_v36, %v13419_v48  ;;  %v13481_v36 = vrot.slane %v10996_v37, 1 }
 0x1f8   :  { %v593_v4 = vpop.f32.mrb[34].mxu0  ;;  %1256 = vrot.lane.b32.xlu0 %v11010_v3, %s10390_s19  ;;  %v1403_v12 = vsel %vm1385_vm13, %v1401_v63, %v13418_v58  ;;  %v11174_v10 = vsel %vm1328_vm14, %v1344_v9, %v13417_v2 }
 0x1f9   :  { %v594_v31 = vpop.f32.mrb[35].mxu0  ;;  %8441 = vmatmul.mubr.msk.f32.gmra.mrb[140].mxu0 %vm337_vm1, %v10749_v15  ;;  %v13482_v15 = vrot.slane %v11000_v41, 3 }
 0x1fa   :  { %1007 = vmatprep.mubr.f32.mxu0 %v13468_v46 }
 0x1fb   :  { %1258 = vrot.lane.b32.xlu1 %v13481_v36, %s10390_s19 }
 0x1fc   :  { %v11182_v3 = vpop.f32.mrb[36].mxu0  ;;  %1418 = vrot.lane.b32.xlu0 %v11015_v50, %s10390_s19 }
 0x1fd   :  { %v599_v63 = vpop.f32.mrb[37].mxu0  ;;  %8442 = vmatmul.mubr.msk.f32.gmra.mrb[142].mxu0 %vm337_vm1, %v10763_v17  ;;  %v1242_v32 = vrot.slane %v11182_v3, 1 }
 0x1fe   :  { %1078 = vmatprep.mubr.f32.mxu0 %v13468_v46  ;;  %v1347_v17 = vrot.slane %v599_v63, 2  ;;  %v1404_v31 = vrot.slane %v599_v63, 3 }
 0x1ff   :  { %1420 = vrot.lane.b32.xlu1 %v13482_v15, %s10390_s19 }
 0x200   :  { %v11192_v9 = vpop.f32.mrb[38].mxu0  ;;  %1260 = vrot.lane.b32.xlu0 %v11052_v7, %s10390_s19  ;;  %v13483_v7 = vrot.slane %v11030_v5, 1 }
 0x201   :  { %v13422_v4 = vrot.slane %v11192_v9, 1  ;;  %v11198_v50 = vpop.f32.mrb[39].mxu0  ;;  %8445 = vmatmul.mubr.msk.f32.vlgmr.msra.gmra.mrb[144].mxu0 %vm337_vm1, %v10643_v19 }
 0x202   :  { %v13420_v36 = vrot.slane %v11198_v50, 2  ;;  %v13421_v15 = vrot.slane %v11198_v50, 3  ;;  %1082 = vmatprep.mubr.f32.mxu0 %v13468_v46 }
 0x203   :  { %1262 = vrot.lane.b32.xlu1 %v13483_v7, %s10390_s19  ;;  %v1244_v2 = vsel %vm1223_vm12, %v1242_v32, %v13422_v4 }
 0x204   :  { %v609_v58 = vpop.f32.mrb[40].mxu0  ;;  %1422 = vrot.lane.b32.xlu0 %v11057_v62, %s10390_s19  ;;  %v1406_v19 = vsel %vm1385_vm13, %v1404_v31, %v13421_v15  ;;  %v11219_v63 = vsel %vm1328_vm14, %v1347_v17, %v13420_v36 }
 0x205   :  { %v610_v48 = vpop.f32.mrb[41].mxu0  ;;  %8446 = vmatmul.mubr.msk.f32.gmra.mrb[146].mxu0 %vm337_vm1, %v10651_v28  ;;  %v13484_v58 = vrot.slane %v11036_v34, 3  ;;  %v13485_v28 = vrot.slane %v11080_v39, 1 }
 0x206   :  { %1088 = vmatprep.mubr.f32.mxu0 %v13468_v46 }
 0x207   :  { %1424 = vrot.lane.b32.xlu1 %v13484_v58, %s10390_s19 }
 0x208   :  { %v11227_v62 = vpop.f32.mrb[42].mxu0  ;;  %1264 = vrot.lane.b32.xlu0 %v11105_v53, %s10390_s19 }
 0x209   :  { %v615_v32 = vpop.f32.mrb[43].mxu0  ;;  %8447 = vmatmul.mubr.msk.f32.gmra.mrb[148].mxu0 %vm337_vm1, %v10656_v29  ;;  %v1245_v17 = vrot.slane %v11227_v62, 1 }
 0x20a   :  { %1094 = vmatprep.mubr.f32.mxu0 %v13468_v46  ;;  %v1350_v29 = vrot.slane %v615_v32, 2  ;;  %v1407_v7 = vrot.slane %v615_v32, 3 }
 0x20b   :  { %1266 = vrot.lane.b32.xlu1 %v13485_v28, %s10390_s19 }
 0x20c   :  { %1426 = vrot.lane.b32.xlu0 %v11116_v35, %s10390_s19  ;;  %v11239_v48 = vpop.f32.mrb[44].mxu0  ;;  %v13486_v35 = vrot.slane %v11087_v8, 3 }
 0x20d   :  { %v1246_v31 = vrot.slane %v11239_v48, 1  ;;  %v11243_v53 = vpop.f32.mrb[45].mxu0  ;;  %8448 = vmatmul.mubr.msk.f32.gmra.mrb[150].mxu0 %vm337_vm1, %v10665_v40 }
 0x20e   :  { %v13423_v58 = vrot.slane %v11243_v53, 2  ;;  %v1408_v28 = vrot.slane %v11243_v53, 3  ;;  %1098 = vmatprep.mubr.f32.mxu0 %v13468_v46 }
 0x20f   :  { %1428 = vrot.lane.b32.xlu1 %v13486_v35, %s10390_s19  ;;  %v1247_v36 = vsel %vm1223_vm12, %v1245_v17, %v1246_v31  ;;  %v13487_v35 = vrot.slane %v11147_v54, 1  ;;  %v13488_v17 = vrot.slane %v11153_v30, 3 }
 0x210   :  { %1268 = vrot.lane.b32.xlu0 %v1241_v42, %s10390_s19  ;;  %v625_v15 = vpop.f32.mrb[46].mxu0  ;;  %v1409_v4 = vsel %vm1385_vm13, %v1407_v7, %v1408_v28  ;;  %v11259_v40 = vsel %vm1328_vm14, %v1350_v29, %v13423_v58 }
 0x211   :  { %v626_v32 = vpop.f32.mrb[47].mxu0  ;;  %8449 = vmatmul.mubr.msk.f32.gmra.mrb[152].mxu0 %vm337_vm1, %v10673_v43 }
 0x212   :  { %1104 = vmatprep.mubr.f32.mxu0 %v13468_v46 }
 0x213   :  { %1270 = vrot.lane.b32.xlu1 %v13487_v35, %s10390_s19 }
 0x214   :  { %1430 = vrot.lane.b32.xlu0 %v1403_v12, %s10390_s19  ;;  %v694_v42 = vpop.f32.mrb[48].mxu0 }
 0x215   :  { %v696_v15 = vpop.f32.mrb[49].mxu0  ;;  %8450 = vmatmul.mubr.msk.f32.gmra.mrb[154].mxu0 %vm337_vm1, %v10680_v47  ;;  %v1491_v29 = vrot.slane %v694_v42, 4  ;;  %v1547_v7 = vrot.slane %v694_v42, 5 }
 0x216   :  { %1110 = vmatprep.mubr.f32.mxu0 %v13468_v46  ;;  %v1652_v47 = vrot.slane %v696_v15, 6  ;;  %v1709_v58 = vrot.slane %v696_v15, 7 }
 0x217   :  { %1432 = vrot.lane.b32.xlu1 %v13488_v17, %s10390_s19 }
 0x218   :  { %1272 = vrot.lane.b32.xlu0 %v1244_v2, %s10390_s19  ;;  %v11275_v43 = vpop.f32.mrb[50].mxu0  ;;  %v13489_v2 = vrot.slane %v11192_v9, 1 }
 0x219   :  { %v13426_v32 = vrot.slane %v11275_v43, 4  ;;  %v1548_v12 = vrot.slane %v11275_v43, 5  ;;  %v11279_v35 = vpop.f32.mrb[51].mxu0  ;;  %8451 = vmatmul.mubr.msk.f32.gmra.mrb[156].mxu0 %vm337_vm1, %v10687_v51 }
 0x21a   :  { %v13425_v26 = vrot.slane %v11279_v35, 6  ;;  %v1710_v17 = vrot.slane %v11279_v35, 7  ;;  %1114 = vmatprep.mubr.f32.mxu0 %v13468_v46 }
 0x21b   :  { %1274 = vrot.lane.b32.xlu1 %v13489_v2, %s10390_s19  ;;  %v1549_v42 = vsel %vm410_vm0, %v1547_v7, %v1548_v12  ;;  %v11293_v45 = vsel %vm1490_vm15, %v1491_v29, %v13426_v32  ;;  %v13490_v29 = vrot.slane %v11198_v50, 3 }
 0x21c   :  { %1434 = vrot.lane.b32.xlu0 %v1406_v19, %s10390_s19  ;;  %v706_v51 = vpop.f32.mrb[52].mxu0  ;;  %v1711_v15 = vsel %vm1708_vm2, %v1709_v58, %v1710_v17  ;;  %v11300_v27 = vsel %vm1651_vm3, %v1652_v47, %v13425_v26 }
 0x21d   :  { %v707_v38 = vpop.f32.mrb[53].mxu0  ;;  %8452 = vmatmul.mubr.msk.f32.gmra.mrb[158].mxu0 %vm337_vm1, %v10694_v56 }
 0x21e   :  { %1120 = vmatprep.mubr.f32.mxu0 %v13468_v46 }
 0x21f   :  { %1436 = vrot.lane.b32.xlu1 %v13490_v29, %s10390_s19 }
 0x220   :  { %1276 = vrot.lane.b32.xlu0 %v1247_v36, %s10390_s19  ;;  %v710_v19 = vpop.f32.mrb[54].mxu0 }
 0x221   :  { %v712_v7 = vpop.f32.mrb[55].mxu0  ;;  %8453 = vmatmul.mubr.msk.f32.gmra.mrb[160].mxu0 %vm337_vm1, %v10701_v59  ;;  %v1494_v38 = vrot.slane %v710_v19, 4  ;;  %v1550_v58 = vrot.slane %v710_v19, 5 }
 0x222   :  { %1126 = vmatprep.mubr.f32.mxu0 %v13468_v46  ;;  %v1655_v59 = vrot.slane %v712_v7, 6  ;;  %v1712_v51 = vrot.slane %v712_v7, 7 }
 0x223   :  { %1278 = vrot.lane.b32.xlu1 %v1246_v31, %s10390_s19 }
 0x224   :  { %1438 = vrot.lane.b32.xlu0 %v1409_v4, %s10390_s19  ;;  %v11314_v56 = vpop.f32.mrb[56].mxu0 }
 0x225   :  { %v13434_v47 = vrot.slane %v11314_v56, 4  ;;  %v1551_v2 = vrot.slane %v11314_v56, 5  ;;  %v11318_v36 = vpop.f32.mrb[57].mxu0  ;;  %8454 = vmatmul.mubr.msk.f32.gmra.mrb[162].mxu0 %vm337_vm1, %v10710_v0 }
 0x226   :  { %v13427_v29 = vrot.slane %v11318_v36, 6  ;;  %v1713_v31 = vrot.slane %v11318_v36, 7  ;;  %1130 = vmatprep.mubr.f32.mxu0 %v13468_v46 }
 0x227   :  { %1440 = vrot.lane.b32.xlu1 %v1408_v28, %s10390_s19  ;;  %v1552_v4 = vsel %vm410_vm0, %v1550_v58, %v1551_v2  ;;  %v11330_v19 = vsel %vm1490_vm15, %v1494_v38, %v13434_v47 }
 0x228   :  { %1571 = vrot.lane.b32.xlu0 %v1549_v42, %s10390_s19  ;;  %v722_v0 = vpop.f32.mrb[58].mxu0  ;;  %v1714_v7 = vsel %vm1708_vm2, %v1712_v51, %v1713_v31  ;;  %v11337_v26 = vsel %vm1651_vm3, %v1655_v59, %v13427_v29 }
 0x229   :  { %v723_v32 = vpop.f32.mrb[59].mxu0  ;;  %8455 = vmatmul.mubr.msk.f32.gmra.mrb[164].mxu0 %vm337_vm1, %v10718_v6 }
 0x22a   :  { %1136 = vmatprep.mubr.f32.mxu0 %v13468_v46 }
 0x22b   :  { %1573 = vrot.lane.b32.xlu1 %v1548_v12, %s10390_s19 }
 0x22c   :  { %1733 = vrot.lane.b32.xlu0 %v1711_v15, %s10390_s19  ;;  %v726_v28 = vpop.f32.mrb[60].mxu0 }
 0x22d   :  { %v728_v42 = vpop.f32.mrb[61].mxu0  ;;  %8456 = vmatmul.mubr.msk.f32.gmra.mrb[166].mxu0 %vm337_vm1, %v10732_v11  ;;  %v1497_v32 = vrot.slane %v726_v28, 4  ;;  %v1553_v12 = vrot.slane %v726_v28, 5 }
 0x22e   :  { %v1249_v38 = vpop.permute.xlu0 %1248  ;;  %1142 = vmatprep.mubr.f32.mxu0 %v13468_v46  ;;  %v1715_v0 = vrot.slane %v728_v42, 7 }
 0x22f   :  { %v1296_v58 = vadd.f32 %v1249_v38, %v10925_v44  ;;  %1735 = vrot.lane.b32.xlu1 %v1710_v17, %s10390_s19  ;;  %v1658_v44 = vrot.slane %v728_v42, 6 }
 0x230   :  { %1575 = vrot.lane.b32.xlu0 %v1552_v4, %s10390_s19  ;;  %v11350_v6 = vpop.f32.mrb[62].mxu0 }
 0x231   :  { %v13433_v15 = vrot.slane %v11350_v6, 4  ;;  %v1554_v59 = vrot.slane %v11350_v6, 5  ;;  %v11354_v51 = vpop.f32.mrb[63].mxu0  ;;  %8457 = vmatmul.mubr.msk.f32.gmra.mrb[168].mxu0 %vm337_vm1, %v10746_v14  ;;  %v1369_v11 = vadd.f32 %v10951_v57, %v1296_v58 }
 0x232   :  { %v13430_v17 = vrot.slane %v11354_v51, 6  ;;  %v1716_v4 = vrot.slane %v11354_v51, 7  ;;  %v1411_v38 = vpop.permute.xlu0 %1410  ;;  %1146 = vmatprep.mubr.f32.mxu0 %v13468_v46 }
 0x233   :  { %v1458_v28 = vadd.f32 %v1411_v38, %v1369_v11  ;;  %1577 = vrot.lane.b32.xlu1 %v1551_v2, %s10390_s19  ;;  %v1555_v29 = vsel %vm410_vm0, %v1553_v12, %v1554_v59  ;;  %v11367_v14 = vsel %vm1490_vm15, %v1497_v32, %v13433_v15 }
 0x234   :  { %1737 = vrot.lane.b32.xlu0 %v1714_v7, %s10390_s19  ;;  %v738_v57 = vpop.f32.mrb[64].mxu0  ;;  %v1717_v42 = vsel %vm1708_vm2, %v1715_v0, %v1716_v4  ;;  %v11374_v58 = vsel %vm1651_vm3, %v1658_v44, %v13430_v17 }
 0x235   :  { %v739_v11 = vpop.f32.mrb[65].mxu0  ;;  %8458 = vmatmul.mubr.msk.f32.gmra.mrb[170].mxu0 %vm337_vm1, %v10760_v16  ;;  %v11379_v2 = vadd.f32 %v11293_v45, %v1458_v28 }
 0x236   :  { %1152 = vmatprep.mubr.f32.mxu0 %v13468_v46 }
 0x237   :  { %1739 = vrot.lane.b32.xlu1 %v1713_v31, %s10390_s19 }
 0x238   :  { %1579 = vrot.lane.b32.xlu0 %v1555_v29, %s10390_s19  ;;  %v742_v7 = vpop.f32.mrb[66].mxu0 }
 0x239   :  { %v744_v32 = vpop.f32.mrb[67].mxu0  ;;  %8459 = vmatmul.mubr.msk.f32.gmra.mrb[172].mxu0 %vm337_vm1, %v10773_v18  ;;  %v1500_v45 = vrot.slane %v742_v7, 4  ;;  %v1556_v12 = vrot.slane %v742_v7, 5 }
 0x23a   :  { %1158 = vmatprep.mubr.f32.mxu0 %v13468_v46  ;;  %v1661_v18 = vrot.slane %v744_v32, 6  ;;  %v1718_v0 = vrot.slane %v744_v32, 7 }
 0x23b   :  { %1581 = vrot.lane.b32.xlu1 %v1554_v59, %s10390_s19 }
 0x23c   :  { %1741 = vrot.lane.b32.xlu0 %v1717_v42, %s10390_s19  ;;  %v11389_v16 = vpop.f32.mrb[68].mxu0 }
 0x23d   :  { %v13432_v44 = vrot.slane %v11389_v16, 4  ;;  %v1557_v31 = vrot.slane %v11389_v16, 5  ;;  %v11393_v29 = vpop.f32.mrb[69].mxu0  ;;  %8460 = vmatmul.mubr.msk.f32.gmra.mrb[174].mxu0 %vm337_vm1, %v10780_v20 }
 0x23e   :  { %v13428_v38 = vrot.slane %v11393_v29, 6  ;;  %v1719_v59 = vrot.slane %v11393_v29, 7  ;;  %1162 = vmatprep.mubr.f32.mxu0 %v13468_v46 }
 0x23f   :  { %1743 = vrot.lane.b32.xlu1 %v1716_v4, %s10390_s19  ;;  %v1558_v28 = vsel %vm410_vm0, %v1556_v12, %v1557_v31  ;;  %v11405_v57 = vsel %vm1490_vm15, %v1500_v45, %v13432_v44 }
 0x240   :  { %1583 = vrot.lane.b32.xlu0 %v1558_v28, %s10390_s19  ;;  %v754_v20 = vpop.f32.mrb[70].mxu0  ;;  %v1720_v42 = vsel %vm1708_vm2, %v1718_v0, %v1719_v59  ;;  %v11412_v11 = vsel %vm1651_vm3, %v1661_v18, %v13428_v38 }
 0x241   :  { %v755_v7 = vpop.f32.mrb[71].mxu0  ;;  %8461 = vmatmul.mubr.msk.f32.gmra.mrb[176].mxu0 %vm337_vm1, %v10787_v21 }
 0x242   :  { %1168 = vmatprep.mubr.f32.mxu0 %v13468_v46 }
 0x243   :  { %1585 = vrot.lane.b32.xlu1 %v1557_v31, %s10390_s19 }
 0x244   :  { %1745 = vrot.lane.b32.xlu0 %v1720_v42, %s10390_s19  ;;  %v758_v4 = vpop.f32.mrb[72].mxu0 }
 0x245   :  { %v760_v32 = vpop.f32.mrb[73].mxu0  ;;  %8462 = vmatmul.mubr.msk.f32.gmra.mrb[178].mxu0 %vm337_vm1, %v10794_v22  ;;  %v1503_v12 = vrot.slane %v758_v4, 4  ;;  %v1559_v18 = vrot.slane %v758_v4, 5 }
 0x246   :  { %1174 = vmatprep.mubr.f32.mxu0 %v13468_v46  ;;  %v1664_v28 = vrot.slane %v760_v32, 6  ;;  %v1721_v20 = vrot.slane %v760_v32, 7 }
 0x247   :  { %1747 = vrot.lane.b32.xlu1 %v1719_v59, %s10390_s19 }
 0x248   :  { %v11423_v45 = vpop.f32.mrb[74].mxu0 }
 0x249   :  { %v13431_v21 = vrot.slane %v11423_v45, 4  ;;  %v11426_v0 = vpop.f32.mrb[75].mxu0  ;;  %8463 = vmatmul.mubr.msk.f32.gmra.mrb[180].mxu0 %vm337_vm1, %v10801_v23  ;;  %v1560_v31 = vrot.slane %v11423_v45, 5 }
 0x24a   :  { %v13429_v22 = vrot.slane %v11426_v0, 6  ;;  %1178 = vmatprep.mubr.f32.mxu0 %v13468_v46  ;;  %v1722_v59 = vrot.slane %v11426_v0, 7 }
 0x24b   :  { %1589 = vrot.lane.b32.xlu1 %v1560_v31, %s10390_s19  ;;  %v1561_v42 = vsel %vm410_vm0, %v1559_v18, %v1560_v31  ;;  %v11439_v7 = vsel %vm1490_vm15, %v1503_v12, %v13431_v21 }
 0x24c   :  { %1587 = vrot.lane.b32.xlu0 %v1561_v42, %s10390_s19  ;;  %v770_v23 = vpop.f32.mrb[76].mxu0  ;;  %v1723_v4 = vsel %vm1708_vm2, %v1721_v20, %v1722_v59  ;;  %v11446_v32 = vsel %vm1651_vm3, %v1664_v28, %v13429_v22 }
 0x24d   :  { %v771_v38 = vpop.f32.mrb[77].mxu0  ;;  %8464 = vmatmul.mubr.msk.f32.gmra.mrb[182].mxu0 %vm337_vm1, %v10809_v24  ;;  %vm2438_vm1 = vcmask 516096  }
 0x24e   :  { %2626 = vmatprep.mubr.f32.mxu0 %v13468_v46 }
 0x24f   :  { %1751 = vrot.lane.b32.xlu1 %v1722_v59, %s10390_s19 }
 0x250   :  { %1749 = vrot.lane.b32.xlu0 %v1723_v4, %s10390_s19  ;;  %v774_v12 = vpop.f32.mrb[78].mxu0 }
 0x251   :  { %v11453_v18 = vpop.permute.xlu1 %2199  ;;  %v776_v31 = vpop.f32.mrb[79].mxu0  ;;  %v1506_v42 = vrot.slane %v774_v12, 4  ;;  %v1562_v23 = vrot.slane %v774_v12, 5 }
 0x252   :  { %13491 = vst [vmem:[#allocation29_spill] sm:$0xff] %v11453_v18  ;;  %v1667_v17 = vrot.slane %v776_v31, 6  ;;  %v1724_v59 = vrot.slane %v776_v31, 7 }
 0x254   :  { %v11455_v20 = vpop.f32.mrb[80].mxu0 }
 0x255   :  { %v13436_v28 = vrot.slane %v11455_v20, 4  ;;  %v11458_v38 = vpop.permute.xlu1 %2359  ;;  %v11460_v22 = vpop.f32.mrb[81].mxu0  ;;  %v1563_v24 = vrot.slane %v11455_v20, 5 }
 0x256   :  { %13492 = vst [vmem:[#allocation30_spill] sm:$0xff] %v11458_v38  ;;  %13493 = vst [vmem:[#allocation31_spill] sm:$0xff] %v11460_v22  ;;  %v13439_v4 = vrot.slane %v11460_v22, 6  ;;  %v1725_v21 = vrot.slane %v11460_v22, 7 }
 0x257   :  { %1593 = vrot.lane.b32.xlu1 %v1563_v24, %s10390_s19  ;;  %v1564_v44 = vsel %vm410_vm0, %v1562_v23, %v1563_v24  ;;  %v11470_v12 = vsel %vm1490_vm15, %v1506_v42, %v13436_v28  ;;  %v13495_v23 = vrot.slane %v10933_v60, 2 }
 0x258   :  { %1591 = vrot.lane.b32.xlu0 %v1564_v44, %s10390_s19  ;;  %v786_v15 = vpop.f32.mrb[82].mxu0  ;;  %v1726_v47 = vsel %vm1708_vm2, %v1724_v59, %v1725_v21  ;;  %v11477_v31 = vsel %vm1651_vm3, %v1667_v17, %v13439_v4  ;;  %v13497_v17 = vrot.slane %v11275_v43, 4 }
 0x259   :  { %13494 = vst [vmem:[#allocation32_spill] sm:$0xff] %v11477_v31  ;;  %v1251_v38 = vpop.permute.xlu1 %1250  ;;  %v787_v18 = vpop.f32.mrb[83].mxu0 }
 0x25a   :  { %v1297_v46 = vadd.f32 %v1251_v38, %v10930_v52 }
 0x25b   :  { %1755 = vrot.lane.b32.xlu1 %v1725_v21, %s10390_s19 }
 0x25c   :  { %1753 = vrot.lane.b32.xlu0 %v1726_v47, %s10390_s19  ;;  %v790_v42 = vpop.f32.mrb[84].mxu0  ;;  %v1370_v44 = vadd.f32 %v13495_v23, %v1297_v46 }
 0x25d   :  { %v1413_v15 = vpop.permute.xlu1 %1412  ;;  %v792_v24 = vpop.f32.mrb[85].mxu0  ;;  %v1509_v52 = vrot.slane %v790_v42, 4  ;;  %v1565_v38 = vrot.slane %v790_v42, 5 }
 0x25e   :  { %v1459_v59 = vadd.f32 %v1413_v15, %v1370_v44  ;;  %v11484_v28 = vpop.permute.xlu0 %2201  ;;  %v1670_v46 = vrot.slane %v792_v24, 6  ;;  %v1727_v23 = vrot.slane %v792_v24, 7 }
 0x25f   :  { %13496 = vst [vmem:[#allocation33_spill] sm:$0xff] %v11484_v28 }
 0x260   :  { %v11486_v55 = vpop.f32.mrb[86].mxu0  ;;  %v11490_v18 = vadd.f32 %v13497_v17, %v1459_v59 }
 0x261   :  { %v13441_v21 = vrot.slane %v11486_v55, 4  ;;  %v11493_v47 = vpop.permute.xlu1 %2203  ;;  %v11495_v4 = vpop.f32.mrb[87].mxu0  ;;  %v1566_v60 = vrot.slane %v11486_v55, 5 }
 0x262   :  { %13498 = vst [vmem:[#allocation34_spill] sm:$0xff] %v11493_v47  ;;  %v13442_v44 = vrot.slane %v11495_v4, 6  ;;  %v1253_v15 = vpop.permute.xlu0 %1252  ;;  %v1728_v28 = vrot.slane %v11495_v4, 7 }
 0x263   :  { %v1298_v43 = vadd.f32 %v1253_v15, %v10957_v61  ;;  %1597 = vrot.lane.b32.xlu1 %v1566_v60, %s10390_s19  ;;  %v1567_v42 = vsel %vm410_vm0, %v1565_v38, %v1566_v60  ;;  %v11506_v59 = vsel %vm1490_vm15, %v1509_v52, %v13441_v21 }
 0x264   :  { %1595 = vrot.lane.b32.xlu0 %v1567_v42, %s10390_s19  ;;  %v802_v17 = vpop.f32.mrb[88].mxu0  ;;  %v1729_v24 = vsel %vm1708_vm2, %v1727_v23, %v1728_v28  ;;  %v11513_v47 = vsel %vm1651_vm3, %v1670_v46, %v13442_v44  ;;  %v13500_v23 = vrot.slane %v10966_v13, 2 }
 0x265   :  { %13499 = vst [vmem:[#allocation35_spill] sm:$0xff] %v11513_v47  ;;  %v1255_v61 = vpop.permute.xlu1 %1254  ;;  %v803_v15 = vpop.f32.mrb[89].mxu0  ;;  %v1371_v31 = vadd.f32 %v10986_v33, %v1298_v43  ;;  %v13501_v33 = vld [vmem:[#allocation17_spill] sm:$0xff] }
 0x266   :  { %v1299_v38 = vadd.f32 %v1255_v61, %v10962_v1  ;;  %v1415_v60 = vpop.permute.xlu0 %1414 }
 0x267   :  { %v1460_v22 = vadd.f32 %v1415_v60, %v1371_v31  ;;  %1759 = vrot.lane.b32.xlu1 %v1728_v28, %s10390_s19  ;;  %v13502_v28 = vrot.slane %v11314_v56, 4 }
 0x268   :  { %1757 = vrot.lane.b32.xlu0 %v1729_v24, %s10390_s19  ;;  %v806_v52 = vpop.f32.mrb[90].mxu0  ;;  %v1372_v42 = vadd.f32 %v13500_v23, %v1299_v38 }
 0x269   :  { %v1417_v17 = vpop.permute.xlu1 %1416  ;;  %v808_v21 = vpop.f32.mrb[91].mxu0  ;;  %v11522_v46 = vadd.f32 %v11330_v19, %v1460_v22  ;;  %v1512_v1 = vrot.slane %v806_v52, 4  ;;  %v1568_v61 = vrot.slane %v806_v52, 5  ;;  %v13503_v19 = vld [vmem:[#allocation18_spill] sm:$0xff] }
 0x26a   :  { %v1461_v15 = vadd.f32 %v1417_v17, %v1372_v42  ;;  %v1257_v44 = vpop.permute.xlu0 %1256  ;;  %v1673_v60 = vrot.slane %v808_v21, 6  ;;  %v1730_v17 = vrot.slane %v808_v21, 7 }
 0x26b   :  { %v1300_v43 = vadd.f32 %v1257_v44, %v13501_v33 }
 0x26c   :  { %v11525_v31 = vpop.f32.mrb[92].mxu0  ;;  %v11529_v24 = vadd.f32 %v13502_v28, %v1461_v15 }
 0x26d   :  { %v13443_v13 = vrot.slane %v11525_v31, 4  ;;  %v1259_v38 = vpop.permute.xlu1 %1258  ;;  %v11532_v23 = vpop.f32.mrb[93].mxu0  ;;  %v1373_v22 = vadd.f32 %v13503_v19, %v1300_v43  ;;  %v1569_v42 = vrot.slane %v11525_v31, 5 }
 0x26e   :  { %v1301_v44 = vadd.f32 %v1259_v38, %v10996_v37  ;;  %v13444_v52 = vrot.slane %v11532_v23, 6  ;;  %v1419_v33 = vpop.permute.xlu0 %1418  ;;  %v1731_v56 = vrot.slane %v11532_v23, 7  ;;  %v13504_v37 = vrot.slane %v11000_v41, 2 }
 0x26f   :  { %v1462_v15 = vadd.f32 %v1419_v33, %v1373_v22  ;;  %1601 = vrot.lane.b32.xlu1 %v1569_v42, %s10390_s19  ;;  %v1570_v28 = vsel %vm410_vm0, %v1568_v61, %v1569_v42  ;;  %v11544_v47 = vsel %vm1490_vm15, %v1512_v1, %v13443_v13  ;;  %v13505_v13 = vld [vmem:[#allocation19_spill] sm:$0xff] }
 0x270   :  { %1599 = vrot.lane.b32.xlu0 %v1570_v28, %s10390_s19  ;;  %v818_v21 = vpop.f32.mrb[94].mxu0  ;;  %v1374_v43 = vadd.f32 %v13504_v37, %v1301_v44  ;;  %v1732_v38 = vsel %vm1708_vm2, %v1730_v17, %v1731_v56  ;;  %v11553_v19 = vsel %vm1651_vm3, %v1673_v60, %v13444_v52  ;;  %v13506_v17 = vrot.slane %v11350_v6, 4  ;;  %v13507_v37 = vld [vmem:[#allocation22_spill] sm:$0xff] }
 0x271   :  { %v1421_v22 = vpop.permute.xlu1 %1420  ;;  %v819_v61 = vpop.f32.mrb[95].mxu0  ;;  %v11556_v42 = vadd.f32 %v11367_v14, %v1462_v15 }
 0x272   :  { %v1463_v1 = vadd.f32 %v1421_v22, %v1374_v43  ;;  %v1261_v33 = vpop.permute.xlu0 %1260 }
 0x273   :  { %v1302_v28 = vadd.f32 %v1261_v33, %v13505_v13  ;;  %1763 = vrot.lane.b32.xlu1 %v1731_v56, %s10390_s19  ;;  %v13508_v13 = vrot.slane %v11036_v34, 2 }
 0x274   :  { %1761 = vrot.lane.b32.xlu0 %v1732_v38, %s10390_s19  ;;  %v887_v41 = vpop.f32.mrb[96].mxu0  ;;  %v11563_v44 = vadd.f32 %v13506_v17, %v1463_v1  ;;  %v13509_v17 = vld [vmem:[#allocation23_spill] sm:$0xff] }
 0x275   :  { %v1263_v60 = vpop.permute.xlu1 %1262  ;;  %v888_v21 = vpop.f32.mrb[97].mxu0  ;;  %v1375_v61 = vadd.f32 %v13507_v37, %v1302_v28 }
 0x276   :  { %v1303_v14 = vadd.f32 %v1263_v60, %v11030_v5  ;;  %v1423_v15 = vpop.permute.xlu0 %1422  ;;  %v13510_v5 = vrot.slane %v11389_v16, 4 }
 0x277   :  { %v1464_v43 = vadd.f32 %v1423_v15, %v1375_v61 }
 0x278   :  { %v11567_v22 = vpop.f32.mrb[98].mxu0  ;;  %v1376_v56 = vadd.f32 %v13508_v13, %v1303_v14 }
 0x279   :  { %v1425_v33 = vpop.permute.xlu1 %1424  ;;  %v893_v38 = vpop.f32.mrb[99].mxu0  ;;  %v11572_v41 = vadd.f32 %v11405_v57, %v1464_v43  ;;  %v1829_v60 = vrot.slane %v11567_v22, 1 }
 0x27a   :  { %v1465_v6 = vadd.f32 %v1425_v33, %v1376_v56  ;;  %v1265_v1 = vpop.permute.xlu0 %1264  ;;  %v1933_v37 = vrot.slane %v893_v38, 2  ;;  %v1989_v15 = vrot.slane %v893_v38, 3 }
 0x27b   :  { %v1304_v21 = vadd.f32 %v1265_v1, %v13509_v17 }
 0x27c   :  { %v11575_v52 = vpop.f32.mrb[100].mxu0  ;;  %v11579_v28 = vadd.f32 %v13510_v5, %v1465_v6 }
 0x27d   :  { %v1267_v34 = vpop.permute.xlu1 %1266  ;;  %v11582_v61 = vpop.f32.mrb[101].mxu0  ;;  %v1377_v14 = vadd.f32 %v11121_v25, %v1304_v21  ;;  %v1830_v57 = vrot.slane %v11575_v52, 1  ;;  %v13511_v25 = vrot.slane %v11087_v8, 2 }
 0x27e   :  { %v1305_v43 = vadd.f32 %v1267_v34, %v11080_v39  ;;  %v1934_v13 = vrot.slane %v11582_v61, 2  ;;  %v1427_v56 = vpop.permute.xlu0 %1426  ;;  %v1990_v16 = vrot.slane %v11582_v61, 3 }
 0x27f   :  { %v1466_v33 = vadd.f32 %v1427_v56, %v1377_v14  ;;  %1855 = vrot.lane.b32.xlu1 %v1830_v57, %s10390_s19  ;;  %v1831_v6 = vsel %vm1223_vm12, %v1829_v60, %v1830_v57 }
 0x280   :  { %1853 = vrot.lane.b32.xlu0 %v1831_v6, %s10390_s19  ;;  %v903_v1 = vpop.f32.mrb[102].mxu0  ;;  %v1378_v17 = vadd.f32 %v13511_v25, %v1305_v43  ;;  %v1991_v38 = vsel %vm1385_vm13, %v1989_v15, %v1990_v16  ;;  %v11598_v39 = vsel %vm1328_vm14, %v1933_v37, %v1934_v13  ;;  %v13512_v15 = vrot.slane %v11423_v45, 4 }
 0x281   :  { %v1429_v21 = vpop.permute.xlu1 %1428  ;;  %v904_v5 = vpop.f32.mrb[103].mxu0  ;;  %v11601_v34 = vadd.f32 %v11439_v7, %v1466_v33 }
 0x282   :  { %v1467_v14 = vadd.f32 %v1429_v21, %v1378_v17  ;;  %v1269_v60 = vpop.permute.xlu0 %1268 }
 0x283   :  { %v1306_v57 = vadd.f32 %v1269_v60, %v11137_v49  ;;  %2015 = vrot.lane.b32.xlu1 %v1990_v16, %s10390_s19  ;;  %v13513_v49 = vrot.slane %v11153_v30, 2 }
 0x284   :  { %2013 = vrot.lane.b32.xlu0 %v1991_v38, %s10390_s19  ;;  %v11606_v8 = vpop.f32.mrb[104].mxu0  ;;  %v11610_v43 = vadd.f32 %v13512_v15, %v1467_v14 }
 0x285   :  { %v1271_v37 = vpop.permute.xlu1 %1270  ;;  %v909_v56 = vpop.f32.mrb[105].mxu0  ;;  %v1379_v6 = vadd.f32 %v11174_v10, %v1306_v57  ;;  %v1832_v17 = vrot.slane %v11606_v8, 1 }
 0x286   :  { %v1307_v7 = vadd.f32 %v1271_v37, %v11147_v54  ;;  %v1431_v33 = vpop.permute.xlu0 %1430  ;;  %v1936_v38 = vrot.slane %v909_v56, 2  ;;  %v1992_v10 = vrot.slane %v909_v56, 3 }
 0x287   :  { %v1468_v1 = vadd.f32 %v1431_v33, %v1379_v6 }
 0x288   :  { %v11614_v25 = vpop.f32.mrb[106].mxu0  ;;  %v1380_v16 = vadd.f32 %v13513_v49, %v1307_v7 }
 0x289   :  { %v1833_v45 = vrot.slane %v11614_v25, 1  ;;  %v1433_v21 = vpop.permute.xlu1 %1432  ;;  %v11620_v5 = vpop.f32.mrb[107].mxu0  ;;  %v11623_v14 = vadd.f32 %v11470_v12, %v1468_v1  ;;  %v13514_v12 = vrot.slane %v11455_v20, 4 }
 0x28a   :  { %v1469_v54 = vadd.f32 %v1433_v21, %v1380_v16  ;;  %v1937_v60 = vrot.slane %v11620_v5, 2  ;;  %v1993_v57 = vrot.slane %v11620_v5, 3  ;;  %v1273_v15 = vpop.permute.xlu0 %1272  ;;  %v13515_v21 = vrot.slane %v11198_v50, 2 }
 0x28b   :  { %v1308_v30 = vadd.f32 %v1273_v15, %v11182_v3  ;;  %1859 = vrot.lane.b32.xlu1 %v1833_v45, %s10390_s19  ;;  %v1834_v37 = vsel %vm1223_vm12, %v1832_v17, %v1833_v45 }
 0x28c   :  { %1857 = vrot.lane.b32.xlu0 %v1834_v37, %s10390_s19  ;;  %v919_v6 = vpop.f32.mrb[108].mxu0  ;;  %v1994_v7 = vsel %vm1385_vm13, %v1992_v10, %v1993_v57  ;;  %v11634_v56 = vadd.f32 %v13514_v12, %v1469_v54  ;;  %v11639_v33 = vsel %vm1328_vm14, %v1936_v38, %v1937_v60 }
 0x28d   :  { %v1275_v1 = vpop.permute.xlu1 %1274  ;;  %v920_v3 = vpop.f32.mrb[109].mxu0  ;;  %v1381_v49 = vadd.f32 %v11219_v63, %v1308_v30 }
 0x28e   :  { %v1309_v16 = vadd.f32 %v1275_v1, %v11192_v9  ;;  %v1435_v17 = vpop.permute.xlu0 %1434 }
 0x28f   :  { %v1470_v45 = vadd.f32 %v1435_v17, %v1381_v49  ;;  %2019 = vrot.lane.b32.xlu1 %v1993_v57, %s10390_s19  ;;  %v13516_v57 = vrot.slane %v11486_v55, 4 }
 0x290   :  { %2017 = vrot.lane.b32.xlu0 %v1994_v7, %s10390_s19  ;;  %v11645_v20 = vpop.f32.mrb[110].mxu0  ;;  %v1382_v10 = vadd.f32 %v13515_v21, %v1309_v16 }
 0x291   :  { %v1437_v54 = vpop.permute.xlu1 %1436  ;;  %v925_v38 = vpop.f32.mrb[111].mxu0  ;;  %v11650_v15 = vadd.f32 %v11506_v59, %v1470_v45  ;;  %v1835_v7 = vrot.slane %v11645_v20, 1 }
 0x292   :  { %v1471_v37 = vadd.f32 %v1437_v54, %v1382_v10  ;;  %v1277_v63 = vpop.permute.xlu0 %1276  ;;  %v1939_v12 = vrot.slane %v925_v38, 2  ;;  %v1995_v49 = vrot.slane %v925_v38, 3  ;;  %v13517_v54 = vrot.slane %v11243_v53, 2 }
 0x293   :  { %v1310_v9 = vadd.f32 %v1277_v63, %v11227_v62 }
 0x294   :  { %v11653_v30 = vpop.f32.mrb[112].mxu0  ;;  %v11657_v6 = vadd.f32 %v13516_v57, %v1471_v37 }
 0x295   :  { %v1836_v50 = vrot.slane %v11653_v30, 1  ;;  %v1279_v1 = vpop.permute.xlu1 %1278  ;;  %v11661_v3 = vpop.f32.mrb[113].mxu0  ;;  %v1383_v59 = vadd.f32 %v11259_v40, %v1310_v9 }
 0x296   :  { %v1311_v16 = vadd.f32 %v1279_v1, %v11239_v48  ;;  %v1940_v62 = vrot.slane %v11661_v3, 2  ;;  %v1996_v17 = vrot.slane %v11661_v3, 3  ;;  %v1439_v55 = vpop.permute.xlu0 %1438  ;;  %v13518_v1 = vrot.slane %v11525_v31, 4 }
 0x297   :  { %v1472_v45 = vadd.f32 %v1439_v55, %v1383_v59  ;;  %1863 = vrot.lane.b32.xlu1 %v1836_v50, %s10390_s19  ;;  %v1837_v21 = vsel %vm1223_vm12, %v1835_v7, %v1836_v50 }
 0x298   :  { %1861 = vrot.lane.b32.xlu0 %v1837_v21, %s10390_s19  ;;  %v935_v10 = vpop.f32.mrb[114].mxu0  ;;  %v1384_v37 = vadd.f32 %v13517_v54, %v1311_v16  ;;  %v1997_v40 = vsel %vm1385_vm13, %v1995_v49, %v1996_v17  ;;  %v11676_v48 = vsel %vm1328_vm14, %v1939_v12, %v1940_v62 }
 0x299   :  { %v1441_v38 = vpop.permute.xlu1 %1440  ;;  %v936_v63 = vpop.f32.mrb[115].mxu0  ;;  %v11679_v9 = vadd.f32 %v11544_v47, %v1472_v45 }
 0x29a   :  { %v1473_v57 = vadd.f32 %v1441_v38, %v1384_v37  ;;  %v1572_v7 = vpop.permute.xlu0 %1571 }
 0x29b   :  { %v1619_v50 = vadd.f32 %v1572_v7, %v11379_v2  ;;  %2023 = vrot.lane.b32.xlu1 %v1996_v17, %s10390_s19  ;;  %v13519_v2 = vrot.slane %v11279_v35, 6 }
 0x29c   :  { %2021 = vrot.lane.b32.xlu0 %v1997_v40, %s10390_s19  ;;  %v11684_v53 = vpop.f32.mrb[116].mxu0  ;;  %v11688_v59 = vadd.f32 %v13518_v1, %v1473_v57 }
 0x29d   :  { %v1574_v12 = vpop.permute.xlu1 %1573  ;;  %v941_v49 = vpop.f32.mrb[117].mxu0  ;;  %v1692_v16 = vadd.f32 %v11300_v27, %v1619_v50  ;;  %v1838_v10 = vrot.slane %v11684_v53, 1 }
 0x29e   :  { %v1620_v47 = vadd.f32 %v1574_v12, %v11490_v18  ;;  %v1734_v55 = vpop.permute.xlu0 %1733  ;;  %v1942_v54 = vrot.slane %v941_v49, 2  ;;  %v1998_v27 = vrot.slane %v941_v49, 3 }
 0x29f   :  { %v1781_v45 = vadd.f32 %v1734_v55, %v1692_v16 }
 0x2a0   :  { %v11692_v21 = vpop.f32.mrb[118].mxu0  ;;  %v1693_v17 = vadd.f32 %v13519_v2, %v1620_v47 }
 0x2a1   :  { %v1839_v31 = vrot.slane %v11692_v21, 1  ;;  %v1736_v37 = vpop.permute.xlu1 %1735  ;;  %v11698_v40 = vpop.f32.mrb[119].mxu0  ;;  %v11701_v38 = vadd.f32 %v1781_v45, %v11567_v22 }
 0x2a2   :  { %v1782_v18 = vadd.f32 %v1736_v37, %v1693_v17  ;;  %v1943_v63 = vrot.slane %v11698_v40, 2  ;;  %v1999_v57 = vrot.slane %v11698_v40, 3  ;;  %v1576_v7 = vpop.permute.xlu0 %1575  ;;  %v2519_v40 = vld [vmem:[%s13384_s3 + $0x48] sm:$0xff] }
 0x2a3   :  { %v1621_v35 = vadd.f32 %v1576_v7, %v11522_v46  ;;  %1867 = vrot.lane.b32.xlu1 %v1839_v31, %s10390_s19  ;;  %v1840_v50 = vsel %vm1223_vm12, %v1838_v10, %v1839_v31 }
 0x2a4   :  { %1865 = vrot.lane.b32.xlu0 %v1840_v50, %s10390_s19  ;;  %v951_v1 = vpop.f32.mrb[120].mxu0  ;;  %v2000_v12 = vsel %vm1385_vm13, %v1998_v27, %v1999_v57  ;;  %v11711_v22 = vadd.f32 %v1782_v18, %v11575_v52  ;;  %v11716_v49 = vsel %vm1328_vm14, %v1942_v54, %v1943_v63  ;;  %v13520_v52 = vrot.slane %v11318_v36, 6 }
 0x2a5   :  { %v1578_v16 = vpop.permute.xlu1 %1577  ;;  %v952_v47 = vpop.f32.mrb[121].mxu0  ;;  %v1694_v46 = vadd.f32 %v11337_v26, %v1621_v35 }
 0x2a6   :  { %v1622_v55 = vadd.f32 %v1578_v16, %v11529_v24  ;;  %v1738_v45 = vpop.permute.xlu0 %1737 }
 0x2a7   :  { %v1783_v2 = vadd.f32 %v1738_v45, %v1694_v46  ;;  %2027 = vrot.lane.b32.xlu1 %v1999_v57, %s10390_s19 }
 0x2a8   :  { %2025 = vrot.lane.b32.xlu0 %v2000_v12, %s10390_s19  ;;  %v11722_v17 = vpop.f32.mrb[122].mxu0  ;;  %v1695_v10 = vadd.f32 %v13520_v52, %v1622_v55 }
 0x2a9   :  { %v1740_v31 = vpop.permute.xlu1 %1739  ;;  %v957_v54 = vpop.f32.mrb[123].mxu0  ;;  %v11727_v37 = vadd.f32 %v1783_v2, %v11606_v8  ;;  %v1841_v7 = vrot.slane %v11722_v17, 1  ;;  %v13521_v2 = vrot.slane %v11354_v51, 6 }
 0x2aa   :  { %v1784_v27 = vadd.f32 %v1740_v31, %v1695_v10  ;;  %v1580_v26 = vpop.permute.xlu0 %1579  ;;  %v1945_v35 = vrot.slane %v957_v54, 2  ;;  %v2001_v12 = vrot.slane %v957_v54, 3 }
 0x2ab   :  { %v1623_v24 = vadd.f32 %v1580_v26, %v11556_v42 }
 0x2ac   :  { %v11730_v18 = vpop.f32.mrb[124].mxu0  ;;  %v11733_v57 = vadd.f32 %v1784_v27, %v11614_v25 }
 0x2ad   :  { %v1842_v36 = vrot.slane %v11730_v18, 1  ;;  %v1582_v50 = vpop.permute.xlu1 %1581  ;;  %v11737_v1 = vpop.f32.mrb[125].mxu0  ;;  %v1696_v8 = vadd.f32 %v11374_v58, %v1623_v24 }
 0x2ae   :  { %v1624_v16 = vadd.f32 %v1582_v50, %v11563_v44  ;;  %v1946_v42 = vrot.slane %v11737_v1, 2  ;;  %v2002_v47 = vrot.slane %v11737_v1, 3  ;;  %v1742_v46 = vpop.permute.xlu0 %1741 }
 0x2af   :  { %v1785_v25 = vadd.f32 %v1742_v46, %v1696_v8  ;;  %1871 = vrot.lane.b32.xlu1 %v1842_v36, %s10390_s19  ;;  %v1843_v55 = vsel %vm1223_vm12, %v1841_v7, %v1842_v36 }
 0x2b0   :  { %1869 = vrot.lane.b32.xlu0 %v1843_v55, %s10390_s19  ;;  %v967_v45 = vpop.f32.mrb[126].mxu0  ;;  %v1697_v52 = vadd.f32 %v13521_v2, %v1624_v16  ;;  %v2003_v58 = vsel %vm1385_vm13, %v2001_v12, %v2002_v47  ;;  %v11752_v44 = vsel %vm1328_vm14, %v1945_v35, %v1946_v42 }
 0x2b1   :  { %v1744_v10 = vpop.permute.xlu1 %1743  ;;  %v968_v31 = vpop.f32.mrb[127].mxu0  ;;  %v11755_v54 = vadd.f32 %v1785_v25, %v11645_v20 }
 0x2b2   :  { %v1786_v27 = vadd.f32 %v1744_v10, %v1697_v52  ;;  %v1584_v26 = vpop.permute.xlu0 %1583 }
 0x2b3   :  { %v1625_v24 = vadd.f32 %v1584_v26, %v11572_v41  ;;  %2031 = vrot.lane.b32.xlu1 %v2002_v47, %s10390_s19  ;;  %v13522_v41 = vrot.slane %v11393_v29, 6 }
 0x2b4   :  { %2029 = vrot.lane.b32.xlu0 %v2003_v58, %s10390_s19  ;;  %v11760_v51 = vpop.f32.mrb[128].mxu0  ;;  %v11763_v7 = vadd.f32 %v1786_v27, %v11653_v30 }
 0x2b5   :  { %v1586_v35 = vpop.permute.xlu1 %1585  ;;  %v973_v36 = vpop.f32.mrb[129].mxu0  ;;  %v1698_v50 = vadd.f32 %v11412_v11, %v1625_v24  ;;  %v1844_v46 = vrot.slane %v11760_v51, 1 }
 0x2b6   :  { %v1626_v20 = vadd.f32 %v1586_v35, %v11579_v28  ;;  %v1746_v8 = vpop.permute.xlu0 %1745  ;;  %v1948_v25 = vrot.slane %v973_v36, 2  ;;  %v2004_v11 = vrot.slane %v973_v36, 3 }
 0x2b7   :  { %v1787_v12 = vadd.f32 %v1746_v8, %v1698_v50 }
 0x2b8   :  { %v11767_v16 = vpop.f32.mrb[130].mxu0  ;;  %v1699_v47 = vadd.f32 %v13522_v41, %v1626_v20 }
 0x2b9   :  { %v1845_v55 = vrot.slane %v11767_v16, 1  ;;  %v1748_v30 = vpop.permute.xlu1 %1747  ;;  %v11773_v45 = vpop.f32.mrb[131].mxu0  ;;  %v11776_v2 = vadd.f32 %v1787_v12, %v11684_v53 }
 0x2ba   :  { %v1788_v28 = vadd.f32 %v1748_v30, %v1699_v47  ;;  %v13449_v52 = vrot.slane %v11773_v45, 2  ;;  %v2005_v58 = vrot.slane %v11773_v45, 3 }
 0x2bb   :  { %1875 = vrot.lane.b32.xlu1 %v1845_v55, %s10390_s19  ;;  %v1846_v29 = vsel %vm1223_vm12, %v1844_v46, %v1845_v55 }
 0x2bc   :  { %1873 = vrot.lane.b32.xlu0 %v1846_v29, %s10390_s19  ;;  %v983_v10 = vpop.f32.mrb[132].mxu0  ;;  %v2006_v31 = vsel %vm1385_vm13, %v2004_v11, %v2005_v58  ;;  %v11785_v27 = vadd.f32 %v1788_v28, %v11692_v21  ;;  %v11790_v53 = vsel %vm1328_vm14, %v1948_v25, %v13449_v52  ;;  %v13523_v21 = vrot.slane %v11426_v0, 6 }
 0x2bd   :  { %v1590_v26 = vpop.permute.xlu1 %1589  ;;  %v984_v24 = vpop.f32.mrb[133].mxu0 }
 0x2be   :  { %v1628_v35 = vadd.f32 %v1590_v26, %v11610_v43  ;;  %v1588_v36 = vpop.permute.xlu0 %1587 }
 0x2bf   :  { %v1627_v50 = vadd.f32 %v1588_v36, %v11601_v34  ;;  %2035 = vrot.lane.b32.xlu1 %v2005_v58, %s10390_s19 }
 0x2c0   :  { %2033 = vrot.lane.b32.xlu0 %v2006_v31, %s10390_s19  ;;  %v11796_v20 = vpop.f32.mrb[134].mxu0  ;;  %v1701_v8 = vadd.f32 %v13523_v21, %v1628_v35 }
 0x2c1   :  { %v1752_v12 = vpop.permute.xlu1 %1751  ;;  %v989_v41 = vpop.f32.mrb[135].mxu0  ;;  %v1700_v47 = vadd.f32 %v11446_v32, %v1627_v50  ;;  %v1847_v30 = vrot.slane %v11796_v20, 1 }
 0x2c2   :  { %v1790_v46 = vadd.f32 %v1752_v12, %v1701_v8  ;;  %v1750_v25 = vpop.permute.xlu0 %1749  ;;  %v1951_v58 = vrot.slane %v989_v41, 2  ;;  %v2007_v29 = vrot.slane %v989_v41, 3  ;;  %v13524_v12 = vld [vmem:[#allocation31_spill] sm:$0xff] }
 0x2c3   :  { %v1789_v55 = vadd.f32 %v1750_v25, %v1700_v47  ;;  %v13525_v41 = vrot.slane %v13524_v12, 6 }
 0x2c4   :  { %v11801_v43 = vpop.f32.mrb[136].mxu0  ;;  %v11804_v34 = vadd.f32 %v1790_v46, %v11730_v18 }
 0x2c5   :  { %v1848_v11 = vrot.slane %v11801_v43, 1  ;;  %v11808_v28 = vpop.f32.mrb[137].mxu0  ;;  %v11811_v0 = vadd.f32 %v1789_v55, %v11722_v17  ;;  %v13526_v55 = vld [vmem:[#allocation32_spill] sm:$0xff] }
 0x2c6   :  { %v13448_v32 = vrot.slane %v11808_v28, 2  ;;  %v2008_v10 = vrot.slane %v11808_v28, 3 }
 0x2c7   :  { %1879 = vrot.lane.b32.xlu1 %v1848_v11, %s10390_s19  ;;  %v1849_v18 = vsel %vm1223_vm12, %v1847_v30, %v1848_v11 }
 0x2c8   :  { %1877 = vrot.lane.b32.xlu0 %v1849_v18, %s10390_s19  ;;  %v999_v31 = vpop.f32.mrb[138].mxu0  ;;  %v2009_v26 = vsel %vm1385_vm13, %v2007_v29, %v2008_v10  ;;  %v11822_v17 = vsel %vm1328_vm14, %v1951_v58, %v13448_v32 }
 0x2c9   :  { %v1594_v24 = vpop.permute.xlu1 %1593  ;;  %v1000_v35 = vpop.f32.mrb[139].mxu0 }
 0x2ca   :  { %v1630_v36 = vadd.f32 %v1594_v24, %v11634_v56  ;;  %v1592_v50 = vpop.permute.xlu0 %1591 }
 0x2cb   :  { %v1629_v21 = vadd.f32 %v1592_v50, %v11623_v14  ;;  %2039 = vrot.lane.b32.xlu1 %v2008_v10, %s10390_s19 }
 0x2cc   :  { %2037 = vrot.lane.b32.xlu0 %v2009_v26, %s10390_s19  ;;  %v11828_v8 = vpop.f32.mrb[140].mxu0  ;;  %v1703_v47 = vadd.f32 %v13525_v41, %v1630_v36 }
 0x2cd   :  { %v1756_v46 = vpop.permute.xlu1 %1755  ;;  %v1005_v25 = vpop.f32.mrb[141].mxu0  ;;  %v1702_v30 = vadd.f32 %v13526_v55, %v1629_v21  ;;  %v1850_v10 = vrot.slane %v11828_v8, 1 }
 0x2ce   :  { %v1792_v11 = vadd.f32 %v1756_v46, %v1703_v47  ;;  %v1754_v58 = vpop.permute.xlu0 %1753  ;;  %v1954_v24 = vrot.slane %v1005_v25, 2  ;;  %v2010_v35 = vrot.slane %v1005_v25, 3 }
 0x2cf   :  { %v1791_v29 = vadd.f32 %v1754_v58, %v1702_v30 }
 0x2d0   :  { %v11833_v56 = vpop.f32.mrb[142].mxu0  ;;  %v11836_v14 = vadd.f32 %v1792_v11, %v11767_v16  ;;  %v13527_v11 = vrot.slane %v11495_v4, 6 }
 0x2d1   :  { %v1851_v18 = vrot.slane %v11833_v56, 1  ;;  %v11840_v31 = vpop.f32.mrb[143].mxu0  ;;  %v11843_v26 = vadd.f32 %v1791_v29, %v11760_v51 }
 0x2d2   :  { %v13446_v36 = vrot.slane %v11840_v31, 2  ;;  %v2011_v50 = vrot.slane %v11840_v31, 3 }
 0x2d3   :  { %1883 = vrot.lane.b32.xlu1 %v1851_v18, %s10390_s19  ;;  %v1852_v16 = vsel %vm1223_vm12, %v1850_v10, %v1851_v18  ;;  %v13528_v18 = vld [vmem:[#allocation35_spill] sm:$0xff] }
 0x2d4   :  { %1881 = vrot.lane.b32.xlu0 %v1852_v16, %s10390_s19  ;;  %v1080_v21 = vpop.f32.mrb[144].mxu0  ;;  %v2012_v12 = vsel %vm1385_vm13, %v2010_v35, %v2011_v50  ;;  %v11854_v51 = vsel %vm1328_vm14, %v1954_v24, %v13446_v36 }
 0x2d5   :  { %v1598_v41 = vpop.permute.xlu1 %1597  ;;  %v1081_v47 = vpop.f32.mrb[145].mxu0 }
 0x2d6   :  { %v1632_v46 = vadd.f32 %v1598_v41, %v11657_v6  ;;  %v1596_v25 = vpop.permute.xlu0 %1595 }
 0x2d7   :  { %v1631_v55 = vadd.f32 %v1596_v25, %v11650_v15  ;;  %2043 = vrot.lane.b32.xlu1 %v2011_v50, %s10390_s19 }
 0x2d8   :  { %2041 = vrot.lane.b32.xlu0 %v2012_v12, %s10390_s19  ;;  %v1084_v30 = vpop.f32.mrb[146].mxu0  ;;  %v1705_v58 = vadd.f32 %v13527_v11, %v1632_v46 }
 0x2d9   :  { %v1760_v29 = vpop.permute.xlu1 %1759  ;;  %v1086_v10 = vpop.f32.mrb[147].mxu0  ;;  %v1704_v24 = vadd.f32 %v13528_v18, %v1631_v55  ;;  %v2093_v47 = vrot.slane %v1084_v30, 4  ;;  %v2149_v50 = vrot.slane %v1084_v30, 5 }
 0x2da   :  { %v1794_v35 = vadd.f32 %v1760_v29, %v1705_v58  ;;  %v1758_v16 = vpop.permute.xlu0 %1757  ;;  %v2253_v25 = vrot.slane %v1086_v10, 6  ;;  %v2309_v55 = vrot.slane %v1086_v10, 7 }
 0x2db   :  { %v1793_v21 = vadd.f32 %v1758_v16, %v1704_v24 }
 0x2dc   :  { %v11863_v6 = vpop.f32.mrb[148].mxu0  ;;  %v11866_v15 = vadd.f32 %v1794_v35, %v11801_v43 }
 0x2dd   :  { %v2094_v12 = vrot.slane %v11863_v6, 4  ;;  %v2150_v41 = vrot.slane %v11863_v6, 5  ;;  %v11870_v4 = vpop.f32.mrb[149].mxu0  ;;  %v11873_v46 = vadd.f32 %v1793_v21, %v11796_v20 }
 0x2de   :  { %v13445_v11 = vrot.slane %v11870_v4, 6  ;;  %v2310_v58 = vrot.slane %v11870_v4, 7 }
 0x2df   :  { %2175 = vrot.lane.b32.xlu1 %v2150_v41, %s10390_s19  ;;  %v2151_v43 = vsel %vm410_vm0, %v2149_v50, %v2150_v41  ;;  %v11882_v30 = vsel %vm1490_vm15, %v2093_v47, %v2094_v12  ;;  %v13529_v50 = vrot.slane %v11532_v23, 6 }
 0x2e0   :  { %v1096_v29 = vpop.f32.mrb[150].mxu0  ;;  %2173 = vrot.lane.b32.xlu0 %v2151_v43, %s10390_s19  ;;  %v2311_v20 = vsel %vm1708_vm2, %v2309_v55, %v2310_v58  ;;  %v11889_v10 = vsel %vm1651_vm3, %v2253_v25, %v13445_v11 }
 0x2e1   :  { %v1602_v18 = vpop.permute.xlu1 %1601  ;;  %v1097_v24 = vpop.f32.mrb[151].mxu0 }
 0x2e2   :  { %v1634_v35 = vadd.f32 %v1602_v18, %v11688_v59  ;;  %v1600_v16 = vpop.permute.xlu0 %1599 }
 0x2e3   :  { %v1633_v21 = vadd.f32 %v1600_v16, %v11679_v9  ;;  %2335 = vrot.lane.b32.xlu1 %v2310_v58, %s10390_s19 }
 0x2e4   :  { %v1100_v47 = vpop.f32.mrb[152].mxu0  ;;  %2333 = vrot.lane.b32.xlu0 %v2311_v20, %s10390_s19  ;;  %v1707_v41 = vadd.f32 %v13529_v50, %v1634_v35 }
 0x2e5   :  { %v1764_v55 = vpop.permute.xlu1 %1763  ;;  %v1102_v43 = vpop.f32.mrb[153].mxu0  ;;  %v1706_v25 = vadd.f32 %v11553_v19, %v1633_v21  ;;  %v2096_v36 = vrot.slane %v1100_v47, 4  ;;  %v2152_v58 = vrot.slane %v1100_v47, 5 }
 0x2e6   :  { %v1796_v29 = vadd.f32 %v1764_v55, %v1707_v41  ;;  %v1762_v11 = vpop.permute.xlu0 %1761  ;;  %v2256_v19 = vrot.slane %v1102_v43, 6  ;;  %v2312_v16 = vrot.slane %v1102_v43, 7 }
 0x2e7   :  { %v1795_v24 = vadd.f32 %v1762_v11, %v1706_v25 }
 0x2e8   :  { %v11898_v59 = vpop.f32.mrb[154].mxu0  ;;  %v11901_v9 = vadd.f32 %v1796_v29, %v11833_v56 }
 0x2e9   :  { %v2097_v18 = vrot.slane %v11898_v59, 4  ;;  %v2153_v20 = vrot.slane %v11898_v59, 5  ;;  %v11905_v23 = vpop.f32.mrb[155].mxu0  ;;  %v11908_v35 = vadd.f32 %v1795_v24, %v11828_v8 }
 0x2ea   :  { %v13447_v11 = vrot.slane %v11905_v23, 6  ;;  %v2313_v21 = vrot.slane %v11905_v23, 7 }
 0x2eb   :  { %2179 = vrot.lane.b32.xlu1 %v2153_v20, %s10390_s19  ;;  %v2154_v56 = vsel %vm410_vm0, %v2152_v58, %v2153_v20  ;;  %v11917_v47 = vsel %vm1490_vm15, %v2096_v36, %v2097_v18 }
 0x2ec   :  { %v1112_v50 = vpop.f32.mrb[156].mxu0  ;;  %2177 = vrot.lane.b32.xlu0 %v2154_v56, %s10390_s19  ;;  %v2314_v8 = vsel %vm1708_vm2, %v2312_v16, %v2313_v21  ;;  %v11924_v41 = vsel %vm1651_vm3, %v2256_v19, %v13447_v11 }
 0x2ed   :  { %v1113_v55 = vpop.f32.mrb[157].mxu0 }
 0x2ef   :  { %2339 = vrot.lane.b32.xlu1 %v2313_v21, %s10390_s19 }
 0x2f0   :  { %v1116_v43 = vpop.f32.mrb[158].mxu0  ;;  %2337 = vrot.lane.b32.xlu0 %v2314_v8, %s10390_s19 }
 0x2f1   :  { %v1856_v25 = vpop.permute.xlu1 %1855  ;;  %v1118_v29 = vpop.f32.mrb[159].mxu0  ;;  %v2099_v20 = vrot.slane %v1116_v43, 4  ;;  %v2155_v16 = vrot.slane %v1116_v43, 5 }
 0x2f2   :  { %v1902_v36 = vadd.f32 %v1856_v25, %v11711_v22  ;;  %v1854_v24 = vpop.permute.xlu0 %1853  ;;  %v2259_v50 = vrot.slane %v1118_v29, 6  ;;  %v2315_v25 = vrot.slane %v1118_v29, 7 }
 0x2f3   :  { %v1901_v58 = vadd.f32 %v1854_v24, %v11701_v38 }
 0x2f4   :  { %v11930_v56 = vpop.f32.mrb[160].mxu0  ;;  %v1974_v19 = vadd.f32 %v1934_v13, %v1902_v36 }
 0x2f5   :  { %v2100_v21 = vrot.slane %v11930_v56, 4  ;;  %v2156_v55 = vrot.slane %v11930_v56, 5  ;;  %v2016_v8 = vpop.permute.xlu1 %2015  ;;  %v11936_v11 = vpop.f32.mrb[161].mxu0  ;;  %v1973_v22 = vadd.f32 %v11598_v39, %v1901_v58  ;;  %v2511_v58 = vld [vmem:[%s13384_s3 + $0x8] sm:$0xff] }
 0x2f6   :  { %v2062_v32 = vadd.f32 %v2016_v8, %v1974_v19  ;;  %v13453_v38 = vrot.slane %v11936_v11, 6  ;;  %v2316_v43 = vrot.slane %v11936_v11, 7  ;;  %v2014_v24 = vpop.permute.xlu0 %2013 }
 0x2f7   :  { %v2061_v52 = vadd.f32 %v2014_v24, %v1973_v22  ;;  %2183 = vrot.lane.b32.xlu1 %v2156_v55, %s10390_s19  ;;  %v2157_v61 = vsel %vm410_vm0, %v2155_v16, %v2156_v55  ;;  %v11946_v13 = vsel %vm1490_vm15, %v2099_v20, %v2100_v21  ;;  %v2513_v16 = vld [vmem:[%s13384_s3 + $0x18] sm:$0xff]  ;;  %v2510_v20 = vld [vmem:[%s13384_s3] sm:$0xff]  ;;  %v2512_v55 = vld [vmem:[%s13384_s3 + $0x10] sm:$0xff] }
 0x2f8   :  { %v1128_v36 = vpop.f32.mrb[162].mxu0  ;;  %2181 = vrot.lane.b32.xlu0 %v2157_v61, %s10390_s19  ;;  %v2317_v39 = vsel %vm1708_vm2, %v2315_v25, %v2316_v43  ;;  %v11952_v29 = vadd.f32 %v2094_v12, %v2062_v32  ;;  %v11966_v19 = vsel %vm1651_vm3, %v2259_v50, %v13453_v38  ;;  %v8711_v12 = vpack.c.bf16 %v2513_v16, %v2511_v58 }
 0x2f9   :  { %v1129_v6 = vpop.f32.mrb[163].mxu0  ;;  %v11969_v32 = vadd.f32 %v11882_v30, %v2061_v52  ;;  %v8713_v8 = vpack.c.bf16 %v2512_v55, %v2510_v20 }
 0x2fa   :  { %8712 = vmatprep.subr.bf16.mxu0 %v8711_v12 }
 0x2fb   :  { %2343 = vrot.lane.b32.xlu1 %v2316_v43, %s10390_s19  ;;  %8714 = vmatpush1.bf16.msra.mxu0 %v8713_v8 }
 0x2fc   :  { %v1132_v22 = vpop.f32.mrb[164].mxu0  ;;  %2341 = vrot.lane.b32.xlu0 %v2317_v39, %s10390_s19 }
 0x2fd   :  { %v1860_v25 = vpop.permute.xlu1 %1859  ;;  %v1134_v50 = vpop.f32.mrb[165].mxu0  ;;  %v2102_v30 = vrot.slane %v1132_v22, 4  ;;  %v2158_v36 = vrot.slane %v1132_v22, 5 }
 0x2fe   :  { %v1904_v24 = vadd.f32 %v1860_v25, %v11733_v57  ;;  %v1858_v61 = vpop.permute.xlu0 %1857  ;;  %v2262_v43 = vrot.slane %v1134_v50, 6  ;;  %v2318_v55 = vrot.slane %v1134_v50, 7 }
 0x2ff   :  { %v1903_v52 = vadd.f32 %v1858_v61, %v11727_v37 }
 0x300   :  { %v11978_v58 = vpop.f32.mrb[166].mxu0  ;;  %v1976_v16 = vadd.f32 %v1937_v60, %v1904_v24 }
 0x301   :  { %v2103_v20 = vrot.slane %v11978_v58, 4  ;;  %v2159_v39 = vrot.slane %v11978_v58, 5  ;;  %v2020_v6 = vpop.permute.xlu1 %2019  ;;  %v11984_v12 = vpop.f32.mrb[167].mxu0  ;;  %v1975_v57 = vadd.f32 %v11639_v33, %v1903_v52  ;;  %v2515_v52 = vld [vmem:[%s13384_s3 + $0x28] sm:$0xff]  ;;  %v13530_v58 = vld [vmem:[#allocation20_spill] sm:$0xff] }
 0x302   :  { %v2064_v8 = vadd.f32 %v2020_v6, %v1976_v16  ;;  %v13452_v37 = vrot.slane %v11984_v12, 6  ;;  %v2319_v22 = vrot.slane %v11984_v12, 7  ;;  %v2018_v25 = vpop.permute.xlu0 %2017  ;;  %v2516_v6 = vld [vmem:[%s13384_s3 + $0x30] sm:$0xff] }
 0x303   :  { %v2063_v61 = vadd.f32 %v2018_v25, %v1975_v57  ;;  %2187 = vrot.lane.b32.xlu1 %v2159_v39, %s10390_s19  ;;  %v2160_v5 = vsel %vm410_vm0, %v2158_v36, %v2159_v39  ;;  %v11994_v60 = vsel %vm1490_vm15, %v2102_v30, %v2103_v20  ;;  %v2517_v36 = vld [vmem:[%s13384_s3 + $0x38] sm:$0xff]  ;;  %v2514_v30 = vld [vmem:[%s13384_s3 + $0x20] sm:$0xff] }
 0x304   :  { %v1144_v24 = vpop.f32.mrb[168].mxu0  ;;  %2185 = vrot.lane.b32.xlu0 %v2160_v5, %s10390_s19  ;;  %v2320_v33 = vsel %vm1708_vm2, %v2318_v55, %v2319_v22  ;;  %v12000_v50 = vadd.f32 %v2097_v18, %v2064_v8  ;;  %v12014_v16 = vsel %vm1651_vm3, %v2262_v43, %v13452_v37  ;;  %v8715_v39 = vpack.c.bf16 %v2517_v36, %v2515_v52 }
 0x305   :  { %v1145_v59 = vpop.f32.mrb[169].mxu0  ;;  %v12017_v18 = vadd.f32 %v11917_v47, %v2063_v61  ;;  %v8717_v57 = vpack.c.bf16 %v2516_v6, %v2514_v30 }
 0x306   :  { %8716 = vmatprep.subr.bf16.mxu0 %v8715_v39 }
 0x307   :  { %2347 = vrot.lane.b32.xlu1 %v2319_v22, %s10390_s19  ;;  %8718 = vmatpush1.bf16.msra.mxu0 %v8717_v57 }
 0x308   :  { %v1148_v55 = vpop.f32.mrb[170].mxu0  ;;  %2345 = vrot.lane.b32.xlu0 %v2320_v33, %s10390_s19 }
 0x309   :  { %v1864_v8 = vpop.permute.xlu1 %1863  ;;  %v1150_v43 = vpop.f32.mrb[171].mxu0  ;;  %v2105_v61 = vrot.slane %v1148_v55, 4  ;;  %v2161_v24 = vrot.slane %v1148_v55, 5 }
 0x30a   :  { %v1906_v25 = vadd.f32 %v1864_v8, %v11763_v7  ;;  %v1862_v5 = vpop.permute.xlu0 %1861  ;;  %v2265_v22 = vrot.slane %v1150_v43, 6  ;;  %v2321_v6 = vrot.slane %v1150_v43, 7 }
 0x30b   :  { %v1905_v47 = vadd.f32 %v1862_v5, %v11755_v54 }
 0x30c   :  { %v12026_v52 = vpop.f32.mrb[172].mxu0  ;;  %v1978_v36 = vadd.f32 %v1940_v62, %v1906_v25 }
 0x30d   :  { %v2106_v30 = vrot.slane %v12026_v52, 4  ;;  %v2162_v33 = vrot.slane %v12026_v52, 5  ;;  %v2024_v59 = vpop.permute.xlu1 %2023  ;;  %v12032_v39 = vpop.f32.mrb[173].mxu0  ;;  %v1977_v7 = vadd.f32 %v11676_v48, %v1905_v47  ;;  %v2641_v52 = vld [vmem:[#allocation8 + $0x40] sm:$0xff] }
 0x30e   :  { %v2066_v57 = vadd.f32 %v2024_v59, %v1978_v36  ;;  %v13450_v54 = vrot.slane %v12032_v39, 6  ;;  %v2322_v55 = vrot.slane %v12032_v39, 7  ;;  %v2022_v8 = vpop.permute.xlu0 %2021 }
 0x30f   :  { %v2065_v5 = vadd.f32 %v2022_v8, %v1977_v7  ;;  %2191 = vrot.lane.b32.xlu1 %v2162_v33, %s10390_s19  ;;  %v2163_v3 = vsel %vm410_vm0, %v2161_v24, %v2162_v33  ;;  %v12042_v62 = vsel %vm1490_vm15, %v2105_v61, %v2106_v30 }
 0x310   :  { %v1160_v25 = vpop.f32.mrb[174].mxu0  ;;  %2189 = vrot.lane.b32.xlu0 %v2163_v3, %s10390_s19  ;;  %v2323_v48 = vsel %vm1708_vm2, %v2321_v6, %v2322_v55  ;;  %v12048_v43 = vadd.f32 %v2100_v21, %v2066_v57  ;;  %v12053_v47 = vsel %vm1651_vm3, %v2265_v22, %v13450_v54 }
 0x311   :  { %v1161_v24 = vpop.f32.mrb[175].mxu0  ;;  %v12056_v36 = vadd.f32 %v11946_v13, %v2065_v5 }
 0x313   :  { %2351 = vrot.lane.b32.xlu1 %v2322_v55, %s10390_s19 }
 0x314   :  { %v1164_v61 = vpop.f32.mrb[176].mxu0  ;;  %2349 = vrot.lane.b32.xlu0 %v2323_v48, %s10390_s19 }
 0x315   :  { %v1868_v33 = vpop.permute.xlu1 %1867  ;;  %v1166_v59 = vpop.f32.mrb[177].mxu0  ;;  %v2108_v6 = vrot.slane %v1164_v61, 4  ;;  %v2164_v57 = vrot.slane %v1164_v61, 5 }
 0x316   :  { %v1908_v56 = vadd.f32 %v1868_v33, %v11785_v27  ;;  %v1866_v21 = vpop.permute.xlu0 %1865  ;;  %v2268_v8 = vrot.slane %v1166_v59, 6  ;;  %v2324_v48 = vrot.slane %v1166_v59, 7 }
 0x317   :  { %v1907_v7 = vadd.f32 %v1866_v21, %v11776_v2 }
 0x318   :  { %v12062_v22 = vpop.f32.mrb[178].mxu0  ;;  %v1980_v13 = vadd.f32 %v1943_v63, %v1908_v56  ;;  %v2521_v63 = vld [vmem:[%s13384_s3 + $0x58] sm:$0xff]  ;;  %v2518_v56 = vld [vmem:[%s13384_s3 + $0x40] sm:$0xff] }
 0x319   :  { %v13456_v55 = vrot.slane %v12062_v22, 4  ;;  %v2165_v5 = vrot.slane %v12062_v22, 5  ;;  %v2028_v3 = vpop.permute.xlu1 %2027  ;;  %v12068_v25 = vpop.f32.mrb[179].mxu0  ;;  %v1979_v27 = vadd.f32 %v11716_v49, %v1907_v7  ;;  %v8719_v21 = vpack.c.bf16 %v2521_v63, %v2519_v40  ;;  %v2520_v7 = vld [vmem:[%s13384_s3 + $0x50] sm:$0xff] }
 0x31a   :  { %v2068_v24 = vadd.f32 %v2028_v3, %v1980_v13  ;;  %v13451_v2 = vrot.slane %v12068_v25, 6  ;;  %v2325_v61 = vrot.slane %v12068_v25, 7  ;;  %v2026_v33 = vpop.permute.xlu0 %2025 }
 0x31b   :  { %v2067_v49 = vadd.f32 %v2026_v33, %v1979_v27  ;;  %2195 = vrot.lane.b32.xlu1 %v2165_v5, %s10390_s19  ;;  %v2166_v59 = vsel %vm410_vm0, %v2164_v57, %v2165_v5  ;;  %v12090_v13 = vsel %vm1490_vm15, %v2108_v6, %v13456_v55  ;;  %v8721_v57 = vpack.c.bf16 %v2520_v7, %v2518_v56 }
 0x31c   :  { %v1176_v3 = vpop.f32.mrb[180].mxu0  ;;  %2193 = vrot.lane.b32.xlu0 %v2166_v59, %s10390_s19  ;;  %v2326_v54 = vsel %vm1708_vm2, %v2324_v48, %v2325_v61  ;;  %v12096_v27 = vadd.f32 %v2103_v20, %v2068_v24  ;;  %v12101_v5 = vsel %vm1651_vm3, %v2268_v8, %v13451_v2  ;;  %8720 = vmatprep.subr.bf16.mxu0 %v8719_v21  ;;  %v13455_v20 = vrot.slane %v13530_v58, 4  ;;  %v13531_v59 = vld [vmem:[#allocation21_spill] sm:$0xff]  ;;  %v2634_v2 = vld [vmem:[#allocation8 + $0x8] sm:$0xff] }
 0x31d   :  { %v1177_v33 = vpop.f32.mrb[181].mxu0  ;;  %v12104_v40 = vadd.f32 %v11994_v60, %v2067_v49  ;;  %8722 = vmatpush1.bf16.msra.mxu0 %v8721_v57  ;;  %v13454_v8 = vrot.slane %v13531_v59, 6 }
 0x31f   :  { %2355 = vrot.lane.b32.xlu1 %v2325_v61, %s10390_s19  ;;  %v13532_v61 = vld [vmem:[#allocation25_spill] sm:$0xff] }
 0x320   :  { %v1180_v6 = vpop.f32.mrb[182].mxu0  ;;  %2353 = vrot.lane.b32.xlu0 %v2326_v54, %s10390_s19  ;;  %v13533_v57 = vrot.slane %v13532_v61, 7  ;;  %v13534_v54 = vrot.slane %v13530_v58, 5 }
 0x321   :  { %v2111_v48 = vrot.slane %v1180_v6, 4  ;;  %v2167_v24 = vrot.slane %v1180_v6, 5  ;;  %v1872_v63 = vpop.permute.xlu1 %1871  ;;  %v1182_v56 = vpop.f32.mrb[183].mxu0 }
 0x322   :  { %v1910_v7 = vadd.f32 %v1872_v63, %v11804_v34  ;;  %v2271_v3 = vrot.slane %v1182_v56, 6  ;;  %v1870_v60 = vpop.permute.xlu0 %1869  ;;  %v2327_v49 = vrot.slane %v1182_v56, 7  ;;  %v2636_v34 = vld [vmem:[#allocation8 + $0x18] sm:$0xff] }
 0x323   :  { %v1909_v21 = vadd.f32 %v1870_v60, %v11811_v0  ;;  %2363 = vrot.lane.b32.xlu1 %v13533_v57, %s10390_s19  ;;  %v2169_v33 = vsel %vm410_vm0, %v2167_v24, %v13534_v54  ;;  %v12121_v6 = vsel %vm1490_vm15, %v2111_v48, %v13455_v20  ;;  %v12131_v56 = vpack.c.bf16 %v2636_v34, %v2634_v2  ;;  %v2633_v24 = vld [vmem:[#allocation8] sm:$0xff]  ;;  %v2635_v60 = vld [vmem:[#allocation8 + $0x10] sm:$0xff]  ;;  %v2638_v2 = vld [vmem:[#allocation8 + $0x28] sm:$0xff] }
 0x324   :  { %2197 = vrot.lane.b32.xlu0 %v2169_v33, %s10390_s19  ;;  %v1982_v0 = vadd.f32 %v1946_v42, %v1910_v7  ;;  %v12129_v63 = vsel %vm1651_vm3, %v2271_v3, %v13454_v8  ;;  %v12134_v54 = vpack.c.bf16 %v2635_v60, %v2633_v24  ;;  %v13535_v42 = vrot.slane %v13531_v59, 7  ;;  %v2640_v3 = vld [vmem:[#allocation8 + $0x38] sm:$0xff]  ;;  %v2637_v33 = vld [vmem:[#allocation8 + $0x20] sm:$0xff]  ;;  %v2639_v34 = vld [vmem:[#allocation8 + $0x30] sm:$0xff] }
 0x325   :  { %v2032_v57 = vpop.permute.xlu1 %2031  ;;  %v1981_v48 = vadd.f32 %v11752_v44, %v1909_v21  ;;  %8728 = vmatprep.subr.bf16.mxu1 %v12131_v56  ;;  %v12146_v21 = vpack.c.bf16 %v2640_v3, %v2638_v2  ;;  %v2644_v24 = vld [vmem:[#allocation8 + $0x58] sm:$0xff]  ;;  %v13536_v60 = vld [vmem:[#allocation27_spill] sm:$0xff]  ;;  %vm2436_vm0 = vcmask 523264  }
 0x326   :  { %v2070_v37 = vadd.f32 %v2032_v57, %v1982_v0  ;;  %v2030_v38 = vpop.permute.xlu0 %2029  ;;  %v2329_v7 = vsel %vm1708_vm2, %v2327_v49, %v13535_v42  ;;  %8730 = vmatpush1.bf16.msra.mxu1 %v12134_v54  ;;  %v12151_v0 = vpack.c.bf16 %v2639_v34, %v2637_v33  ;;  %v2642_v49 = vld [vmem:[#allocation8 + $0x48] sm:$0xff]  ;;  %v2522_v33 = vld [vmem:[%s13384_s3 + $0x60] sm:$0xff] }
 0x327   :  { %v2069_v1 = vadd.f32 %v2030_v38, %v1981_v48  ;;  %8732 = vmatprep.subr.bf16.mxu1 %v12146_v21  ;;  %v2523_v42 = vld [vmem:[%s13384_s3 + $0x68] sm:$0xff] }
 0x328   :  { %2357 = vrot.lane.b32.xlu0 %v2329_v7, %s10390_s19  ;;  %v12144_v44 = vadd.f32 %v2106_v30, %v2070_v37  ;;  %v12157_v37 = vpack.c.bf16 %v2644_v24, %v2642_v49  ;;  %v2643_v30 = vld [vmem:[#allocation8 + $0x50] sm:$0xff]  ;;  %v2646_v34 = vld [vmem:[#allocation8 + $0x68] sm:$0xff]  ;;  %v13537_v49 = vrot.slane %v11773_v45, 2  ;;  %v13538_v45 = vrot.slane %v12062_v22, 4 }
 0x329   :  { %v12149_v38 = vadd.f32 %v12042_v62, %v2069_v1  ;;  %v12159_v48 = vpack.c.bf16 %v2643_v30, %v2641_v52  ;;  %v2525_v7 = vld [vmem:[%s13384_s3 + $0x78] sm:$0xff]  ;;  %v2645_v30 = vld [vmem:[#allocation8 + $0x60] sm:$0xff] }
 0x32a   :  { %8734 = vmatpush1.bf16.msra.mxu1 %v12151_v0  ;;  %v8723_v3 = vpack.c.bf16 %v2525_v7, %v2523_v42  ;;  %v2648_v52 = vld [vmem:[#allocation8 + $0x78] sm:$0xff] }
 0x32b   :  { %8736 = vmatprep.subr.bf16.mxu1 %v12157_v37  ;;  %v12180_v42 = vpack.c.bf16 %v2648_v52, %v2646_v34 }
 0x32c   :  { %2361 = vrot.lane.b32.xlu0 %v13536_v60, %s10390_s19  ;;  %8724 = vmatprep.subr.bf16.mxu0 %v8723_v3 }
 0x32d   :  { %v1876_v57 = vpop.permute.xlu1 %1875 }
 0x32e   :  { %v1912_v62 = vadd.f32 %v1876_v57, %v11836_v14  ;;  %v1874_v1 = vpop.permute.xlu0 %1873  ;;  %v2524_v14 = vld [vmem:[%s13384_s3 + $0x70] sm:$0xff]  ;;  %8738 = vmatpush1.bf16.msra.mxu1 %v12159_v48 }
 0x32f   :  { %v1911_v2 = vadd.f32 %v1874_v1, %v11843_v26  ;;  %v8725_v60 = vpack.c.bf16 %v2524_v14, %v2522_v33  ;;  %v2647_v57 = vld [vmem:[#allocation8 + $0x70] sm:$0xff]  ;;  %8740 = vmatprep.subr.bf16.mxu1 %v12180_v42  ;;  %v13540_v33 = vrot.slane %v11808_v28, 2  ;;  %v13542_v28 = vld [vmem:[#allocation29_spill] sm:$0xff] }
 0x330   :  { %v1984_v24 = vadd.f32 %v13537_v49, %v1912_v62  ;;  %v12182_v7 = vpack.c.bf16 %v2647_v57, %v2645_v30  ;;  %v13543_v30 = vrot.slane %v13531_v59, 6 }
 0x331   :  { %v2036_v26 = vpop.permute.xlu1 %2035  ;;  %v1983_v1 = vadd.f32 %v11790_v53, %v1911_v2  ;;  %8726 = vmatpush1.bf16.msra.mxu0 %v8725_v60  ;;  %v13539_v2 = vmov 0.0   ;;  %v13541_v60 = vrot.slane %v13530_v58, 4 }
 0x332   :  { %v2072_v8 = vadd.f32 %v2036_v26, %v1984_v24  ;;  %v2034_v20 = vpop.permute.xlu0 %2033  ;;  %8744 = vmatprep.subr.bf16.mxu0 %v12131_v56  ;;  %8742 = vmatpush1.bf16.msra.mxu1 %v12182_v7 }
 0x333   :  { %v2071_v55 = vadd.f32 %v2034_v20, %v1983_v1  ;;  %8760 = vmatprep.subr.bf16.mxu1 %v12131_v56 }
 0x334   :  { %v12188_v62 = vadd.f32 %v13538_v45, %v2072_v8 }
 0x335   :  { %v12192_v53 = vadd.f32 %v12090_v13, %v2071_v55  ;;  %2717 = vmatmul.mubr.f32.vlgmr.msra.gmra.mrb[8].mxu1 %v13539_v2 }
 0x336   :  { %8762 = vmatpush1.bf16.msra.mxu1 %v12134_v54  ;;  %2920 = vmatprep.mubr.f32.mxu1 %v13539_v2 }
 0x337   :  { %8764 = vmatprep.subr.bf16.mxu1 %v12146_v21 }
 0x339   :  { %v1880_v20 = vpop.permute.xlu1 %1879 }
 0x33a   :  { %v1914_v22 = vadd.f32 %v1880_v20, %v11866_v15  ;;  %v1878_v8 = vpop.permute.xlu0 %1877  ;;  %8766 = vmatpush1.bf16.msra.mxu1 %v12151_v0 }
 0x33b   :  { %v1913_v3 = vadd.f32 %v1878_v8, %v11873_v46  ;;  %8768 = vmatprep.subr.bf16.mxu1 %v12157_v37 }
 0x33c   :  { %v1986_v55 = vadd.f32 %v13540_v33, %v1914_v22  ;;  %v13545_v33 = vld [vmem:[#allocation24_spill] sm:$0xff] }
 0x33d   :  { %v2040_v13 = vpop.permute.xlu1 %2039  ;;  %v1985_v14 = vadd.f32 %v11822_v17, %v1913_v3 }
 0x33e   :  { %v2074_v34 = vadd.f32 %v2040_v13, %v1986_v55  ;;  %v2038_v49 = vpop.permute.xlu0 %2037  ;;  %8770 = vmatpush1.bf16.msra.mxu1 %v12159_v48  ;;  %v13546_v55 = vrot.slane %v13545_v33, 4 }
 0x33f   :  { %v2073_v24 = vadd.f32 %v2038_v49, %v1985_v14  ;;  %8772 = vmatprep.subr.bf16.mxu1 %v12180_v42  ;;  %v13547_v14 = vld [vmem:[#allocation26_spill] sm:$0xff] }
 0x340   :  { %v2146_v52 = vadd.f32 %v13541_v60, %v2074_v34  ;;  %v13548_v49 = vld [vmem:[#allocation34_spill] sm:$0xff] }
 0x341   :  { %v12210_v15 = vadd.f32 %v12121_v6, %v2073_v24  ;;  %v13544_v6 = vrot.slane %v11840_v31, 2 }
 0x342   :  { %v2234_v46 = vadd.f32 %v13542_v28, %v2146_v52  ;;  %8774 = vmatpush1.bf16.msra.mxu1 %v12182_v7  ;;  %v13551_v28 = vld [vmem:[#allocation28_spill] sm:$0xff] }
 0x343   :  { %8792 = vmatprep.subr.bf16.mxu1 %v12131_v56 }
 0x344   :  { %v12216_v17 = vadd.f32 %v13543_v30, %v2234_v46 }
 0x345   :  { %v1884_v57 = vpop.permute.xlu1 %1883 }
 0x346   :  { %v1916_v58 = vadd.f32 %v1884_v57, %v11901_v9  ;;  %v1882_v26 = vpop.permute.xlu0 %1881  ;;  %v13549_v9 = vld [vmem:[#allocation33_spill] sm:$0xff] }
 0x347   :  { %v1915_v1 = vadd.f32 %v1882_v26, %v11908_v35  ;;  %v13550_v35 = vrot.slane %v13532_v61, 6  ;;  %v12245_v61 = vld [vmem:[%s13383_s2] ss:$0 sm:$0xff] }
 0x348   :  { %v1988_v45 = vadd.f32 %v13544_v6, %v1916_v58  ;;  %v13552_v58 = vrot.slane %v11870_v4, 6 }
 0x349   :  { %v2044_v20 = vpop.permute.xlu1 %2043  ;;  %v1987_v22 = vadd.f32 %v11854_v51, %v1915_v1 }
 0x34a   :  { %v2076_v8 = vadd.f32 %v2044_v20, %v1988_v45  ;;  %v2042_v59 = vpop.permute.xlu0 %2041 }
 0x34b   :  { %v2075_v3 = vadd.f32 %v2042_v59, %v1987_v22 }
 0x34c   :  { %v2148_v13 = vadd.f32 %v13546_v55, %v2076_v8 }
 0x34d   :  { %v2147_v34 = vadd.f32 %v13547_v14, %v2075_v3 }
 0x34e   :  { %v2236_v24 = vadd.f32 %v13548_v49, %v2148_v13 }
 0x34f   :  { %v2235_v60 = vadd.f32 %v13549_v9, %v2147_v34  ;;  %v13553_v34 = vrot.slane %v11905_v23, 6 }
 0x350   :  { %v12232_v52 = vadd.f32 %v13550_v35, %v2236_v24 }
 0x351   :  { %v2176_v31 = vpop.permute.xlu1 %2175  ;;  %v12235_v46 = vadd.f32 %v13551_v28, %v2235_v60 }
 0x352   :  { %v2222_v51 = vadd.f32 %v2176_v31, %v11952_v29  ;;  %v2174_v30 = vpop.permute.xlu0 %2173 }
 0x353   :  { %v2221_v57 = vadd.f32 %v2174_v30, %v11969_v32 }
 0x354   :  { %v2294_v26 = vadd.f32 %v13552_v58, %v2222_v51 }
 0x355   :  { %v2336_v1 = vpop.permute.xlu1 %2335  ;;  %v2293_v6 = vadd.f32 %v11889_v10, %v2221_v57 }
 0x356   :  { %v2382_v45 = vadd.f32 %v2336_v1, %v2294_v26  ;;  %v2334_v20 = vpop.permute.xlu0 %2333 }
 0x357   :  { %v2381_v22 = vadd.f32 %v2334_v20, %v2293_v6 }
 0x358   :  { %v2405_v8 = vadd.f32 %v12245_v61, %v2382_v45 }
 0x359   :  { %v2404_v29 = vadd.f32 %v12245_v61, %v2381_v22 }
 0x35a   :  { %v2421_v59 = vmax.f32 %v2405_v8, 0.0  ;;  %v13554_v8 = vrot.slane %v11936_v11, 6 }
 0x35b   :  { %v2420_v4 = vmax.f32 %v2404_v29, 0.0 }
 0x35c   :  { %v2439_v32 = vsel %vm2438_vm1, %v2421_v59, -inf }
 0x35d   :  { %v2437_v10 = vsel %vm2436_vm0, %v2420_v4, -inf  ;;  %v2180_v3 = vpop.permute.xlu1 %2179 }
 0x35e   :  { %v2440_v33 = vmax.f32 %v2437_v10, %v2439_v32  ;;  %v2224_v55 = vadd.f32 %v2180_v3, %v12000_v50  ;;  %v2178_v13 = vpop.permute.xlu0 %2177 }
 0x35f   :  { %v2223_v14 = vadd.f32 %v2178_v13, %v12017_v18 }
 0x360   :  { %v2296_v49 = vadd.f32 %v13553_v34, %v2224_v55  ;;  %v2441_v60 = vrot.slane %v2440_v33, 4 }
 0x361   :  { %v2340_v24 = vpop.permute.xlu1 %2339  ;;  %v2295_v9 = vadd.f32 %v11924_v41, %v2223_v14 }
 0x362   :  { %v2384_v35 = vadd.f32 %v2340_v24, %v2296_v49  ;;  %v2338_v31 = vpop.permute.xlu0 %2337  ;;  %v2442_v57 = vmax.f32 %v2440_v33, %v2441_v60 }
 0x363   :  { %v2383_v28 = vadd.f32 %v2338_v31, %v2295_v9 }
 0x364   :  { %v2407_v51 = vadd.f32 %v12245_v61, %v2384_v35  ;;  %v2443_v1 = vrot.slane %v2442_v57, 2 }
 0x365   :  { %v2406_v30 = vadd.f32 %v12245_v61, %v2383_v28 }
 0x366   :  { %v2423_v58 = vmax.f32 %v2407_v51, 0.0  ;;  %v2444_v32 = vmax.f32 %v2442_v57, %v2443_v1 }
 0x367   :  { %v2422_v50 = vmax.f32 %v2406_v30, 0.0 }
 0x368   :  { %v2448_v26 = vsel %vm2438_vm1, %v2423_v58, -inf  ;;  %v2445_v34 = vrot.slane %v2444_v32, 1 }
 0x369   :  { %v2447_v18 = vsel %vm2436_vm0, %v2422_v50, -inf  ;;  %v2184_v23 = vpop.permute.xlu1 %2183 }
 0x36a   :  { %v2449_v6 = vmax.f32 %v2447_v18, %v2448_v26  ;;  %v2226_v41 = vadd.f32 %v2184_v23, %v12048_v43  ;;  %v2182_v45 = vpop.permute.xlu0 %2181  ;;  %v2446_v35 = vmax.f32 %v2444_v32, %v2445_v34  ;;  %v13555_v26 = vrot.slane %v11984_v12, 6 }
 0x36b   :  { %v2225_v20 = vadd.f32 %v2182_v45, %v12056_v36  ;;  %v13556_v34 = vrot.slane %v12032_v39, 6 }
 0x36c   :  { %v2450_v22 = vrot.slane %v2449_v6, 4  ;;  %v2298_v29 = vadd.f32 %v13554_v8, %v2226_v41 }
 0x36d   :  { %v2344_v59 = vpop.permute.xlu1 %2343  ;;  %v2297_v4 = vadd.f32 %v11966_v19, %v2225_v20 }
 0x36e   :  { %v2451_v10 = vmax.f32 %v2449_v6, %v2450_v22  ;;  %v2386_v3 = vadd.f32 %v2344_v59, %v2298_v29  ;;  %v2342_v33 = vpop.permute.xlu0 %2341 }
 0x36f   :  { %v2385_v55 = vadd.f32 %v2342_v33, %v2297_v4 }
 0x370   :  { %v2452_v13 = vrot.slane %v2451_v10, 2  ;;  %v2409_v14 = vadd.f32 %v12245_v61, %v2386_v3 }
 0x371   :  { %v2408_v43 = vadd.f32 %v12245_v61, %v2385_v55 }
 0x372   :  { %v2453_v49 = vmax.f32 %v2451_v10, %v2452_v13  ;;  %v2425_v36 = vmax.f32 %v2409_v14, 0.0 }
 0x373   :  { %v2424_v24 = vmax.f32 %v2408_v43, 0.0 }
 0x374   :  { %v2454_v9 = vrot.slane %v2453_v49, 1  ;;  %v2457_v11 = vsel %vm2438_vm1, %v2425_v36, -inf }
 0x375   :  { %v2456_v19 = vsel %vm2436_vm0, %v2424_v24, -inf  ;;  %v2188_v60 = vpop.permute.xlu1 %2187 }
 0x376   :  { %v2455_v31 = vmax.f32 %v2453_v49, %v2454_v9  ;;  %v2458_v28 = vmax.f32 %v2456_v19, %v2457_v11  ;;  %v2228_v51 = vadd.f32 %v2188_v60, %v12096_v27  ;;  %v2186_v30 = vpop.permute.xlu0 %2185 }
 0x377   :  { %v2227_v57 = vadd.f32 %v2186_v30, %v12104_v40 }
 0x378   :  { %v2547_v58 = vsel %vm2546_vm4, %v2455_v31, %v2446_v35  ;;  %v2459_v50 = vrot.slane %v2458_v28, 4  ;;  %v2300_v18 = vadd.f32 %v13555_v26, %v2228_v51 }
 0x379   :  { %v2348_v23 = vpop.permute.xlu1 %2347  ;;  %v2299_v1 = vadd.f32 %v12014_v16, %v2227_v57 }
 0x37a   :  { %v2460_v6 = vmax.f32 %v2458_v28, %v2459_v50  ;;  %v2388_v41 = vadd.f32 %v2348_v23, %v2300_v18  ;;  %v2346_v45 = vpop.permute.xlu0 %2345 }
 0x37b   :  { %v2387_v20 = vadd.f32 %v2346_v45, %v2299_v1 }
 0x37c   :  { %v2461_v22 = vrot.slane %v2460_v6, 2  ;;  %v2411_v8 = vadd.f32 %v12245_v61, %v2388_v41 }
 0x37d   :  { %v2410_v27 = vadd.f32 %v12245_v61, %v2387_v20 }
 0x37e   :  { %v2462_v29 = vmax.f32 %v2460_v6, %v2461_v22  ;;  %v2427_v59 = vmax.f32 %v2411_v8, 0.0  ;;  %v13557_v6 = vrot.slane %v12068_v25, 6 }
 0x37f   :  { %v2426_v40 = vmax.f32 %v2410_v27, 0.0 }
 0x380   :  { %v2463_v4 = vrot.slane %v2462_v29, 1  ;;  %v2466_v32 = vsel %vm2438_vm1, %v2427_v59, -inf }
 0x381   :  { %v2465_v12 = vsel %vm2436_vm0, %v2426_v40, -inf  ;;  %v2192_v10 = vpop.permute.xlu1 %2191 }
 0x382   :  { %v2464_v16 = vmax.f32 %v2462_v29, %v2463_v4  ;;  %v2467_v3 = vmax.f32 %v2465_v12, %v2466_v32  ;;  %v2230_v33 = vadd.f32 %v2192_v10, %v12144_v44  ;;  %v2190_v55 = vpop.permute.xlu0 %2189 }
 0x383   :  { %v2229_v13 = vadd.f32 %v2190_v55, %v12149_v38 }
 0x384   :  { %v2549_v14 = vsel %vm2548_vm5, %v2464_v16, %v2547_v58  ;;  %v2468_v43 = vrot.slane %v2467_v3, 4  ;;  %v2302_v49 = vadd.f32 %v13556_v34, %v2230_v33 }
 0x385   :  { %v2352_v36 = vpop.permute.xlu1 %2351  ;;  %v2301_v24 = vadd.f32 %v12053_v47, %v2229_v13 }
 0x386   :  { %v2469_v9 = vmax.f32 %v2467_v3, %v2468_v43  ;;  %v2390_v11 = vadd.f32 %v2352_v36, %v2302_v49  ;;  %v2350_v19 = vpop.permute.xlu0 %2349 }
 0x387   :  { %v2389_v60 = vadd.f32 %v2350_v19, %v2301_v24 }
 0x388   :  { %v2470_v35 = vrot.slane %v2469_v9, 2  ;;  %v2413_v31 = vadd.f32 %v12245_v61, %v2390_v11 }
 0x389   :  { %v2412_v44 = vadd.f32 %v12245_v61, %v2389_v60 }
 0x38a   :  { %v2471_v28 = vmax.f32 %v2469_v9, %v2470_v35  ;;  %v2429_v51 = vmax.f32 %v2413_v31, 0.0 }
 0x38b   :  { %v2428_v38 = vmax.f32 %v2412_v44, 0.0 }
 0x38c   :  { %v2472_v30 = vrot.slane %v2471_v28, 1  ;;  %v2475_v57 = vsel %vm2438_vm1, %v2429_v51, -inf }
 0x38d   :  { %v2474_v39 = vsel %vm2436_vm0, %v2428_v38, -inf  ;;  %v2196_v58 = vpop.permute.xlu1 %2195 }
 0x38e   :  { %v2473_v47 = vmax.f32 %v2471_v28, %v2472_v30  ;;  %v2476_v50 = vmax.f32 %v2474_v39, %v2475_v57  ;;  %v2232_v26 = vadd.f32 %v2196_v58, %v12188_v62  ;;  %v2194_v18 = vpop.permute.xlu0 %2193  ;;  %v13558_v62 = vld [vmem:[#allocation30_spill] sm:$0xff] }
 0x38f   :  { %v2231_v23 = vadd.f32 %v2194_v18, %v12192_v53  ;;  %v2394_v32 = vadd.f32 %v13558_v62, %v12216_v17 }
 0x390   :  { %v2477_v1 = vrot.slane %v2476_v50, 4  ;;  %v2304_v41 = vadd.f32 %v13557_v6, %v2232_v26  ;;  %v2551_v45 = vsel %vm2550_vm6, %v2473_v47, %v2549_v14 }
 0x391   :  { %v2356_v20 = vpop.permute.xlu1 %2355  ;;  %v2303_v22 = vadd.f32 %v12101_v5, %v2231_v23  ;;  %v2417_v17 = vadd.f32 %v12245_v61, %v2394_v32 }
 0x392   :  { %v2478_v8 = vmax.f32 %v2476_v50, %v2477_v1  ;;  %v2392_v27 = vadd.f32 %v2356_v20, %v2304_v41  ;;  %v2354_v29 = vpop.permute.xlu0 %2353 }
 0x393   :  { %v2391_v59 = vadd.f32 %v2354_v29, %v2303_v22  ;;  %v2433_v19 = vmax.f32 %v2417_v17, 0.0 }
 0x394   :  { %v2479_v40 = vrot.slane %v2478_v8, 2  ;;  %v2415_v4 = vadd.f32 %v12245_v61, %v2392_v27 }
 0x395   :  { %v2414_v53 = vadd.f32 %v12245_v61, %v2391_v59  ;;  %v2364_v25 = vpop.permute.xlu1 %2363  ;;  %v2493_v51 = vsel %vm2438_vm1, %v2433_v19, -inf }
 0x396   :  { %v2480_v12 = vmax.f32 %v2478_v8, %v2479_v40  ;;  %v2431_v10 = vmax.f32 %v2415_v4, 0.0  ;;  %v2198_v16 = vpop.permute.xlu0 %2197  ;;  %v2396_v14 = vadd.f32 %v2364_v25, %v12232_v52 }
 0x397   :  { %v2430_v3 = vmax.f32 %v2414_v53, 0.0  ;;  %v2233_v33 = vadd.f32 %v2198_v16, %v12210_v15  ;;  %v2526_v16 = vld [vmem:[%s13386_s5] sm:$0x3] }
 0x398   :  { %v2481_v5 = vrot.slane %v2480_v12, 1  ;;  %v2484_v55 = vsel %vm2438_vm1, %v2431_v10, -inf  ;;  %v2419_v15 = vadd.f32 %v12245_v61, %v2396_v14 }
 0x399   :  { %v2483_v13 = vsel %vm2436_vm0, %v2430_v3, -inf  ;;  %v2305_v43 = vadd.f32 %v12129_v63, %v2233_v33 }
 0x39a   :  { %v2482_v34 = vmax.f32 %v2480_v12, %v2481_v5  ;;  %v2485_v49 = vmax.f32 %v2483_v13, %v2484_v55  ;;  %v2358_v36 = vpop.permute.xlu0 %2357  ;;  %v2435_v63 = vmax.f32 %v2419_v15, 0.0  ;;  %v13559_v12 = vlaneseq }
 0x39b   :  { %v2393_v24 = vadd.f32 %v2358_v36, %v2305_v43 }
 0x39c   :  { %v2486_v9 = vrot.slane %v2485_v49, 4  ;;  %v2553_v11 = vsel %vm2552_vm7, %v2482_v34, %v2551_v45  ;;  %v2502_v26 = vsel %vm2438_vm1, %v2435_v63, -inf  ;;  %v12321_v10 = vshrl.u32 %v13559_v12, 7 }
 0x39d   :  { %v2416_v60 = vadd.f32 %v12245_v61, %v2393_v24 }
 0x39e   :  { %v2487_v35 = vmax.f32 %v2485_v49, %v2486_v9  ;;  %v2362_v31 = vpop.permute.xlu0 %2361  ;;  %v13458_v25 = vsub.s32 0, %v12321_v10  ;;  %v13457_v13 = vsub.s32 1, %v12321_v10 }
 0x39f   :  { %v2432_v44 = vmax.f32 %v2416_v60, 0.0  ;;  %v2395_v52 = vadd.f32 %v2362_v31, %v12235_v46 }
 0x3a0   :  { %v2488_v28 = vrot.slane %v2487_v35, 2  ;;  %v2531_v3 = vrot.slane %v2526_v16, %v13458_v25  ;;  %v2535_v17 = vrot.slane %v2526_v16, %v13457_v13 }
 0x3a1   :  { %v2492_v38 = vsel %vm2436_vm0, %v2432_v44, -inf  ;;  %v2418_v30 = vadd.f32 %v12245_v61, %v2395_v52 }
 0x3a2   :  { %v2489_v57 = vmax.f32 %v2487_v35, %v2488_v28  ;;  %v2494_v39 = vmax.f32 %v2492_v38, %v2493_v51 }
 0x3a3   :  { %v2434_v58 = vmax.f32 %v2418_v30, 0.0 }
 0x3a4   :  { %v2490_v47 = vrot.slane %v2489_v57, 1  ;;  %v2495_v50 = vrot.slane %v2494_v39, 4 }
 0x3a5   :  { %v2501_v18 = vsel %vm2436_vm0, %v2434_v58, -inf }
 0x3a6   :  { %v2491_v23 = vmax.f32 %v2489_v57, %v2490_v47  ;;  %v2496_v46 = vmax.f32 %v2494_v39, %v2495_v50  ;;  %v2503_v1 = vmax.f32 %v2501_v18, %v2502_v26 }
 0x3a8   :  { %v2497_v6 = vrot.slane %v2496_v46, 2  ;;  %v2504_v41 = vrot.slane %v2503_v1, 4  ;;  %v2555_v45 = vsel %vm2554_vm8, %v2491_v23, %v2553_v11 }
 0x3aa   :  { %v2498_v20 = vmax.f32 %v2496_v46, %v2497_v6  ;;  %v2505_v22 = vmax.f32 %v2503_v1, %v2504_v41 }
 0x3ac   :  { %v2499_v8 = vrot.slane %v2498_v20, 1  ;;  %v2506_v61 = vrot.slane %v2505_v22, 2 }
 0x3ae   :  { %v2500_v27 = vmax.f32 %v2498_v20, %v2499_v8  ;;  %v2507_v29 = vmax.f32 %v2505_v22, %v2506_v61 }
 0x3b0   :  { %v2508_v59 = vrot.slane %v2507_v29, 1  ;;  %v2557_v40 = vsel %vm2556_vm9, %v2500_v27, %v2555_v45 }
 0x3b2   :  { %v2509_v4 = vmax.f32 %v2507_v29, %v2508_v59 }
 0x3b4   :  { %v2559_v62 = vsel %vm2558_vm10, %v2509_v4, %v2557_v40 }
 0x3b5   :  { %8470 = vmatmul.mubr.msk.f32.vlgmr.msra.gmra.mrb[184].mxu0 %vm2436_vm0, %v2559_v62 }
 0x3b6   :  { %8746 = vmatpush1.bf16.msra.mxu0 %v12134_v54  ;;  %2818 = vmatprep.mubr.f32.mxu0 %v13539_v2 }
 0x3b7   :  { %8748 = vmatprep.subr.bf16.mxu0 %v12146_v21 }
 0x3ba   :  { %8750 = vmatpush1.bf16.msra.mxu0 %v12151_v0 }
 0x3bb   :  { %8752 = vmatprep.subr.bf16.mxu0 %v12157_v37 }
 0x3be   :  { %8754 = vmatpush1.bf16.msra.mxu0 %v12159_v48 }
 0x3bf   :  { %8756 = vmatprep.subr.bf16.mxu0 %v12180_v42 }
 0x3c2   :  { %8758 = vmatpush1.bf16.msra.mxu0 %v12182_v7 }
 0x3c3   :  { %8776 = vmatprep.subr.bf16.mxu0 %v12131_v56 }
 0x408   :  { %v2718_v32 = vpop.f32.mrb[8].mxu1 }
 0x409   :  { %v2720_v53 = vpop.f32.mrb[9].mxu1 }
 0x488   :  { %v2628_v33 = vpop.f32.mrb[184].mxu0 }
 0x489   :  { %v12329_v5 = vadd.f32 %v2628_v33, %v2531_v3  ;;  %v2630_v55 = vpop.f32.mrb[185].mxu0 }
 0x48a   :  { %v12335_v34 = vadd.f32 %v2630_v55, %v2535_v17 }
 0x48b   :  { %v2723_v14 = vadd.f32 %v2718_v32, %v12329_v5 }
 0x48c   :  { %v2724_v49 = vadd.f32 %v2720_v53, %v12335_v34 }
 0x48d   :  { %v8471_v43 = vmul.f32 -1.442695, %v2723_v14 }
 0x48e   :  { %v8472_v19 = vmul.f32 -1.442695, %v2724_v49 }
 0x48f   :  { %9692 = vpow2.f32 %v8471_v43 }
 0x490   :  { %9694 = vtanh.f32 %v2724_v49 }
 0x499   :  { %v9693_v36 = vpop.eup %9692 }
 0x49a   :  { %v2728_v24 = vadd.f32 1.0, %v9693_v36  ;;  %v9695_v9 = vpop.eup %9694 }
 0x49c   :  { %9696 = vrcp.f32 %v2728_v24 }
 0x49d   :  { %9698 = vpow2.f32 %v8472_v19 }
 0x4a6   :  { %v9697_v11 = vpop.eup %9696 }
 0x4a7   :  { %v2739_v15 = vmul.f32 %v9697_v11, %v9695_v9  ;;  %v9699_v60 = vpop.eup %9698  ;;  %v2738_v31 = vmul.f32 0.0, %v9697_v11 }
 0x4a8   :  { %v2735_v35 = vadd.f32 1.0, %v9699_v60 }
 0x4a9   :  { %2741 = vrot.lane.b32.xlu0 %v2739_v15, %s10390_s19 }
 0x4aa   :  { %9700 = vrcp.f32 %v2735_v35 }
 0x4b4   :  { %v9701_v28 = vpop.eup %9700 }
 0x51b   :  { %v2742_v44 = vpop.permute.xlu0 %2741 }
 0x51c   :  { %v2744_v52 = vadd.f32 %v2742_v44, %v2738_v31 }
 0x51e   :  { %9702 = vtanh.f32 %v2744_v52 }
 0x528   :  { %v9703_v63 = vpop.eup %9702 }
 0x529   :  { %v2746_v51 = vmul.f32 %v9703_v63, %v9701_v28 }
 0x52b   :  { %2748 = vrot.lane.b32.xlu1 %v2746_v51, %s10390_s19 }
 0x59d   :  { %v2749_v38 = vpop.permute.xlu1 %2748 }
 0x59e   :  { %2751 = vst.msk [vmem:[#allocation2] sm:$0xff] %vm2436_vm0, %v2749_v38  ;;  %8473 = vmatmul.mubr.msk.f32.vlgmr.msra.gmra.mrb[186].mxu0 %vm2436_vm0, %v2749_v38 }
 0x59f   :  { %8778 = vmatpush1.bf16.msra.mxu0 %v12134_v54  ;;  %3022 = vmatprep.mubr.f32.mxu0 %v13539_v2 }
 0x5a0   :  { %8780 = vmatprep.subr.bf16.mxu0 %v12146_v21 }
 0x5a3   :  { %8782 = vmatpush1.bf16.msra.mxu0 %v12151_v0 }
 0x5a4   :  { %8784 = vmatprep.subr.bf16.mxu0 %v12157_v37 }
 0x5a7   :  { %8786 = vmatpush1.bf16.msra.mxu0 %v12159_v48 }
 0x5a8   :  { %8788 = vmatprep.subr.bf16.mxu0 %v12180_v42 }
 0x5ab   :  { %8790 = vmatpush1.bf16.msra.mxu0 %v12182_v7 }
 0x5ac   :  { %8808 = vmatprep.subr.bf16.mxu0 %v12131_v56 }
 0x671   :  { %v2820_v30 = vpop.f32.mrb[186].mxu0 }
 0x672   :  { %v2825_v57 = vadd.f32 %v2820_v30, %v12329_v5  ;;  %v2822_v39 = vpop.f32.mrb[187].mxu0 }
 0x673   :  { %v2826_v47 = vadd.f32 %v2822_v39, %v12335_v34 }
 0x674   :  { %v8474_v58 = vmul.f32 -1.442695, %v2825_v57 }
 0x675   :  { %v8475_v1 = vmul.f32 -1.442695, %v2826_v47 }
 0x676   :  { %9704 = vpow2.f32 %v8474_v58 }
 0x677   :  { %9706 = vtanh.f32 %v2826_v47 }
 0x680   :  { %v9705_v50 = vpop.eup %9704 }
 0x681   :  { %v2830_v26 = vadd.f32 1.0, %v9705_v50  ;;  %v9707_v18 = vpop.eup %9706 }
 0x683   :  { %9708 = vrcp.f32 %v2830_v26 }
 0x684   :  { %9710 = vpow2.f32 %v8475_v1 }
 0x68d   :  { %v9709_v23 = vpop.eup %9708 }
 0x68e   :  { %v2841_v46 = vmul.f32 %v9709_v23, %v9707_v18  ;;  %v9711_v6 = vpop.eup %9710  ;;  %v2840_v45 = vmul.f32 %v9709_v23, %v2744_v52 }
 0x68f   :  { %v2837_v41 = vadd.f32 1.0, %v9711_v6 }
 0x690   :  { %2843 = vrot.lane.b32.xlu0 %v2841_v46, %s10390_s19 }
 0x691   :  { %9712 = vrcp.f32 %v2837_v41 }
 0x69b   :  { %v9713_v8 = vpop.eup %9712 }
 0x702   :  { %v2844_v20 = vpop.permute.xlu0 %2843 }
 0x703   :  { %v2846_v22 = vadd.f32 %v2844_v20, %v2840_v45 }
 0x705   :  { %9714 = vtanh.f32 %v2846_v22 }
 0x70f   :  { %v9715_v61 = vpop.eup %9714 }
 0x710   :  { %v2848_v27 = vmul.f32 %v9715_v61, %v9713_v8 }
 0x712   :  { %2850 = vrot.lane.b32.xlu1 %v2848_v27, %s10390_s19 }
 0x784   :  { %v2851_v29 = vpop.permute.xlu1 %2850 }
 0x785   :  { %2853 = vst.msk [vmem:[#allocation2 + $0x8] sm:$0xff] %vm2436_vm0, %v2851_v29  ;;  %8476 = vmatmul.mubr.msk.f32.vlgmr.msra.gmra.mrb[10].mxu1 %vm2436_vm0, %v2851_v29 }
 0x786   :  { %8794 = vmatpush1.bf16.msra.mxu1 %v12134_v54  ;;  %3124 = vmatprep.mubr.f32.mxu1 %v13539_v2 }
 0x787   :  { %8796 = vmatprep.subr.bf16.mxu1 %v12146_v21 }
 0x78a   :  { %8798 = vmatpush1.bf16.msra.mxu1 %v12151_v0 }
 0x78b   :  { %8800 = vmatprep.subr.bf16.mxu1 %v12157_v37 }
 0x78e   :  { %8802 = vmatpush1.bf16.msra.mxu1 %v12159_v48 }
 0x78f   :  { %8804 = vmatprep.subr.bf16.mxu1 %v12180_v42 }
 0x792   :  { %8806 = vmatpush1.bf16.msra.mxu1 %v12182_v7 }
 0x793   :  { %8824 = vmatprep.subr.bf16.mxu1 %v12131_v56 }
 0x858   :  { %v2922_v59 = vpop.f32.mrb[10].mxu1 }
 0x859   :  { %v2927_v40 = vadd.f32 %v2922_v59, %v12329_v5  ;;  %v2924_v4 = vpop.f32.mrb[11].mxu1 }
 0x85a   :  { %v2928_v32 = vadd.f32 %v2924_v4, %v12335_v34 }
 0x85b   :  { %v8477_v62 = vmul.f32 -1.442695, %v2927_v40 }
 0x85c   :  { %v8478_v55 = vmul.f32 -1.442695, %v2928_v32 }
 0x85d   :  { %9716 = vpow2.f32 %v8477_v62 }
 0x85e   :  { %9718 = vtanh.f32 %v2928_v32 }
 0x867   :  { %v9717_v53 = vpop.eup %9716 }
 0x868   :  { %v2932_v12 = vadd.f32 1.0, %v9717_v53  ;;  %v9719_v16 = vpop.eup %9718 }
 0x86a   :  { %9720 = vrcp.f32 %v2932_v12 }
 0x86b   :  { %9722 = vpow2.f32 %v8478_v55 }
 0x874   :  { %v9721_v3 = vpop.eup %9720 }
 0x875   :  { %v2943_v33 = vmul.f32 %v9721_v3, %v9719_v16  ;;  %v9723_v14 = vpop.eup %9722  ;;  %v2942_v17 = vmul.f32 %v9721_v3, %v2846_v22 }
 0x876   :  { %v2939_v43 = vadd.f32 1.0, %v9723_v14 }
 0x877   :  { %2945 = vrot.lane.b32.xlu0 %v2943_v33, %s10390_s19 }
 0x878   :  { %9724 = vrcp.f32 %v2939_v43 }
 0x882   :  { %v9725_v24 = vpop.eup %9724 }
 0x8e9   :  { %v2946_v49 = vpop.permute.xlu0 %2945 }
 0x8ea   :  { %v2948_v36 = vadd.f32 %v2946_v49, %v2942_v17 }
 0x8ec   :  { %9726 = vtanh.f32 %v2948_v36 }
 0x8f6   :  { %v9727_v9 = vpop.eup %9726 }
 0x8f7   :  { %v2950_v11 = vmul.f32 %v9727_v9, %v9725_v24 }
 0x8f9   :  { %2952 = vrot.lane.b32.xlu1 %v2950_v11, %s10390_s19 }
 0x96b   :  { %v2953_v15 = vpop.permute.xlu1 %2952 }
 0x96c   :  { %2955 = vst.msk [vmem:[#allocation2 + $0x10] sm:$0xff] %vm2436_vm0, %v2953_v15  ;;  %8479 = vmatmul.mubr.msk.f32.vlgmr.msra.gmra.mrb[188].mxu0 %vm2436_vm0, %v2953_v15 }
 0x96d   :  { %8810 = vmatpush1.bf16.msra.mxu0 %v12134_v54  ;;  %3226 = vmatprep.mubr.f32.mxu0 %v13539_v2 }
 0x96e   :  { %8812 = vmatprep.subr.bf16.mxu0 %v12146_v21 }
 0x971   :  { %8814 = vmatpush1.bf16.msra.mxu0 %v12151_v0 }
 0x972   :  { %8816 = vmatprep.subr.bf16.mxu0 %v12157_v37 }
 0x975   :  { %8818 = vmatpush1.bf16.msra.mxu0 %v12159_v48 }
 0x976   :  { %8820 = vmatprep.subr.bf16.mxu0 %v12180_v42 }
 0x979   :  { %8822 = vmatpush1.bf16.msra.mxu0 %v12182_v7 }
 0x97a   :  { %8840 = vmatprep.subr.bf16.mxu0 %v12131_v56 }
 0xa3f   :  { %v3024_v19 = vpop.f32.mrb[188].mxu0 }
 0xa40   :  { %v3029_v60 = vadd.f32 %v3024_v19, %v12329_v5  ;;  %v3026_v35 = vpop.f32.mrb[189].mxu0 }
 0xa41   :  { %v3030_v44 = vadd.f32 %v3026_v35, %v12335_v34 }
 0xa42   :  { %v8480_v31 = vmul.f32 -1.442695, %v3029_v60 }
 0xa43   :  { %v8481_v30 = vmul.f32 -1.442695, %v3030_v44 }
 0xa44   :  { %9728 = vpow2.f32 %v8480_v31 }
 0xa45   :  { %9730 = vtanh.f32 %v3030_v44 }
 0xa4e   :  { %v9729_v52 = vpop.eup %9728 }
 0xa4f   :  { %v3034_v28 = vadd.f32 1.0, %v9729_v52  ;;  %v9731_v63 = vpop.eup %9730 }
 0xa51   :  { %9732 = vrcp.f32 %v3034_v28 }
 0xa52   :  { %9734 = vpow2.f32 %v8481_v30 }
 0xa5b   :  { %v9733_v51 = vpop.eup %9732 }
 0xa5c   :  { %v3045_v38 = vmul.f32 %v9733_v51, %v9731_v63  ;;  %v9735_v57 = vpop.eup %9734  ;;  %v3044_v58 = vmul.f32 %v9733_v51, %v2948_v36 }
 0xa5d   :  { %v3041_v39 = vadd.f32 1.0, %v9735_v57 }
 0xa5e   :  { %3047 = vrot.lane.b32.xlu0 %v3045_v38, %s10390_s19 }
 0xa5f   :  { %9736 = vrcp.f32 %v3041_v39 }
 0xa69   :  { %v9737_v26 = vpop.eup %9736 }
 0xad0   :  { %v3048_v47 = vpop.permute.xlu0 %3047 }
 0xad1   :  { %v3050_v50 = vadd.f32 %v3048_v47, %v3044_v58 }
 0xad3   :  { %9738 = vtanh.f32 %v3050_v50 }
 0xadd   :  { %v9739_v18 = vpop.eup %9738 }
 0xade   :  { %v3052_v23 = vmul.f32 %v9739_v18, %v9737_v26 }
 0xae0   :  { %3054 = vrot.lane.b32.xlu1 %v3052_v23, %s10390_s19 }
 0xb52   :  { %v3055_v46 = vpop.permute.xlu1 %3054 }
 0xb53   :  { %3057 = vst.msk [vmem:[#allocation2 + $0x18] sm:$0xff] %vm2436_vm0, %v3055_v46  ;;  %8482 = vmatmul.mubr.msk.f32.vlgmr.msra.gmra.mrb[12].mxu1 %vm2436_vm0, %v3055_v46 }
 0xb54   :  { %8826 = vmatpush1.bf16.msra.mxu1 %v12134_v54  ;;  %3328 = vmatprep.mubr.f32.mxu1 %v13539_v2 }
 0xb55   :  { %8828 = vmatprep.subr.bf16.mxu1 %v12146_v21 }
 0xb58   :  { %8830 = vmatpush1.bf16.msra.mxu1 %v12151_v0 }
 0xb59   :  { %8832 = vmatprep.subr.bf16.mxu1 %v12157_v37 }
 0xb5c   :  { %8834 = vmatpush1.bf16.msra.mxu1 %v12159_v48 }
 0xb5d   :  { %8836 = vmatprep.subr.bf16.mxu1 %v12180_v42 }
 0xb60   :  { %8838 = vmatpush1.bf16.msra.mxu1 %v12182_v7 }
 0xb61   :  { %8856 = vmatprep.subr.bf16.mxu1 %v12131_v56 }
 0xc26   :  { %v3126_v1 = vpop.f32.mrb[12].mxu1 }
 0xc27   :  { %v3131_v6 = vadd.f32 %v3126_v1, %v12329_v5  ;;  %v3128_v41 = vpop.f32.mrb[13].mxu1 }
 0xc28   :  { %v3132_v20 = vadd.f32 %v3128_v41, %v12335_v34 }
 0xc29   :  { %v8483_v45 = vmul.f32 -1.442695, %v3131_v6 }
 0xc2a   :  { %v8484_v59 = vmul.f32 -1.442695, %v3132_v20 }
 0xc2b   :  { %9740 = vpow2.f32 %v8483_v45 }
 0xc2c   :  { %9742 = vtanh.f32 %v3132_v20 }
 0xc35   :  { %v9741_v22 = vpop.eup %9740 }
 0xc36   :  { %v3136_v8 = vadd.f32 1.0, %v9741_v22  ;;  %v9743_v61 = vpop.eup %9742 }
 0xc38   :  { %9744 = vrcp.f32 %v3136_v8 }
 0xc39   :  { %9746 = vpow2.f32 %v8484_v59 }
 0xc42   :  { %v9745_v27 = vpop.eup %9744 }
 0xc43   :  { %v3147_v29 = vmul.f32 %v9745_v27, %v9743_v61  ;;  %v9747_v40 = vpop.eup %9746  ;;  %v3146_v62 = vmul.f32 %v9745_v27, %v3050_v50 }
 0xc44   :  { %v3143_v4 = vadd.f32 1.0, %v9747_v40 }
 0xc45   :  { %3149 = vrot.lane.b32.xlu0 %v3147_v29, %s10390_s19 }
 0xc46   :  { %9748 = vrcp.f32 %v3143_v4 }
 0xc50   :  { %v9749_v12 = vpop.eup %9748 }
 0xcb7   :  { %v3150_v32 = vpop.permute.xlu0 %3149 }
 0xcb8   :  { %v3152_v53 = vadd.f32 %v3150_v32, %v3146_v62 }
 0xcba   :  { %9750 = vtanh.f32 %v3152_v53 }
 0xcc4   :  { %v9751_v16 = vpop.eup %9750 }
 0xcc5   :  { %v3154_v3 = vmul.f32 %v9751_v16, %v9749_v12 }
 0xcc7   :  { %3156 = vrot.lane.b32.xlu1 %v3154_v3, %s10390_s19 }
 0xd39   :  { %v3157_v33 = vpop.permute.xlu1 %3156 }
 0xd3a   :  { %3159 = vst.msk [vmem:[#allocation2 + $0x20] sm:$0xff] %vm2436_vm0, %v3157_v33  ;;  %8485 = vmatmul.mubr.msk.f32.vlgmr.msra.gmra.mrb[190].mxu0 %vm2436_vm0, %v3157_v33 }
 0xd3b   :  { %8842 = vmatpush1.bf16.msra.mxu0 %v12134_v54  ;;  %3430 = vmatprep.mubr.f32.mxu0 %v13539_v2 }
 0xd3c   :  { %8844 = vmatprep.subr.bf16.mxu0 %v12146_v21 }
 0xd3f   :  { %8846 = vmatpush1.bf16.msra.mxu0 %v12151_v0 }
 0xd40   :  { %8848 = vmatprep.subr.bf16.mxu0 %v12157_v37 }
 0xd43   :  { %8850 = vmatpush1.bf16.msra.mxu0 %v12159_v48 }
 0xd44   :  { %8852 = vmatprep.subr.bf16.mxu0 %v12180_v42 }
 0xd47   :  { %8854 = vmatpush1.bf16.msra.mxu0 %v12182_v7 }
 0xd48   :  { %8872 = vmatprep.subr.bf16.mxu0 %v12131_v56 }
 0xe0d   :  { %v3228_v55 = vpop.f32.mrb[190].mxu0 }
 0xe0e   :  { %v3233_v14 = vadd.f32 %v3228_v55, %v12329_v5  ;;  %v3230_v43 = vpop.f32.mrb[191].mxu0 }
 0xe0f   :  { %v3234_v49 = vadd.f32 %v3230_v43, %v12335_v34 }
 0xe10   :  { %v8486_v17 = vmul.f32 -1.442695, %v3233_v14 }
 0xe11   :  { %v8487_v19 = vmul.f32 -1.442695, %v3234_v49 }
 0xe12   :  { %9752 = vpow2.f32 %v8486_v17 }
 0xe13   :  { %9754 = vtanh.f32 %v3234_v49 }
 0xe1c   :  { %v9753_v36 = vpop.eup %9752 }
 0xe1d   :  { %v3238_v24 = vadd.f32 1.0, %v9753_v36  ;;  %v9755_v9 = vpop.eup %9754 }
 0xe1f   :  { %9756 = vrcp.f32 %v3238_v24 }
 0xe20   :  { %9758 = vpow2.f32 %v8487_v19 }
 0xe29   :  { %v9757_v11 = vpop.eup %9756 }
 0xe2a   :  { %v3249_v15 = vmul.f32 %v9757_v11, %v9755_v9  ;;  %v9759_v60 = vpop.eup %9758  ;;  %v3248_v31 = vmul.f32 %v9757_v11, %v3152_v53 }
 0xe2b   :  { %v3245_v35 = vadd.f32 1.0, %v9759_v60 }
 0xe2c   :  { %3251 = vrot.lane.b32.xlu0 %v3249_v15, %s10390_s19 }
 0xe2d   :  { %9760 = vrcp.f32 %v3245_v35 }
 0xe37   :  { %v9761_v28 = vpop.eup %9760 }
 0xe9e   :  { %v3252_v44 = vpop.permute.xlu0 %3251 }
 0xe9f   :  { %v3254_v52 = vadd.f32 %v3252_v44, %v3248_v31 }
 0xea1   :  { %9762 = vtanh.f32 %v3254_v52 }
 0xeab   :  { %v9763_v63 = vpop.eup %9762 }
 0xeac   :  { %v3256_v51 = vmul.f32 %v9763_v63, %v9761_v28 }
 0xeae   :  { %3258 = vrot.lane.b32.xlu1 %v3256_v51, %s10390_s19 }
 0xf20   :  { %v3259_v38 = vpop.permute.xlu1 %3258 }
 0xf21   :  { %3261 = vst.msk [vmem:[#allocation2 + $0x28] sm:$0xff] %vm2436_vm0, %v3259_v38  ;;  %8488 = vmatmul.mubr.msk.f32.vlgmr.msra.gmra.mrb[14].mxu1 %vm2436_vm0, %v3259_v38 }
 0xf22   :  { %8858 = vmatpush1.bf16.msra.mxu1 %v12134_v54  ;;  %3532 = vmatprep.mubr.f32.mxu1 %v13539_v2 }
 0xf23   :  { %8860 = vmatprep.subr.bf16.mxu1 %v12146_v21 }
 0xf26   :  { %8862 = vmatpush1.bf16.msra.mxu1 %v12151_v0 }
 0xf27   :  { %8864 = vmatprep.subr.bf16.mxu1 %v12157_v37 }
 0xf2a   :  { %8866 = vmatpush1.bf16.msra.mxu1 %v12159_v48 }
 0xf2b   :  { %8868 = vmatprep.subr.bf16.mxu1 %v12180_v42 }
 0xf2e   :  { %8870 = vmatpush1.bf16.msra.mxu1 %v12182_v7 }
 0xf2f   :  { %8888 = vmatprep.subr.bf16.mxu1 %v12131_v56 }
 0xff4   :  { %v3330_v30 = vpop.f32.mrb[14].mxu1 }
 0xff5   :  { %v3335_v57 = vadd.f32 %v3330_v30, %v12329_v5  ;;  %v3332_v39 = vpop.f32.mrb[15].mxu1 }
 0xff6   :  { %v3336_v47 = vadd.f32 %v3332_v39, %v12335_v34 }
 0xff7   :  { %v8489_v58 = vmul.f32 -1.442695, %v3335_v57 }
 0xff8   :  { %v8490_v1 = vmul.f32 -1.442695, %v3336_v47 }
 0xff9   :  { %9764 = vpow2.f32 %v8489_v58 }
 0xffa   :  { %9766 = vtanh.f32 %v3336_v47 }
0x1003   :  { %v9765_v50 = vpop.eup %9764 }
0x1004   :  { %v3340_v26 = vadd.f32 1.0, %v9765_v50  ;;  %v9767_v18 = vpop.eup %9766 }
0x1006   :  { %9768 = vrcp.f32 %v3340_v26 }
0x1007   :  { %9770 = vpow2.f32 %v8490_v1 }
0x1010   :  { %v9769_v23 = vpop.eup %9768 }
0x1011   :  { %v3351_v46 = vmul.f32 %v9769_v23, %v9767_v18  ;;  %v9771_v6 = vpop.eup %9770  ;;  %v3350_v45 = vmul.f32 %v9769_v23, %v3254_v52 }
0x1012   :  { %v3347_v41 = vadd.f32 1.0, %v9771_v6 }
0x1013   :  { %3353 = vrot.lane.b32.xlu0 %v3351_v46, %s10390_s19 }
0x1014   :  { %9772 = vrcp.f32 %v3347_v41 }
0x101e   :  { %v9773_v8 = vpop.eup %9772 }
0x1085   :  { %v3354_v20 = vpop.permute.xlu0 %3353 }
0x1086   :  { %v3356_v22 = vadd.f32 %v3354_v20, %v3350_v45 }
0x1088   :  { %9774 = vtanh.f32 %v3356_v22 }
0x1092   :  { %v9775_v61 = vpop.eup %9774 }
0x1093   :  { %v3358_v27 = vmul.f32 %v9775_v61, %v9773_v8 }
0x1095   :  { %3360 = vrot.lane.b32.xlu1 %v3358_v27, %s10390_s19 }
0x1107   :  { %v3361_v29 = vpop.permute.xlu1 %3360 }
0x1108   :  { %3363 = vst.msk [vmem:[#allocation2 + $0x30] sm:$0xff] %vm2436_vm0, %v3361_v29  ;;  %8491 = vmatmul.mubr.msk.f32.vlgmr.msra.gmra.mrb[192].mxu0 %vm2436_vm0, %v3361_v29 }
0x1109   :  { %8874 = vmatpush1.bf16.msra.mxu0 %v12134_v54  ;;  %3634 = vmatprep.mubr.f32.mxu0 %v13539_v2 }
0x110a   :  { %8876 = vmatprep.subr.bf16.mxu0 %v12146_v21 }
0x110d   :  { %8878 = vmatpush1.bf16.msra.mxu0 %v12151_v0 }
0x110e   :  { %8880 = vmatprep.subr.bf16.mxu0 %v12157_v37 }
0x1111   :  { %8882 = vmatpush1.bf16.msra.mxu0 %v12159_v48 }
0x1112   :  { %8884 = vmatprep.subr.bf16.mxu0 %v12180_v42 }
0x1115   :  { %8886 = vmatpush1.bf16.msra.mxu0 %v12182_v7 }
0x1116   :  { %8904 = vmatprep.subr.bf16.mxu0 %v12131_v56 }
0x11db   :  { %v3432_v59 = vpop.f32.mrb[192].mxu0 }
0x11dc   :  { %v3437_v40 = vadd.f32 %v3432_v59, %v12329_v5  ;;  %v3434_v4 = vpop.f32.mrb[193].mxu0 }
0x11dd   :  { %v3438_v32 = vadd.f32 %v3434_v4, %v12335_v34 }
0x11de   :  { %v8492_v62 = vmul.f32 -1.442695, %v3437_v40 }
0x11df   :  { %v8493_v55 = vmul.f32 -1.442695, %v3438_v32 }
0x11e0   :  { %9776 = vpow2.f32 %v8492_v62 }
0x11e1   :  { %9778 = vtanh.f32 %v3438_v32 }
0x11ea   :  { %v9777_v53 = vpop.eup %9776 }
0x11eb   :  { %v3442_v12 = vadd.f32 1.0, %v9777_v53  ;;  %v9779_v16 = vpop.eup %9778 }
0x11ed   :  { %9780 = vrcp.f32 %v3442_v12 }
0x11ee   :  { %9782 = vpow2.f32 %v8493_v55 }
0x11f7   :  { %v9781_v3 = vpop.eup %9780 }
0x11f8   :  { %v3453_v33 = vmul.f32 %v9781_v3, %v9779_v16  ;;  %v9783_v14 = vpop.eup %9782  ;;  %v3452_v17 = vmul.f32 %v9781_v3, %v3356_v22 }
0x11f9   :  { %v3449_v43 = vadd.f32 1.0, %v9783_v14 }
0x11fa   :  { %3455 = vrot.lane.b32.xlu0 %v3453_v33, %s10390_s19 }
0x11fb   :  { %9784 = vrcp.f32 %v3449_v43 }
0x1205   :  { %v9785_v24 = vpop.eup %9784 }
0x126c   :  { %v3456_v49 = vpop.permute.xlu0 %3455 }
0x126d   :  { %v3458_v36 = vadd.f32 %v3456_v49, %v3452_v17 }
0x126f   :  { %9786 = vtanh.f32 %v3458_v36 }
0x1279   :  { %v9787_v9 = vpop.eup %9786 }
0x127a   :  { %v3460_v11 = vmul.f32 %v9787_v9, %v9785_v24 }
0x127c   :  { %3462 = vrot.lane.b32.xlu1 %v3460_v11, %s10390_s19 }
0x12ee   :  { %v3463_v15 = vpop.permute.xlu1 %3462 }
0x12ef   :  { %3465 = vst.msk [vmem:[#allocation2 + $0x38] sm:$0xff] %vm2436_vm0, %v3463_v15  ;;  %8494 = vmatmul.mubr.msk.f32.vlgmr.msra.gmra.mrb[16].mxu1 %vm2436_vm0, %v3463_v15 }
0x12f0   :  { %8890 = vmatpush1.bf16.msra.mxu1 %v12134_v54  ;;  %3736 = vmatprep.mubr.f32.mxu1 %v13539_v2 }
0x12f1   :  { %8892 = vmatprep.subr.bf16.mxu1 %v12146_v21 }
0x12f4   :  { %8894 = vmatpush1.bf16.msra.mxu1 %v12151_v0 }
0x12f5   :  { %8896 = vmatprep.subr.bf16.mxu1 %v12157_v37 }
0x12f8   :  { %8898 = vmatpush1.bf16.msra.mxu1 %v12159_v48 }
0x12f9   :  { %8900 = vmatprep.subr.bf16.mxu1 %v12180_v42 }
0x12fc   :  { %8902 = vmatpush1.bf16.msra.mxu1 %v12182_v7 }
0x12fd   :  { %8920 = vmatprep.subr.bf16.mxu1 %v12131_v56 }
0x13c2   :  { %v3534_v19 = vpop.f32.mrb[16].mxu1 }
0x13c3   :  { %v3539_v60 = vadd.f32 %v3534_v19, %v12329_v5  ;;  %v3536_v35 = vpop.f32.mrb[17].mxu1 }
0x13c4   :  { %v3540_v44 = vadd.f32 %v3536_v35, %v12335_v34 }
0x13c5   :  { %v8495_v31 = vmul.f32 -1.442695, %v3539_v60 }
0x13c6   :  { %v8496_v30 = vmul.f32 -1.442695, %v3540_v44 }
0x13c7   :  { %9788 = vpow2.f32 %v8495_v31 }
0x13c8   :  { %9790 = vtanh.f32 %v3540_v44 }
0x13d1   :  { %v9789_v52 = vpop.eup %9788 }
0x13d2   :  { %v3544_v28 = vadd.f32 1.0, %v9789_v52  ;;  %v9791_v63 = vpop.eup %9790 }
0x13d4   :  { %9792 = vrcp.f32 %v3544_v28 }
0x13d5   :  { %9794 = vpow2.f32 %v8496_v30 }
0x13de   :  { %v9793_v51 = vpop.eup %9792 }
0x13df   :  { %v3555_v38 = vmul.f32 %v9793_v51, %v9791_v63  ;;  %v9795_v57 = vpop.eup %9794  ;;  %v3554_v58 = vmul.f32 %v9793_v51, %v3458_v36 }
0x13e0   :  { %v3551_v39 = vadd.f32 1.0, %v9795_v57 }
0x13e1   :  { %3557 = vrot.lane.b32.xlu0 %v3555_v38, %s10390_s19 }
0x13e2   :  { %9796 = vrcp.f32 %v3551_v39 }
0x13ec   :  { %v9797_v26 = vpop.eup %9796 }
0x1453   :  { %v3558_v47 = vpop.permute.xlu0 %3557 }
0x1454   :  { %v3560_v50 = vadd.f32 %v3558_v47, %v3554_v58 }
0x1456   :  { %9798 = vtanh.f32 %v3560_v50 }
0x1460   :  { %v9799_v18 = vpop.eup %9798 }
0x1461   :  { %v3562_v23 = vmul.f32 %v9799_v18, %v9797_v26 }
0x1463   :  { %3564 = vrot.lane.b32.xlu1 %v3562_v23, %s10390_s19 }
0x14d5   :  { %v3565_v46 = vpop.permute.xlu1 %3564 }
0x14d6   :  { %3567 = vst.msk [vmem:[#allocation2 + $0x40] sm:$0xff] %vm2436_vm0, %v3565_v46  ;;  %8497 = vmatmul.mubr.msk.f32.vlgmr.msra.gmra.mrb[194].mxu0 %vm2436_vm0, %v3565_v46 }
0x14d7   :  { %8906 = vmatpush1.bf16.msra.mxu0 %v12134_v54  ;;  %3838 = vmatprep.mubr.f32.mxu0 %v13539_v2 }
0x14d8   :  { %8908 = vmatprep.subr.bf16.mxu0 %v12146_v21 }
0x14db   :  { %8910 = vmatpush1.bf16.msra.mxu0 %v12151_v0 }
0x14dc   :  { %8912 = vmatprep.subr.bf16.mxu0 %v12157_v37 }
0x14df   :  { %8914 = vmatpush1.bf16.msra.mxu0 %v12159_v48 }
0x14e0   :  { %8916 = vmatprep.subr.bf16.mxu0 %v12180_v42 }
0x14e3   :  { %8918 = vmatpush1.bf16.msra.mxu0 %v12182_v7 }
0x14e4   :  { %8936 = vmatprep.subr.bf16.mxu0 %v12131_v56 }
0x15a9   :  { %v3636_v1 = vpop.f32.mrb[194].mxu0 }
0x15aa   :  { %v3641_v6 = vadd.f32 %v3636_v1, %v12329_v5  ;;  %v3638_v41 = vpop.f32.mrb[195].mxu0 }
0x15ab   :  { %v3642_v20 = vadd.f32 %v3638_v41, %v12335_v34 }
0x15ac   :  { %v8498_v45 = vmul.f32 -1.442695, %v3641_v6 }
0x15ad   :  { %v8499_v59 = vmul.f32 -1.442695, %v3642_v20 }
0x15ae   :  { %9800 = vpow2.f32 %v8498_v45 }
0x15af   :  { %9802 = vtanh.f32 %v3642_v20 }
0x15b8   :  { %v9801_v22 = vpop.eup %9800 }
0x15b9   :  { %v3646_v8 = vadd.f32 1.0, %v9801_v22  ;;  %v9803_v61 = vpop.eup %9802 }
0x15bb   :  { %9804 = vrcp.f32 %v3646_v8 }
0x15bc   :  { %9806 = vpow2.f32 %v8499_v59 }
0x15c5   :  { %v9805_v27 = vpop.eup %9804 }
0x15c6   :  { %v3657_v29 = vmul.f32 %v9805_v27, %v9803_v61  ;;  %v9807_v40 = vpop.eup %9806  ;;  %v3656_v62 = vmul.f32 %v9805_v27, %v3560_v50 }
0x15c7   :  { %v3653_v4 = vadd.f32 1.0, %v9807_v40 }
0x15c8   :  { %3659 = vrot.lane.b32.xlu0 %v3657_v29, %s10390_s19 }
0x15c9   :  { %9808 = vrcp.f32 %v3653_v4 }
0x15d3   :  { %v9809_v12 = vpop.eup %9808 }
0x163a   :  { %v3660_v32 = vpop.permute.xlu0 %3659 }
0x163b   :  { %v3662_v53 = vadd.f32 %v3660_v32, %v3656_v62 }
0x163d   :  { %9810 = vtanh.f32 %v3662_v53 }
0x1647   :  { %v9811_v16 = vpop.eup %9810 }
0x1648   :  { %v3664_v3 = vmul.f32 %v9811_v16, %v9809_v12 }
0x164a   :  { %3666 = vrot.lane.b32.xlu1 %v3664_v3, %s10390_s19 }
0x16bc   :  { %v3667_v33 = vpop.permute.xlu1 %3666 }
0x16bd   :  { %3669 = vst.msk [vmem:[#allocation2 + $0x48] sm:$0xff] %vm2436_vm0, %v3667_v33  ;;  %8500 = vmatmul.mubr.msk.f32.vlgmr.msra.gmra.mrb[18].mxu1 %vm2436_vm0, %v3667_v33 }
0x16be   :  { %8922 = vmatpush1.bf16.msra.mxu1 %v12134_v54  ;;  %3940 = vmatprep.mubr.f32.mxu1 %v13539_v2 }
0x16bf   :  { %8924 = vmatprep.subr.bf16.mxu1 %v12146_v21 }
0x16c2   :  { %8926 = vmatpush1.bf16.msra.mxu1 %v12151_v0 }
0x16c3   :  { %8928 = vmatprep.subr.bf16.mxu1 %v12157_v37 }
0x16c6   :  { %8930 = vmatpush1.bf16.msra.mxu1 %v12159_v48 }
0x16c7   :  { %8932 = vmatprep.subr.bf16.mxu1 %v12180_v42 }
0x16ca   :  { %8934 = vmatpush1.bf16.msra.mxu1 %v12182_v7 }
0x16cb   :  { %8952 = vmatprep.subr.bf16.mxu1 %v12131_v56 }
0x1790   :  { %v3738_v55 = vpop.f32.mrb[18].mxu1 }
0x1791   :  { %v3743_v14 = vadd.f32 %v3738_v55, %v12329_v5  ;;  %v3740_v43 = vpop.f32.mrb[19].mxu1 }
0x1792   :  { %v3744_v49 = vadd.f32 %v3740_v43, %v12335_v34 }
0x1793   :  { %v8501_v17 = vmul.f32 -1.442695, %v3743_v14 }
0x1794   :  { %v8502_v19 = vmul.f32 -1.442695, %v3744_v49 }
0x1795   :  { %9812 = vpow2.f32 %v8501_v17 }
0x1796   :  { %9814 = vtanh.f32 %v3744_v49 }
0x179f   :  { %v9813_v36 = vpop.eup %9812 }
0x17a0   :  { %v3748_v24 = vadd.f32 1.0, %v9813_v36  ;;  %v9815_v9 = vpop.eup %9814 }
0x17a2   :  { %9816 = vrcp.f32 %v3748_v24 }
0x17a3   :  { %9818 = vpow2.f32 %v8502_v19 }
0x17ac   :  { %v9817_v11 = vpop.eup %9816 }
0x17ad   :  { %v3759_v15 = vmul.f32 %v9817_v11, %v9815_v9  ;;  %v9819_v60 = vpop.eup %9818  ;;  %v3758_v31 = vmul.f32 %v9817_v11, %v3662_v53 }
0x17ae   :  { %v3755_v35 = vadd.f32 1.0, %v9819_v60 }
0x17af   :  { %3761 = vrot.lane.b32.xlu0 %v3759_v15, %s10390_s19 }
0x17b0   :  { %9820 = vrcp.f32 %v3755_v35 }
0x17ba   :  { %v9821_v28 = vpop.eup %9820 }
0x1821   :  { %v3762_v44 = vpop.permute.xlu0 %3761 }
0x1822   :  { %v3764_v52 = vadd.f32 %v3762_v44, %v3758_v31 }
0x1824   :  { %9822 = vtanh.f32 %v3764_v52 }
0x182e   :  { %v9823_v63 = vpop.eup %9822 }
0x182f   :  { %v3766_v51 = vmul.f32 %v9823_v63, %v9821_v28 }
0x1831   :  { %3768 = vrot.lane.b32.xlu1 %v3766_v51, %s10390_s19 }
0x18a3   :  { %v3769_v38 = vpop.permute.xlu1 %3768 }
0x18a4   :  { %3771 = vst.msk [vmem:[#allocation2 + $0x50] sm:$0xff] %vm2436_vm0, %v3769_v38  ;;  %8503 = vmatmul.mubr.msk.f32.vlgmr.msra.gmra.mrb[196].mxu0 %vm2436_vm0, %v3769_v38 }
0x18a5   :  { %8938 = vmatpush1.bf16.msra.mxu0 %v12134_v54  ;;  %4042 = vmatprep.mubr.f32.mxu0 %v13539_v2 }
0x18a6   :  { %8940 = vmatprep.subr.bf16.mxu0 %v12146_v21 }
0x18a9   :  { %8942 = vmatpush1.bf16.msra.mxu0 %v12151_v0 }
0x18aa   :  { %8944 = vmatprep.subr.bf16.mxu0 %v12157_v37 }
0x18ad   :  { %8946 = vmatpush1.bf16.msra.mxu0 %v12159_v48 }
0x18ae   :  { %8948 = vmatprep.subr.bf16.mxu0 %v12180_v42 }
0x18b1   :  { %8950 = vmatpush1.bf16.msra.mxu0 %v12182_v7 }
0x18b2   :  { %8968 = vmatprep.subr.bf16.mxu0 %v12131_v56 }
0x1977   :  { %v3840_v30 = vpop.f32.mrb[196].mxu0 }
0x1978   :  { %v3845_v57 = vadd.f32 %v3840_v30, %v12329_v5  ;;  %v3842_v39 = vpop.f32.mrb[197].mxu0 }
0x1979   :  { %v3846_v47 = vadd.f32 %v3842_v39, %v12335_v34 }
0x197a   :  { %v8504_v58 = vmul.f32 -1.442695, %v3845_v57 }
0x197b   :  { %v8505_v1 = vmul.f32 -1.442695, %v3846_v47 }
0x197c   :  { %9824 = vpow2.f32 %v8504_v58 }
0x197d   :  { %9826 = vtanh.f32 %v3846_v47 }
0x1986   :  { %v9825_v50 = vpop.eup %9824 }
0x1987   :  { %v3850_v26 = vadd.f32 1.0, %v9825_v50  ;;  %v9827_v18 = vpop.eup %9826 }
0x1989   :  { %9828 = vrcp.f32 %v3850_v26 }
0x198a   :  { %9830 = vpow2.f32 %v8505_v1 }
0x1993   :  { %v9829_v23 = vpop.eup %9828 }
0x1994   :  { %v3861_v46 = vmul.f32 %v9829_v23, %v9827_v18  ;;  %v9831_v6 = vpop.eup %9830  ;;  %v3860_v45 = vmul.f32 %v9829_v23, %v3764_v52 }
0x1995   :  { %v3857_v41 = vadd.f32 1.0, %v9831_v6 }
0x1996   :  { %3863 = vrot.lane.b32.xlu0 %v3861_v46, %s10390_s19 }
0x1997   :  { %9832 = vrcp.f32 %v3857_v41 }
0x19a1   :  { %v9833_v8 = vpop.eup %9832 }
0x1a08   :  { %v3864_v20 = vpop.permute.xlu0 %3863 }
0x1a09   :  { %v3866_v22 = vadd.f32 %v3864_v20, %v3860_v45 }
0x1a0b   :  { %9834 = vtanh.f32 %v3866_v22 }
0x1a15   :  { %v9835_v61 = vpop.eup %9834 }
0x1a16   :  { %v3868_v27 = vmul.f32 %v9835_v61, %v9833_v8 }
0x1a18   :  { %3870 = vrot.lane.b32.xlu1 %v3868_v27, %s10390_s19 }
0x1a8a   :  { %v3871_v29 = vpop.permute.xlu1 %3870 }
0x1a8b   :  { %3873 = vst.msk [vmem:[#allocation2 + $0x58] sm:$0xff] %vm2436_vm0, %v3871_v29  ;;  %8506 = vmatmul.mubr.msk.f32.vlgmr.msra.gmra.mrb[20].mxu1 %vm2436_vm0, %v3871_v29 }
0x1a8c   :  { %8954 = vmatpush1.bf16.msra.mxu1 %v12134_v54  ;;  %4144 = vmatprep.mubr.f32.mxu1 %v13539_v2 }
0x1a8d   :  { %8956 = vmatprep.subr.bf16.mxu1 %v12146_v21 }
0x1a90   :  { %8958 = vmatpush1.bf16.msra.mxu1 %v12151_v0 }
0x1a91   :  { %8960 = vmatprep.subr.bf16.mxu1 %v12157_v37 }
0x1a94   :  { %8962 = vmatpush1.bf16.msra.mxu1 %v12159_v48 }
0x1a95   :  { %8964 = vmatprep.subr.bf16.mxu1 %v12180_v42 }
0x1a98   :  { %8966 = vmatpush1.bf16.msra.mxu1 %v12182_v7 }
0x1a99   :  { %8984 = vmatprep.subr.bf16.mxu1 %v12131_v56 }
0x1b5e   :  { %v3942_v59 = vpop.f32.mrb[20].mxu1 }
0x1b5f   :  { %v3947_v40 = vadd.f32 %v3942_v59, %v12329_v5  ;;  %v3944_v4 = vpop.f32.mrb[21].mxu1 }
0x1b60   :  { %v3948_v32 = vadd.f32 %v3944_v4, %v12335_v34 }
0x1b61   :  { %v8507_v62 = vmul.f32 -1.442695, %v3947_v40 }
0x1b62   :  { %v8508_v55 = vmul.f32 -1.442695, %v3948_v32 }
0x1b63   :  { %9836 = vpow2.f32 %v8507_v62 }
0x1b64   :  { %9838 = vtanh.f32 %v3948_v32 }
0x1b6d   :  { %v9837_v53 = vpop.eup %9836 }
0x1b6e   :  { %v3952_v12 = vadd.f32 1.0, %v9837_v53  ;;  %v9839_v16 = vpop.eup %9838 }
0x1b70   :  { %9840 = vrcp.f32 %v3952_v12 }
0x1b71   :  { %9842 = vpow2.f32 %v8508_v55 }
0x1b7a   :  { %v9841_v3 = vpop.eup %9840 }
0x1b7b   :  { %v3963_v33 = vmul.f32 %v9841_v3, %v9839_v16  ;;  %v9843_v14 = vpop.eup %9842  ;;  %v3962_v17 = vmul.f32 %v9841_v3, %v3866_v22 }
0x1b7c   :  { %v3959_v43 = vadd.f32 1.0, %v9843_v14 }
0x1b7d   :  { %3965 = vrot.lane.b32.xlu0 %v3963_v33, %s10390_s19 }
0x1b7e   :  { %9844 = vrcp.f32 %v3959_v43 }
0x1b88   :  { %v9845_v24 = vpop.eup %9844 }
0x1bef   :  { %v3966_v49 = vpop.permute.xlu0 %3965 }
0x1bf0   :  { %v3968_v36 = vadd.f32 %v3966_v49, %v3962_v17 }
0x1bf2   :  { %9846 = vtanh.f32 %v3968_v36 }
0x1bfc   :  { %v9847_v9 = vpop.eup %9846 }
0x1bfd   :  { %v3970_v11 = vmul.f32 %v9847_v9, %v9845_v24 }
0x1bff   :  { %3972 = vrot.lane.b32.xlu1 %v3970_v11, %s10390_s19 }
0x1c71   :  { %v3973_v15 = vpop.permute.xlu1 %3972 }
0x1c72   :  { %3975 = vst.msk [vmem:[#allocation2 + $0x60] sm:$0xff] %vm2436_vm0, %v3973_v15  ;;  %8509 = vmatmul.mubr.msk.f32.vlgmr.msra.gmra.mrb[198].mxu0 %vm2436_vm0, %v3973_v15 }
0x1c73   :  { %8970 = vmatpush1.bf16.msra.mxu0 %v12134_v54  ;;  %4246 = vmatprep.mubr.f32.mxu0 %v13539_v2 }
0x1c74   :  { %8972 = vmatprep.subr.bf16.mxu0 %v12146_v21 }
0x1c77   :  { %8974 = vmatpush1.bf16.msra.mxu0 %v12151_v0 }
0x1c78   :  { %8976 = vmatprep.subr.bf16.mxu0 %v12157_v37 }
0x1c7b   :  { %8978 = vmatpush1.bf16.msra.mxu0 %v12159_v48 }
0x1c7c   :  { %8980 = vmatprep.subr.bf16.mxu0 %v12180_v42 }
0x1c7f   :  { %8982 = vmatpush1.bf16.msra.mxu0 %v12182_v7 }
0x1c80   :  { %9000 = vmatprep.subr.bf16.mxu0 %v12131_v56 }
0x1d45   :  { %v4044_v19 = vpop.f32.mrb[198].mxu0 }
0x1d46   :  { %v4049_v60 = vadd.f32 %v4044_v19, %v12329_v5  ;;  %v4046_v35 = vpop.f32.mrb[199].mxu0 }
0x1d47   :  { %v4050_v44 = vadd.f32 %v4046_v35, %v12335_v34 }
0x1d48   :  { %v8510_v31 = vmul.f32 -1.442695, %v4049_v60 }
0x1d49   :  { %v8511_v30 = vmul.f32 -1.442695, %v4050_v44 }
0x1d4a   :  { %9848 = vpow2.f32 %v8510_v31 }
0x1d4b   :  { %9850 = vtanh.f32 %v4050_v44 }
0x1d54   :  { %v9849_v52 = vpop.eup %9848 }
0x1d55   :  { %v4054_v28 = vadd.f32 1.0, %v9849_v52  ;;  %v9851_v63 = vpop.eup %9850 }
0x1d57   :  { %9852 = vrcp.f32 %v4054_v28 }
0x1d58   :  { %9854 = vpow2.f32 %v8511_v30 }
0x1d61   :  { %v9853_v51 = vpop.eup %9852 }
0x1d62   :  { %v4065_v38 = vmul.f32 %v9853_v51, %v9851_v63  ;;  %v9855_v57 = vpop.eup %9854  ;;  %v4064_v58 = vmul.f32 %v9853_v51, %v3968_v36 }
0x1d63   :  { %v4061_v39 = vadd.f32 1.0, %v9855_v57 }
0x1d64   :  { %4067 = vrot.lane.b32.xlu0 %v4065_v38, %s10390_s19 }
0x1d65   :  { %9856 = vrcp.f32 %v4061_v39 }
0x1d6f   :  { %v9857_v26 = vpop.eup %9856 }
0x1dd6   :  { %v4068_v47 = vpop.permute.xlu0 %4067 }
0x1dd7   :  { %v4070_v50 = vadd.f32 %v4068_v47, %v4064_v58 }
0x1dd9   :  { %9858 = vtanh.f32 %v4070_v50 }
0x1de3   :  { %v9859_v18 = vpop.eup %9858 }
0x1de4   :  { %v4072_v23 = vmul.f32 %v9859_v18, %v9857_v26 }
0x1de6   :  { %4074 = vrot.lane.b32.xlu1 %v4072_v23, %s10390_s19 }
0x1e58   :  { %v4075_v46 = vpop.permute.xlu1 %4074 }
0x1e59   :  { %4077 = vst.msk [vmem:[#allocation2 + $0x68] sm:$0xff] %vm2436_vm0, %v4075_v46  ;;  %8512 = vmatmul.mubr.msk.f32.vlgmr.msra.gmra.mrb[22].mxu1 %vm2436_vm0, %v4075_v46 }
0x1e5a   :  { %8986 = vmatpush1.bf16.msra.mxu1 %v12134_v54  ;;  %4348 = vmatprep.mubr.f32.mxu1 %v13539_v2 }
0x1e5b   :  { %8988 = vmatprep.subr.bf16.mxu1 %v12146_v21 }
0x1e5e   :  { %8990 = vmatpush1.bf16.msra.mxu1 %v12151_v0 }
0x1e5f   :  { %8992 = vmatprep.subr.bf16.mxu1 %v12157_v37 }
0x1e62   :  { %8994 = vmatpush1.bf16.msra.mxu1 %v12159_v48 }
0x1e63   :  { %8996 = vmatprep.subr.bf16.mxu1 %v12180_v42 }
0x1e66   :  { %8998 = vmatpush1.bf16.msra.mxu1 %v12182_v7 }
0x1e67   :  { %9016 = vmatprep.subr.bf16.mxu1 %v12131_v56 }
0x1f2c   :  { %v4146_v1 = vpop.f32.mrb[22].mxu1 }
0x1f2d   :  { %v4151_v6 = vadd.f32 %v4146_v1, %v12329_v5  ;;  %v4148_v41 = vpop.f32.mrb[23].mxu1 }
0x1f2e   :  { %v4152_v20 = vadd.f32 %v4148_v41, %v12335_v34 }
0x1f2f   :  { %v8513_v45 = vmul.f32 -1.442695, %v4151_v6 }
0x1f30   :  { %v8514_v59 = vmul.f32 -1.442695, %v4152_v20 }
0x1f31   :  { %9860 = vpow2.f32 %v8513_v45 }
0x1f32   :  { %9862 = vtanh.f32 %v4152_v20 }
0x1f3b   :  { %v9861_v22 = vpop.eup %9860 }
0x1f3c   :  { %v4156_v8 = vadd.f32 1.0, %v9861_v22  ;;  %v9863_v61 = vpop.eup %9862 }
0x1f3e   :  { %9864 = vrcp.f32 %v4156_v8 }
0x1f3f   :  { %9866 = vpow2.f32 %v8514_v59 }
0x1f48   :  { %v9865_v27 = vpop.eup %9864 }
0x1f49   :  { %v4167_v29 = vmul.f32 %v9865_v27, %v9863_v61  ;;  %v9867_v40 = vpop.eup %9866  ;;  %v4166_v62 = vmul.f32 %v9865_v27, %v4070_v50 }
0x1f4a   :  { %v4163_v4 = vadd.f32 1.0, %v9867_v40 }
0x1f4b   :  { %4169 = vrot.lane.b32.xlu0 %v4167_v29, %s10390_s19 }
0x1f4c   :  { %9868 = vrcp.f32 %v4163_v4 }
0x1f56   :  { %v9869_v12 = vpop.eup %9868 }
0x1fbd   :  { %v4170_v32 = vpop.permute.xlu0 %4169 }
0x1fbe   :  { %v4172_v53 = vadd.f32 %v4170_v32, %v4166_v62 }
0x1fc0   :  { %9870 = vtanh.f32 %v4172_v53 }
0x1fca   :  { %v9871_v16 = vpop.eup %9870 }
0x1fcb   :  { %v4174_v3 = vmul.f32 %v9871_v16, %v9869_v12 }
0x1fcd   :  { %4176 = vrot.lane.b32.xlu1 %v4174_v3, %s10390_s19 }
0x203f   :  { %v4177_v33 = vpop.permute.xlu1 %4176 }
0x2040   :  { %4179 = vst.msk [vmem:[#allocation2 + $0x70] sm:$0xff] %vm2436_vm0, %v4177_v33  ;;  %8515 = vmatmul.mubr.msk.f32.vlgmr.msra.gmra.mrb[200].mxu0 %vm2436_vm0, %v4177_v33 }
0x2041   :  { %9002 = vmatpush1.bf16.msra.mxu0 %v12134_v54  ;;  %4450 = vmatprep.mubr.f32.mxu0 %v13539_v2 }
0x2042   :  { %9004 = vmatprep.subr.bf16.mxu0 %v12146_v21 }
0x2045   :  { %9006 = vmatpush1.bf16.msra.mxu0 %v12151_v0 }
0x2046   :  { %9008 = vmatprep.subr.bf16.mxu0 %v12157_v37 }
0x2049   :  { %9010 = vmatpush1.bf16.msra.mxu0 %v12159_v48 }
0x204a   :  { %9012 = vmatprep.subr.bf16.mxu0 %v12180_v42 }
0x204d   :  { %9014 = vmatpush1.bf16.msra.mxu0 %v12182_v7 }
0x204e   :  { %9032 = vmatprep.subr.bf16.mxu0 %v12131_v56 }
0x2113   :  { %v4248_v55 = vpop.f32.mrb[200].mxu0 }
0x2114   :  { %v4253_v14 = vadd.f32 %v4248_v55, %v12329_v5  ;;  %v4250_v43 = vpop.f32.mrb[201].mxu0 }
0x2115   :  { %v4254_v49 = vadd.f32 %v4250_v43, %v12335_v34 }
0x2116   :  { %v8516_v17 = vmul.f32 -1.442695, %v4253_v14 }
0x2117   :  { %v8517_v19 = vmul.f32 -1.442695, %v4254_v49 }
0x2118   :  { %9872 = vpow2.f32 %v8516_v17 }
0x2119   :  { %9874 = vtanh.f32 %v4254_v49 }
0x2122   :  { %v9873_v36 = vpop.eup %9872 }
0x2123   :  { %v4258_v24 = vadd.f32 1.0, %v9873_v36  ;;  %v9875_v9 = vpop.eup %9874 }
0x2125   :  { %9876 = vrcp.f32 %v4258_v24 }
0x2126   :  { %9878 = vpow2.f32 %v8517_v19 }
0x212f   :  { %v9877_v11 = vpop.eup %9876 }
0x2130   :  { %v4269_v15 = vmul.f32 %v9877_v11, %v9875_v9  ;;  %v9879_v60 = vpop.eup %9878  ;;  %v4268_v31 = vmul.f32 %v9877_v11, %v4172_v53 }
0x2131   :  { %v4265_v35 = vadd.f32 1.0, %v9879_v60 }
0x2132   :  { %4271 = vrot.lane.b32.xlu0 %v4269_v15, %s10390_s19 }
0x2133   :  { %9880 = vrcp.f32 %v4265_v35 }
0x213d   :  { %v9881_v28 = vpop.eup %9880 }
0x21a4   :  { %v4272_v44 = vpop.permute.xlu0 %4271 }
0x21a5   :  { %v4274_v52 = vadd.f32 %v4272_v44, %v4268_v31 }
0x21a7   :  { %9882 = vtanh.f32 %v4274_v52 }
0x21b1   :  { %v9883_v63 = vpop.eup %9882 }
0x21b2   :  { %v4276_v51 = vmul.f32 %v9883_v63, %v9881_v28 }
0x21b4   :  { %4278 = vrot.lane.b32.xlu1 %v4276_v51, %s10390_s19 }
0x2226   :  { %v4279_v38 = vpop.permute.xlu1 %4278 }
0x2227   :  { %4281 = vst.msk [vmem:[#allocation2 + $0x78] sm:$0xff] %vm2436_vm0, %v4279_v38  ;;  %8518 = vmatmul.mubr.msk.f32.vlgmr.msra.gmra.mrb[24].mxu1 %vm2436_vm0, %v4279_v38 }
0x2228   :  { %9018 = vmatpush1.bf16.msra.mxu1 %v12134_v54  ;;  %4552 = vmatprep.mubr.f32.mxu1 %v13539_v2 }
0x2229   :  { %9020 = vmatprep.subr.bf16.mxu1 %v12146_v21 }
0x222c   :  { %9022 = vmatpush1.bf16.msra.mxu1 %v12151_v0 }
0x222d   :  { %9024 = vmatprep.subr.bf16.mxu1 %v12157_v37 }
0x2230   :  { %9026 = vmatpush1.bf16.msra.mxu1 %v12159_v48 }
0x2231   :  { %9028 = vmatprep.subr.bf16.mxu1 %v12180_v42 }
0x2234   :  { %9030 = vmatpush1.bf16.msra.mxu1 %v12182_v7 }
0x2235   :  { %9048 = vmatprep.subr.bf16.mxu1 %v12131_v56 }
0x22fa   :  { %v4350_v30 = vpop.f32.mrb[24].mxu1 }
0x22fb   :  { %v4355_v57 = vadd.f32 %v4350_v30, %v12329_v5  ;;  %v4352_v39 = vpop.f32.mrb[25].mxu1 }
0x22fc   :  { %v4356_v47 = vadd.f32 %v4352_v39, %v12335_v34 }
0x22fd   :  { %v8519_v58 = vmul.f32 -1.442695, %v4355_v57 }
0x22fe   :  { %v8520_v1 = vmul.f32 -1.442695, %v4356_v47 }
0x22ff   :  { %9884 = vpow2.f32 %v8519_v58 }
0x2300   :  { %9886 = vtanh.f32 %v4356_v47 }
0x2309   :  { %v9885_v50 = vpop.eup %9884 }
0x230a   :  { %v4360_v26 = vadd.f32 1.0, %v9885_v50  ;;  %v9887_v18 = vpop.eup %9886 }
0x230c   :  { %9888 = vrcp.f32 %v4360_v26 }
0x230d   :  { %9890 = vpow2.f32 %v8520_v1 }
0x2316   :  { %v9889_v23 = vpop.eup %9888 }
0x2317   :  { %v4371_v46 = vmul.f32 %v9889_v23, %v9887_v18  ;;  %v9891_v6 = vpop.eup %9890  ;;  %v4370_v45 = vmul.f32 %v9889_v23, %v4274_v52 }
0x2318   :  { %v4367_v41 = vadd.f32 1.0, %v9891_v6 }
0x2319   :  { %4373 = vrot.lane.b32.xlu0 %v4371_v46, %s10390_s19 }
0x231a   :  { %9892 = vrcp.f32 %v4367_v41 }
0x2324   :  { %v9893_v8 = vpop.eup %9892 }
0x238b   :  { %v4374_v20 = vpop.permute.xlu0 %4373 }
0x238c   :  { %v4376_v22 = vadd.f32 %v4374_v20, %v4370_v45 }
0x238e   :  { %9894 = vtanh.f32 %v4376_v22 }
0x2398   :  { %v9895_v61 = vpop.eup %9894 }
0x2399   :  { %v4378_v27 = vmul.f32 %v9895_v61, %v9893_v8 }
0x239b   :  { %4380 = vrot.lane.b32.xlu1 %v4378_v27, %s10390_s19 }
0x240d   :  { %v4381_v29 = vpop.permute.xlu1 %4380 }
0x240e   :  { %4383 = vst.msk [vmem:[#allocation2 + $0x80] sm:$0xff] %vm2436_vm0, %v4381_v29  ;;  %8521 = vmatmul.mubr.msk.f32.vlgmr.msra.gmra.mrb[202].mxu0 %vm2436_vm0, %v4381_v29 }
0x240f   :  { %9034 = vmatpush1.bf16.msra.mxu0 %v12134_v54  ;;  %4654 = vmatprep.mubr.f32.mxu0 %v13539_v2 }
0x2410   :  { %9036 = vmatprep.subr.bf16.mxu0 %v12146_v21 }
0x2413   :  { %9038 = vmatpush1.bf16.msra.mxu0 %v12151_v0 }
0x2414   :  { %9040 = vmatprep.subr.bf16.mxu0 %v12157_v37 }
0x2417   :  { %9042 = vmatpush1.bf16.msra.mxu0 %v12159_v48 }
0x2418   :  { %9044 = vmatprep.subr.bf16.mxu0 %v12180_v42 }
0x241b   :  { %9046 = vmatpush1.bf16.msra.mxu0 %v12182_v7 }
0x241c   :  { %9064 = vmatprep.subr.bf16.mxu0 %v12131_v56 }
0x24e1   :  { %v4452_v59 = vpop.f32.mrb[202].mxu0 }
0x24e2   :  { %v4457_v40 = vadd.f32 %v4452_v59, %v12329_v5  ;;  %v4454_v4 = vpop.f32.mrb[203].mxu0 }
0x24e3   :  { %v4458_v32 = vadd.f32 %v4454_v4, %v12335_v34 }
0x24e4   :  { %v8522_v62 = vmul.f32 -1.442695, %v4457_v40 }
0x24e5   :  { %v8523_v55 = vmul.f32 -1.442695, %v4458_v32 }
0x24e6   :  { %9896 = vpow2.f32 %v8522_v62 }
0x24e7   :  { %9898 = vtanh.f32 %v4458_v32 }
0x24f0   :  { %v9897_v53 = vpop.eup %9896 }
0x24f1   :  { %v4462_v12 = vadd.f32 1.0, %v9897_v53  ;;  %v9899_v16 = vpop.eup %9898 }
0x24f3   :  { %9900 = vrcp.f32 %v4462_v12 }
0x24f4   :  { %9902 = vpow2.f32 %v8523_v55 }
0x24fd   :  { %v9901_v3 = vpop.eup %9900 }
0x24fe   :  { %v4473_v33 = vmul.f32 %v9901_v3, %v9899_v16  ;;  %v9903_v14 = vpop.eup %9902  ;;  %v4472_v17 = vmul.f32 %v9901_v3, %v4376_v22 }
0x24ff   :  { %v4469_v43 = vadd.f32 1.0, %v9903_v14 }
0x2500   :  { %4475 = vrot.lane.b32.xlu0 %v4473_v33, %s10390_s19 }
0x2501   :  { %9904 = vrcp.f32 %v4469_v43 }
0x250b   :  { %v9905_v24 = vpop.eup %9904 }
0x2572   :  { %v4476_v49 = vpop.permute.xlu0 %4475 }
0x2573   :  { %v4478_v36 = vadd.f32 %v4476_v49, %v4472_v17 }
0x2575   :  { %9906 = vtanh.f32 %v4478_v36 }
0x257f   :  { %v9907_v9 = vpop.eup %9906 }
0x2580   :  { %v4480_v11 = vmul.f32 %v9907_v9, %v9905_v24 }
0x2582   :  { %4482 = vrot.lane.b32.xlu1 %v4480_v11, %s10390_s19 }
0x25f4   :  { %v4483_v15 = vpop.permute.xlu1 %4482 }
0x25f5   :  { %4485 = vst.msk [vmem:[#allocation2 + $0x88] sm:$0xff] %vm2436_vm0, %v4483_v15  ;;  %8524 = vmatmul.mubr.msk.f32.vlgmr.msra.gmra.mrb[26].mxu1 %vm2436_vm0, %v4483_v15 }
0x25f6   :  { %9050 = vmatpush1.bf16.msra.mxu1 %v12134_v54  ;;  %4756 = vmatprep.mubr.f32.mxu1 %v13539_v2 }
0x25f7   :  { %9052 = vmatprep.subr.bf16.mxu1 %v12146_v21 }
0x25fa   :  { %9054 = vmatpush1.bf16.msra.mxu1 %v12151_v0 }
0x25fb   :  { %9056 = vmatprep.subr.bf16.mxu1 %v12157_v37 }
0x25fe   :  { %9058 = vmatpush1.bf16.msra.mxu1 %v12159_v48 }
0x25ff   :  { %9060 = vmatprep.subr.bf16.mxu1 %v12180_v42 }
0x2602   :  { %9062 = vmatpush1.bf16.msra.mxu1 %v12182_v7 }
0x2603   :  { %9080 = vmatprep.subr.bf16.mxu1 %v12131_v56 }
0x26c8   :  { %v4554_v19 = vpop.f32.mrb[26].mxu1 }
0x26c9   :  { %v4559_v60 = vadd.f32 %v4554_v19, %v12329_v5  ;;  %v4556_v35 = vpop.f32.mrb[27].mxu1 }
0x26ca   :  { %v4560_v44 = vadd.f32 %v4556_v35, %v12335_v34 }
0x26cb   :  { %v8525_v31 = vmul.f32 -1.442695, %v4559_v60 }
0x26cc   :  { %v8526_v30 = vmul.f32 -1.442695, %v4560_v44 }
0x26cd   :  { %9908 = vpow2.f32 %v8525_v31 }
0x26ce   :  { %9910 = vtanh.f32 %v4560_v44 }
0x26d7   :  { %v9909_v52 = vpop.eup %9908 }
0x26d8   :  { %v4564_v28 = vadd.f32 1.0, %v9909_v52  ;;  %v9911_v63 = vpop.eup %9910 }
0x26da   :  { %9912 = vrcp.f32 %v4564_v28 }
0x26db   :  { %9914 = vpow2.f32 %v8526_v30 }
0x26e4   :  { %v9913_v51 = vpop.eup %9912 }
0x26e5   :  { %v4575_v38 = vmul.f32 %v9913_v51, %v9911_v63  ;;  %v9915_v57 = vpop.eup %9914  ;;  %v4574_v58 = vmul.f32 %v9913_v51, %v4478_v36 }
0x26e6   :  { %v4571_v39 = vadd.f32 1.0, %v9915_v57 }
0x26e7   :  { %4577 = vrot.lane.b32.xlu0 %v4575_v38, %s10390_s19 }
0x26e8   :  { %9916 = vrcp.f32 %v4571_v39 }
0x26f2   :  { %v9917_v26 = vpop.eup %9916 }
0x2759   :  { %v4578_v47 = vpop.permute.xlu0 %4577 }
0x275a   :  { %v4580_v50 = vadd.f32 %v4578_v47, %v4574_v58 }
0x275c   :  { %9918 = vtanh.f32 %v4580_v50 }
0x2766   :  { %v9919_v18 = vpop.eup %9918 }
0x2767   :  { %v4582_v23 = vmul.f32 %v9919_v18, %v9917_v26 }
0x2769   :  { %4584 = vrot.lane.b32.xlu1 %v4582_v23, %s10390_s19 }
0x27db   :  { %v4585_v46 = vpop.permute.xlu1 %4584 }
0x27dc   :  { %4587 = vst.msk [vmem:[#allocation2 + $0x90] sm:$0xff] %vm2436_vm0, %v4585_v46  ;;  %8527 = vmatmul.mubr.msk.f32.vlgmr.msra.gmra.mrb[204].mxu0 %vm2436_vm0, %v4585_v46 }
0x27dd   :  { %9066 = vmatpush1.bf16.msra.mxu0 %v12134_v54  ;;  %4858 = vmatprep.mubr.f32.mxu0 %v13539_v2 }
0x27de   :  { %9068 = vmatprep.subr.bf16.mxu0 %v12146_v21 }
0x27e1   :  { %9070 = vmatpush1.bf16.msra.mxu0 %v12151_v0 }
0x27e2   :  { %9072 = vmatprep.subr.bf16.mxu0 %v12157_v37 }
0x27e5   :  { %9074 = vmatpush1.bf16.msra.mxu0 %v12159_v48 }
0x27e6   :  { %9076 = vmatprep.subr.bf16.mxu0 %v12180_v42 }
0x27e9   :  { %9078 = vmatpush1.bf16.msra.mxu0 %v12182_v7 }
0x27ea   :  { %9096 = vmatprep.subr.bf16.mxu0 %v12131_v56 }
0x28af   :  { %v4656_v1 = vpop.f32.mrb[204].mxu0 }
0x28b0   :  { %v4661_v6 = vadd.f32 %v4656_v1, %v12329_v5  ;;  %v4658_v41 = vpop.f32.mrb[205].mxu0 }
0x28b1   :  { %v4662_v20 = vadd.f32 %v4658_v41, %v12335_v34 }
0x28b2   :  { %v8528_v45 = vmul.f32 -1.442695, %v4661_v6 }
0x28b3   :  { %v8529_v59 = vmul.f32 -1.442695, %v4662_v20 }
0x28b4   :  { %9920 = vpow2.f32 %v8528_v45 }
0x28b5   :  { %9922 = vtanh.f32 %v4662_v20  ;;  %v5479_v20 = vld [vmem:[#allocation11] sm:$0xff] }
0x28be   :  { %v9921_v22 = vpop.eup %9920 }
0x28bf   :  { %v4666_v8 = vadd.f32 1.0, %v9921_v22  ;;  %v9923_v61 = vpop.eup %9922  ;;  %v5481_v22 = vld [vmem:[#allocation11 + $0x10] sm:$0xff] }
0x28c1   :  { %9924 = vrcp.f32 %v4666_v8  ;;  %v5484_v8 = vld [vmem:[#allocation11 + $0x28] sm:$0xff] }
0x28c2   :  { %9926 = vpow2.f32 %v8529_v59  ;;  %v5483_v59 = vld [vmem:[#allocation11 + $0x20] sm:$0xff] }
0x28cb   :  { %v9925_v27 = vpop.eup %9924 }
0x28cc   :  { %v4677_v29 = vmul.f32 %v9925_v27, %v9923_v61  ;;  %v9927_v56 = vpop.eup %9926  ;;  %v4676_v4 = vmul.f32 %v9925_v27, %v4580_v50  ;;  %v5486_v61 = vld [vmem:[#allocation11 + $0x38] sm:$0xff]  ;;  %v9129_v27 = vpack.c.bf16 %v5481_v22, %v5479_v20 }
0x28cd   :  { %v4673_v40 = vadd.f32 1.0, %v9927_v56  ;;  %v5485_v56 = vld [vmem:[#allocation11 + $0x30] sm:$0xff] }
0x28ce   :  { %4679 = vrot.lane.b32.xlu0 %v4677_v29, %s10390_s19  ;;  %v9131_v29 = vpack.c.bf16 %v5486_v61, %v5484_v8 }
0x28cf   :  { %9928 = vrcp.f32 %v4673_v40 }
0x28d9   :  { %v9929_v53 = vpop.eup %9928 }
0x2940   :  { %v4680_v62 = vpop.permute.xlu0 %4679 }
0x2941   :  { %v4682_v32 = vadd.f32 %v4680_v62, %v4676_v4  ;;  %v5488_v4 = vld [vmem:[#allocation11 + $0x48] sm:$0xff]  ;;  %v5490_v62 = vld [vmem:[#allocation11 + $0x58] sm:$0xff] }
0x2943   :  { %9930 = vtanh.f32 %v4682_v32 }
0x294d   :  { %v9931_v12 = vpop.eup %9930 }
0x294e   :  { %v4684_v16 = vmul.f32 %v9931_v12, %v9929_v53  ;;  %v9135_v53 = vpack.c.bf16 %v5490_v62, %v5488_v4  ;;  %v5487_v12 = vld [vmem:[#allocation11 + $0x40] sm:$0xff]  ;;  %v5124_v62 = vld [vmem:[#allocation10 + $0x10] sm:$0xff] }
0x294f   :  { %v5122_v4 = vld [vmem:[#allocation10] sm:$0xff] }
0x2950   :  { %4686 = vrot.lane.b32.xlu1 %v4684_v16, %s10390_s19  ;;  %v5489_v16 = vld [vmem:[#allocation11 + $0x50] sm:$0xff] }
0x29c2   :  { %v4687_v3 = vpop.permute.xlu1 %4686 }
0x29c3   :  { %4689 = vst.msk [vmem:[#allocation2 + $0x98] sm:$0xff] %vm2436_vm0, %v4687_v3  ;;  %8530 = vmatmul.mubr.msk.f32.vlgmr.msra.gmra.mrb[28].mxu1 %vm2436_vm0, %v4687_v3  ;;  %v5492_v3 = vld [vmem:[#allocation11 + $0x68] sm:$0xff] }
0x29c4   :  { %9082 = vmatpush1.bf16.msra.mxu1 %v12134_v54  ;;  %4960 = vmatprep.mubr.f32.mxu1 %v13539_v2 }
0x29c5   :  { %9084 = vmatprep.subr.bf16.mxu1 %v12146_v21 }
0x29c8   :  { %9086 = vmatpush1.bf16.msra.mxu1 %v12151_v0 }
0x29c9   :  { %9088 = vmatprep.subr.bf16.mxu1 %v12157_v37 }
0x29cc   :  { %9090 = vmatpush1.bf16.msra.mxu1 %v12159_v48 }
0x29cd   :  { %9092 = vmatprep.subr.bf16.mxu1 %v12180_v42 }
0x29d0   :  { %9094 = vmatpush1.bf16.msra.mxu1 %v12182_v7 }
0x2a96   :  { %v4758_v33 = vpop.f32.mrb[28].mxu1 }
0x2a97   :  { %v4763_v55 = vadd.f32 %v4758_v33, %v12329_v5  ;;  %v4760_v14 = vpop.f32.mrb[29].mxu1  ;;  %v5494_v33 = vld [vmem:[#allocation11 + $0x78] sm:$0xff] }
0x2a98   :  { %v4764_v17 = vadd.f32 %v4760_v14, %v12335_v34  ;;  %v9139_v14 = vpack.c.bf16 %v5494_v33, %v5492_v3  ;;  %v5126_v3 = vld [vmem:[#allocation10 + $0x20] sm:$0xff]  ;;  %v5128_v33 = vld [vmem:[#allocation10 + $0x30] sm:$0xff] }
0x2a99   :  { %v8531_v43 = vmul.f32 -1.442695, %v4763_v55  ;;  %v9137_v55 = vpack.c.bf16 %v5489_v16, %v5487_v12  ;;  %v9113_v12 = vpack.c.bf16 %v5124_v62, %v5122_v4  ;;  %v5760_v62 = vld [vmem:[#allocation13 + $0x40] sm:$0xff] }
0x2a9a   :  { %v8532_v15 = vmul.f32 -1.442695, %v4764_v17 }
0x2a9b   :  { %9932 = vpow2.f32 %v8531_v43  ;;  %v5491_v43 = vld [vmem:[#allocation11 + $0x60] sm:$0xff] }
0x2a9c   :  { %9934 = vtanh.f32 %v4764_v17  ;;  %v5493_v17 = vld [vmem:[#allocation11 + $0x70] sm:$0xff] }
0x2aa5   :  { %v9933_v49 = vpop.eup %9932 }
0x2aa6   :  { %v4768_v36 = vadd.f32 1.0, %v9933_v49  ;;  %v9935_v24 = vpop.eup %9934  ;;  %v9141_v49 = vpack.c.bf16 %v5493_v17, %v5491_v43  ;;  %v9117_v43 = vpack.c.bf16 %v5128_v33, %v5126_v3 }
0x2aa8   :  { %9936 = vrcp.f32 %v4768_v36  ;;  %v12659_v36 = vld [vmem:[#allocation2] sm:$0xff] }
0x2aa9   :  { %9938 = vpow2.f32 %v8532_v15  ;;  %v12679_v15 = vld [vmem:[#allocation2 + $0x20] sm:$0xff] }
0x2ab2   :  { %v9937_v9 = vpop.eup %9936 }
0x2ab3   :  { %v4779_v11 = vmul.f32 %v9937_v9, %v9935_v24  ;;  %v9939_v19 = vpop.eup %9938  ;;  %v4778_v35 = vmul.f32 %v9937_v9, %v4682_v32  ;;  %v9133_v32 = vpack.c.bf16 %v5485_v56, %v5483_v59  ;;  %v12664_v24 = vld [vmem:[#allocation2 + $0x8] sm:$0xff]  ;;  %v12669_v9 = vld [vmem:[#allocation2 + $0x10] sm:$0xff] }
0x2ab4   :  { %v4775_v60 = vadd.f32 1.0, %v9939_v19  ;;  %v12684_v19 = vld [vmem:[#allocation2 + $0x28] sm:$0xff] }
0x2ab5   :  { %4781 = vrot.lane.b32.xlu0 %v4779_v11, %s10390_s19  ;;  %v12674_v11 = vld [vmem:[#allocation2 + $0x18] sm:$0xff] }
0x2ab6   :  { %9940 = vrcp.f32 %v4775_v60  ;;  %v12689_v60 = vld [vmem:[#allocation2 + $0x30] sm:$0xff] }
0x2ac0   :  { %v9941_v52 = vpop.eup %9940 }
0x2b27   :  { %v4782_v31 = vpop.permute.xlu0 %4781 }
0x2b28   :  { %v4784_v44 = vadd.f32 %v4782_v31, %v4778_v35  ;;  %v12694_v35 = vld [vmem:[#allocation2 + $0x38] sm:$0xff]  ;;  %v12699_v31 = vld [vmem:[#allocation2 + $0x40] sm:$0xff] }
0x2b2a   :  { %9942 = vtanh.f32 %v4784_v44 }
0x2b34   :  { %v9943_v28 = vpop.eup %9942 }
0x2b35   :  { %v4786_v63 = vmul.f32 %v9943_v28, %v9941_v52  ;;  %v12709_v52 = vld [vmem:[#allocation2 + $0x50] sm:$0xff]  ;;  %v12714_v28 = vld [vmem:[#allocation2 + $0x58] sm:$0xff] }
0x2b37   :  { %4788 = vrot.lane.b32.xlu1 %v4786_v63, %s10390_s19  ;;  %v12719_v63 = vld [vmem:[#allocation2 + $0x60] sm:$0xff] }
0x2ba9   :  { %v4789_v51 = vpop.permute.xlu1 %4788 }
0x2baa   :  { %4791 = vst.msk [vmem:[#allocation2 + $0xa0] sm:$0xff] %vm2436_vm0, %v4789_v51  ;;  %8533 = vmatmul.mubr.msk.f32.vlgmr.msra.gmra.mrb[206].mxu0 %vm2436_vm0, %v4789_v51  ;;  %v12724_v51 = vld [vmem:[#allocation2 + $0x68] sm:$0xff] }
0x2bab   :  { %9098 = vmatpush1.bf16.msra.mxu0 %v12134_v54  ;;  %5062 = vmatprep.mubr.f32.mxu0 %v13539_v2 }
0x2bac   :  { %9100 = vmatprep.subr.bf16.mxu0 %v12146_v21 }
0x2baf   :  { %9102 = vmatpush1.bf16.msra.mxu0 %v12151_v0 }
0x2bb0   :  { %9104 = vmatprep.subr.bf16.mxu0 %v12157_v37 }
0x2bb3   :  { %9106 = vmatpush1.bf16.msra.mxu0 %v12159_v48  ;;  %v5480_v48 = vld [vmem:[#allocation11 + $0x8] sm:$0xff] }
0x2bb4   :  { %9108 = vmatprep.subr.bf16.mxu0 %v12180_v42  ;;  %v5482_v42 = vld [vmem:[#allocation11 + $0x18] sm:$0xff] }
0x2bb7   :  { %9110 = vmatpush1.bf16.msra.mxu0 %v12182_v7  ;;  %v9127_v7 = vpack.c.bf16 %v5482_v42, %v5480_v48 }
0x2bb9   :  { %9128 = vmatprep.subr.bf16.mxu1 %v9127_v7 }
0x2c7d   :  { %v4860_v38 = vpop.f32.mrb[206].mxu0 }
0x2c7e   :  { %v4865_v30 = vadd.f32 %v4860_v38, %v12329_v5  ;;  %v4862_v57 = vpop.f32.mrb[207].mxu0  ;;  %v12729_v38 = vld [vmem:[#allocation2 + $0x70] sm:$0xff] }
0x2c7f   :  { %v4866_v54 = vadd.f32 %v4862_v57, %v12335_v34  ;;  %v12739_v57 = vld [vmem:[#allocation2 + $0x80] sm:$0xff] }
0x2c80   :  { %v8534_v39 = vmul.f32 -1.442695, %v4865_v30  ;;  %v12734_v30 = vld [vmem:[#allocation2 + $0x78] sm:$0xff] }
0x2c81   :  { %v8535_v50 = vmul.f32 -1.442695, %v4866_v54 }
0x2c82   :  { %9944 = vpow2.f32 %v8534_v39  ;;  %v12744_v39 = vld [vmem:[#allocation2 + $0x88] sm:$0xff] }
0x2c83   :  { %9946 = vtanh.f32 %v4866_v54  ;;  %v12749_v54 = vld [vmem:[#allocation2 + $0x90] sm:$0xff] }
0x2c8c   :  { %v9945_v58 = vpop.eup %9944 }
0x2c8d   :  { %v4870_v21 = vadd.f32 1.0, %v9945_v58  ;;  %v9947_v0 = vpop.eup %9946  ;;  %v12754_v58 = vld [vmem:[#allocation2 + $0x98] sm:$0xff] }
0x2c8f   :  { %9948 = vrcp.f32 %v4870_v21  ;;  %v12759_v21 = vld [vmem:[#allocation2 + $0xa0] sm:$0xff] }
0x2c90   :  { %9950 = vpow2.f32 %v8535_v50 }
0x2c99   :  { %v9949_v37 = vpop.eup %9948 }
0x2c9a   :  { %v4881_v47 = vmul.f32 %v9949_v37, %v9947_v0  ;;  %v9951_v26 = vpop.eup %9950  ;;  %v4880_v23 = vmul.f32 %v9949_v37, %v4784_v44  ;;  %v12704_v44 = vld [vmem:[#allocation2 + $0x48] sm:$0xff] }
0x2c9b   :  { %v4877_v18 = vadd.f32 1.0, %v9951_v26 }
0x2c9c   :  { %4883 = vrot.lane.b32.xlu0 %v4881_v47, %s10390_s19 }
0x2c9d   :  { %9952 = vrcp.f32 %v4877_v18 }
0x2ca7   :  { %v9953_v6 = vpop.eup %9952 }
0x2d0e   :  { %v4884_v46 = vpop.permute.xlu0 %4883 }
0x2d0f   :  { %v12652_v1 = vadd.f32 %v4884_v46, %v4880_v23 }
0x2d11   :  { %9954 = vtanh.f32 %v12652_v1 }
0x2d1b   :  { %v9955_v41 = vpop.eup %9954 }
0x2d1c   :  { %v4888_v45 = vmul.f32 %v9955_v41, %v9953_v6  ;;  %v5123_v6 = vld [vmem:[#allocation10 + $0x8] sm:$0xff]  ;;  %v5125_v41 = vld [vmem:[#allocation10 + $0x18] sm:$0xff] }
0x2d1e   :  { %4890 = vrot.lane.b32.xlu1 %v4888_v45, %s10390_s19  ;;  %v9111_v45 = vpack.c.bf16 %v5125_v41, %v5123_v6  ;;  %v5757_v6 = vld [vmem:[#allocation13 + $0x28] sm:$0xff]  ;;  %v5759_v41 = vld [vmem:[#allocation13 + $0x38] sm:$0xff] }
0x2d20   :  { %9112 = vmatprep.subr.bf16.mxu0 %v9111_v45 }
0x2d90   :  { %v4891_v40 = vpop.permute.xlu1 %4890 }
0x2d91   :  { %4893 = vst.msk [vmem:[#allocation2 + $0xa8] sm:$0xff] %vm2436_vm0, %v4891_v40  ;;  %8536 = vmatmul.mubr.msk.f32.vlgmr.msra.gmra.mrb[30].mxu1 %vm2436_vm0, %v4891_v40 }
0x2d92   :  { %9130 = vmatpush1.bf16.msra.mxu1 %v9129_v27  ;;  %5559 = vmatprep.mubr.f32.mxu1 %v13539_v2 }
0x2d93   :  { %9132 = vmatprep.subr.bf16.mxu1 %v9131_v29 }
0x2d96   :  { %9134 = vmatpush1.bf16.msra.mxu1 %v9133_v32  ;;  %v5127_v32 = vld [vmem:[#allocation10 + $0x28] sm:$0xff] }
0x2d97   :  { %9136 = vmatprep.subr.bf16.mxu1 %v9135_v53  ;;  %v5129_v53 = vld [vmem:[#allocation10 + $0x38] sm:$0xff] }
0x2d98   :  { %v12764_v0 = vld [vmem:[#allocation2 + $0xa8] sm:$0xff]  ;;  %v9115_v16 = vpack.c.bf16 %v5129_v53, %v5127_v32  ;;  %v5762_v32 = vld [vmem:[#allocation13 + $0x50] sm:$0xff] }
0x2d99   :  { %v5765_v53 = vld [vmem:[#allocation13 + $0x68] sm:$0xff]  ;;  %v12901_v33 = vpack.c.bf16 %v5762_v32, %v5760_v62 }
0x2d9a   :  { %9138 = vmatpush1.bf16.msra.mxu1 %v9137_v55  ;;  %v5131_v55 = vld [vmem:[#allocation10 + $0x48] sm:$0xff] }
0x2d9b   :  { %9140 = vmatprep.subr.bf16.mxu1 %v9139_v14  ;;  %v5133_v14 = vld [vmem:[#allocation10 + $0x58] sm:$0xff] }
0x2d9c   :  { %v9119_v17 = vpack.c.bf16 %v5133_v14, %v5131_v55  ;;  %v5764_v55 = vld [vmem:[#allocation13 + $0x60] sm:$0xff]  ;;  %v5766_v14 = vld [vmem:[#allocation13 + $0x70] sm:$0xff] }
0x2d9e   :  { %9142 = vmatpush1.bf16.msra.mxu1 %v9141_v49  ;;  %v5130_v49 = vld [vmem:[#allocation10 + $0x40] sm:$0xff] }
0x2da1   :  { %8566 = vmatmul.mubr.msk.f32.vlgmr.msra.gmra.mrb[32].mxu1 %vm2436_vm0, %v12659_v36 }
0x2da2   :  { %5565 = vmatprep.mubr.f32.mxu1 %v13539_v2 }
0x2da5   :  { %8567 = vmatmul.mubr.msk.f32.gmra.mrb[34].mxu1 %vm2436_vm0, %v12664_v24 }
0x2da6   :  { %5571 = vmatprep.mubr.f32.mxu1 %v13539_v2 }
0x2da9   :  { %8568 = vmatmul.mubr.msk.f32.gmra.mrb[36].mxu1 %vm2436_vm0, %v12669_v9 }
0x2daa   :  { %5577 = vmatprep.mubr.f32.mxu1 %v13539_v2 }
0x2dad   :  { %8569 = vmatmul.mubr.msk.f32.gmra.mrb[38].mxu1 %vm2436_vm0, %v12674_v11 }
0x2dae   :  { %5583 = vmatprep.mubr.f32.mxu1 %v13539_v2 }
0x2db1   :  { %8570 = vmatmul.mubr.msk.f32.gmra.mrb[40].mxu1 %vm2436_vm0, %v12679_v15 }
0x2db2   :  { %5589 = vmatprep.mubr.f32.mxu1 %v13539_v2 }
0x2db5   :  { %8571 = vmatmul.mubr.msk.f32.gmra.mrb[42].mxu1 %vm2436_vm0, %v12684_v19 }
0x2db6   :  { %5595 = vmatprep.mubr.f32.mxu1 %v13539_v2 }
0x2db9   :  { %8572 = vmatmul.mubr.msk.f32.gmra.mrb[44].mxu1 %vm2436_vm0, %v12689_v60 }
0x2dba   :  { %5601 = vmatprep.mubr.f32.mxu1 %v13539_v2 }
0x2dbd   :  { %8573 = vmatmul.mubr.msk.f32.gmra.mrb[46].mxu1 %vm2436_vm0, %v12694_v35 }
0x2dbe   :  { %5607 = vmatprep.mubr.f32.mxu1 %v13539_v2 }
0x2dc1   :  { %8574 = vmatmul.mubr.msk.f32.gmra.mrb[48].mxu1 %vm2436_vm0, %v12699_v31 }
0x2dc2   :  { %5613 = vmatprep.mubr.f32.mxu1 %v13539_v2 }
0x2dc5   :  { %8575 = vmatmul.mubr.msk.f32.gmra.mrb[50].mxu1 %vm2436_vm0, %v12704_v44 }
0x2dc6   :  { %5619 = vmatprep.mubr.f32.mxu1 %v13539_v2 }
0x2dc9   :  { %8576 = vmatmul.mubr.msk.f32.gmra.mrb[52].mxu1 %vm2436_vm0, %v12709_v52 }
0x2dca   :  { %5625 = vmatprep.mubr.f32.mxu1 %v13539_v2 }
0x2dcd   :  { %8577 = vmatmul.mubr.msk.f32.gmra.mrb[54].mxu1 %vm2436_vm0, %v12714_v28 }
0x2dce   :  { %5631 = vmatprep.mubr.f32.mxu1 %v13539_v2 }
0x2dd1   :  { %8578 = vmatmul.mubr.msk.f32.gmra.mrb[56].mxu1 %vm2436_vm0, %v12719_v63 }
0x2dd2   :  { %5637 = vmatprep.mubr.f32.mxu1 %v13539_v2 }
0x2dd5   :  { %8579 = vmatmul.mubr.msk.f32.gmra.mrb[58].mxu1 %vm2436_vm0, %v12724_v51 }
0x2dd6   :  { %5643 = vmatprep.mubr.f32.mxu1 %v13539_v2 }
0x2dd9   :  { %8580 = vmatmul.mubr.msk.f32.gmra.mrb[60].mxu1 %vm2436_vm0, %v12729_v38 }
0x2dda   :  { %5649 = vmatprep.mubr.f32.mxu1 %v13539_v2 }
0x2ddd   :  { %8581 = vmatmul.mubr.msk.f32.gmra.mrb[62].mxu1 %vm2436_vm0, %v12734_v30 }
0x2dde   :  { %5655 = vmatprep.mubr.f32.mxu1 %v13539_v2 }
0x2de1   :  { %8582 = vmatmul.mubr.msk.f32.gmra.mrb[64].mxu1 %vm2436_vm0, %v12739_v57 }
0x2de2   :  { %5661 = vmatprep.mubr.f32.mxu1 %v13539_v2 }
0x2de5   :  { %8583 = vmatmul.mubr.msk.f32.gmra.mrb[66].mxu1 %vm2436_vm0, %v12744_v39 }
0x2de6   :  { %5667 = vmatprep.mubr.f32.mxu1 %v13539_v2 }
0x2de9   :  { %8584 = vmatmul.mubr.msk.f32.gmra.mrb[68].mxu1 %vm2436_vm0, %v12749_v54 }
0x2dea   :  { %5673 = vmatprep.mubr.f32.mxu1 %v13539_v2 }
0x2ded   :  { %8585 = vmatmul.mubr.msk.f32.gmra.mrb[70].mxu1 %vm2436_vm0, %v12754_v58 }
0x2dee   :  { %5679 = vmatprep.mubr.f32.mxu1 %v13539_v2 }
0x2df1   :  { %8586 = vmatmul.mubr.msk.f32.gmra.mrb[72].mxu1 %vm2436_vm0, %v12759_v21 }
0x2df2   :  { %5685 = vmatprep.mubr.f32.mxu1 %v13539_v2 }
0x2df5   :  { %8587 = vmatmul.mubr.msk.f32.gmra.mrb[74].mxu1 %vm2436_vm0, %v12764_v0 }
0x2df6   :  { %5691 = vmatprep.mubr.f32.mxu1 %v13539_v2 }
0x2e64   :  { %v4962_v37 = vpop.f32.mrb[30].mxu1 }
0x2e65   :  { %v4967_v47 = vadd.f32 %v4962_v37, %v12329_v5  ;;  %v4964_v48 = vpop.f32.mrb[31].mxu1  ;;  %v5132_v37 = vld [vmem:[#allocation10 + $0x50] sm:$0xff] }
0x2e66   :  { %v4968_v7 = vadd.f32 %v4964_v48, %v12335_v34  ;;  %v5137_v48 = vld [vmem:[#allocation10 + $0x78] sm:$0xff] }
0x2e67   :  { %v8537_v42 = vmul.f32 -1.442695, %v4967_v47  ;;  %v5135_v47 = vld [vmem:[#allocation10 + $0x68] sm:$0xff] }
0x2e68   :  { %v8538_v20 = vmul.f32 -1.442695, %v4968_v7 }
0x2e69   :  { %9956 = vpow2.f32 %v8537_v42  ;;  %v9121_v42 = vpack.c.bf16 %v5132_v37, %v5130_v49  ;;  %v12911_v49 = vpack.c.bf16 %v5766_v14, %v5764_v55 }
0x2e6a   :  { %9958 = vtanh.f32 %v4968_v7  ;;  %v9123_v7 = vpack.c.bf16 %v5137_v48, %v5135_v47 }
0x2e73   :  { %v9957_v50 = vpop.eup %9956 }
0x2e74   :  { %v4972_v26 = vadd.f32 1.0, %v9957_v50  ;;  %v9959_v18 = vpop.eup %9958  ;;  %v5134_v50 = vld [vmem:[#allocation10 + $0x60] sm:$0xff] }
0x2e76   :  { %9960 = vrcp.f32 %v4972_v26  ;;  %v5136_v26 = vld [vmem:[#allocation10 + $0x70] sm:$0xff] }
0x2e77   :  { %9962 = vpow2.f32 %v8538_v20  ;;  %v12883_v20 = vpack.c.bf16 %v5759_v41, %v5757_v6 }
0x2e80   :  { %v9961_v23 = vpop.eup %9960 }
0x2e81   :  { %v4983_v46 = vmul.f32 %v9961_v23, %v9959_v18  ;;  %v9963_v22 = vpop.eup %9962  ;;  %v4982_v61 = vmul.f32 %v9961_v23, %v12652_v1  ;;  %v9125_v23 = vpack.c.bf16 %v5136_v26, %v5134_v50 }
0x2e82   :  { %v4979_v8 = vadd.f32 1.0, %v9963_v22  ;;  %v5756_v22 = vld [vmem:[#allocation13 + $0x20] sm:$0xff] }
0x2e83   :  { %4985 = vrot.lane.b32.xlu0 %v4983_v46, %s10390_s19  ;;  %v5754_v46 = vld [vmem:[#allocation13 + $0x10] sm:$0xff] }
0x2e84   :  { %9964 = vrcp.f32 %v4979_v8  ;;  %v5758_v8 = vld [vmem:[#allocation13 + $0x30] sm:$0xff] }
0x2e8e   :  { %v9965_v59 = vpop.eup %9964 }
0x2ef5   :  { %v4986_v27 = vpop.permute.xlu0 %4985 }
0x2ef6   :  { %v12773_v29 = vadd.f32 %v4986_v27, %v4982_v61  ;;  %v5761_v61 = vld [vmem:[#allocation13 + $0x48] sm:$0xff] }
0x2ef8   :  { %9966 = vtanh.f32 %v12773_v29 }
0x2f02   :  { %v9967_v56 = vpop.eup %9966 }
0x2f03   :  { %v4990_v40 = vmul.f32 %v9967_v56, %v9965_v59  ;;  %v5763_v59 = vld [vmem:[#allocation13 + $0x58] sm:$0xff] }
0x2f04   :  { %v12894_v4 = vpack.c.bf16 %v5763_v59, %v5761_v61 }
0x2f05   :  { %4992 = vrot.lane.b32.xlu1 %v4990_v40, %s10390_s19  ;;  %v12891_v40 = vpack.c.bf16 %v5758_v8, %v5756_v22 }
0x2f77   :  { %v4993_v1 = vpop.permute.xlu1 %4992 }
0x2f78   :  { %4995 = vst.msk [vmem:[#allocation2 + $0xb0] sm:$0xff] %vm2436_vm0, %v4993_v1  ;;  %8539 = vmatmul.mubr.msk.f32.vlgmr.msra.gmra.mrb[208].mxu0 %vm2436_vm0, %v4993_v1 }
0x2f79   :  { %9114 = vmatpush1.bf16.msra.mxu0 %v9113_v12  ;;  %5286 = vmatprep.mubr.f32.mxu0 %v13539_v2  ;;  %v5767_v12 = vld [vmem:[#allocation13 + $0x78] sm:$0xff] }
0x2f7a   :  { %9116 = vmatprep.subr.bf16.mxu0 %v9115_v16  ;;  %v12904_v1 = vpack.c.bf16 %v5767_v12, %v5765_v53 }
0x2f7d   :  { %9118 = vmatpush1.bf16.msra.mxu0 %v9117_v43 }
0x2f7e   :  { %9120 = vmatprep.subr.bf16.mxu0 %v9119_v17 }
0x2f7f   :  { %v5120_v18 = vld [vmem:[#allocation2 + $0xb0] sm:$0xff] }
0x2f80   :  { %8588 = vmatmul.mubr.msk.f32.gmra.mrb[76].mxu1 %vm2436_vm0, %v5120_v18 }
0x2f81   :  { %9122 = vmatpush1.bf16.msra.mxu0 %v9121_v42  ;;  %5697 = vmatprep.mubr.f32.mxu1 %v13539_v2 }
0x2f82   :  { %9124 = vmatprep.subr.bf16.mxu0 %v9123_v7 }
0x2f85   :  { %9126 = vmatpush1.bf16.msra.mxu0 %v9125_v23 }
0x2f88   :  { %8542 = vmatmul.mubr.msk.f32.vlgmr.msra.gmra.mrb[210].mxu0 %vm2436_vm0, %v12659_v36 }
0x2f89   :  { %5292 = vmatprep.mubr.f32.mxu0 %v13539_v2 }
0x2f8c   :  { %8543 = vmatmul.mubr.msk.f32.gmra.mrb[212].mxu0 %vm2436_vm0, %v12664_v24 }
0x2f8d   :  { %5298 = vmatprep.mubr.f32.mxu0 %v13539_v2 }
0x2f90   :  { %8544 = vmatmul.mubr.msk.f32.gmra.mrb[214].mxu0 %vm2436_vm0, %v12669_v9 }
0x2f91   :  { %5304 = vmatprep.mubr.f32.mxu0 %v13539_v2 }
0x2f94   :  { %8545 = vmatmul.mubr.msk.f32.gmra.mrb[216].mxu0 %vm2436_vm0, %v12674_v11 }
0x2f95   :  { %5310 = vmatprep.mubr.f32.mxu0 %v13539_v2 }
0x2f98   :  { %8546 = vmatmul.mubr.msk.f32.gmra.mrb[218].mxu0 %vm2436_vm0, %v12679_v15 }
0x2f99   :  { %5316 = vmatprep.mubr.f32.mxu0 %v13539_v2 }
0x2f9c   :  { %8547 = vmatmul.mubr.msk.f32.gmra.mrb[220].mxu0 %vm2436_vm0, %v12684_v19 }
0x2f9d   :  { %5322 = vmatprep.mubr.f32.mxu0 %v13539_v2 }
0x2fa0   :  { %8548 = vmatmul.mubr.msk.f32.gmra.mrb[222].mxu0 %vm2436_vm0, %v12689_v60 }
0x2fa1   :  { %5328 = vmatprep.mubr.f32.mxu0 %v13539_v2 }
0x2fa4   :  { %8549 = vmatmul.mubr.msk.f32.gmra.mrb[224].mxu0 %vm2436_vm0, %v12694_v35 }
0x2fa5   :  { %5334 = vmatprep.mubr.f32.mxu0 %v13539_v2 }
0x2fa8   :  { %8550 = vmatmul.mubr.msk.f32.gmra.mrb[226].mxu0 %vm2436_vm0, %v12699_v31 }
0x2fa9   :  { %5340 = vmatprep.mubr.f32.mxu0 %v13539_v2 }
0x2fac   :  { %8551 = vmatmul.mubr.msk.f32.gmra.mrb[228].mxu0 %vm2436_vm0, %v12704_v44 }
0x2fad   :  { %5346 = vmatprep.mubr.f32.mxu0 %v13539_v2 }
0x2fb0   :  { %8552 = vmatmul.mubr.msk.f32.gmra.mrb[230].mxu0 %vm2436_vm0, %v12709_v52 }
0x2fb1   :  { %5352 = vmatprep.mubr.f32.mxu0 %v13539_v2 }
0x2fb4   :  { %8553 = vmatmul.mubr.msk.f32.gmra.mrb[232].mxu0 %vm2436_vm0, %v12714_v28 }
0x2fb5   :  { %5358 = vmatprep.mubr.f32.mxu0 %v13539_v2 }
0x2fb8   :  { %8554 = vmatmul.mubr.msk.f32.gmra.mrb[234].mxu0 %vm2436_vm0, %v12719_v63 }
0x2fb9   :  { %5364 = vmatprep.mubr.f32.mxu0 %v13539_v2 }
0x2fbc   :  { %8555 = vmatmul.mubr.msk.f32.gmra.mrb[236].mxu0 %vm2436_vm0, %v12724_v51 }
0x2fbd   :  { %5370 = vmatprep.mubr.f32.mxu0 %v13539_v2 }
0x2fc0   :  { %8556 = vmatmul.mubr.msk.f32.gmra.mrb[238].mxu0 %vm2436_vm0, %v12729_v38 }
0x2fc1   :  { %5376 = vmatprep.mubr.f32.mxu0 %v13539_v2 }
0x2fc4   :  { %8557 = vmatmul.mubr.msk.f32.gmra.mrb[240].mxu0 %vm2436_vm0, %v12734_v30 }
0x2fc5   :  { %5382 = vmatprep.mubr.f32.mxu0 %v13539_v2 }
0x2fc8   :  { %8558 = vmatmul.mubr.msk.f32.gmra.mrb[242].mxu0 %vm2436_vm0, %v12739_v57 }
0x2fc9   :  { %5388 = vmatprep.mubr.f32.mxu0 %v13539_v2 }
0x2fcc   :  { %8559 = vmatmul.mubr.msk.f32.gmra.mrb[244].mxu0 %vm2436_vm0, %v12744_v39 }
0x2fcd   :  { %5394 = vmatprep.mubr.f32.mxu0 %v13539_v2 }
0x2fd0   :  { %8560 = vmatmul.mubr.msk.f32.gmra.mrb[246].mxu0 %vm2436_vm0, %v12749_v54  ;;  %v5753_v54 = vld [vmem:[#allocation13 + $0x8] sm:$0xff] }
0x2fd1   :  { %5400 = vmatprep.mubr.f32.mxu0 %v13539_v2 }
0x2fd4   :  { %8561 = vmatmul.mubr.msk.f32.gmra.mrb[248].mxu0 %vm2436_vm0, %v12754_v58  ;;  %v5755_v58 = vld [vmem:[#allocation13 + $0x18] sm:$0xff] }
0x2fd5   :  { %5406 = vmatprep.mubr.f32.mxu0 %v13539_v2 }
0x2fd8   :  { %8562 = vmatmul.mubr.msk.f32.gmra.mrb[250].mxu0 %vm2436_vm0, %v12759_v21  ;;  %v5752_v21 = vld [vmem:[#allocation13] sm:$0xff] }
0x2fd9   :  { %5412 = vmatprep.mubr.f32.mxu0 %v13539_v2  ;;  %v12881_v45 = vpack.c.bf16 %v5754_v46, %v5752_v21 }
0x2fdc   :  { %8563 = vmatmul.mubr.msk.f32.gmra.mrb[252].mxu0 %vm2436_vm0, %v12764_v0  ;;  %v12879_v0 = vpack.c.bf16 %v5755_v58, %v5753_v54 }
0x2fdd   :  { %5418 = vmatprep.mubr.f32.mxu0 %v13539_v2 }
0x2fde   :  { %9144 = vmatprep.subr.bf16.mxu1 %v12879_v0 }
0x2fdf   :  { %9146 = vmatpush1.bf16.msra.mxu1 %v12881_v45 }
0x2fe0   :  { %8564 = vmatmul.mubr.msk.f32.gmra.mrb[254].mxu0 %vm2436_vm0, %v5120_v18  ;;  %9148 = vmatprep.subr.bf16.mxu1 %v12883_v20 }
0x2fe1   :  { %5424 = vmatprep.mubr.f32.mxu0 %v13539_v2 }
0x2fe3   :  { %9150 = vmatpush1.bf16.msra.mxu1 %v12891_v40 }
0x2fe4   :  { %9152 = vmatprep.subr.bf16.mxu1 %v12894_v4 }
0x2fe7   :  { %9154 = vmatpush1.bf16.msra.mxu1 %v12901_v33 }
0x2fe8   :  { %9156 = vmatprep.subr.bf16.mxu1 %v12904_v1 }
0x2feb   :  { %9158 = vmatpush1.bf16.msra.mxu1 %v12911_v49 }
0x2fec   :  { %9160 = vmatprep.subr.bf16.mxu1 %v12879_v0 }
0x304b   :  { %v5064_v36 = vpop.f32.mrb[208].mxu0 }
0x304c   :  { %v5069_v24 = vadd.f32 %v5064_v36, %v12329_v5  ;;  %v5066_v9 = vpop.f32.mrb[209].mxu0 }
0x304d   :  { %v12852_v15 = vadd.f32 %v5066_v9, %v12335_v34 }
0x304e   :  { %v8540_v11 = vmul.f32 -1.442695, %v5069_v24 }
0x304f   :  { %v8541_v12 = vmul.f32 -1.442695, %v12852_v15 }
0x3050   :  { %9968 = vpow2.f32 %v8540_v11 }
0x3051   :  { %9970 = vtanh.f32 %v12852_v15  ;;  %v13570_v15 = vsub.s32 0, %v12321_v10 }
0x305a   :  { %v9969_v19 = vpop.eup %9968 }
0x305b   :  { %v5074_v60 = vadd.f32 1.0, %v9969_v19  ;;  %v12854_v35 = vpop.f32.mrb[210].mxu0  ;;  %v9971_v63 = vpop.eup %9970 }
0x305c   :  { %v12857_v31 = vpop.f32.mrb[211].mxu0 }
0x305d   :  { %9972 = vrcp.f32 %v5074_v60 }
0x305e   :  { %9974 = vpow2.f32 %v8541_v12 }
0x305f   :  { %v12859_v44 = vpop.f32.mrb[212].mxu0 }
0x3060   :  { %v12861_v52 = vpop.f32.mrb[213].mxu0 }
0x3063   :  { %v12863_v5 = vpop.f32.mrb[214].mxu0 }
0x3064   :  { %v12865_v28 = vpop.f32.mrb[215].mxu0 }
0x3067   :  { %v12867_v34 = vpop.eup %9972  ;;  %v12869_v51 = vpop.f32.mrb[216].mxu0 }
0x3068   :  { %v12871_v38 = vpop.f32.mrb[217].mxu0  ;;  %v5085_v30 = vmul.f32 %v12867_v34, %v9971_v63  ;;  %v9975_v55 = vpop.eup %9974  ;;  %v5084_v13 = vmul.f32 %v12867_v34, %v12773_v29 }
0x3069   :  { %v5081_v14 = vadd.f32 1.0, %v9975_v55 }
0x306a   :  { %5087 = vrot.lane.b32.xlu0 %v5085_v30, %s10390_s19 }
0x306b   :  { %v12875_v57 = vpop.f32.mrb[218].mxu0  ;;  %9976 = vrcp.f32 %v5081_v14 }
0x306c   :  { %v12877_v39 = vpop.f32.mrb[219].mxu0 }
0x306f   :  { %v12885_v27 = vpop.f32.mrb[220].mxu0 }
0x3070   :  { %v12888_v56 = vpop.f32.mrb[221].mxu0 }
0x3073   :  { %v12896_v16 = vpop.f32.mrb[222].mxu0 }
0x3074   :  { %v12898_v3 = vpop.f32.mrb[223].mxu0 }
0x3077   :  { %v12906_v43 = vpop.f32.mrb[224].mxu0 }
0x3078   :  { %v12908_v17 = vpop.f32.mrb[225].mxu0 }
0x307b   :  { %v12914_v37 = vpop.f32.mrb[226].mxu0 }
0x307c   :  { %v12916_v47 = vpop.f32.mrb[227].mxu0 }
0x307f   :  { %v12920_v48 = vpop.f32.mrb[228].mxu0 }
0x3080   :  { %v12922_v42 = vpop.f32.mrb[229].mxu0 }
0x3083   :  { %v12924_v7 = vpop.f32.mrb[230].mxu0 }
0x3084   :  { %v12926_v50 = vpop.f32.mrb[231].mxu0 }
0x3087   :  { %v12928_v26 = vpop.f32.mrb[232].mxu0 }
0x3088   :  { %v12930_v18 = vpop.f32.mrb[233].mxu0 }
0x308b   :  { %v12932_v23 = vpop.f32.mrb[234].mxu0 }
0x308c   :  { %v12934_v36 = vpop.f32.mrb[235].mxu0 }
0x308f   :  { %v12936_v24 = vpop.f32.mrb[236].mxu0 }
0x3090   :  { %v12938_v9 = vpop.f32.mrb[237].mxu0 }
0x3093   :  { %v12940_v11 = vpop.f32.mrb[238].mxu0 }
0x3094   :  { %v12942_v19 = vpop.f32.mrb[239].mxu0 }
0x3097   :  { %v12944_v60 = vpop.f32.mrb[240].mxu0 }
0x3098   :  { %v12946_v63 = vpop.f32.mrb[241].mxu0 }
0x309b   :  { %v12948_v30 = vpop.f32.mrb[242].mxu0 }
0x309c   :  { %v12950_v54 = vpop.f32.mrb[243].mxu0 }
0x309f   :  { %v12952_v58 = vpop.f32.mrb[244].mxu0 }
0x30a0   :  { %v12954_v21 = vpop.f32.mrb[245].mxu0 }
0x30a3   :  { %v12956_v46 = vpop.f32.mrb[246].mxu0 }
0x30a4   :  { %v12958_v6 = vpop.f32.mrb[247].mxu0 }
0x30a7   :  { %v12960_v41 = vpop.f32.mrb[248].mxu0 }
0x30a8   :  { %13560 = vst [vmem:[#allocation17_spill] sm:$0xff] %v12960_v41  ;;  %v12962_v22 = vpop.f32.mrb[249].mxu0 }
0x30a9   :  { %13561 = vst [vmem:[#allocation18_spill] sm:$0xff] %v12962_v22 }
0x30ab   :  { %v12964_v8 = vpop.f32.mrb[250].mxu0 }
0x30ac   :  { %13562 = vst [vmem:[#allocation19_spill] sm:$0xff] %v12964_v8  ;;  %v12966_v61 = vpop.f32.mrb[251].mxu0 }
0x30ad   :  { %13563 = vst [vmem:[#allocation22_spill] sm:$0xff] %v12966_v61  ;;  %v9977_v61 = vpop.eup %9976 }
0x30af   :  { %v12968_v59 = vpop.f32.mrb[252].mxu0 }
0x30b0   :  { %13564 = vst [vmem:[#allocation23_spill] sm:$0xff] %v12968_v59  ;;  %v12970_v62 = vpop.f32.mrb[253].mxu0 }
0x30b1   :  { %13565 = vst [vmem:[#allocation31_spill] sm:$0xff] %v12970_v62 }
0x30b3   :  { %v12972_v32 = vpop.f32.mrb[254].mxu0 }
0x30b4   :  { %13566 = vst [vmem:[#allocation32_spill] sm:$0xff] %v12972_v32  ;;  %v12974_v53 = vpop.f32.mrb[255].mxu0 }
0x30b5   :  { %13567 = vst [vmem:[#allocation35_spill] sm:$0xff] %v12974_v53 }
0x30dc   :  { %v5088_v25 = vpop.permute.xlu0 %5087 }
0x30dd   :  { %v5090_v8 = vadd.f32 %v5088_v25, %v5084_v13  ;;  %v5138_v25 = vld [vmem:[%s13389_s8] sm:$0x3] }
0x30de   :  { %v13003_v34 = vrot.slane %v5138_v25, %v13570_v15 }
0x30df   :  { %9978 = vtanh.f32 %v5090_v8 }
0x30e9   :  { %v9979_v59 = vpop.eup %9978 }
0x30ea   :  { %v5092_v22 = vmul.f32 %v9979_v59, %v9977_v61  ;;  %v5289_v61 = vadd.f32 %v12854_v35, %v13003_v34 }
0x30ec   :  { %5094 = vrot.lane.b32.xlu1 %v5092_v22, %s10390_s19  ;;  %v13571_v22 = vsub.s32 1, %v12321_v10 }
0x30ee   :  { %v13007_v8 = vrot.slane %v5138_v25, %v13571_v22 }
0x30f0   :  { %v5291_v59 = vadd.f32 %v12857_v31, %v13007_v8 }
0x315e   :  { %v5095_v32 = vpop.permute.xlu1 %5094 }
0x315f   :  { %5097 = vst.msk [vmem:[#allocation2 + $0xb8] sm:$0xff] %vm2436_vm0, %v5095_v32 }
0x3166   :  { %v5121_v53 = vld [vmem:[#allocation2 + $0xb8] sm:$0xff] }
0x3167   :  { %8565 = vmatmul.mubr.msk.f32.gmra.mrb[0].mxu0 %vm2436_vm0, %v5121_v53  ;;  %8589 = vmatmul.mubr.msk.f32.gmra.mrb[78].mxu1 %vm2436_vm0, %v5121_v53 }
0x3168   :  { %5838 = vmatprep.mubr.f32.mxu1 %v13539_v2 }
0x316f   :  { %5839 = vmatmul.mubr.f32.vlgmr.msra.gmra.mrb[78].mxu1 %v13539_v2 }
0x3170   :  { %9162 = vmatpush1.bf16.msra.mxu1 %v12881_v45  ;;  %5944 = vmatprep.mubr.f32.mxu1 %v13539_v2 }
0x3171   :  { %9164 = vmatprep.subr.bf16.mxu1 %v12883_v20 }
0x3174   :  { %9166 = vmatpush1.bf16.msra.mxu1 %v12891_v40 }
0x3175   :  { %9168 = vmatprep.subr.bf16.mxu1 %v12894_v4 }
0x3178   :  { %9170 = vmatpush1.bf16.msra.mxu1 %v12901_v33 }
0x3179   :  { %9172 = vmatprep.subr.bf16.mxu1 %v12904_v1 }
0x317c   :  { %9174 = vmatpush1.bf16.msra.mxu1 %v12911_v49 }
0x317d   :  { %9176 = vmatprep.subr.bf16.mxu1 %v12879_v0 }
0x323a   :  { %v12997_v13 = vpop.f32.mrb[0].mxu0 }
0x323b   :  { %13568 = vst [vmem:[#allocation20_spill] sm:$0xff] %v12997_v13  ;;  %v12999_v29 = vpop.f32.mrb[1].mxu0 }
0x323c   :  { %13569 = vst [vmem:[#allocation21_spill] sm:$0xff] %v12999_v29 }
0x3242   :  { %v5840_v32 = vpop.f32.mrb[78].mxu1 }
0x3243   :  { %v9536_v53 = vadd.f32 %v5840_v32, %v5289_v61  ;;  %v5842_v12 = vpop.f32.mrb[79].mxu1 }
0x3244   :  { %v9538_v55 = vadd.f32 %v5842_v12, %v5291_v59 }
0x3245   :  { %v8590_v14 = vmul.f32 -1.442695, %v9536_v53 }
0x3246   :  { %v8591_v22 = vmul.f32 -1.442695, %v9538_v55 }
0x3247   :  { %9980 = vpow2.f32 %v8590_v14 }
0x3248   :  { %9982 = vtanh.f32 %v9538_v55 }
0x3251   :  { %v9981_v29 = vpop.eup %9980 }
0x3252   :  { %v5850_v13 = vadd.f32 1.0, %v9981_v29  ;;  %v9983_v15 = vpop.eup %9982 }
0x3254   :  { %9984 = vrcp.f32 %v5850_v13 }
0x3255   :  { %9986 = vpow2.f32 %v8591_v22 }
0x325e   :  { %v9985_v10 = vpop.eup %9984 }
0x325f   :  { %v5861_v25 = vmul.f32 %v9985_v10, %v9983_v15  ;;  %v9987_v35 = vpop.eup %9986  ;;  %v5860_v31 = vmul.f32 0.0, %v9985_v10 }
0x3260   :  { %v5857_v62 = vadd.f32 1.0, %v9987_v35 }
0x3261   :  { %5863 = vrot.lane.b32.xlu0 %v5861_v25, %s10390_s19 }
0x3262   :  { %9988 = vrcp.f32 %v5857_v62  ;;  %v5297_v62 = vadd.f32 %v12861_v52, %v13007_v8 }
0x326c   :  { %v9989_v59 = vpop.eup %9988 }
0x32d3   :  { %v5864_v41 = vpop.permute.xlu0 %5863 }
0x32d4   :  { %v5866_v61 = vadd.f32 %v5864_v41, %v5860_v31  ;;  %v5295_v41 = vadd.f32 %v12859_v44, %v13003_v34 }
0x32d6   :  { %9990 = vtanh.f32 %v5866_v61 }
0x32e0   :  { %v9991_v32 = vpop.eup %9990 }
0x32e1   :  { %v5868_v53 = vmul.f32 %v9991_v32, %v9989_v59 }
0x32e3   :  { %5876 = vrot.lane.b32.xlu1 %v5868_v53, %s10390_s19 }
0x3355   :  { %v5877_v13 = vpop.permute.xlu1 %5876 }
0x3356   :  { %8592 = vmatmul.mubr.msk.f32.vlgmr.msra.gmra.mrb[76].mxu1 %vm2436_vm0, %v5877_v13 }
0x3357   :  { %9178 = vmatpush1.bf16.msra.mxu1 %v12881_v45  ;;  %6050 = vmatprep.mubr.f32.mxu1 %v13539_v2 }
0x3358   :  { %9180 = vmatprep.subr.bf16.mxu1 %v12883_v20 }
0x335b   :  { %9182 = vmatpush1.bf16.msra.mxu1 %v12891_v40 }
0x335c   :  { %9184 = vmatprep.subr.bf16.mxu1 %v12894_v4 }
0x335f   :  { %9186 = vmatpush1.bf16.msra.mxu1 %v12901_v33 }
0x3360   :  { %9188 = vmatprep.subr.bf16.mxu1 %v12904_v1 }
0x3363   :  { %9190 = vmatpush1.bf16.msra.mxu1 %v12911_v49 }
0x3364   :  { %9192 = vmatprep.subr.bf16.mxu1 %v12879_v0 }
0x3429   :  { %v5946_v29 = vpop.f32.mrb[76].mxu1 }
0x342a   :  { %v9540_v12 = vadd.f32 %v5946_v29, %v5295_v41  ;;  %v5948_v55 = vpop.f32.mrb[77].mxu1 }
0x342b   :  { %v9542_v14 = vadd.f32 %v5948_v55, %v5297_v62  ;;  %v5303_v55 = vadd.f32 %v12865_v28, %v13007_v8 }
0x342c   :  { %v8593_v15 = vmul.f32 -1.442695, %v9540_v12 }
0x342d   :  { %v8594_v59 = vmul.f32 -1.442695, %v9542_v14 }
0x342e   :  { %9992 = vpow2.f32 %v8593_v15 }
0x342f   :  { %9994 = vtanh.f32 %v9542_v14 }
0x3438   :  { %v9993_v10 = vpop.eup %9992 }
0x3439   :  { %v5956_v25 = vadd.f32 1.0, %v9993_v10  ;;  %v9995_v22 = vpop.eup %9994 }
0x343b   :  { %9996 = vrcp.f32 %v5956_v25 }
0x343c   :  { %9998 = vpow2.f32 %v8594_v59 }
0x3445   :  { %v9997_v35 = vpop.eup %9996 }
0x3446   :  { %v5967_v31 = vmul.f32 %v9997_v35, %v9995_v22  ;;  %v9999_v44 = vpop.eup %9998  ;;  %v5966_v52 = vmul.f32 %v9997_v35, %v5866_v61  ;;  %v5301_v61 = vadd.f32 %v12863_v5, %v13003_v34 }
0x3447   :  { %v5963_v32 = vadd.f32 1.0, %v9999_v44 }
0x3448   :  { %5969 = vrot.lane.b32.xlu0 %v5967_v31, %s10390_s19 }
0x3449   :  { %10000 = vrcp.f32 %v5963_v32 }
0x3453   :  { %v10001_v41 = vpop.eup %10000 }
0x34ba   :  { %v5970_v53 = vpop.permute.xlu0 %5969 }
0x34bb   :  { %v5972_v13 = vadd.f32 %v5970_v53, %v5966_v52 }
0x34bd   :  { %10002 = vtanh.f32 %v5972_v13 }
0x34c7   :  { %v10003_v62 = vpop.eup %10002 }
0x34c8   :  { %v5974_v29 = vmul.f32 %v10003_v62, %v10001_v41 }
0x34ca   :  { %5982 = vrot.lane.b32.xlu1 %v5974_v29, %s10390_s19 }
0x353c   :  { %v5983_v12 = vpop.permute.xlu1 %5982 }
0x353d   :  { %8595 = vmatmul.mubr.msk.f32.vlgmr.msra.gmra.mrb[74].mxu1 %vm2436_vm0, %v5983_v12 }
0x353e   :  { %9194 = vmatpush1.bf16.msra.mxu1 %v12881_v45  ;;  %6156 = vmatprep.mubr.f32.mxu1 %v13539_v2 }
0x353f   :  { %9196 = vmatprep.subr.bf16.mxu1 %v12883_v20 }
0x3542   :  { %9198 = vmatpush1.bf16.msra.mxu1 %v12891_v40 }
0x3543   :  { %9200 = vmatprep.subr.bf16.mxu1 %v12894_v4 }
0x3546   :  { %9202 = vmatpush1.bf16.msra.mxu1 %v12901_v33 }
0x3547   :  { %9204 = vmatprep.subr.bf16.mxu1 %v12904_v1 }
0x354a   :  { %9206 = vmatpush1.bf16.msra.mxu1 %v12911_v49 }
0x354b   :  { %9208 = vmatprep.subr.bf16.mxu1 %v12879_v0 }
0x3610   :  { %v6052_v14 = vpop.f32.mrb[74].mxu1 }
0x3611   :  { %v9544_v15 = vadd.f32 %v6052_v14, %v5301_v61  ;;  %v6054_v10 = vpop.f32.mrb[75].mxu1  ;;  %v5309_v14 = vadd.f32 %v12871_v38, %v13007_v8 }
0x3612   :  { %v9546_v25 = vadd.f32 %v6054_v10, %v5303_v55 }
0x3613   :  { %v8596_v22 = vmul.f32 -1.442695, %v9544_v15 }
0x3614   :  { %v8597_v52 = vmul.f32 -1.442695, %v9546_v25 }
0x3615   :  { %10004 = vpow2.f32 %v8596_v22 }
0x3616   :  { %10006 = vtanh.f32 %v9546_v25 }
0x361f   :  { %v10005_v35 = vpop.eup %10004 }
0x3620   :  { %v6062_v31 = vadd.f32 1.0, %v10005_v35  ;;  %v10007_v59 = vpop.eup %10006 }
0x3622   :  { %10008 = vrcp.f32 %v6062_v31 }
0x3623   :  { %10010 = vpow2.f32 %v8597_v52 }
0x362c   :  { %v10009_v44 = vpop.eup %10008 }
0x362d   :  { %v6073_v32 = vmul.f32 %v10009_v44, %v10007_v59  ;;  %v10011_v5 = vpop.eup %10010  ;;  %v6072_v28 = vmul.f32 %v10009_v44, %v5972_v13  ;;  %v5307_v13 = vadd.f32 %v12869_v51, %v13003_v34 }
0x362e   :  { %v6069_v53 = vadd.f32 1.0, %v10011_v5 }
0x362f   :  { %6075 = vrot.lane.b32.xlu0 %v6073_v32, %s10390_s19 }
0x3630   :  { %10012 = vrcp.f32 %v6069_v53 }
0x363a   :  { %v10013_v29 = vpop.eup %10012 }
0x36a1   :  { %v6076_v41 = vpop.permute.xlu0 %6075 }
0x36a2   :  { %v6078_v62 = vadd.f32 %v6076_v41, %v6072_v28 }
0x36a4   :  { %10014 = vtanh.f32 %v6078_v62 }
0x36ae   :  { %v10015_v12 = vpop.eup %10014 }
0x36af   :  { %v6080_v61 = vmul.f32 %v10015_v12, %v10013_v29 }
0x36b1   :  { %6088 = vrot.lane.b32.xlu1 %v6080_v61, %s10390_s19 }
0x3723   :  { %v6089_v55 = vpop.permute.xlu1 %6088 }
0x3724   :  { %8598 = vmatmul.mubr.msk.f32.vlgmr.msra.gmra.mrb[72].mxu1 %vm2436_vm0, %v6089_v55 }
0x3725   :  { %9210 = vmatpush1.bf16.msra.mxu1 %v12881_v45  ;;  %6262 = vmatprep.mubr.f32.mxu1 %v13539_v2 }
0x3726   :  { %9212 = vmatprep.subr.bf16.mxu1 %v12883_v20 }
0x3729   :  { %9214 = vmatpush1.bf16.msra.mxu1 %v12891_v40 }
0x372a   :  { %9216 = vmatprep.subr.bf16.mxu1 %v12894_v4 }
0x372d   :  { %9218 = vmatpush1.bf16.msra.mxu1 %v12901_v33 }
0x372e   :  { %9220 = vmatprep.subr.bf16.mxu1 %v12904_v1 }
0x3731   :  { %9222 = vmatpush1.bf16.msra.mxu1 %v12911_v49 }
0x3732   :  { %9224 = vmatprep.subr.bf16.mxu1 %v12879_v0 }
0x37f7   :  { %v6158_v15 = vpop.f32.mrb[72].mxu1 }
0x37f8   :  { %v9548_v10 = vadd.f32 %v6158_v15, %v5307_v13  ;;  %v6160_v25 = vpop.f32.mrb[73].mxu1  ;;  %v5315_v13 = vadd.f32 %v12877_v39, %v13007_v8 }
0x37f9   :  { %v9550_v22 = vadd.f32 %v6160_v25, %v5309_v14 }
0x37fa   :  { %v8599_v35 = vmul.f32 -1.442695, %v9548_v10 }
0x37fb   :  { %v8600_v5 = vmul.f32 -1.442695, %v9550_v22 }
0x37fc   :  { %10016 = vpow2.f32 %v8599_v35 }
0x37fd   :  { %10018 = vtanh.f32 %v9550_v22 }
0x3806   :  { %v10017_v31 = vpop.eup %10016 }
0x3807   :  { %v6168_v59 = vadd.f32 1.0, %v10017_v31  ;;  %v10019_v44 = vpop.eup %10018 }
0x3809   :  { %10020 = vrcp.f32 %v6168_v59 }
0x380a   :  { %10022 = vpow2.f32 %v8600_v5 }
0x3813   :  { %v10021_v32 = vpop.eup %10020 }
0x3814   :  { %v6179_v52 = vmul.f32 %v10021_v32, %v10019_v44  ;;  %v10023_v51 = vpop.eup %10022  ;;  %v6178_v38 = vmul.f32 %v10021_v32, %v6078_v62  ;;  %v5313_v62 = vadd.f32 %v12875_v57, %v13003_v34 }
0x3815   :  { %v6175_v53 = vadd.f32 1.0, %v10023_v51 }
0x3816   :  { %6181 = vrot.lane.b32.xlu0 %v6179_v52, %s10390_s19 }
0x3817   :  { %10024 = vrcp.f32 %v6175_v53 }
0x3821   :  { %v10025_v29 = vpop.eup %10024 }
0x3888   :  { %v6182_v28 = vpop.permute.xlu0 %6181 }
0x3889   :  { %v6184_v41 = vadd.f32 %v6182_v28, %v6178_v38 }
0x388b   :  { %10026 = vtanh.f32 %v6184_v41 }
0x3895   :  { %v10027_v12 = vpop.eup %10026 }
0x3896   :  { %v6186_v61 = vmul.f32 %v10027_v12, %v10025_v29 }
0x3898   :  { %6194 = vrot.lane.b32.xlu1 %v6186_v61, %s10390_s19  ;;  %v5321_v61 = vadd.f32 %v12888_v56, %v13007_v8 }
0x390a   :  { %v6195_v55 = vpop.permute.xlu1 %6194 }
0x390b   :  { %8601 = vmatmul.mubr.msk.f32.vlgmr.msra.gmra.mrb[70].mxu1 %vm2436_vm0, %v6195_v55 }
0x390c   :  { %9226 = vmatpush1.bf16.msra.mxu1 %v12881_v45  ;;  %6368 = vmatprep.mubr.f32.mxu1 %v13539_v2 }
0x390d   :  { %9228 = vmatprep.subr.bf16.mxu1 %v12883_v20 }
0x3910   :  { %9230 = vmatpush1.bf16.msra.mxu1 %v12891_v40 }
0x3911   :  { %9232 = vmatprep.subr.bf16.mxu1 %v12894_v4 }
0x3914   :  { %9234 = vmatpush1.bf16.msra.mxu1 %v12901_v33 }
0x3915   :  { %9236 = vmatprep.subr.bf16.mxu1 %v12904_v1 }
0x3918   :  { %9238 = vmatpush1.bf16.msra.mxu1 %v12911_v49 }
0x3919   :  { %9240 = vmatprep.subr.bf16.mxu1 %v12879_v0 }
0x39de   :  { %v6264_v14 = vpop.f32.mrb[70].mxu1 }
0x39df   :  { %v9552_v15 = vadd.f32 %v6264_v14, %v5313_v62  ;;  %v6266_v10 = vpop.f32.mrb[71].mxu1 }
0x39e0   :  { %v9554_v25 = vadd.f32 %v6266_v10, %v5315_v13 }
0x39e1   :  { %v8602_v22 = vmul.f32 -1.442695, %v9552_v15 }
0x39e2   :  { %v8603_v52 = vmul.f32 -1.442695, %v9554_v25 }
0x39e3   :  { %10028 = vpow2.f32 %v8602_v22 }
0x39e4   :  { %10030 = vtanh.f32 %v9554_v25 }
0x39ed   :  { %v10029_v35 = vpop.eup %10028 }
0x39ee   :  { %v6274_v31 = vadd.f32 1.0, %v10029_v35  ;;  %v10031_v59 = vpop.eup %10030 }
0x39f0   :  { %10032 = vrcp.f32 %v6274_v31 }
0x39f1   :  { %10034 = vpow2.f32 %v8603_v52 }
0x39fa   :  { %v10033_v44 = vpop.eup %10032 }
0x39fb   :  { %v6285_v32 = vmul.f32 %v10033_v44, %v10031_v59  ;;  %v10035_v57 = vpop.eup %10034  ;;  %v6284_v39 = vmul.f32 %v10033_v44, %v6184_v41  ;;  %v5319_v41 = vadd.f32 %v12885_v27, %v13003_v34 }
0x39fc   :  { %v6281_v5 = vadd.f32 1.0, %v10035_v57 }
0x39fd   :  { %6287 = vrot.lane.b32.xlu0 %v6285_v32, %s10390_s19 }
0x39fe   :  { %10036 = vrcp.f32 %v6281_v5 }
0x3a08   :  { %v10037_v38 = vpop.eup %10036 }
0x3a6f   :  { %v6288_v51 = vpop.permute.xlu0 %6287 }
0x3a70   :  { %v6290_v53 = vadd.f32 %v6288_v51, %v6284_v39 }
0x3a72   :  { %10038 = vtanh.f32 %v6290_v53 }
0x3a7c   :  { %v10039_v28 = vpop.eup %10038 }
0x3a7d   :  { %v6292_v29 = vmul.f32 %v10039_v28, %v10037_v38  ;;  %v5327_v38 = vadd.f32 %v12898_v3, %v13007_v8 }
0x3a7f   :  { %6300 = vrot.lane.b32.xlu1 %v6292_v29, %s10390_s19 }
0x3af1   :  { %v6301_v12 = vpop.permute.xlu1 %6300 }
0x3af2   :  { %8604 = vmatmul.mubr.msk.f32.vlgmr.msra.gmra.mrb[68].mxu1 %vm2436_vm0, %v6301_v12 }
0x3af3   :  { %9242 = vmatpush1.bf16.msra.mxu1 %v12881_v45  ;;  %6474 = vmatprep.mubr.f32.mxu1 %v13539_v2 }
0x3af4   :  { %9244 = vmatprep.subr.bf16.mxu1 %v12883_v20 }
0x3af7   :  { %9246 = vmatpush1.bf16.msra.mxu1 %v12891_v40 }
0x3af8   :  { %9248 = vmatprep.subr.bf16.mxu1 %v12894_v4 }
0x3afb   :  { %9250 = vmatpush1.bf16.msra.mxu1 %v12901_v33 }
0x3afc   :  { %9252 = vmatprep.subr.bf16.mxu1 %v12904_v1 }
0x3aff   :  { %9254 = vmatpush1.bf16.msra.mxu1 %v12911_v49 }
0x3b00   :  { %9256 = vmatprep.subr.bf16.mxu1 %v12879_v0 }
0x3bc5   :  { %v6370_v55 = vpop.f32.mrb[68].mxu1 }
0x3bc6   :  { %v9556_v62 = vadd.f32 %v6370_v55, %v5319_v41  ;;  %v6372_v13 = vpop.f32.mrb[69].mxu1 }
0x3bc7   :  { %v9558_v14 = vadd.f32 %v6372_v13, %v5321_v61 }
0x3bc8   :  { %v8605_v15 = vmul.f32 -1.442695, %v9556_v62 }
0x3bc9   :  { %v8606_v59 = vmul.f32 -1.442695, %v9558_v14 }
0x3bca   :  { %10040 = vpow2.f32 %v8605_v15 }
0x3bcb   :  { %10042 = vtanh.f32 %v9558_v14 }
0x3bd4   :  { %v10041_v10 = vpop.eup %10040 }
0x3bd5   :  { %v6380_v25 = vadd.f32 1.0, %v10041_v10  ;;  %v10043_v22 = vpop.eup %10042 }
0x3bd7   :  { %10044 = vrcp.f32 %v6380_v25 }
0x3bd8   :  { %10046 = vpow2.f32 %v8606_v59 }
0x3be1   :  { %v10045_v35 = vpop.eup %10044 }
0x3be2   :  { %v6391_v31 = vmul.f32 %v10045_v35, %v10043_v22  ;;  %v10047_v27 = vpop.eup %10046  ;;  %v6390_v56 = vmul.f32 %v10045_v35, %v6290_v53  ;;  %v5325_v53 = vadd.f32 %v12896_v16, %v13003_v34 }
0x3be3   :  { %v6387_v44 = vadd.f32 1.0, %v10047_v27 }
0x3be4   :  { %6393 = vrot.lane.b32.xlu0 %v6391_v31, %s10390_s19 }
0x3be5   :  { %10048 = vrcp.f32 %v6387_v44 }
0x3bef   :  { %v10049_v57 = vpop.eup %10048 }
0x3c56   :  { %v6394_v32 = vpop.permute.xlu0 %6393 }
0x3c57   :  { %v6396_v52 = vadd.f32 %v6394_v32, %v6390_v56  ;;  %v5331_v56 = vadd.f32 %v12906_v43, %v13003_v34  ;;  %v5333_v32 = vadd.f32 %v12908_v17, %v13007_v8 }
0x3c59   :  { %10050 = vtanh.f32 %v6396_v52 }
0x3c63   :  { %v10051_v5 = vpop.eup %10050 }
0x3c64   :  { %v6398_v39 = vmul.f32 %v10051_v5, %v10049_v57 }
0x3c66   :  { %6406 = vrot.lane.b32.xlu1 %v6398_v39, %s10390_s19 }
0x3cd8   :  { %v6407_v51 = vpop.permute.xlu1 %6406 }
0x3cd9   :  { %8607 = vmatmul.mubr.msk.f32.vlgmr.msra.gmra.mrb[66].mxu1 %vm2436_vm0, %v6407_v51 }
0x3cda   :  { %9258 = vmatpush1.bf16.msra.mxu1 %v12881_v45  ;;  %6580 = vmatprep.mubr.f32.mxu1 %v13539_v2 }
0x3cdb   :  { %9260 = vmatprep.subr.bf16.mxu1 %v12883_v20 }
0x3cde   :  { %9262 = vmatpush1.bf16.msra.mxu1 %v12891_v40 }
0x3cdf   :  { %9264 = vmatprep.subr.bf16.mxu1 %v12894_v4 }
0x3ce2   :  { %9266 = vmatpush1.bf16.msra.mxu1 %v12901_v33 }
0x3ce3   :  { %9268 = vmatprep.subr.bf16.mxu1 %v12904_v1 }
0x3ce6   :  { %9270 = vmatpush1.bf16.msra.mxu1 %v12911_v49 }
0x3ce7   :  { %9272 = vmatprep.subr.bf16.mxu1 %v12879_v0 }
0x3dac   :  { %v6476_v28 = vpop.f32.mrb[66].mxu1 }
0x3dad   :  { %v9560_v29 = vadd.f32 %v6476_v28, %v5325_v53  ;;  %v6478_v12 = vpop.f32.mrb[67].mxu1 }
0x3dae   :  { %v9562_v41 = vadd.f32 %v6478_v12, %v5327_v38 }
0x3daf   :  { %v8608_v61 = vmul.f32 -1.442695, %v9560_v29 }
0x3db0   :  { %v8609_v10 = vmul.f32 -1.442695, %v9562_v41 }
0x3db1   :  { %10052 = vpow2.f32 %v8608_v61 }
0x3db2   :  { %10054 = vtanh.f32 %v9562_v41 }
0x3dbb   :  { %v10053_v55 = vpop.eup %10052 }
0x3dbc   :  { %v6486_v62 = vadd.f32 1.0, %v10053_v55  ;;  %v10055_v13 = vpop.eup %10054 }
0x3dbe   :  { %10056 = vrcp.f32 %v6486_v62 }
0x3dbf   :  { %10058 = vpow2.f32 %v8609_v10 }
0x3dc8   :  { %v10057_v14 = vpop.eup %10056 }
0x3dc9   :  { %v6497_v15 = vmul.f32 %v10057_v14, %v10055_v13  ;;  %v10059_v16 = vpop.eup %10058  ;;  %v6496_v3 = vmul.f32 %v10057_v14, %v6396_v52 }
0x3dca   :  { %v6493_v25 = vadd.f32 1.0, %v10059_v16  ;;  %v5337_v16 = vadd.f32 %v12914_v37, %v13003_v34 }
0x3dcb   :  { %6499 = vrot.lane.b32.xlu0 %v6497_v15, %s10390_s19 }
0x3dcc   :  { %10060 = vrcp.f32 %v6493_v25  ;;  %v5339_v25 = vadd.f32 %v12916_v47, %v13007_v8 }
0x3dd6   :  { %v10061_v31 = vpop.eup %10060 }
0x3e3d   :  { %v6500_v22 = vpop.permute.xlu0 %6499 }
0x3e3e   :  { %v6502_v35 = vadd.f32 %v6500_v22, %v6496_v3 }
0x3e40   :  { %10062 = vtanh.f32 %v6502_v35 }
0x3e4a   :  { %v10063_v59 = vpop.eup %10062 }
0x3e4b   :  { %v6504_v27 = vmul.f32 %v10063_v59, %v10061_v31 }
0x3e4d   :  { %6512 = vrot.lane.b32.xlu1 %v6504_v27, %s10390_s19 }
0x3ebf   :  { %v6513_v44 = vpop.permute.xlu1 %6512 }
0x3ec0   :  { %8610 = vmatmul.mubr.msk.f32.vlgmr.msra.gmra.mrb[64].mxu1 %vm2436_vm0, %v6513_v44 }
0x3ec1   :  { %9274 = vmatpush1.bf16.msra.mxu1 %v12881_v45  ;;  %6686 = vmatprep.mubr.f32.mxu1 %v13539_v2 }
0x3ec2   :  { %9276 = vmatprep.subr.bf16.mxu1 %v12883_v20 }
0x3ec5   :  { %9278 = vmatpush1.bf16.msra.mxu1 %v12891_v40 }
0x3ec6   :  { %9280 = vmatprep.subr.bf16.mxu1 %v12894_v4 }
0x3ec9   :  { %9282 = vmatpush1.bf16.msra.mxu1 %v12901_v33 }
0x3eca   :  { %9284 = vmatprep.subr.bf16.mxu1 %v12904_v1 }
0x3ecd   :  { %9286 = vmatpush1.bf16.msra.mxu1 %v12911_v49 }
0x3ece   :  { %9288 = vmatprep.subr.bf16.mxu1 %v12879_v0 }
0x3f93   :  { %v6582_v52 = vpop.f32.mrb[64].mxu1 }
0x3f94   :  { %v9564_v57 = vadd.f32 %v6582_v52, %v5331_v56  ;;  %v6584_v5 = vpop.f32.mrb[65].mxu1 }
0x3f95   :  { %v9566_v39 = vadd.f32 %v6584_v5, %v5333_v32 }
0x3f96   :  { %v8611_v51 = vmul.f32 -1.442695, %v9564_v57 }
0x3f97   :  { %v8612_v41 = vmul.f32 -1.442695, %v9566_v39 }
0x3f98   :  { %10064 = vpow2.f32 %v8611_v51 }
0x3f99   :  { %10066 = vtanh.f32 %v9566_v39 }
0x3fa2   :  { %v10065_v53 = vpop.eup %10064 }
0x3fa3   :  { %v6592_v38 = vadd.f32 1.0, %v10065_v53  ;;  %v10067_v28 = vpop.eup %10066 }
0x3fa5   :  { %10068 = vrcp.f32 %v6592_v38 }
0x3fa6   :  { %10070 = vpow2.f32 %v8612_v41  ;;  %v5345_v41 = vadd.f32 %v12922_v42, %v13007_v8 }
0x3faf   :  { %v10069_v29 = vpop.eup %10068 }
0x3fb0   :  { %v6603_v12 = vmul.f32 %v10069_v29, %v10067_v28  ;;  %v10071_v43 = vpop.eup %10070  ;;  %v6602_v17 = vmul.f32 %v10069_v29, %v6502_v35 }
0x3fb1   :  { %v6599_v61 = vadd.f32 1.0, %v10071_v43 }
0x3fb2   :  { %6605 = vrot.lane.b32.xlu0 %v6603_v12, %s10390_s19  ;;  %v5343_v12 = vadd.f32 %v12920_v48, %v13003_v34 }
0x3fb3   :  { %10072 = vrcp.f32 %v6599_v61 }
0x3fbd   :  { %v10073_v13 = vpop.eup %10072 }
0x4024   :  { %v6606_v55 = vpop.permute.xlu0 %6605 }
0x4025   :  { %v6608_v62 = vadd.f32 %v6606_v55, %v6602_v17 }
0x4027   :  { %10074 = vtanh.f32 %v6608_v62 }
0x4031   :  { %v10075_v14 = vpop.eup %10074 }
0x4032   :  { %v6610_v15 = vmul.f32 %v10075_v14, %v10073_v13 }
0x4034   :  { %6618 = vrot.lane.b32.xlu1 %v6610_v15, %s10390_s19 }
0x40a6   :  { %v6619_v10 = vpop.permute.xlu1 %6618 }
0x40a7   :  { %8613 = vmatmul.mubr.msk.f32.vlgmr.msra.gmra.mrb[62].mxu1 %vm2436_vm0, %v6619_v10 }
0x40a8   :  { %9290 = vmatpush1.bf16.msra.mxu1 %v12881_v45  ;;  %6792 = vmatprep.mubr.f32.mxu1 %v13539_v2 }
0x40a9   :  { %9292 = vmatprep.subr.bf16.mxu1 %v12883_v20 }
0x40ac   :  { %9294 = vmatpush1.bf16.msra.mxu1 %v12891_v40 }
0x40ad   :  { %9296 = vmatprep.subr.bf16.mxu1 %v12894_v4 }
0x40b0   :  { %9298 = vmatpush1.bf16.msra.mxu1 %v12901_v33 }
0x40b1   :  { %9300 = vmatprep.subr.bf16.mxu1 %v12904_v1 }
0x40b4   :  { %9302 = vmatpush1.bf16.msra.mxu1 %v12911_v49 }
0x40b5   :  { %9304 = vmatprep.subr.bf16.mxu1 %v12879_v0 }
0x417a   :  { %v6688_v3 = vpop.f32.mrb[62].mxu1 }
0x417b   :  { %v9568_v22 = vadd.f32 %v6688_v3, %v5337_v16  ;;  %v6690_v35 = vpop.f32.mrb[63].mxu1 }
0x417c   :  { %v9570_v31 = vadd.f32 %v6690_v35, %v5339_v25 }
0x417d   :  { %v8614_v59 = vmul.f32 -1.442695, %v9568_v22 }
0x417e   :  { %v8615_v57 = vmul.f32 -1.442695, %v9570_v31 }
0x417f   :  { %10076 = vpow2.f32 %v8614_v59 }
0x4180   :  { %10078 = vtanh.f32 %v9570_v31 }
0x4189   :  { %v10077_v27 = vpop.eup %10076 }
0x418a   :  { %v6698_v44 = vadd.f32 1.0, %v10077_v27  ;;  %v10079_v56 = vpop.eup %10078 }
0x418c   :  { %10080 = vrcp.f32 %v6698_v44 }
0x418d   :  { %10082 = vpow2.f32 %v8615_v57 }
0x4196   :  { %v10081_v32 = vpop.eup %10080 }
0x4197   :  { %v6709_v52 = vmul.f32 %v10081_v32, %v10079_v56  ;;  %v10083_v37 = vpop.eup %10082  ;;  %v6708_v47 = vmul.f32 %v10081_v32, %v6608_v62  ;;  %v5349_v56 = vadd.f32 %v12924_v7, %v13003_v34  ;;  %v5351_v32 = vadd.f32 %v12926_v50, %v13007_v8 }
0x4198   :  { %v6705_v5 = vadd.f32 1.0, %v10083_v37 }
0x4199   :  { %6711 = vrot.lane.b32.xlu0 %v6709_v52, %s10390_s19 }
0x419a   :  { %10084 = vrcp.f32 %v6705_v5 }
0x41a4   :  { %v10085_v53 = vpop.eup %10084 }
0x420b   :  { %v6712_v39 = vpop.permute.xlu0 %6711 }
0x420c   :  { %v6714_v51 = vadd.f32 %v6712_v39, %v6708_v47 }
0x420e   :  { %10086 = vtanh.f32 %v6714_v51 }
0x4218   :  { %v10087_v38 = vpop.eup %10086 }
0x4219   :  { %v6716_v28 = vmul.f32 %v10087_v38, %v10085_v53 }
0x421b   :  { %6724 = vrot.lane.b32.xlu1 %v6716_v28, %s10390_s19 }
0x428d   :  { %v6725_v29 = vpop.permute.xlu1 %6724 }
0x428e   :  { %8616 = vmatmul.mubr.msk.f32.vlgmr.msra.gmra.mrb[60].mxu1 %vm2436_vm0, %v6725_v29 }
0x428f   :  { %9306 = vmatpush1.bf16.msra.mxu1 %v12881_v45  ;;  %6898 = vmatprep.mubr.f32.mxu1 %v13539_v2 }
0x4290   :  { %9308 = vmatprep.subr.bf16.mxu1 %v12883_v20 }
0x4293   :  { %9310 = vmatpush1.bf16.msra.mxu1 %v12891_v40 }
0x4294   :  { %9312 = vmatprep.subr.bf16.mxu1 %v12894_v4 }
0x4297   :  { %9314 = vmatpush1.bf16.msra.mxu1 %v12901_v33 }
0x4298   :  { %9316 = vmatprep.subr.bf16.mxu1 %v12904_v1 }
0x429b   :  { %9318 = vmatpush1.bf16.msra.mxu1 %v12911_v49 }
0x429c   :  { %9320 = vmatprep.subr.bf16.mxu1 %v12879_v0 }
0x4361   :  { %v6794_v43 = vpop.f32.mrb[60].mxu1 }
0x4362   :  { %v9572_v61 = vadd.f32 %v6794_v43, %v5343_v12  ;;  %v6796_v17 = vpop.f32.mrb[61].mxu1 }
0x4363   :  { %v9574_v55 = vadd.f32 %v6796_v17, %v5345_v41 }
0x4364   :  { %v8617_v62 = vmul.f32 -1.442695, %v9572_v61 }
0x4365   :  { %v8618_v25 = vmul.f32 -1.442695, %v9574_v55 }
0x4366   :  { %10088 = vpow2.f32 %v8617_v62 }
0x4367   :  { %10090 = vtanh.f32 %v9574_v55 }
0x4370   :  { %v10089_v13 = vpop.eup %10088 }
0x4371   :  { %v6804_v14 = vadd.f32 1.0, %v10089_v13  ;;  %v10091_v15 = vpop.eup %10090  ;;  %v5355_v13 = vadd.f32 %v12928_v26, %v13003_v34 }
0x4373   :  { %10092 = vrcp.f32 %v6804_v14  ;;  %v5357_v14 = vadd.f32 %v12930_v18, %v13007_v8 }
0x4374   :  { %10094 = vpow2.f32 %v8618_v25 }
0x437d   :  { %v10093_v10 = vpop.eup %10092 }
0x437e   :  { %v6815_v16 = vmul.f32 %v10093_v10, %v10091_v15  ;;  %v10095_v48 = vpop.eup %10094  ;;  %v6814_v42 = vmul.f32 %v10093_v10, %v6714_v51 }
0x437f   :  { %v6811_v3 = vadd.f32 1.0, %v10095_v48 }
0x4380   :  { %6817 = vrot.lane.b32.xlu0 %v6815_v16, %s10390_s19 }
0x4381   :  { %10096 = vrcp.f32 %v6811_v3 }
0x438b   :  { %v10097_v31 = vpop.eup %10096 }
0x43f2   :  { %v6818_v22 = vpop.permute.xlu0 %6817 }
0x43f3   :  { %v6820_v35 = vadd.f32 %v6818_v22, %v6814_v42 }
0x43f5   :  { %10098 = vtanh.f32 %v6820_v35 }
0x43ff   :  { %v10099_v59 = vpop.eup %10098 }
0x4400   :  { %v6822_v27 = vmul.f32 %v10099_v59, %v10097_v31 }
0x4402   :  { %6830 = vrot.lane.b32.xlu1 %v6822_v27, %s10390_s19 }
0x4474   :  { %v6831_v44 = vpop.permute.xlu1 %6830 }
0x4475   :  { %8619 = vmatmul.mubr.msk.f32.vlgmr.msra.gmra.mrb[58].mxu1 %vm2436_vm0, %v6831_v44 }
0x4476   :  { %9322 = vmatpush1.bf16.msra.mxu1 %v12881_v45  ;;  %7004 = vmatprep.mubr.f32.mxu1 %v13539_v2 }
0x4477   :  { %9324 = vmatprep.subr.bf16.mxu1 %v12883_v20 }
0x447a   :  { %9326 = vmatpush1.bf16.msra.mxu1 %v12891_v40 }
0x447b   :  { %9328 = vmatprep.subr.bf16.mxu1 %v12894_v4 }
0x447e   :  { %9330 = vmatpush1.bf16.msra.mxu1 %v12901_v33 }
0x447f   :  { %9332 = vmatprep.subr.bf16.mxu1 %v12904_v1 }
0x4482   :  { %9334 = vmatpush1.bf16.msra.mxu1 %v12911_v49 }
0x4483   :  { %9336 = vmatprep.subr.bf16.mxu1 %v12879_v0 }
0x4548   :  { %v6900_v52 = vpop.f32.mrb[58].mxu1 }
0x4549   :  { %v9576_v57 = vadd.f32 %v6900_v52, %v5349_v56  ;;  %v6902_v37 = vpop.f32.mrb[59].mxu1 }
0x454a   :  { %v9578_v5 = vadd.f32 %v6902_v37, %v5351_v32 }
0x454b   :  { %v8620_v47 = vmul.f32 -1.442695, %v9576_v57 }
0x454c   :  { %v8621_v29 = vmul.f32 -1.442695, %v9578_v5 }
0x454d   :  { %10100 = vpow2.f32 %v8620_v47  ;;  %v5363_v47 = vadd.f32 %v12934_v36, %v13007_v8 }
0x454e   :  { %10102 = vtanh.f32 %v9578_v5  ;;  %v5361_v5 = vadd.f32 %v12932_v23, %v13003_v34 }
0x4557   :  { %v10101_v39 = vpop.eup %10100 }
0x4558   :  { %v6910_v51 = vadd.f32 1.0, %v10101_v39  ;;  %v10103_v53 = vpop.eup %10102 }
0x455a   :  { %10104 = vrcp.f32 %v6910_v51 }
0x455b   :  { %10106 = vpow2.f32 %v8621_v29 }
0x4564   :  { %v10105_v38 = vpop.eup %10104 }
0x4565   :  { %v6921_v28 = vmul.f32 %v10105_v38, %v10103_v53  ;;  %v10107_v7 = vpop.eup %10106  ;;  %v6920_v50 = vmul.f32 %v10105_v38, %v6820_v35 }
0x4566   :  { %v6917_v12 = vadd.f32 1.0, %v10107_v7 }
0x4567   :  { %6923 = vrot.lane.b32.xlu0 %v6921_v28, %s10390_s19 }
0x4568   :  { %10108 = vrcp.f32 %v6917_v12 }
0x4572   :  { %v10109_v61 = vpop.eup %10108 }
0x45d9   :  { %v6924_v41 = vpop.permute.xlu0 %6923 }
0x45da   :  { %v6926_v43 = vadd.f32 %v6924_v41, %v6920_v50 }
0x45dc   :  { %10110 = vtanh.f32 %v6926_v43 }
0x45e6   :  { %v10111_v17 = vpop.eup %10110 }
0x45e7   :  { %v6928_v55 = vmul.f32 %v10111_v17, %v10109_v61 }
0x45e9   :  { %6936 = vrot.lane.b32.xlu1 %v6928_v55, %s10390_s19 }
0x465b   :  { %v6937_v62 = vpop.permute.xlu1 %6936 }
0x465c   :  { %8622 = vmatmul.mubr.msk.f32.vlgmr.msra.gmra.mrb[56].mxu1 %vm2436_vm0, %v6937_v62 }
0x465d   :  { %9338 = vmatpush1.bf16.msra.mxu1 %v12881_v45  ;;  %7110 = vmatprep.mubr.f32.mxu1 %v13539_v2 }
0x465e   :  { %9340 = vmatprep.subr.bf16.mxu1 %v12883_v20 }
0x4661   :  { %9342 = vmatpush1.bf16.msra.mxu1 %v12891_v40 }
0x4662   :  { %9344 = vmatprep.subr.bf16.mxu1 %v12894_v4 }
0x4665   :  { %9346 = vmatpush1.bf16.msra.mxu1 %v12901_v33 }
0x4666   :  { %9348 = vmatprep.subr.bf16.mxu1 %v12904_v1 }
0x4669   :  { %9350 = vmatpush1.bf16.msra.mxu1 %v12911_v49 }
0x466a   :  { %9352 = vmatprep.subr.bf16.mxu1 %v12879_v0 }
0x472f   :  { %v7006_v15 = vpop.f32.mrb[56].mxu1 }
0x4730   :  { %v9580_v10 = vadd.f32 %v7006_v15, %v5355_v13  ;;  %v7008_v16 = vpop.f32.mrb[57].mxu1 }
0x4731   :  { %v9582_v25 = vadd.f32 %v7008_v16, %v5357_v14  ;;  %v5369_v16 = vadd.f32 %v12938_v9, %v13007_v8 }
0x4732   :  { %v8623_v48 = vmul.f32 -1.442695, %v9580_v10  ;;  %v5367_v10 = vadd.f32 %v12936_v24, %v13003_v34 }
0x4733   :  { %v8624_v59 = vmul.f32 -1.442695, %v9582_v25 }
0x4734   :  { %10112 = vpow2.f32 %v8623_v48 }
0x4735   :  { %10114 = vtanh.f32 %v9582_v25 }
0x473e   :  { %v10113_v3 = vpop.eup %10112 }
0x473f   :  { %v7016_v42 = vadd.f32 1.0, %v10113_v3  ;;  %v10115_v22 = vpop.eup %10114 }
0x4741   :  { %10116 = vrcp.f32 %v7016_v42 }
0x4742   :  { %10118 = vpow2.f32 %v8624_v59 }
0x474b   :  { %v10117_v35 = vpop.eup %10116 }
0x474c   :  { %v7027_v31 = vmul.f32 %v10117_v35, %v10115_v22  ;;  %v10119_v26 = vpop.eup %10118  ;;  %v7026_v18 = vmul.f32 %v10117_v35, %v6926_v43 }
0x474d   :  { %v7023_v27 = vadd.f32 1.0, %v10119_v26 }
0x474e   :  { %7029 = vrot.lane.b32.xlu0 %v7027_v31, %s10390_s19 }
0x474f   :  { %10120 = vrcp.f32 %v7023_v27 }
0x4759   :  { %v10121_v32 = vpop.eup %10120 }
0x47c0   :  { %v7030_v44 = vpop.permute.xlu0 %7029 }
0x47c1   :  { %v7032_v56 = vadd.f32 %v7030_v44, %v7026_v18 }
0x47c3   :  { %10122 = vtanh.f32 %v7032_v56 }
0x47cd   :  { %v10123_v52 = vpop.eup %10122 }
0x47ce   :  { %v7034_v57 = vmul.f32 %v10123_v52, %v10121_v32 }
0x47d0   :  { %7042 = vrot.lane.b32.xlu1 %v7034_v57, %s10390_s19 }
0x4842   :  { %v7043_v37 = vpop.permute.xlu1 %7042 }
0x4843   :  { %8625 = vmatmul.mubr.msk.f32.vlgmr.msra.gmra.mrb[54].mxu1 %vm2436_vm0, %v7043_v37 }
0x4844   :  { %9354 = vmatpush1.bf16.msra.mxu1 %v12881_v45  ;;  %7216 = vmatprep.mubr.f32.mxu1 %v13539_v2 }
0x4845   :  { %9356 = vmatprep.subr.bf16.mxu1 %v12883_v20 }
0x4848   :  { %9358 = vmatpush1.bf16.msra.mxu1 %v12891_v40 }
0x4849   :  { %9360 = vmatprep.subr.bf16.mxu1 %v12894_v4 }
0x484c   :  { %9362 = vmatpush1.bf16.msra.mxu1 %v12901_v33 }
0x484d   :  { %9364 = vmatprep.subr.bf16.mxu1 %v12904_v1 }
0x4850   :  { %9366 = vmatpush1.bf16.msra.mxu1 %v12911_v49 }
0x4851   :  { %9368 = vmatprep.subr.bf16.mxu1 %v12879_v0 }
0x4916   :  { %v7112_v39 = vpop.f32.mrb[54].mxu1 }
0x4917   :  { %v9584_v51 = vadd.f32 %v7112_v39, %v5361_v5  ;;  %v7114_v53 = vpop.f32.mrb[55].mxu1  ;;  %v5375_v39 = vadd.f32 %v12942_v19, %v13007_v8 }
0x4918   :  { %v9586_v38 = vadd.f32 %v7114_v53, %v5363_v47  ;;  %v5373_v47 = vadd.f32 %v12940_v11, %v13003_v34 }
0x4919   :  { %v8626_v28 = vmul.f32 -1.442695, %v9584_v51 }
0x491a   :  { %v8627_v43 = vmul.f32 -1.442695, %v9586_v38 }
0x491b   :  { %10124 = vpow2.f32 %v8626_v28 }
0x491c   :  { %10126 = vtanh.f32 %v9586_v38 }
0x4925   :  { %v10125_v29 = vpop.eup %10124 }
0x4926   :  { %v7122_v7 = vadd.f32 1.0, %v10125_v29  ;;  %v10127_v12 = vpop.eup %10126 }
0x4928   :  { %10128 = vrcp.f32 %v7122_v7 }
0x4929   :  { %10130 = vpow2.f32 %v8627_v43 }
0x4932   :  { %v10129_v50 = vpop.eup %10128 }
0x4933   :  { %v7133_v41 = vmul.f32 %v10129_v50, %v10127_v12  ;;  %v10131_v23 = vpop.eup %10130  ;;  %v7132_v36 = vmul.f32 %v10129_v50, %v7032_v56 }
0x4934   :  { %v7129_v61 = vadd.f32 1.0, %v10131_v23 }
0x4935   :  { %7135 = vrot.lane.b32.xlu0 %v7133_v41, %s10390_s19 }
0x4936   :  { %10132 = vrcp.f32 %v7129_v61 }
0x4940   :  { %v10133_v62 = vpop.eup %10132 }
0x49a7   :  { %v7136_v17 = vpop.permute.xlu0 %7135 }
0x49a8   :  { %v7138_v55 = vadd.f32 %v7136_v17, %v7132_v36 }
0x49aa   :  { %10134 = vtanh.f32 %v7138_v55 }
0x49b4   :  { %v10135_v13 = vpop.eup %10134 }
0x49b5   :  { %v7140_v14 = vmul.f32 %v10135_v13, %v10133_v62 }
0x49b7   :  { %7148 = vrot.lane.b32.xlu1 %v7140_v14, %s10390_s19 }
0x4a29   :  { %v7149_v15 = vpop.permute.xlu1 %7148 }
0x4a2a   :  { %8628 = vmatmul.mubr.msk.f32.vlgmr.msra.gmra.mrb[52].mxu1 %vm2436_vm0, %v7149_v15  ;;  %v5379_v15 = vadd.f32 %v12944_v60, %v13003_v34 }
0x4a2b   :  { %9370 = vmatpush1.bf16.msra.mxu1 %v12881_v45  ;;  %7322 = vmatprep.mubr.f32.mxu1 %v13539_v2 }
0x4a2c   :  { %9372 = vmatprep.subr.bf16.mxu1 %v12883_v20 }
0x4a2f   :  { %9374 = vmatpush1.bf16.msra.mxu1 %v12891_v40 }
0x4a30   :  { %9376 = vmatprep.subr.bf16.mxu1 %v12894_v4 }
0x4a33   :  { %9378 = vmatpush1.bf16.msra.mxu1 %v12901_v33 }
0x4a34   :  { %9380 = vmatprep.subr.bf16.mxu1 %v12904_v1 }
0x4a37   :  { %9382 = vmatpush1.bf16.msra.mxu1 %v12911_v49 }
0x4a38   :  { %9384 = vmatprep.subr.bf16.mxu1 %v12879_v0 }
0x4afd   :  { %v7218_v25 = vpop.f32.mrb[52].mxu1 }
0x4afe   :  { %v9588_v48 = vadd.f32 %v7218_v25, %v5367_v10  ;;  %v7220_v3 = vpop.f32.mrb[53].mxu1  ;;  %v5381_v10 = vadd.f32 %v12946_v63, %v13007_v8 }
0x4aff   :  { %v9590_v42 = vadd.f32 %v7220_v3, %v5369_v16 }
0x4b00   :  { %v8629_v22 = vmul.f32 -1.442695, %v9588_v48 }
0x4b01   :  { %v8630_v18 = vmul.f32 -1.442695, %v9590_v42 }
0x4b02   :  { %10136 = vpow2.f32 %v8629_v22 }
0x4b03   :  { %10138 = vtanh.f32 %v9590_v42 }
0x4b0c   :  { %v10137_v35 = vpop.eup %10136 }
0x4b0d   :  { %v7228_v31 = vadd.f32 1.0, %v10137_v35  ;;  %v10139_v59 = vpop.eup %10138 }
0x4b0f   :  { %10140 = vrcp.f32 %v7228_v31 }
0x4b10   :  { %10142 = vpow2.f32 %v8630_v18 }
0x4b19   :  { %v10141_v26 = vpop.eup %10140 }
0x4b1a   :  { %v7239_v27 = vmul.f32 %v10141_v26, %v10139_v59  ;;  %v10143_v24 = vpop.eup %10142  ;;  %v7238_v9 = vmul.f32 %v10141_v26, %v7138_v55 }
0x4b1b   :  { %v7235_v44 = vadd.f32 1.0, %v10143_v24 }
0x4b1c   :  { %7241 = vrot.lane.b32.xlu0 %v7239_v27, %s10390_s19 }
0x4b1d   :  { %10144 = vrcp.f32 %v7235_v44 }
0x4b27   :  { %v10145_v52 = vpop.eup %10144 }
0x4b8e   :  { %v7242_v56 = vpop.permute.xlu0 %7241 }
0x4b8f   :  { %v7244_v32 = vadd.f32 %v7242_v56, %v7238_v9 }
0x4b91   :  { %10146 = vtanh.f32 %v7244_v32 }
0x4b9b   :  { %v10147_v57 = vpop.eup %10146 }
0x4b9c   :  { %v7246_v37 = vmul.f32 %v10147_v57, %v10145_v52  ;;  %v5385_v57 = vadd.f32 %v12948_v30, %v13003_v34 }
0x4b9e   :  { %7254 = vrot.lane.b32.xlu1 %v7246_v37, %s10390_s19  ;;  %v5387_v37 = vadd.f32 %v12950_v54, %v13007_v8 }
0x4c10   :  { %v7255_v5 = vpop.permute.xlu1 %7254 }
0x4c11   :  { %8631 = vmatmul.mubr.msk.f32.vlgmr.msra.gmra.mrb[50].mxu1 %vm2436_vm0, %v7255_v5 }
0x4c12   :  { %9386 = vmatpush1.bf16.msra.mxu1 %v12881_v45  ;;  %7428 = vmatprep.mubr.f32.mxu1 %v13539_v2 }
0x4c13   :  { %9388 = vmatprep.subr.bf16.mxu1 %v12883_v20 }
0x4c16   :  { %9390 = vmatpush1.bf16.msra.mxu1 %v12891_v40 }
0x4c17   :  { %9392 = vmatprep.subr.bf16.mxu1 %v12894_v4 }
0x4c1a   :  { %9394 = vmatpush1.bf16.msra.mxu1 %v12901_v33 }
0x4c1b   :  { %9396 = vmatprep.subr.bf16.mxu1 %v12904_v1 }
0x4c1e   :  { %9398 = vmatpush1.bf16.msra.mxu1 %v12911_v49 }
0x4c1f   :  { %9400 = vmatprep.subr.bf16.mxu1 %v12879_v0 }
0x4ce4   :  { %v7324_v51 = vpop.f32.mrb[50].mxu1 }
0x4ce5   :  { %v9592_v53 = vadd.f32 %v7324_v51, %v5373_v47  ;;  %v7326_v38 = vpop.f32.mrb[51].mxu1 }
0x4ce6   :  { %v9594_v28 = vadd.f32 %v7326_v38, %v5375_v39 }
0x4ce7   :  { %v8632_v29 = vmul.f32 -1.442695, %v9592_v53 }
0x4ce8   :  { %v8633_v23 = vmul.f32 -1.442695, %v9594_v28 }
0x4ce9   :  { %10148 = vpow2.f32 %v8632_v29 }
0x4cea   :  { %10150 = vtanh.f32 %v9594_v28 }
0x4cf3   :  { %v10149_v7 = vpop.eup %10148 }
0x4cf4   :  { %v7334_v12 = vadd.f32 1.0, %v10149_v7  ;;  %v10151_v50 = vpop.eup %10150 }
0x4cf6   :  { %10152 = vrcp.f32 %v7334_v12 }
0x4cf7   :  { %10154 = vpow2.f32 %v8633_v23 }
0x4d00   :  { %v10153_v41 = vpop.eup %10152 }
0x4d01   :  { %v7345_v43 = vmul.f32 %v10153_v41, %v10151_v50  ;;  %v10155_v11 = vpop.eup %10154  ;;  %v7344_v19 = vmul.f32 %v10153_v41, %v7244_v32 }
0x4d02   :  { %v7341_v61 = vadd.f32 1.0, %v10155_v11 }
0x4d03   :  { %7347 = vrot.lane.b32.xlu0 %v7345_v43, %s10390_s19 }
0x4d04   :  { %10156 = vrcp.f32 %v7341_v61 }
0x4d0e   :  { %v10157_v55 = vpop.eup %10156 }
0x4d75   :  { %v7348_v36 = vpop.permute.xlu0 %7347 }
0x4d76   :  { %v7350_v17 = vadd.f32 %v7348_v36, %v7344_v19 }
0x4d78   :  { %10158 = vtanh.f32 %v7350_v17 }
0x4d82   :  { %v10159_v62 = vpop.eup %10158 }
0x4d83   :  { %v7352_v13 = vmul.f32 %v10159_v62, %v10157_v55  ;;  %v5393_v55 = vadd.f32 %v12954_v21, %v13007_v8 }
0x4d85   :  { %7360 = vrot.lane.b32.xlu1 %v7352_v13, %s10390_s19 }
0x4df7   :  { %v7361_v14 = vpop.permute.xlu1 %7360 }
0x4df8   :  { %8634 = vmatmul.mubr.msk.f32.vlgmr.msra.gmra.mrb[48].mxu1 %vm2436_vm0, %v7361_v14 }
0x4df9   :  { %9402 = vmatpush1.bf16.msra.mxu1 %v12881_v45  ;;  %7534 = vmatprep.mubr.f32.mxu1 %v13539_v2 }
0x4dfa   :  { %9404 = vmatprep.subr.bf16.mxu1 %v12883_v20 }
0x4dfd   :  { %9406 = vmatpush1.bf16.msra.mxu1 %v12891_v40 }
0x4dfe   :  { %9408 = vmatprep.subr.bf16.mxu1 %v12894_v4 }
0x4e01   :  { %9410 = vmatpush1.bf16.msra.mxu1 %v12901_v33 }
0x4e02   :  { %9412 = vmatprep.subr.bf16.mxu1 %v12904_v1 }
0x4e05   :  { %9414 = vmatpush1.bf16.msra.mxu1 %v12911_v49 }
0x4e06   :  { %9416 = vmatprep.subr.bf16.mxu1 %v12879_v0 }
0x4ecb   :  { %v7430_v16 = vpop.f32.mrb[48].mxu1 }
0x4ecc   :  { %v9596_v25 = vadd.f32 %v7430_v16, %v5379_v15  ;;  %v7432_v48 = vpop.f32.mrb[49].mxu1 }
0x4ecd   :  { %v9598_v3 = vadd.f32 %v7432_v48, %v5381_v10 }
0x4ece   :  { %v8635_v42 = vmul.f32 -1.442695, %v9596_v25 }
0x4ecf   :  { %v8636_v27 = vmul.f32 -1.442695, %v9598_v3 }
0x4ed0   :  { %10160 = vpow2.f32 %v8635_v42 }
0x4ed1   :  { %10162 = vtanh.f32 %v9598_v3 }
0x4eda   :  { %v10161_v22 = vpop.eup %10160 }
0x4edb   :  { %v7440_v35 = vadd.f32 1.0, %v10161_v22  ;;  %v10163_v31 = vpop.eup %10162 }
0x4edd   :  { %10164 = vrcp.f32 %v7440_v35 }
0x4ede   :  { %10166 = vpow2.f32 %v8636_v27 }
0x4ee7   :  { %v10165_v59 = vpop.eup %10164 }
0x4ee8   :  { %v7451_v26 = vmul.f32 %v10165_v59, %v10163_v31  ;;  %v10167_v60 = vpop.eup %10166  ;;  %v7450_v63 = vmul.f32 %v10165_v59, %v7350_v17  ;;  %v5391_v17 = vadd.f32 %v12952_v58, %v13003_v34 }
0x4ee9   :  { %v7447_v18 = vadd.f32 1.0, %v10167_v60 }
0x4eea   :  { %7453 = vrot.lane.b32.xlu0 %v7451_v26, %s10390_s19 }
0x4eeb   :  { %10168 = vrcp.f32 %v7447_v18 }
0x4ef5   :  { %v10169_v9 = vpop.eup %10168 }
0x4f5c   :  { %v7454_v24 = vpop.permute.xlu0 %7453 }
0x4f5d   :  { %v7456_v44 = vadd.f32 %v7454_v24, %v7450_v63  ;;  %v5397_v63 = vadd.f32 %v12956_v46, %v13003_v34  ;;  %v5399_v24 = vadd.f32 %v12958_v6, %v13007_v8 }
0x4f5f   :  { %10170 = vtanh.f32 %v7456_v44 }
0x4f69   :  { %v10171_v56 = vpop.eup %10170 }
0x4f6a   :  { %v7458_v32 = vmul.f32 %v10171_v56, %v10169_v9 }
0x4f6c   :  { %7466 = vrot.lane.b32.xlu1 %v7458_v32, %s10390_s19 }
0x4fde   :  { %v7467_v52 = vpop.permute.xlu1 %7466 }
0x4fdf   :  { %8637 = vmatmul.mubr.msk.f32.vlgmr.msra.gmra.mrb[46].mxu1 %vm2436_vm0, %v7467_v52 }
0x4fe0   :  { %9418 = vmatpush1.bf16.msra.mxu1 %v12881_v45  ;;  %7640 = vmatprep.mubr.f32.mxu1 %v13539_v2 }
0x4fe1   :  { %9420 = vmatprep.subr.bf16.mxu1 %v12883_v20 }
0x4fe4   :  { %9422 = vmatpush1.bf16.msra.mxu1 %v12891_v40 }
0x4fe5   :  { %9424 = vmatprep.subr.bf16.mxu1 %v12894_v4 }
0x4fe8   :  { %9426 = vmatpush1.bf16.msra.mxu1 %v12901_v33 }
0x4fe9   :  { %9428 = vmatprep.subr.bf16.mxu1 %v12904_v1 }
0x4fec   :  { %9430 = vmatpush1.bf16.msra.mxu1 %v12911_v49 }
0x4fed   :  { %9432 = vmatprep.subr.bf16.mxu1 %v12879_v0 }
0x50b2   :  { %v7536_v5 = vpop.f32.mrb[46].mxu1 }
0x50b3   :  { %v9600_v47 = vadd.f32 %v7536_v5, %v5385_v57  ;;  %v7538_v39 = vpop.f32.mrb[47].mxu1 }
0x50b4   :  { %v9602_v51 = vadd.f32 %v7538_v39, %v5387_v37 }
0x50b5   :  { %v8638_v53 = vmul.f32 -1.442695, %v9600_v47 }
0x50b6   :  { %v8639_v50 = vmul.f32 -1.442695, %v9602_v51 }
0x50b7   :  { %10172 = vpow2.f32 %v8638_v53 }
0x50b8   :  { %10174 = vtanh.f32 %v9602_v51 }
0x50c1   :  { %v10173_v38 = vpop.eup %10172 }
0x50c2   :  { %v7546_v28 = vadd.f32 1.0, %v10173_v38  ;;  %v10175_v29 = vpop.eup %10174 }
0x50c4   :  { %10176 = vrcp.f32 %v7546_v28 }
0x50c5   :  { %10178 = vpow2.f32 %v8639_v50 }
0x50ce   :  { %v10177_v7 = vpop.eup %10176 }
0x50cf   :  { %v7557_v12 = vmul.f32 %v10177_v7, %v10175_v29  ;;  %v10179_v30 = vpop.eup %10178  ;;  %v7556_v54 = vmul.f32 %v10177_v7, %v7456_v44 }
0x50d0   :  { %v7553_v41 = vadd.f32 1.0, %v10179_v30  ;;  %v13572_v30 = vld [vmem:[#allocation17_spill] sm:$0xff] }
0x50d1   :  { %7559 = vrot.lane.b32.xlu0 %v7557_v12, %s10390_s19 }
0x50d2   :  { %10180 = vrcp.f32 %v7553_v41  ;;  %v5403_v41 = vadd.f32 %v13572_v30, %v13003_v34 }
0x50dc   :  { %v10181_v11 = vpop.eup %10180 }
0x5143   :  { %v7560_v43 = vpop.permute.xlu0 %7559 }
0x5144   :  { %v7562_v23 = vadd.f32 %v7560_v43, %v7556_v54  ;;  %v13573_v54 = vld [vmem:[#allocation18_spill] sm:$0xff] }
0x5145   :  { %v5405_v43 = vadd.f32 %v13573_v54, %v13007_v8 }
0x5146   :  { %10182 = vtanh.f32 %v7562_v23 }
0x5150   :  { %v10183_v61 = vpop.eup %10182 }
0x5151   :  { %v7564_v19 = vmul.f32 %v10183_v61, %v10181_v11 }
0x5153   :  { %7572 = vrot.lane.b32.xlu1 %v7564_v19, %s10390_s19 }
0x51c5   :  { %v7573_v36 = vpop.permute.xlu1 %7572 }
0x51c6   :  { %8640 = vmatmul.mubr.msk.f32.vlgmr.msra.gmra.mrb[44].mxu1 %vm2436_vm0, %v7573_v36 }
0x51c7   :  { %9434 = vmatpush1.bf16.msra.mxu1 %v12881_v45  ;;  %7746 = vmatprep.mubr.f32.mxu1 %v13539_v2 }
0x51c8   :  { %9436 = vmatprep.subr.bf16.mxu1 %v12883_v20 }
0x51cb   :  { %9438 = vmatpush1.bf16.msra.mxu1 %v12891_v40 }
0x51cc   :  { %9440 = vmatprep.subr.bf16.mxu1 %v12894_v4 }
0x51cf   :  { %9442 = vmatpush1.bf16.msra.mxu1 %v12901_v33 }
0x51d0   :  { %9444 = vmatprep.subr.bf16.mxu1 %v12904_v1 }
0x51d3   :  { %9446 = vmatpush1.bf16.msra.mxu1 %v12911_v49 }
0x51d4   :  { %9448 = vmatprep.subr.bf16.mxu1 %v12879_v0 }
0x5299   :  { %v7642_v62 = vpop.f32.mrb[44].mxu1 }
0x529a   :  { %v9604_v13 = vadd.f32 %v7642_v62, %v5391_v17  ;;  %v7644_v14 = vpop.f32.mrb[45].mxu1 }
0x529b   :  { %v9606_v15 = vadd.f32 %v7644_v14, %v5393_v55 }
0x529c   :  { %v8641_v10 = vmul.f32 -1.442695, %v9604_v13 }
0x529d   :  { %v8642_v22 = vmul.f32 -1.442695, %v9606_v15 }
0x529e   :  { %10184 = vpow2.f32 %v8641_v10 }
0x529f   :  { %10186 = vtanh.f32 %v9606_v15 }
0x52a8   :  { %v10185_v16 = vpop.eup %10184 }
0x52a9   :  { %v7652_v25 = vadd.f32 1.0, %v10185_v16  ;;  %v10187_v48 = vpop.eup %10186 }
0x52ab   :  { %10188 = vrcp.f32 %v7652_v25 }
0x52ac   :  { %10190 = vpow2.f32 %v8642_v22 }
0x52b5   :  { %v10189_v3 = vpop.eup %10188 }
0x52b6   :  { %v7663_v42 = vmul.f32 %v10189_v3, %v10187_v48  ;;  %v10191_v58 = vpop.eup %10190  ;;  %v7662_v21 = vmul.f32 %v10189_v3, %v7562_v23 }
0x52b7   :  { %v7659_v35 = vadd.f32 1.0, %v10191_v58 }
0x52b8   :  { %7665 = vrot.lane.b32.xlu0 %v7663_v42, %s10390_s19 }
0x52b9   :  { %10192 = vrcp.f32 %v7659_v35 }
0x52c3   :  { %v10193_v26 = vpop.eup %10192 }
0x532a   :  { %v7666_v31 = vpop.permute.xlu0 %7665 }
0x532b   :  { %v7668_v59 = vadd.f32 %v7666_v31, %v7662_v21  ;;  %v13574_v21 = vld [vmem:[#allocation19_spill] sm:$0xff] }
0x532c   :  { %v5409_v31 = vadd.f32 %v13574_v21, %v13003_v34 }
0x532d   :  { %10194 = vtanh.f32 %v7668_v59 }
0x5337   :  { %v10195_v27 = vpop.eup %10194 }
0x5338   :  { %v7670_v60 = vmul.f32 %v10195_v27, %v10193_v26 }
0x533a   :  { %7678 = vrot.lane.b32.xlu1 %v7670_v60, %s10390_s19 }
0x53ac   :  { %v7679_v18 = vpop.permute.xlu1 %7678 }
0x53ad   :  { %8643 = vmatmul.mubr.msk.f32.vlgmr.msra.gmra.mrb[42].mxu1 %vm2436_vm0, %v7679_v18 }
0x53ae   :  { %9450 = vmatpush1.bf16.msra.mxu1 %v12881_v45  ;;  %7852 = vmatprep.mubr.f32.mxu1 %v13539_v2 }
0x53af   :  { %9452 = vmatprep.subr.bf16.mxu1 %v12883_v20 }
0x53b2   :  { %9454 = vmatpush1.bf16.msra.mxu1 %v12891_v40 }
0x53b3   :  { %9456 = vmatprep.subr.bf16.mxu1 %v12894_v4 }
0x53b6   :  { %9458 = vmatpush1.bf16.msra.mxu1 %v12901_v33 }
0x53b7   :  { %9460 = vmatprep.subr.bf16.mxu1 %v12904_v1 }
0x53ba   :  { %9462 = vmatpush1.bf16.msra.mxu1 %v12911_v49 }
0x53bb   :  { %9464 = vmatprep.subr.bf16.mxu1 %v12879_v0 }
0x5480   :  { %v7748_v44 = vpop.f32.mrb[42].mxu1 }
0x5481   :  { %v9608_v9 = vadd.f32 %v7748_v44, %v5397_v63  ;;  %v7750_v56 = vpop.f32.mrb[43].mxu1 }
0x5482   :  { %v9610_v32 = vadd.f32 %v7750_v56, %v5399_v24 }
0x5483   :  { %v8644_v52 = vmul.f32 -1.442695, %v9608_v9 }
0x5484   :  { %v8645_v51 = vmul.f32 -1.442695, %v9610_v32 }
0x5485   :  { %10196 = vpow2.f32 %v8644_v52 }
0x5486   :  { %10198 = vtanh.f32 %v9610_v32 }
0x548f   :  { %v10197_v57 = vpop.eup %10196 }
0x5490   :  { %v7758_v37 = vadd.f32 1.0, %v10197_v57  ;;  %v10199_v5 = vpop.eup %10198 }
0x5492   :  { %10200 = vrcp.f32 %v7758_v37 }
0x5493   :  { %10202 = vpow2.f32 %v8645_v51 }
0x549c   :  { %v10201_v47 = vpop.eup %10200 }
0x549d   :  { %v7769_v39 = vmul.f32 %v10201_v47, %v10199_v5  ;;  %v10203_v46 = vpop.eup %10202  ;;  %v7768_v6 = vmul.f32 %v10201_v47, %v7668_v59  ;;  %v13575_v59 = vld [vmem:[#allocation22_spill] sm:$0xff] }
0x549e   :  { %v7765_v53 = vadd.f32 1.0, %v10203_v46  ;;  %v5411_v26 = vadd.f32 %v13575_v59, %v13007_v8 }
0x549f   :  { %7771 = vrot.lane.b32.xlu0 %v7769_v39, %s10390_s19 }
0x54a0   :  { %10204 = vrcp.f32 %v7765_v53 }
0x54aa   :  { %v10205_v29 = vpop.eup %10204 }
0x5511   :  { %v7772_v38 = vpop.permute.xlu0 %7771 }
0x5512   :  { %v7774_v28 = vadd.f32 %v7772_v38, %v7768_v6 }
0x5514   :  { %10206 = vtanh.f32 %v7774_v28 }
0x551e   :  { %v10207_v7 = vpop.eup %10206 }
0x551f   :  { %v7776_v12 = vmul.f32 %v10207_v7, %v10205_v29  ;;  %v13577_v7 = vld [vmem:[#allocation31_spill] sm:$0xff] }
0x5521   :  { %7784 = vrot.lane.b32.xlu1 %v7776_v12, %s10390_s19  ;;  %v5417_v12 = vadd.f32 %v13577_v7, %v13007_v8 }
0x5593   :  { %v7785_v50 = vpop.permute.xlu1 %7784 }
0x5594   :  { %8646 = vmatmul.mubr.msk.f32.vlgmr.msra.gmra.mrb[40].mxu1 %vm2436_vm0, %v7785_v50 }
0x5595   :  { %9466 = vmatpush1.bf16.msra.mxu1 %v12881_v45  ;;  %7958 = vmatprep.mubr.f32.mxu1 %v13539_v2 }
0x5596   :  { %9468 = vmatprep.subr.bf16.mxu1 %v12883_v20 }
0x5599   :  { %9470 = vmatpush1.bf16.msra.mxu1 %v12891_v40 }
0x559a   :  { %9472 = vmatprep.subr.bf16.mxu1 %v12894_v4 }
0x559d   :  { %9474 = vmatpush1.bf16.msra.mxu1 %v12901_v33 }
0x559e   :  { %9476 = vmatprep.subr.bf16.mxu1 %v12904_v1 }
0x55a1   :  { %9478 = vmatpush1.bf16.msra.mxu1 %v12911_v49 }
0x55a2   :  { %9480 = vmatprep.subr.bf16.mxu1 %v12879_v0 }
0x5667   :  { %v7854_v23 = vpop.f32.mrb[40].mxu1 }
0x5668   :  { %v9612_v11 = vadd.f32 %v7854_v23, %v5403_v41  ;;  %v7856_v61 = vpop.f32.mrb[41].mxu1 }
0x5669   :  { %v9614_v19 = vadd.f32 %v7856_v61, %v5405_v43 }
0x566a   :  { %v8647_v36 = vmul.f32 -1.442695, %v9612_v11 }
0x566b   :  { %v8648_v15 = vmul.f32 -1.442695, %v9614_v19 }
0x566c   :  { %10208 = vpow2.f32 %v8647_v36 }
0x566d   :  { %10210 = vtanh.f32 %v9614_v19 }
0x5676   :  { %v10209_v17 = vpop.eup %10208 }
0x5677   :  { %v7864_v55 = vadd.f32 1.0, %v10209_v17  ;;  %v10211_v62 = vpop.eup %10210 }
0x5679   :  { %10212 = vrcp.f32 %v7864_v55 }
0x567a   :  { %10214 = vpow2.f32 %v8648_v15 }
0x5683   :  { %v10213_v13 = vpop.eup %10212 }
0x5684   :  { %v7875_v14 = vmul.f32 %v10213_v13, %v10211_v62  ;;  %v10215_v10 = vpop.eup %10214  ;;  %v7874_v25 = vmul.f32 %v10213_v13, %v7774_v28  ;;  %v13576_v28 = vld [vmem:[#allocation23_spill] sm:$0xff] }
0x5685   :  { %v7871_v16 = vadd.f32 1.0, %v10215_v10  ;;  %v5415_v29 = vadd.f32 %v13576_v28, %v13003_v34 }
0x5686   :  { %7877 = vrot.lane.b32.xlu0 %v7875_v14, %s10390_s19 }
0x5687   :  { %10216 = vrcp.f32 %v7871_v16 }
0x5691   :  { %v10217_v42 = vpop.eup %10216 }
0x56f8   :  { %v7878_v48 = vpop.permute.xlu0 %7877 }
0x56f9   :  { %v7880_v3 = vadd.f32 %v7878_v48, %v7874_v25  ;;  %v13578_v48 = vld [vmem:[#allocation32_spill] sm:$0xff] }
0x56fb   :  { %10218 = vtanh.f32 %v7880_v3 }
0x5705   :  { %v10219_v22 = vpop.eup %10218 }
0x5706   :  { %v7882_v58 = vmul.f32 %v10219_v22, %v10217_v42  ;;  %v13579_v42 = vld [vmem:[#allocation35_spill] sm:$0xff] }
0x5708   :  { %7890 = vrot.lane.b32.xlu1 %v7882_v58, %s10390_s19 }
0x577a   :  { %v7891_v35 = vpop.permute.xlu1 %7890 }
0x577b   :  { %8649 = vmatmul.mubr.msk.f32.vlgmr.msra.gmra.mrb[38].mxu1 %vm2436_vm0, %v7891_v35 }
0x577c   :  { %9482 = vmatpush1.bf16.msra.mxu1 %v12881_v45  ;;  %8064 = vmatprep.mubr.f32.mxu1 %v13539_v2 }
0x577d   :  { %9484 = vmatprep.subr.bf16.mxu1 %v12883_v20 }
0x5780   :  { %9486 = vmatpush1.bf16.msra.mxu1 %v12891_v40 }
0x5781   :  { %9488 = vmatprep.subr.bf16.mxu1 %v12894_v4 }
0x5784   :  { %9490 = vmatpush1.bf16.msra.mxu1 %v12901_v33 }
0x5785   :  { %9492 = vmatprep.subr.bf16.mxu1 %v12904_v1 }
0x5788   :  { %9494 = vmatpush1.bf16.msra.mxu1 %v12911_v49 }
0x5789   :  { %9496 = vmatprep.subr.bf16.mxu1 %v12879_v0 }
0x584e   :  { %v7960_v27 = vpop.f32.mrb[38].mxu1 }
0x584f   :  { %v9616_v60 = vadd.f32 %v7960_v27, %v5409_v31  ;;  %v7962_v18 = vpop.f32.mrb[39].mxu1 }
0x5850   :  { %v9618_v63 = vadd.f32 %v7962_v18, %v5411_v26 }
0x5851   :  { %v8650_v24 = vmul.f32 -1.442695, %v9616_v60 }
0x5852   :  { %v8651_v57 = vmul.f32 -1.442695, %v9618_v63 }
0x5853   :  { %10220 = vpow2.f32 %v8650_v24 }
0x5854   :  { %10222 = vtanh.f32 %v9618_v63 }
0x585d   :  { %v10221_v44 = vpop.eup %10220 }
0x585e   :  { %v7970_v9 = vadd.f32 1.0, %v10221_v44  ;;  %v10223_v56 = vpop.eup %10222 }
0x5860   :  { %10224 = vrcp.f32 %v7970_v9  ;;  %v8661_v9 = vld [vmem:[%s13391_s10] ss:$0 sm:$0xff] }
0x5861   :  { %10226 = vpow2.f32 %v8651_v57 }
0x586a   :  { %v10225_v32 = vpop.eup %10224 }
0x586b   :  { %v7981_v52 = vmul.f32 %v10225_v32, %v10223_v56  ;;  %v10227_v37 = vpop.eup %10226  ;;  %v7980_v47 = vmul.f32 %v10225_v32, %v7880_v3  ;;  %v5421_v3 = vadd.f32 %v13578_v48, %v13003_v34  ;;  %v13580_v56 = vld [vmem:[#allocation20_spill] sm:$0xff] }
0x586c   :  { %v7977_v5 = vadd.f32 1.0, %v10227_v37  ;;  %v5427_v32 = vadd.f32 %v13580_v56, %v13003_v34 }
0x586d   :  { %7983 = vrot.lane.b32.xlu0 %v7981_v52, %s10390_s19  ;;  %v13581_v52 = vld [vmem:[#allocation21_spill] sm:$0xff] }
0x586e   :  { %10228 = vrcp.f32 %v7977_v5  ;;  %v5429_v57 = vadd.f32 %v13581_v52, %v13007_v8 }
0x5878   :  { %v10229_v46 = vpop.eup %10228 }
0x58df   :  { %v7984_v39 = vpop.permute.xlu0 %7983 }
0x58e0   :  { %v7986_v51 = vadd.f32 %v7984_v39, %v7980_v47 }
0x58e2   :  { %10230 = vtanh.f32 %v7986_v51 }
0x58ec   :  { %v10231_v53 = vpop.eup %10230 }
0x58ed   :  { %v7988_v6 = vmul.f32 %v10231_v53, %v10229_v46 }
0x58ef   :  { %7996 = vrot.lane.b32.xlu1 %v7988_v6, %s10390_s19 }
0x5961   :  { %v7997_v38 = vpop.permute.xlu1 %7996 }
0x5962   :  { %8652 = vmatmul.mubr.msk.f32.vlgmr.msra.gmra.mrb[36].mxu1 %vm2436_vm0, %v7997_v38 }
0x5963   :  { %9498 = vmatpush1.bf16.msra.mxu1 %v12881_v45  ;;  %8170 = vmatprep.mubr.f32.mxu1 %v13539_v2 }
0x5964   :  { %9500 = vmatprep.subr.bf16.mxu1 %v12883_v20 }
0x5967   :  { %9502 = vmatpush1.bf16.msra.mxu1 %v12891_v40 }
0x5968   :  { %9504 = vmatprep.subr.bf16.mxu1 %v12894_v4 }
0x596b   :  { %9506 = vmatpush1.bf16.msra.mxu1 %v12901_v33 }
0x596c   :  { %9508 = vmatprep.subr.bf16.mxu1 %v12904_v1 }
0x596f   :  { %9510 = vmatpush1.bf16.msra.mxu1 %v12911_v49 }
0x5970   :  { %9512 = vmatprep.subr.bf16.mxu1 %v12879_v0 }
0x5a35   :  { %v8066_v50 = vpop.f32.mrb[36].mxu1 }
0x5a36   :  { %v9620_v30 = vadd.f32 %v8066_v50, %v5415_v29  ;;  %v8068_v41 = vpop.f32.mrb[37].mxu1 }
0x5a37   :  { %v9622_v54 = vadd.f32 %v8068_v41, %v5417_v12 }
0x5a38   :  { %v8653_v43 = vmul.f32 -1.442695, %v9620_v30 }
0x5a39   :  { %v8654_v0 = vmul.f32 -1.442695, %v9622_v54 }
0x5a3a   :  { %10232 = vpow2.f32 %v8653_v43 }
0x5a3b   :  { %10234 = vtanh.f32 %v9622_v54 }
0x5a44   :  { %v10233_v23 = vpop.eup %10232 }
0x5a45   :  { %v8076_v11 = vadd.f32 1.0, %v10233_v23  ;;  %v10235_v61 = vpop.eup %10234 }
0x5a47   :  { %10236 = vrcp.f32 %v8076_v11 }
0x5a48   :  { %10238 = vpow2.f32 %v8654_v0 }
0x5a51   :  { %v10237_v19 = vpop.eup %10236 }
0x5a52   :  { %v8087_v36 = vmul.f32 %v10237_v19, %v10235_v61  ;;  %v10239_v17 = vpop.eup %10238  ;;  %v8086_v62 = vmul.f32 %v10237_v19, %v7986_v51  ;;  %v8662_v19 = vld [vmem:[#allocation5] ss:$0 sm:$0xff] }
0x5a53   :  { %v8083_v55 = vadd.f32 1.0, %v10239_v17 }
0x5a54   :  { %8089 = vrot.lane.b32.xlu0 %v8087_v36, %s10390_s19 }
0x5a55   :  { %10240 = vrcp.f32 %v8083_v55 }
0x5a5f   :  { %v10241_v15 = vpop.eup %10240 }
0x5ac6   :  { %v8090_v13 = vpop.permute.xlu0 %8089 }
0x5ac7   :  { %v8092_v14 = vadd.f32 %v8090_v13, %v8086_v62 }
0x5ac9   :  { %10242 = vtanh.f32 %v8092_v14 }
0x5ad3   :  { %v10243_v10 = vpop.eup %10242 }
0x5ad4   :  { %v8094_v16 = vmul.f32 %v10243_v10, %v10241_v15 }
0x5ad6   :  { %8102 = vrot.lane.b32.xlu1 %v8094_v16, %s10390_s19 }
0x5b48   :  { %v8103_v25 = vpop.permute.xlu1 %8102 }
0x5b49   :  { %8655 = vmatmul.mubr.msk.f32.vlgmr.msra.gmra.mrb[34].mxu1 %vm2436_vm0, %v8103_v25 }
0x5b4a   :  { %9514 = vmatpush1.bf16.msra.mxu1 %v12881_v45  ;;  %8276 = vmatprep.mubr.f32.mxu1 %v13539_v2  ;;  %v5423_v45 = vadd.f32 %v13579_v42, %v13007_v8 }
0x5b4b   :  { %9516 = vmatprep.subr.bf16.mxu1 %v12883_v20 }
0x5b4e   :  { %9518 = vmatpush1.bf16.msra.mxu1 %v12891_v40 }
0x5b4f   :  { %9520 = vmatprep.subr.bf16.mxu1 %v12894_v4 }
0x5b52   :  { %9522 = vmatpush1.bf16.msra.mxu1 %v12901_v33 }
0x5b53   :  { %9524 = vmatprep.subr.bf16.mxu1 %v12904_v1 }
0x5b56   :  { %9526 = vmatpush1.bf16.msra.mxu1 %v12911_v49 }
0x5c1c   :  { %v8172_v22 = vpop.f32.mrb[34].mxu1 }
0x5c1d   :  { %v9624_v2 = vadd.f32 %v8172_v22, %v5421_v3  ;;  %v8174_v58 = vpop.f32.mrb[35].mxu1 }
0x5c1e   :  { %v9626_v20 = vadd.f32 %v8174_v58, %v5423_v45 }
0x5c1f   :  { %v8656_v35 = vmul.f32 -1.442695, %v9624_v2 }
0x5c20   :  { %v8657_v49 = vmul.f32 -1.442695, %v9626_v20 }
0x5c21   :  { %10244 = vpow2.f32 %v8656_v35 }
0x5c22   :  { %10246 = vtanh.f32 %v9626_v20 }
0x5c2b   :  { %v10245_v40 = vpop.eup %10244 }
0x5c2c   :  { %v8182_v4 = vadd.f32 1.0, %v10245_v40  ;;  %v10247_v33 = vpop.eup %10246 }
0x5c2e   :  { %10248 = vrcp.f32 %v8182_v4 }
0x5c2f   :  { %10250 = vpow2.f32 %v8657_v49 }
0x5c38   :  { %v10249_v1 = vpop.eup %10248 }
0x5c39   :  { %v8193_v21 = vmul.f32 %v10249_v1, %v10247_v33  ;;  %v10251_v31 = vpop.eup %10250  ;;  %v8192_v26 = vmul.f32 %v10249_v1, %v8092_v14 }
0x5c3a   :  { %v8189_v59 = vadd.f32 1.0, %v10251_v31 }
0x5c3b   :  { %8195 = vrot.lane.b32.xlu0 %v8193_v21, %s10390_s19 }
0x5c3c   :  { %10252 = vrcp.f32 %v8189_v59 }
0x5c46   :  { %v10253_v18 = vpop.eup %10252 }
0x5cad   :  { %v8196_v27 = vpop.permute.xlu0 %8195 }
0x5cae   :  { %v8198_v60 = vadd.f32 %v8196_v27, %v8192_v26 }
0x5cb0   :  { %10254 = vtanh.f32 %v8198_v60 }
0x5cba   :  { %v10255_v63 = vpop.eup %10254 }
0x5cbb   :  { %v8200_v24 = vmul.f32 %v10255_v63, %v10253_v18 }
0x5cbd   :  { %8208 = vrot.lane.b32.xlu1 %v8200_v24, %s10390_s19 }
0x5cc1   :  { %8313 = vrot.lane.b32.xlu1 %v8661_v9, %s10390_s19 }
0x5d2f   :  { %v8209_v44 = vpop.permute.xlu1 %8208 }
0x5d30   :  { %8658 = vmatmul.mubr.msk.f32.vlgmr.msra.gmra.mrb[32].mxu1 %vm2436_vm0, %v8209_v44 }
0x5d33   :  { %v8314_v54 = vpop.permute.xlu1 %8313 }
0x5e03   :  { %v8278_v37 = vpop.f32.mrb[32].mxu1 }
0x5e04   :  { %v9628_v5 = vadd.f32 %v8278_v37, %v5427_v32  ;;  %v8280_v47 = vpop.f32.mrb[33].mxu1 }
0x5e05   :  { %v9630_v39 = vadd.f32 %v8280_v47, %v5429_v57 }
0x5e06   :  { %v8659_v51 = vmul.f32 -1.442695, %v9628_v5 }
0x5e07   :  { %v8660_v29 = vmul.f32 -1.442695, %v9630_v39 }
0x5e08   :  { %10256 = vpow2.f32 %v8659_v51 }
0x5e09   :  { %10258 = vtanh.f32 %v9630_v39 }
0x5e12   :  { %v10257_v46 = vpop.eup %10256 }
0x5e13   :  { %v8288_v53 = vadd.f32 1.0, %v10257_v46  ;;  %v10259_v6 = vpop.eup %10258 }
0x5e15   :  { %10260 = vrcp.f32 %v8288_v53 }
0x5e16   :  { %10262 = vpow2.f32 %v8660_v29 }
0x5e1f   :  { %v10261_v38 = vpop.eup %10260 }
0x5e20   :  { %v8299_v28 = vmul.f32 %v10261_v38, %v10259_v6  ;;  %v10263_v34 = vpop.eup %10262  ;;  %v8298_v8 = vmul.f32 %v10261_v38, %v8198_v60 }
0x5e21   :  { %v8295_v7 = vadd.f32 1.0, %v10263_v34 }
0x5e22   :  { %8301 = vrot.lane.b32.xlu0 %v8299_v28, %s10390_s19 }
0x5e23   :  { %10264 = vrcp.f32 %v8295_v7 }
0x5e2d   :  { %v10265_v30 = vpop.eup %10264 }
0x5e94   :  { %v8302_v12 = vpop.permute.xlu0 %8301 }
0x5e95   :  { %v8304_v50 = vadd.f32 %v8302_v12, %v8298_v8 }
0x5e97   :  { %10266 = vtanh.f32 %v8304_v50 }
0x5ea1   :  { %v10267_v41 = vpop.eup %10266 }
0x5ea2   :  { %v8306_v43 = vmul.f32 %v10267_v41, %v10265_v30 }
0x5ea4   :  { %v8316_v23 = vmul.f32 %v8314_v54, %v8306_v43 }
0x5ea6   :  { %8318 = vrot.lane.b32.xlu0 %v8316_v23, %s10390_s19 }
0x5f18   :  { %v8319_v11 = vpop.permute.xlu0 %8318 }
0x5f19   :  { %v8321_v61 = vsel %vm2436_vm0, %v8319_v11, 0.0 }
0x5f1a   :  { %8322 = vadd.xlane.f32.xlu1 %v8321_v61 }
0x5fa7   :  { %v8323_v36 = vpop.xlane.xlu1 %8322 }
0x5fa8   :  { %v8331_v0 = vadd.f32 %v8662_v19, %v8323_v36 }
0x5faa   :  { %8333 = vst.msk [vmem:[%s13393_s12] sm:$0xff] %vm8332_vm11, %v8331_v0 }
0x5fab   :  { %8338 = vsyncpa [#allocation7], 1 }
0x5fac   :  { %8339 = vsyncpa [#allocation9], 1 }
0x5fad   :  { %8340 = vsyncpa [#allocation12], 1 }

</bundles_post_ra>
